<compile_context>
chip_gen: v7x
topology: tpu7x:2x2x1
jax: 0.10.0
libtpu: 0.0.40
codegen_flags: <defaults>
</compile_context>

<pallas_src>
import functools

import jax
import jax.numpy as jnp
from jax import lax
from jax.experimental import pallas as pl
from jax.experimental.pallas import tpu as pltpu

KW = 4           # kernel size of every conv in the discriminator
PAD = 1          # padding of every conv
EPS = 1e-5       # BatchNorm eps (PyTorch default)
NEG_SLOPE = 0.2  # LeakyReLU negative slope


def _round_up(x, m):
    return (x + m - 1) // m * m


# ----------------------------- Pallas kernels -------------------------------

def _make_conv_kernel(n_k, tk, use_bn, use_act, has_bias):
    """Pass 1: tiled bf16 matmul with f32 VMEM accumulator and fused epilogue.

    Refs (in order): patches (tm, tk) bf16, weights (K, cout_pad) bf16 resident,
    [bias (1, cout_pad) f32], out (tm, cout_pad), [stats (1, 2, cout_pad) f32],
    acc scratch (tm, cout_pad) f32.
    """
    def kernel(*refs):
        p_ref, w_ref = refs[0], refs[1]
        pos = 2
        b_ref = None
        if has_bias:
            b_ref = refs[pos]
            pos += 1
        o_ref = refs[pos]
        pos += 1
        stat_ref = None
        if use_bn:
            stat_ref = refs[pos]
            pos += 1
        acc_ref = refs[pos]

        k = pl.program_id(1)

        @pl.when(k == 0)
        def _init():
            acc_ref[...] = jnp.zeros_like(acc_ref)

        if n_k == 1:
            w_blk = w_ref[...]
        else:
            k_off = pl.multiple_of(k * tk, tk)      # aligned slice of resident weights
            w_blk = w_ref[pl.ds(k_off, tk), :]

        acc_ref[...] += jnp.dot(p_ref[...], w_blk,
                                preferred_element_type=jnp.float32)

        @pl.when(k == n_k - 1)
        def _epilogue():
            y = acc_ref[...]
            if use_bn:
                # Padded (all-zero) patch rows contribute exactly 0 to both sums.
                stat_ref[0, 0, :] = jnp.sum(y, axis=0)
                stat_ref[0, 1, :] = jnp.sum(y * y, axis=0)
                o_ref[...] = y.astype(o_ref.dtype)
            else:
                if has_bias:
                    y = y + b_ref[...]
                if use_act:
                    y = jnp.where(y >= 0, y, NEG_SLOPE * y)
                o_ref[...] = y.astype(o_ref.dtype)

    return kernel


def _bn_act_kernel(y_ref, sc_ref, sh_ref, o_ref, *, use_act):
    """Pass 2: lane-dense per-channel scale/shift (folded BN) + LeakyReLU (bf16 io)."""
    y = y_ref[...].astype(jnp.float32) * sc_ref[...] + sh_ref[...]
    if use_act:
        y = jnp.where(y >= 0, y, NEG_SLOPE * y)
    o_ref[...] = y.astype(o_ref.dtype)


# ----------------------------- pallas_call wrappers --------------------------

def _conv_pass1(patches, w2d, bias, *, tm, tk, use_bn, use_act, out_dtype):
    m_pad, K = patches.shape
    cout_pad = w2d.shape[1]
    n_m, n_k = m_pad // tm, K // tk
    has_bias = bias is not None

    in_arrays = [patches, w2d]
    in_specs = [
        pl.BlockSpec((tm, tk), lambda i, k: (i, k)),        # patches: streamed once
        pl.BlockSpec((K, cout_pad), lambda i, k: (0, 0)),   # weights: VMEM-resident
    ]
    if has_bias:
        in_arrays.append(bias)
        in_specs.append(pl.BlockSpec((1, cout_pad), lambda i, k: (0, 0)))

    out_shapes = [jax.ShapeDtypeStruct((m_pad, cout_pad), out_dtype)]
    out_specs = [pl.BlockSpec((tm, cout_pad), lambda i, k: (i, 0))]
    if use_bn:
        out_shapes.append(jax.ShapeDtypeStruct((n_m, 2, cout_pad), jnp.float32))
        out_specs.append(pl.BlockSpec((1, 2, cout_pad), lambda i, k: (i, 0, 0)))

    # Explicit VMEM budget with headroom (valid for v5e/v6e/v7x; tiles are small).
    out_bytes = 4 if out_dtype == jnp.float32 else 2
    vmem_est = (2 * tm * tk * 2            # double-buffered patch tiles (bf16)
                + 2 * K * cout_pad * 2     # resident weights (budget 2x to be safe)
                + tm * cout_pad * 4        # f32 accumulator
                + 2 * tm * cout_pad * out_bytes
                + 8 * cout_pad * 8)        # bias / stats
    vmem_limit = int(min(max(vmem_est * 5 // 4, 32 * 1024 * 1024), 48 * 1024 * 1024))

    outs = pl.pallas_call(
        _make_conv_kernel(n_k, tk, use_bn, use_act, has_bias),
        out_shape=tuple(out_shapes),
        grid_spec=pltpu.PrefetchScalarGridSpec(
            num_scalar_prefetch=0,
            grid=(n_m, n_k),
            in_specs=in_specs,
            out_specs=tuple(out_specs),
            scratch_shapes=[pltpu.VMEM((tm, cout_pad), jnp.float32)]),
        compiler_params=pltpu.CompilerParams(
            dimension_semantics=("parallel", "arbitrary"),
            vmem_limit_bytes=vmem_limit),
    )(*in_arrays)
    if not isinstance(outs, (tuple, list)):
        outs = (outs,)
    return outs


def _bn_act_pass2(y, scale, shift, *, use_act):
    m_pad, cout_pad = y.shape
    # Row tile: prefer >= 1 MiB per step (pure HBM-bound streaming), cap at 4096 rows.
    divisors = [c for c in (4096, 2048, 1024, 512, 256, 128, 64, 32, 16, 8)
                if m_pad % c == 0]
    big = [c for c in divisors if c * cout_pad * y.dtype.itemsize >= (1 << 20)]
    tm2 = big[0] if big else (divisors[0] if divisors else m_pad)

    return pl.pallas_call(
        functools.partial(_bn_act_kernel, use_act=use_act),
        out_shape=jax.ShapeDtypeStruct((m_pad, cout_pad), y.dtype),
        grid=(m_pad // tm2,),
        in_specs=[
            pl.BlockSpec((tm2, cout_pad), lambda i: (i, 0)),
            pl.BlockSpec((1, cout_pad), lambda i: (0, 0)),
            pl.BlockSpec((1, cout_pad), lambda i: (0, 0)),
        ],
        out_specs=pl.BlockSpec((tm2, cout_pad), lambda i: (i, 0)),
        input_output_aliases={0: 0},   # y is dead afterwards -> reuse its HBM buffer
        compiler_params=pltpu.CompilerParams(
            dimension_semantics=("parallel",)),
    )(y, scale, shift)


# ------------------------------- JAX glue -----------------------------------

def _im2col(x_nhwc, stride, m_pad):
    """4x4 patches (zero pad 1), bf16, rows zero-padded to m_pad -> [m_pad, 16*C].

    Stride-2 layers expand only 4x (each pixel lands in 4 patches); the stride-1
    tail layers expand 16x but have the smallest spatial maps.  See module TODO.
    """
    N, H, W, C = x_nhwc.shape
    xb = x_nhwc.astype(jnp.bfloat16)
    xp = jnp.pad(xb, ((0, 0), (PAD, PAD), (PAD, PAD), (0, 0)))
    OH = (H + 2 * PAD - KW) // stride + 1
    OW = (W + 2 * PAD - KW) // stride + 1
    taps = []
    for i in range(KW):
        for j in range(KW):
            taps.append(xp[:, i::stride, j::stride, :][:, :OH, :OW, :])
    patches = jnp.stack(taps, axis=3).reshape(N * OH * OW, KW * KW * C)
    M = N * OH * OW
    if m_pad > M:
        patches = jnp.pad(patches, ((0, m_pad - M), (0, 0)))
    return patches


def _pad_axis(a, axis, new_size):
    pad = [(0, 0)] * a.ndim
    pad[axis] = (0, new_size - a.shape[axis])
    return jnp.pad(a, pad)


def _pick_tiles(M, K):
    """M tile <= 512 rows (v5e-safe; bump to 1024 on v6e/v7x if per-step overhead
    shows up in profiles).  Keep >= 2 M-tiles when M allows so the "parallel" axis
    can be sharded across v7x's two TensorCores."""
    if M <= 256:
        tm = _round_up(M, 8)
    elif M <= 1024:
        tm = _round_up((M + 1) // 2, 8)
    else:
        tm = 512
    m_pad = _round_up(M, tm)
    if K <= 2048:
        tk = K
    elif K % 2048 == 0:
        tk = 2048
    else:
        tk = K
    return tm, m_pad, tk


def init_params(key, input_channels, ndf=64, n_layers=3):
    """Deterministic synthetic parameters mirroring the PyTorch layer stack."""
    specs = [(input_channels, ndf, 2, False, True)]          # conv + LeakyReLU
    nf_mult = 1
    for n in range(1, n_layers):                             # conv + BN + LReLU, stride 2
        nf_mult_prev, nf_mult = nf_mult, min(2 ** n, 8)
        specs.append((ndf * nf_mult_prev, ndf * nf_mult, 2, True, True))
    nf_mult_prev, nf_mult = nf_mult, min(2 ** n_layers, 8)   # conv + BN + LReLU, stride 1
    specs.append((ndf * nf_mult_prev, ndf * nf_mult, 1, True, True))
    specs.append((ndf * nf_mult, 1, 1, False, False))        # final 1-channel conv

    params = []
    for cin, cout, stride, use_bn, use_act in specs:
        key, k1, k2, k3, k4 = jax.random.split(key, 5)
        fan_in = cin * KW * KW
        params.append(dict(
            w=jax.random.normal(k1, (KW, KW, cin, cout), jnp.float32) / jnp.sqrt(fan_in),
            b=0.01 * jax.random.normal(k2, (cout,), jnp.float32),
            gamma=1.0 + 0.1 * jax.random.normal(k3, (cout,), jnp.float32),
            beta=0.1 * jax.random.normal(k4, (cout,), jnp.float32),
            stride=stride, use_bn=use_bn, use_act=use_act))
    return params


def nlayer_discriminator_forward(x_nchw, params):
    """Input/output in NCHW (PyTorch convention)."""
    x = jnp.transpose(x_nchw, (0, 2, 3, 1))                  # -> NHWC
    n_layers = len(params)
    for li, p in enumerate(params):
        stride = p["stride"]
        cin, cout = p["w"].shape[2], p["w"].shape[3]
        N, H, W, _ = x.shape
        OH = (H + 2 * PAD - KW) // stride + 1
        OW = (W + 2 * PAD - KW) // stride + 1
        M = N * OH * OW
        K = KW * KW * cin
        cout_pad = _round_up(cout, 128)
        is_last = li == n_layers - 1

        tm, m_pad, tk = _pick_tiles(M, K)

        patches = _im2col(x, stride, m_pad)                                      # bf16
        w2d = _pad_axis(p["w"].reshape(K, cout), 1, cout_pad).astype(jnp.bfloat16)

        bias = None
        if not p["use_bn"]:
            # BN layers skip the bias entirely (it cancels under mean subtraction).
            bias = _pad_axis(p["b"], 0, cout_pad).reshape(1, cout_pad).astype(jnp.float32)

        out_dtype = jnp.float32 if is_last else jnp.bfloat16
        outs = _conv_pass1(patches, w2d, bias, tm=tm, tk=tk,
                           use_bn=p["use_bn"], use_act=p["use_act"],
                           out_dtype=out_dtype)
        y = outs[0]

        if p["use_bn"]:
            # Fold partial sums -> per-channel scale/shift (var = E[y^2] - E[y]^2).
            tot = jnp.sum(outs[1], axis=0)                  # (2, cout_pad) f32
            mean = tot[0] / M
            var = jnp.maximum(tot[1] / M - mean * mean, 0.0)
            # Zero-padded channels: gamma/beta padded with 0 => scale = shift = 0.
            gamma_pad = _pad_axis(p["gamma"], 0, cout_pad)
            beta_pad = _pad_axis(p["beta"], 0, cout_pad)
            scale = gamma_pad * lax.rsqrt(var + EPS)
            shift = beta_pad - mean * scale
            y = _bn_act_pass2(y,
                              scale.reshape(1, cout_pad).astype(jnp.float32),
                              shift.reshape(1, cout_pad).astype(jnp.float32),
                              use_act=p["use_act"])

        x = y[:M, :cout].reshape(N, OH, OW, cout)
    return jnp.transpose(x, (0, 3, 1, 2)).astype(jnp.float32)                    # -> NCHW


# ---------------------------- pure-JAX reference -----------------------------

def reference_forward(x_nchw, params):
    y = x_nchw
    for p in params:
        y = lax.conv_general_dilated(
            y, p["w"], (p["stride"], p["stride"]), ((PAD, PAD), (PAD, PAD)),
            dimension_numbers=("NCHW", "HWIO", "NCHW"),
            precision=lax.Precision.HIGHEST)
        y = y + p["b"][None, :, None, None]
        if p["use_bn"]:
            mu = jnp.mean(y, axis=(0, 2, 3), keepdims=True)
            var = jnp.mean((y - mu) ** 2, axis=(0, 2, 3), keepdims=True)
            y = (y - mu) / jnp.sqrt(var + EPS)
            y = y * p["gamma"][None, :, None, None] + p["beta"][None, :, None, None]
        if p["use_act"]:
            y = jnp.where(y >= 0, y, NEG_SLOPE * y)
    return y


# ---------------------------------- main -------------------------------------

if __name__ == "__main__":
    key = jax.random.PRNGKey(0)
    kx, kp = jax.random.split(key)

    # 32x32 input so the two trailing stride-1 4x4 convs still produce a
    # non-empty patch map (final output 2x2).
    x = jax.random.normal(kx, (2, 4, 32, 32), jnp.float32)   # NCHW, like PyTorch
    params = init_params(kp, input_channels=4, ndf=64, n_layers=3)

    forward = jax.jit(lambda inp: nlayer_discriminator_forward(inp, params))
    out = jax.block_until_ready(forward(x))

    assert out.shape == (2, 1, 2, 2), out.shape
    ref = reference_forward(x, params)
    # Tolerance reflects bf16 matmul inputs + bf16 intermediate storage vs the
    # f32 HIGHEST-precision reference (error compounds over 5 layers + BN rescale).
    assert jnp.allclose(out, ref, rtol=8e-2, atol=8e-2), \
        float(jnp.max(jnp.abs(out - ref)))

    print("KERNEL_OK")
</pallas_src>

<mosaic_0001>
module attributes {stable_mosaic.version = 11 : i64} {
  func.func @kernel(%arg0: i32, %arg1: i32, %arg2: memref<256x64xbf16, #tpu.memory_space<vmem>>, %arg3: memref<64x128xbf16, #tpu.memory_space<vmem>>, %arg4: memref<1x128xf32, #tpu.memory_space<vmem>>, %arg5: memref<256x128xbf16, #tpu.memory_space<vmem>>, %arg6: memref<256x128xf32, #tpu.memory_space<vmem>>) attributes {dimension_semantics = [#tpu.dimension_semantics<parallel>, #tpu.dimension_semantics<arbitrary>], iteration_bounds = array<i64: 2, 1>, scalar_prefetch = 0 : i64, scratch_operands = 1 : i64, tpu.core_type = #tpu.core_type<tc>, window_params = [{transform_indices = @transform_0, window_bounds = array<i64: 256, 64>}, {pipeline_mode = #tpu.pipeline_mode<synchronous>, transform_indices = @transform_1, window_bounds = array<i64: 64, 128>}, {pipeline_mode = #tpu.pipeline_mode<synchronous>, transform_indices = @transform_2, window_bounds = array<i64: 1, 128>}, {transform_indices = @transform_3, window_bounds = array<i64: 256, 128>}]} {
    %c0_i32 = arith.constant 0 : i32
    %0 = arith.cmpi eq, %arg1, %c0_i32 : i32
    %1 = arith.extui %0 : i1 to i32
    %c0_i32_0 = arith.constant 0 : i32
    %2 = arith.cmpi ne, %1, %c0_i32_0 : i32
    scf.if %2 {
      %cst_10 = arith.constant 0.000000e+00 : f32
      %12 = vector.broadcast %cst_10 : f32 to vector<256x128xf32>
      %c0_11 = arith.constant 0 : index
      %c0_12 = arith.constant 0 : index
      %13 = vector.load %arg6[%c0_11, %c0_12] : memref<256x128xf32, #tpu.memory_space<vmem>>, vector<256x128xf32>
      tpu.vector_store %arg6[%c0_11, %c0_12], %12 {strides = array<i32>} : memref<256x128xf32, #tpu.memory_space<vmem>>, vector<256x128xf32>,
    } else {
    }
    %c0 = arith.constant 0 : index
    %c0_1 = arith.constant 0 : index
    %3 = vector.load %arg3[%c0, %c0_1] : memref<64x128xbf16, #tpu.memory_space<vmem>>, vector<64x128xbf16>
    %c0_2 = arith.constant 0 : index
    %c0_3 = arith.constant 0 : index
    %4 = vector.load %arg6[%c0_2, %c0_3] : memref<256x128xf32, #tpu.memory_space<vmem>>, vector<256x128xf32>
    %c0_4 = arith.constant 0 : index
    %c0_5 = arith.constant 0 : index
    %5 = vector.load %arg2[%c0_4, %c0_5] : memref<256x64xbf16, #tpu.memory_space<vmem>>, vector<256x64xbf16>
    %cst = arith.constant dense<0.000000e+00> : vector<256x128xf32>
    %6 = tpu.matmul %5, %3, %cst {dimension_numbers = #tpu.dot_dimension_numbers<[1], [0], [0], [1], [0, 0, 1, 1], [], []>} : vector<256x64xbf16>, vector<64x128xbf16>, vector<256x128xf32> -> vector<256x128xf32>
    %7 = arith.addf %4, %6 : vector<256x128xf32>
    %c0_6 = arith.constant 0 : index
    %c0_7 = arith.constant 0 : index
    %8 = vector.load %arg6[%c0_6, %c0_7] : memref<256x128xf32, #tpu.memory_space<vmem>>, vector<256x128xf32>
    tpu.vector_store %arg6[%c0_6, %c0_7], %7 {strides = array<i32>} : memref<256x128xf32, #tpu.memory_space<vmem>>, vector<256x128xf32>,
    %c0_i32_8 = arith.constant 0 : i32
    %9 = arith.cmpi eq, %arg1, %c0_i32_8 : i32
    %10 = arith.extui %9 : i1 to i32
    %c0_i32_9 = arith.constant 0 : i32
    %11 = arith.cmpi ne, %10, %c0_i32_9 : i32
    scf.if %11 {
      %c0_10 = arith.constant 0 : index
      %c0_11 = arith.constant 0 : index
      %12 = vector.load %arg6[%c0_10, %c0_11] : memref<256x128xf32, #tpu.memory_space<vmem>>, vector<256x128xf32>
      %c0_12 = arith.constant 0 : index
      %c0_13 = arith.constant 0 : index
      %13 = vector.load %arg4[%c0_12, %c0_13] : memref<1x128xf32, #tpu.memory_space<vmem>>, vector<1x128xf32>
      %14 = vector.broadcast %13 : vector<1x128xf32> to vector<256x128xf32>
      %15 = arith.addf %12, %14 : vector<256x128xf32>
      %cst_14 = arith.constant 0.000000e+00 : f32
      %16 = vector.broadcast %cst_14 : f32 to vector<256x128xf32>
      %17 = arith.cmpf oge, %15, %16 : vector<256x128xf32>
      %cst_15 = arith.constant 2.000000e-01 : f32
      %18 = vector.broadcast %cst_15 : f32 to vector<256x128xf32>
      %19 = arith.mulf %18, %15 : vector<256x128xf32>
      %20 = arith.select %17, %15, %19 : vector<256x128xi1>, vector<256x128xf32>
      %21 = arith.truncf %20 : vector<256x128xf32> to vector<256x128xbf16>
      %c0_16 = arith.constant 0 : index
      %c0_17 = arith.constant 0 : index
      %22 = vector.load %arg5[%c0_16, %c0_17] : memref<256x128xbf16, #tpu.memory_space<vmem>>, vector<256x128xbf16>
      tpu.vector_store %arg5[%c0_16, %c0_17], %21 {strides = array<i32>} : memref<256x128xbf16, #tpu.memory_space<vmem>>, vector<256x128xbf16>,
    } else {
    }
    return
  }
  func.func @transform_0(%arg0: i32, %arg1: i32) -> (i32, i32) {
    %c0_i32 = arith.constant 0 : i32
    return %arg0, %arg1 : i32, i32
  }
  func.func @transform_1(%arg0: i32, %arg1: i32) -> (i32, i32) {
    %c0_i32 = arith.constant 0 : i32
    %c0_i32_0 = arith.constant 0 : i32
    %c0_i32_1 = arith.constant 0 : i32
    return %c0_i32, %c0_i32_0 : i32, i32
  }
  func.func @transform_2(%arg0: i32, %arg1: i32) -> (i32, i32) {
    %c0_i32 = arith.constant 0 : i32
    %c0_i32_0 = arith.constant 0 : i32
    %c0_i32_1 = arith.constant 0 : i32
    return %c0_i32, %c0_i32_0 : i32, i32
  }
  func.func @transform_3(%arg0: i32, %arg1: i32) -> (i32, i32) {
    %c0_i32 = arith.constant 0 : i32
    %c0_i32_0 = arith.constant 0 : i32
    return %arg0, %c0_i32 : i32, i32
  }
}

module attributes {stable_mosaic.version = 11 : i64} {
  func.func @kernel(%arg0: i32, %arg1: i32, %arg2: memref<128x1024xbf16, #tpu.memory_space<vmem>>, %arg3: memref<1024x128xbf16, #tpu.memory_space<vmem>>, %arg4: memref<128x128xbf16, #tpu.memory_space<vmem>>, %arg5: memref<1x2x128xf32, #tpu.memory_space<vmem>>, %arg6: memref<128x128xf32, #tpu.memory_space<vmem>>) attributes {dimension_semantics = [#tpu.dimension_semantics<parallel>, #tpu.dimension_semantics<arbitrary>], iteration_bounds = array<i64: 1, 1>, scalar_prefetch = 0 : i64, scratch_operands = 1 : i64, tpu.core_type = #tpu.core_type<tc>, window_params = [{transform_indices = @transform_0, window_bounds = array<i64: 128, 1024>}, {pipeline_mode = #tpu.pipeline_mode<synchronous>, transform_indices = @transform_1, window_bounds = array<i64: 1024, 128>}, {transform_indices = @transform_2, window_bounds = array<i64: 128, 128>}, {transform_indices = @transform_3, window_bounds = array<i64: 1, 2, 128>}]} {
    %c0_i32 = arith.constant 0 : i32
    %0 = arith.cmpi eq, %arg1, %c0_i32 : i32
    %1 = arith.extui %0 : i1 to i32
    %c0_i32_0 = arith.constant 0 : i32
    %2 = arith.cmpi ne, %1, %c0_i32_0 : i32
    scf.if %2 {
      %cst_10 = arith.constant 0.000000e+00 : f32
      %12 = vector.broadcast %cst_10 : f32 to vector<128x128xf32>
      %c0_11 = arith.constant 0 : index
      %c0_12 = arith.constant 0 : index
      %13 = vector.load %arg6[%c0_11, %c0_12] : memref<128x128xf32, #tpu.memory_space<vmem>>, vector<128x128xf32>
      tpu.vector_store %arg6[%c0_11, %c0_12], %12 {strides = array<i32>} : memref<128x128xf32, #tpu.memory_space<vmem>>, vector<128x128xf32>,
    } else {
    }
    %c0 = arith.constant 0 : index
    %c0_1 = arith.constant 0 : index
    %3 = vector.load %arg3[%c0, %c0_1] : memref<1024x128xbf16, #tpu.memory_space<vmem>>, vector<1024x128xbf16>
    %c0_2 = arith.constant 0 : index
    %c0_3 = arith.constant 0 : index
    %4 = vector.load %arg6[%c0_2, %c0_3] : memref<128x128xf32, #tpu.memory_space<vmem>>, vector<128x128xf32>
    %c0_4 = arith.constant 0 : index
    %c0_5 = arith.constant 0 : index
    %5 = vector.load %arg2[%c0_4, %c0_5] : memref<128x1024xbf16, #tpu.memory_space<vmem>>, vector<128x1024xbf16>
    %cst = arith.constant dense<0.000000e+00> : vector<128x128xf32>
    %6 = tpu.matmul %5, %3, %cst {dimension_numbers = #tpu.dot_dimension_numbers<[1], [0], [0], [1], [0, 0, 1, 1], [], []>} : vector<128x1024xbf16>, vector<1024x128xbf16>, vector<128x128xf32> -> vector<128x128xf32>
    %7 = arith.addf %4, %6 : vector<128x128xf32>
    %c0_6 = arith.constant 0 : index
    %c0_7 = arith.constant 0 : index
    %8 = vector.load %arg6[%c0_6, %c0_7] : memref<128x128xf32, #tpu.memory_space<vmem>>, vector<128x128xf32>
    tpu.vector_store %arg6[%c0_6, %c0_7], %7 {strides = array<i32>} : memref<128x128xf32, #tpu.memory_space<vmem>>, vector<128x128xf32>,
    %c0_i32_8 = arith.constant 0 : i32
    %9 = arith.cmpi eq, %arg1, %c0_i32_8 : i32
    %10 = arith.extui %9 : i1 to i32
    %c0_i32_9 = arith.constant 0 : i32
    %11 = arith.cmpi ne, %10, %c0_i32_9 : i32
    scf.if %11 {
      %c0_10 = arith.constant 0 : index
      %c0_11 = arith.constant 0 : index
      %12 = vector.load %arg6[%c0_10, %c0_11] : memref<128x128xf32, #tpu.memory_space<vmem>>, vector<128x128xf32>
      %cst_12 = arith.constant dense<0.000000e+00> : vector<128xf32>
      %13 = vector.multi_reduction <add>, %12, %cst_12 [0] : vector<128x128xf32> to vector<128xf32>
      %c0_13 = arith.constant 0 : index
      %c0_14 = arith.constant 0 : index
      %c0_15 = arith.constant 0 : index
      %14 = vector.load %arg5[%c0_13, %c0_14, %c0_15] : memref<1x2x128xf32, #tpu.memory_space<vmem>>, vector<1x1x128xf32>
      %15 = vector.shape_cast %14 : vector<1x1x128xf32> to vector<128xf32>
      %16 = vector.shape_cast %13 : vector<128xf32> to vector<1x1x128xf32>
      tpu.vector_store %arg5[%c0_13, %c0_14, %c0_15], %16 {strides = array<i32>} : memref<1x2x128xf32, #tpu.memory_space<vmem>>, vector<1x1x128xf32>,
      %17 = arith.mulf %12, %12 : vector<128x128xf32>
      %cst_16 = arith.constant dense<0.000000e+00> : vector<128xf32>
      %18 = vector.multi_reduction <add>, %17, %cst_16 [0] : vector<128x128xf32> to vector<128xf32>
      %c0_17 = arith.constant 0 : index
      %c1 = arith.constant 1 : index
      %c0_18 = arith.constant 0 : index
      %19 = vector.load %arg5[%c0_17, %c1, %c0_18] : memref<1x2x128xf32, #tpu.memory_space<vmem>>, vector<1x1x128xf32>
      %20 = vector.shape_cast %19 : vector<1x1x128xf32> to vector<128xf32>
      %21 = vector.shape_cast %18 : vector<128xf32> to vector<1x1x128xf32>
      tpu.vector_store %arg5[%c0_17, %c1, %c0_18], %21 {strides = array<i32>} : memref<1x2x128xf32, #tpu.memory_space<vmem>>, vector<1x1x128xf32>,
      %22 = arith.truncf %12 : vector<128x128xf32> to vector<128x128xbf16>
      %c0_19 = arith.constant 0 : index
      %c0_20 = arith.constant 0 : index
      %23 = vector.load %arg4[%c0_19, %c0_20] : memref<128x128xbf16, #tpu.memory_space<vmem>>, vector<128x128xbf16>
      tpu.vector_store %arg4[%c0_19, %c0_20], %22 {strides = array<i32>} : memref<128x128xbf16, #tpu.memory_space<vmem>>, vector<128x128xbf16>,
    } else {
    }
    return
  }
  func.func @transform_0(%arg0: i32, %arg1: i32) -> (i32, i32) {
    %c0_i32 = arith.constant 0 : i32
    return %arg0, %arg1 : i32, i32
  }
  func.func @transform_1(%arg0: i32, %arg1: i32) -> (i32, i32) {
    %c0_i32 = arith.constant 0 : i32
    %c0_i32_0 = arith.constant 0 : i32
    %c0_i32_1 = arith.constant 0 : i32
    return %c0_i32, %c0_i32_0 : i32, i32
  }
  func.func @transform_2(%arg0: i32, %arg1: i32) -> (i32, i32) {
    %c0_i32 = arith.constant 0 : i32
    %c0_i32_0 = arith.constant 0 : i32
    return %arg0, %c0_i32 : i32, i32
  }
  func.func @transform_3(%arg0: i32, %arg1: i32) -> (i32, i32, i32) {
    %c0_i32 = arith.constant 0 : i32
    %c0_i32_0 = arith.constant 0 : i32
    %c0_i32_1 = arith.constant 0 : i32
    return %arg0, %c0_i32, %c0_i32_0 : i32, i32, i32
  }
}

module attributes {stable_mosaic.version = 11 : i64} {
  func.func @_bn_act_kernel(%arg0: i32, %arg1: memref<128x128xbf16, #tpu.memory_space<vmem>>, %arg2: memref<1x128xf32, #tpu.memory_space<vmem>>, %arg3: memref<1x128xf32, #tpu.memory_space<vmem>>, %arg4: memref<128x128xbf16, #tpu.memory_space<vmem>>) attributes {dimension_semantics = [#tpu.dimension_semantics<parallel>], iteration_bounds = array<i64: 1>, scalar_prefetch = 0 : i64, scratch_operands = 0 : i64, tpu.core_type = #tpu.core_type<tc>, window_params = [{transform_indices = @transform_0, window_bounds = array<i64: 128, 128>}, {pipeline_mode = #tpu.pipeline_mode<synchronous>, transform_indices = @transform_1, window_bounds = array<i64: 1, 128>}, {pipeline_mode = #tpu.pipeline_mode<synchronous>, transform_indices = @transform_2, window_bounds = array<i64: 1, 128>}, {transform_indices = @transform_3, window_bounds = array<i64: 128, 128>}]} {
    %c0 = arith.constant 0 : index
    %c0_0 = arith.constant 0 : index
    %0 = vector.load %arg1[%c0, %c0_0] : memref<128x128xbf16, #tpu.memory_space<vmem>>, vector<128x128xbf16>
    %1 = arith.extf %0 : vector<128x128xbf16> to vector<128x128xf32>
    %c0_1 = arith.constant 0 : index
    %c0_2 = arith.constant 0 : index
    %2 = vector.load %arg2[%c0_1, %c0_2] : memref<1x128xf32, #tpu.memory_space<vmem>>, vector<1x128xf32>
    %3 = vector.broadcast %2 : vector<1x128xf32> to vector<128x128xf32>
    %4 = arith.mulf %1, %3 : vector<128x128xf32>
    %c0_3 = arith.constant 0 : index
    %c0_4 = arith.constant 0 : index
    %5 = vector.load %arg3[%c0_3, %c0_4] : memref<1x128xf32, #tpu.memory_space<vmem>>, vector<1x128xf32>
    %6 = vector.broadcast %5 : vector<1x128xf32> to vector<128x128xf32>
    %7 = arith.addf %4, %6 : vector<128x128xf32>
    %cst = arith.constant 0.000000e+00 : f32
    %8 = vector.broadcast %cst : f32 to vector<128x128xf32>
    %9 = arith.cmpf oge, %7, %8 : vector<128x128xf32>
    %cst_5 = arith.constant 2.000000e-01 : f32
    %10 = vector.broadcast %cst_5 : f32 to vector<128x128xf32>
    %11 = arith.mulf %10, %7 : vector<128x128xf32>
    %12 = arith.select %9, %7, %11 : vector<128x128xi1>, vector<128x128xf32>
    %13 = arith.truncf %12 : vector<128x128xf32> to vector<128x128xbf16>
    %c0_6 = arith.constant 0 : index
    %c0_7 = arith.constant 0 : index
    %14 = vector.load %arg4[%c0_6, %c0_7] : memref<128x128xbf16, #tpu.memory_space<vmem>>, vector<128x128xbf16>
    tpu.vector_store %arg4[%c0_6, %c0_7], %13 {strides = array<i32>} : memref<128x128xbf16, #tpu.memory_space<vmem>>, vector<128x128xbf16>,
    return
  }
  func.func @transform_0(%arg0: i32) -> (i32, i32) {
    %c0_i32 = arith.constant 0 : i32
    %c0_i32_0 = arith.constant 0 : i32
    return %arg0, %c0_i32 : i32, i32
  }
  func.func @transform_1(%arg0: i32) -> (i32, i32) {
    %c0_i32 = arith.constant 0 : i32
    %c0_i32_0 = arith.constant 0 : i32
    %c0_i32_1 = arith.constant 0 : i32
    return %c0_i32, %c0_i32_0 : i32, i32
  }
  func.func @transform_2(%arg0: i32) -> (i32, i32) {
    %c0_i32 = arith.constant 0 : i32
    %c0_i32_0 = arith.constant 0 : i32
    %c0_i32_1 = arith.constant 0 : i32
    return %c0_i32, %c0_i32_0 : i32, i32
  }
  func.func @transform_3(%arg0: i32) -> (i32, i32) {
    %c0_i32 = arith.constant 0 : i32
    %c0_i32_0 = arith.constant 0 : i32
    return %arg0, %c0_i32 : i32, i32
  }
}

module attributes {stable_mosaic.version = 11 : i64} {
  func.func @kernel(%arg0: i32, %arg1: i32, %arg2: memref<32x2048xbf16, #tpu.memory_space<vmem>>, %arg3: memref<2048x256xbf16, #tpu.memory_space<vmem>>, %arg4: memref<32x256xbf16, #tpu.memory_space<vmem>>, %arg5: memref<1x2x256xf32, #tpu.memory_space<vmem>>, %arg6: memref<32x256xf32, #tpu.memory_space<vmem>>) attributes {dimension_semantics = [#tpu.dimension_semantics<parallel>, #tpu.dimension_semantics<arbitrary>], iteration_bounds = array<i64: 1, 1>, scalar_prefetch = 0 : i64, scratch_operands = 1 : i64, tpu.core_type = #tpu.core_type<tc>, window_params = [{transform_indices = @transform_0, window_bounds = array<i64: 32, 2048>}, {pipeline_mode = #tpu.pipeline_mode<synchronous>, transform_indices = @transform_1, window_bounds = array<i64: 2048, 256>}, {transform_indices = @transform_2, window_bounds = array<i64: 32, 256>}, {transform_indices = @transform_3, window_bounds = array<i64: 1, 2, 256>}]} {
    %c0_i32 = arith.constant 0 : i32
    %0 = arith.cmpi eq, %arg1, %c0_i32 : i32
    %1 = arith.extui %0 : i1 to i32
    %c0_i32_0 = arith.constant 0 : i32
    %2 = arith.cmpi ne, %1, %c0_i32_0 : i32
    scf.if %2 {
      %cst_10 = arith.constant 0.000000e+00 : f32
      %12 = vector.broadcast %cst_10 : f32 to vector<32x256xf32>
      %c0_11 = arith.constant 0 : index
      %c0_12 = arith.constant 0 : index
      %13 = vector.load %arg6[%c0_11, %c0_12] : memref<32x256xf32, #tpu.memory_space<vmem>>, vector<32x256xf32>
      tpu.vector_store %arg6[%c0_11, %c0_12], %12 {strides = array<i32>} : memref<32x256xf32, #tpu.memory_space<vmem>>, vector<32x256xf32>,
    } else {
    }
    %c0 = arith.constant 0 : index
    %c0_1 = arith.constant 0 : index
    %3 = vector.load %arg3[%c0, %c0_1] : memref<2048x256xbf16, #tpu.memory_space<vmem>>, vector<2048x256xbf16>
    %c0_2 = arith.constant 0 : index
    %c0_3 = arith.constant 0 : index
    %4 = vector.load %arg6[%c0_2, %c0_3] : memref<32x256xf32, #tpu.memory_space<vmem>>, vector<32x256xf32>
    %c0_4 = arith.constant 0 : index
    %c0_5 = arith.constant 0 : index
    %5 = vector.load %arg2[%c0_4, %c0_5] : memref<32x2048xbf16, #tpu.memory_space<vmem>>, vector<32x2048xbf16>
    %cst = arith.constant dense<0.000000e+00> : vector<32x256xf32>
    %6 = tpu.matmul %5, %3, %cst {dimension_numbers = #tpu.dot_dimension_numbers<[1], [0], [0], [1], [0, 0, 1, 1], [], []>} : vector<32x2048xbf16>, vector<2048x256xbf16>, vector<32x256xf32> -> vector<32x256xf32>
    %7 = arith.addf %4, %6 : vector<32x256xf32>
    %c0_6 = arith.constant 0 : index
    %c0_7 = arith.constant 0 : index
    %8 = vector.load %arg6[%c0_6, %c0_7] : memref<32x256xf32, #tpu.memory_space<vmem>>, vector<32x256xf32>
    tpu.vector_store %arg6[%c0_6, %c0_7], %7 {strides = array<i32>} : memref<32x256xf32, #tpu.memory_space<vmem>>, vector<32x256xf32>,
    %c0_i32_8 = arith.constant 0 : i32
    %9 = arith.cmpi eq, %arg1, %c0_i32_8 : i32
    %10 = arith.extui %9 : i1 to i32
    %c0_i32_9 = arith.constant 0 : i32
    %11 = arith.cmpi ne, %10, %c0_i32_9 : i32
    scf.if %11 {
      %c0_10 = arith.constant 0 : index
      %c0_11 = arith.constant 0 : index
      %12 = vector.load %arg6[%c0_10, %c0_11] : memref<32x256xf32, #tpu.memory_space<vmem>>, vector<32x256xf32>
      %cst_12 = arith.constant dense<0.000000e+00> : vector<256xf32>
      %13 = vector.multi_reduction <add>, %12, %cst_12 [0] : vector<32x256xf32> to vector<256xf32>
      %c0_13 = arith.constant 0 : index
      %c0_14 = arith.constant 0 : index
      %c0_15 = arith.constant 0 : index
      %14 = vector.load %arg5[%c0_13, %c0_14, %c0_15] : memref<1x2x256xf32, #tpu.memory_space<vmem>>, vector<1x1x256xf32>
      %15 = vector.shape_cast %14 : vector<1x1x256xf32> to vector<256xf32>
      %16 = vector.shape_cast %13 : vector<256xf32> to vector<1x1x256xf32>
      tpu.vector_store %arg5[%c0_13, %c0_14, %c0_15], %16 {strides = array<i32>} : memref<1x2x256xf32, #tpu.memory_space<vmem>>, vector<1x1x256xf32>,
      %17 = arith.mulf %12, %12 : vector<32x256xf32>
      %cst_16 = arith.constant dense<0.000000e+00> : vector<256xf32>
      %18 = vector.multi_reduction <add>, %17, %cst_16 [0] : vector<32x256xf32> to vector<256xf32>
      %c0_17 = arith.constant 0 : index
      %c1 = arith.constant 1 : index
      %c0_18 = arith.constant 0 : index
      %19 = vector.load %arg5[%c0_17, %c1, %c0_18] : memref<1x2x256xf32, #tpu.memory_space<vmem>>, vector<1x1x256xf32>
      %20 = vector.shape_cast %19 : vector<1x1x256xf32> to vector<256xf32>
      %21 = vector.shape_cast %18 : vector<256xf32> to vector<1x1x256xf32>
      tpu.vector_store %arg5[%c0_17, %c1, %c0_18], %21 {strides = array<i32>} : memref<1x2x256xf32, #tpu.memory_space<vmem>>, vector<1x1x256xf32>,
      %22 = arith.truncf %12 : vector<32x256xf32> to vector<32x256xbf16>
      %c0_19 = arith.constant 0 : index
      %c0_20 = arith.constant 0 : index
      %23 = vector.load %arg4[%c0_19, %c0_20] : memref<32x256xbf16, #tpu.memory_space<vmem>>, vector<32x256xbf16>
      tpu.vector_store %arg4[%c0_19, %c0_20], %22 {strides = array<i32>} : memref<32x256xbf16, #tpu.memory_space<vmem>>, vector<32x256xbf16>,
    } else {
    }
    return
  }
  func.func @transform_0(%arg0: i32, %arg1: i32) -> (i32, i32) {
    %c0_i32 = arith.constant 0 : i32
    return %arg0, %arg1 : i32, i32
  }
  func.func @transform_1(%arg0: i32, %arg1: i32) -> (i32, i32) {
    %c0_i32 = arith.constant 0 : i32
    %c0_i32_0 = arith.constant 0 : i32
    %c0_i32_1 = arith.constant 0 : i32
    return %c0_i32, %c0_i32_0 : i32, i32
  }
  func.func @transform_2(%arg0: i32, %arg1: i32) -> (i32, i32) {
    %c0_i32 = arith.constant 0 : i32
    %c0_i32_0 = arith.constant 0 : i32
    return %arg0, %c0_i32 : i32, i32
  }
  func.func @transform_3(%arg0: i32, %arg1: i32) -> (i32, i32, i32) {
    %c0_i32 = arith.constant 0 : i32
    %c0_i32_0 = arith.constant 0 : i32
    %c0_i32_1 = arith.constant 0 : i32
    return %arg0, %c0_i32, %c0_i32_0 : i32, i32, i32
  }
}

module attributes {stable_mosaic.version = 11 : i64} {
  func.func @_bn_act_kernel(%arg0: i32, %arg1: memref<32x256xbf16, #tpu.memory_space<vmem>>, %arg2: memref<1x256xf32, #tpu.memory_space<vmem>>, %arg3: memref<1x256xf32, #tpu.memory_space<vmem>>, %arg4: memref<32x256xbf16, #tpu.memory_space<vmem>>) attributes {dimension_semantics = [#tpu.dimension_semantics<parallel>], iteration_bounds = array<i64: 1>, scalar_prefetch = 0 : i64, scratch_operands = 0 : i64, tpu.core_type = #tpu.core_type<tc>, window_params = [{transform_indices = @transform_0, window_bounds = array<i64: 32, 256>}, {pipeline_mode = #tpu.pipeline_mode<synchronous>, transform_indices = @transform_1, window_bounds = array<i64: 1, 256>}, {pipeline_mode = #tpu.pipeline_mode<synchronous>, transform_indices = @transform_2, window_bounds = array<i64: 1, 256>}, {transform_indices = @transform_3, window_bounds = array<i64: 32, 256>}]} {
    %c0 = arith.constant 0 : index
    %c0_0 = arith.constant 0 : index
    %0 = vector.load %arg1[%c0, %c0_0] : memref<32x256xbf16, #tpu.memory_space<vmem>>, vector<32x256xbf16>
    %1 = arith.extf %0 : vector<32x256xbf16> to vector<32x256xf32>
    %c0_1 = arith.constant 0 : index
    %c0_2 = arith.constant 0 : index
    %2 = vector.load %arg2[%c0_1, %c0_2] : memref<1x256xf32, #tpu.memory_space<vmem>>, vector<1x256xf32>
    %3 = vector.broadcast %2 : vector<1x256xf32> to vector<32x256xf32>
    %4 = arith.mulf %1, %3 : vector<32x256xf32>
    %c0_3 = arith.constant 0 : index
    %c0_4 = arith.constant 0 : index
    %5 = vector.load %arg3[%c0_3, %c0_4] : memref<1x256xf32, #tpu.memory_space<vmem>>, vector<1x256xf32>
    %6 = vector.broadcast %5 : vector<1x256xf32> to vector<32x256xf32>
    %7 = arith.addf %4, %6 : vector<32x256xf32>
    %cst = arith.constant 0.000000e+00 : f32
    %8 = vector.broadcast %cst : f32 to vector<32x256xf32>
    %9 = arith.cmpf oge, %7, %8 : vector<32x256xf32>
    %cst_5 = arith.constant 2.000000e-01 : f32
    %10 = vector.broadcast %cst_5 : f32 to vector<32x256xf32>
    %11 = arith.mulf %10, %7 : vector<32x256xf32>
    %12 = arith.select %9, %7, %11 : vector<32x256xi1>, vector<32x256xf32>
    %13 = arith.truncf %12 : vector<32x256xf32> to vector<32x256xbf16>
    %c0_6 = arith.constant 0 : index
    %c0_7 = arith.constant 0 : index
    %14 = vector.load %arg4[%c0_6, %c0_7] : memref<32x256xbf16, #tpu.memory_space<vmem>>, vector<32x256xbf16>
    tpu.vector_store %arg4[%c0_6, %c0_7], %13 {strides = array<i32>} : memref<32x256xbf16, #tpu.memory_space<vmem>>, vector<32x256xbf16>,
    return
  }
  func.func @transform_0(%arg0: i32) -> (i32, i32) {
    %c0_i32 = arith.constant 0 : i32
    %c0_i32_0 = arith.constant 0 : i32
    return %arg0, %c0_i32 : i32, i32
  }
  func.func @transform_1(%arg0: i32) -> (i32, i32) {
    %c0_i32 = arith.constant 0 : i32
    %c0_i32_0 = arith.constant 0 : i32
    %c0_i32_1 = arith.constant 0 : i32
    return %c0_i32, %c0_i32_0 : i32, i32
  }
  func.func @transform_2(%arg0: i32) -> (i32, i32) {
    %c0_i32 = arith.constant 0 : i32
    %c0_i32_0 = arith.constant 0 : i32
    %c0_i32_1 = arith.constant 0 : i32
    return %c0_i32, %c0_i32_0 : i32, i32
  }
  func.func @transform_3(%arg0: i32) -> (i32, i32) {
    %c0_i32 = arith.constant 0 : i32
    %c0_i32_0 = arith.constant 0 : i32
    return %arg0, %c0_i32 : i32, i32
  }
}

module attributes {stable_mosaic.version = 11 : i64} {
  func.func @kernel(%arg0: i32, %arg1: i32, %arg2: memref<24x2048xbf16, #tpu.memory_space<vmem>>, %arg3: memref<4096x512xbf16, #tpu.memory_space<vmem>>, %arg4: memref<24x512xbf16, #tpu.memory_space<vmem>>, %arg5: memref<1x2x512xf32, #tpu.memory_space<vmem>>, %arg6: memref<24x512xf32, #tpu.memory_space<vmem>>) attributes {dimension_semantics = [#tpu.dimension_semantics<parallel>, #tpu.dimension_semantics<arbitrary>], iteration_bounds = array<i64: 1, 2>, scalar_prefetch = 0 : i64, scratch_operands = 1 : i64, tpu.core_type = #tpu.core_type<tc>, window_params = [{transform_indices = @transform_0, window_bounds = array<i64: 24, 2048>}, {pipeline_mode = #tpu.pipeline_mode<synchronous>, transform_indices = @transform_1, window_bounds = array<i64: 4096, 512>}, {transform_indices = @transform_2, window_bounds = array<i64: 24, 512>}, {transform_indices = @transform_3, window_bounds = array<i64: 1, 2, 512>}]} {
    %c0_i32 = arith.constant 0 : i32
    %0 = arith.cmpi eq, %arg1, %c0_i32 : i32
    %1 = arith.extui %0 : i1 to i32
    %c0_i32_0 = arith.constant 0 : i32
    %2 = arith.cmpi ne, %1, %c0_i32_0 : i32
    scf.if %2 {
      %cst_8 = arith.constant 0.000000e+00 : f32
      %15 = vector.broadcast %cst_8 : f32 to vector<24x512xf32>
      %c0_9 = arith.constant 0 : index
      %c0_10 = arith.constant 0 : index
      %16 = vector.load %arg6[%c0_9, %c0_10] : memref<24x512xf32, #tpu.memory_space<vmem>>, vector<24x512xf32>
      tpu.vector_store %arg6[%c0_9, %c0_10], %15 {strides = array<i32>} : memref<24x512xf32, #tpu.memory_space<vmem>>, vector<24x512xf32>,
    } else {
    }
    %c2048_i32 = arith.constant 2048 : i32
    %3 = arith.muli %arg1, %c2048_i32 : i32
    %4 = tpu.assume_multiple %3, 2048 : i32
    %5 = arith.index_cast %4 : i32 to index
    %c0 = arith.constant 0 : index
    %6 = vector.load %arg3[%5, %c0] : memref<4096x512xbf16, #tpu.memory_space<vmem>>, vector<2048x512xbf16>
    %c0_1 = arith.constant 0 : index
    %c0_2 = arith.constant 0 : index
    %7 = vector.load %arg6[%c0_1, %c0_2] : memref<24x512xf32, #tpu.memory_space<vmem>>, vector<24x512xf32>
    %c0_3 = arith.constant 0 : index
    %c0_4 = arith.constant 0 : index
    %8 = vector.load %arg2[%c0_3, %c0_4] : memref<24x2048xbf16, #tpu.memory_space<vmem>>, vector<24x2048xbf16>
    %cst = arith.constant dense<0.000000e+00> : vector<24x512xf32>
    %9 = tpu.matmul %8, %6, %cst {dimension_numbers = #tpu.dot_dimension_numbers<[1], [0], [0], [1], [0, 0, 1, 1], [], []>} : vector<24x2048xbf16>, vector<2048x512xbf16>, vector<24x512xf32> -> vector<24x512xf32>
    %10 = arith.addf %7, %9 : vector<24x512xf32>
    %c0_5 = arith.constant 0 : index
    %c0_6 = arith.constant 0 : index
    %11 = vector.load %arg6[%c0_5, %c0_6] : memref<24x512xf32, #tpu.memory_space<vmem>>, vector<24x512xf32>
    tpu.vector_store %arg6[%c0_5, %c0_6], %10 {strides = array<i32>} : memref<24x512xf32, #tpu.memory_space<vmem>>, vector<24x512xf32>,
    %c1_i32 = arith.constant 1 : i32
    %12 = arith.cmpi eq, %arg1, %c1_i32 : i32
    %13 = arith.extui %12 : i1 to i32
    %c0_i32_7 = arith.constant 0 : i32
    %14 = arith.cmpi ne, %13, %c0_i32_7 : i32
    scf.if %14 {
      %c0_8 = arith.constant 0 : index
      %c0_9 = arith.constant 0 : index
      %15 = vector.load %arg6[%c0_8, %c0_9] : memref<24x512xf32, #tpu.memory_space<vmem>>, vector<24x512xf32>
      %cst_10 = arith.constant dense<0.000000e+00> : vector<512xf32>
      %16 = vector.multi_reduction <add>, %15, %cst_10 [0] : vector<24x512xf32> to vector<512xf32>
      %c0_11 = arith.constant 0 : index
      %c0_12 = arith.constant 0 : index
      %c0_13 = arith.constant 0 : index
      %17 = vector.load %arg5[%c0_11, %c0_12, %c0_13] : memref<1x2x512xf32, #tpu.memory_space<vmem>>, vector<1x1x512xf32>
      %18 = vector.shape_cast %17 : vector<1x1x512xf32> to vector<512xf32>
      %19 = vector.shape_cast %16 : vector<512xf32> to vector<1x1x512xf32>
      tpu.vector_store %arg5[%c0_11, %c0_12, %c0_13], %19 {strides = array<i32>} : memref<1x2x512xf32, #tpu.memory_space<vmem>>, vector<1x1x512xf32>,
      %20 = arith.mulf %15, %15 : vector<24x512xf32>
      %cst_14 = arith.constant dense<0.000000e+00> : vector<512xf32>
      %21 = vector.multi_reduction <add>, %20, %cst_14 [0] : vector<24x512xf32> to vector<512xf32>
      %c0_15 = arith.constant 0 : index
      %c1 = arith.constant 1 : index
      %c0_16 = arith.constant 0 : index
      %22 = vector.load %arg5[%c0_15, %c1, %c0_16] : memref<1x2x512xf32, #tpu.memory_space<vmem>>, vector<1x1x512xf32>
      %23 = vector.shape_cast %22 : vector<1x1x512xf32> to vector<512xf32>
      %24 = vector.shape_cast %21 : vector<512xf32> to vector<1x1x512xf32>
      tpu.vector_store %arg5[%c0_15, %c1, %c0_16], %24 {strides = array<i32>} : memref<1x2x512xf32, #tpu.memory_space<vmem>>, vector<1x1x512xf32>,
      %25 = arith.truncf %15 : vector<24x512xf32> to vector<24x512xbf16>
      %c0_17 = arith.constant 0 : index
      %c0_18 = arith.constant 0 : index
      %26 = vector.load %arg4[%c0_17, %c0_18] : memref<24x512xbf16, #tpu.memory_space<vmem>>, vector<24x512xbf16>
      tpu.vector_store %arg4[%c0_17, %c0_18], %25 {strides = array<i32>} : memref<24x512xbf16, #tpu.memory_space<vmem>>, vector<24x512xbf16>,
    } else {
    }
    return
  }
  func.func @transform_0(%arg0: i32, %arg1: i32) -> (i32, i32) {
    %c0_i32 = arith.constant 0 : i32
    return %arg0, %arg1 : i32, i32
  }
  func.func @transform_1(%arg0: i32, %arg1: i32) -> (i32, i32) {
    %c0_i32 = arith.constant 0 : i32
    %c0_i32_0 = arith.constant 0 : i32
    %c0_i32_1 = arith.constant 0 : i32
    return %c0_i32, %c0_i32_0 : i32, i32
  }
  func.func @transform_2(%arg0: i32, %arg1: i32) -> (i32, i32) {
    %c0_i32 = arith.constant 0 : i32
    %c0_i32_0 = arith.constant 0 : i32
    return %arg0, %c0_i32 : i32, i32
  }
  func.func @transform_3(%arg0: i32, %arg1: i32) -> (i32, i32, i32) {
    %c0_i32 = arith.constant 0 : i32
    %c0_i32_0 = arith.constant 0 : i32
    %c0_i32_1 = arith.constant 0 : i32
    return %arg0, %c0_i32, %c0_i32_0 : i32, i32, i32
  }
}

module attributes {stable_mosaic.version = 11 : i64} {
  func.func @_bn_act_kernel(%arg0: i32, %arg1: memref<8x512xbf16, #tpu.memory_space<vmem>>, %arg2: memref<1x512xf32, #tpu.memory_space<vmem>>, %arg3: memref<1x512xf32, #tpu.memory_space<vmem>>, %arg4: memref<8x512xbf16, #tpu.memory_space<vmem>>) attributes {dimension_semantics = [#tpu.dimension_semantics<parallel>], iteration_bounds = array<i64: 3>, scalar_prefetch = 0 : i64, scratch_operands = 0 : i64, tpu.core_type = #tpu.core_type<tc>, window_params = [{transform_indices = @transform_0, window_bounds = array<i64: 8, 512>}, {pipeline_mode = #tpu.pipeline_mode<synchronous>, transform_indices = @transform_1, window_bounds = array<i64: 1, 512>}, {pipeline_mode = #tpu.pipeline_mode<synchronous>, transform_indices = @transform_2, window_bounds = array<i64: 1, 512>}, {transform_indices = @transform_3, window_bounds = array<i64: 8, 512>}]} {
    %c0 = arith.constant 0 : index
    %c0_0 = arith.constant 0 : index
    %0 = vector.load %arg1[%c0, %c0_0] : memref<8x512xbf16, #tpu.memory_space<vmem>>, vector<8x512xbf16>
    %1 = arith.extf %0 : vector<8x512xbf16> to vector<8x512xf32>
    %c0_1 = arith.constant 0 : index
    %c0_2 = arith.constant 0 : index
    %2 = vector.load %arg2[%c0_1, %c0_2] : memref<1x512xf32, #tpu.memory_space<vmem>>, vector<1x512xf32>
    %3 = vector.broadcast %2 : vector<1x512xf32> to vector<8x512xf32>
    %4 = arith.mulf %1, %3 : vector<8x512xf32>
    %c0_3 = arith.constant 0 : index
    %c0_4 = arith.constant 0 : index
    %5 = vector.load %arg3[%c0_3, %c0_4] : memref<1x512xf32, #tpu.memory_space<vmem>>, vector<1x512xf32>
    %6 = vector.broadcast %5 : vector<1x512xf32> to vector<8x512xf32>
    %7 = arith.addf %4, %6 : vector<8x512xf32>
    %cst = arith.constant 0.000000e+00 : f32
    %8 = vector.broadcast %cst : f32 to vector<8x512xf32>
    %9 = arith.cmpf oge, %7, %8 : vector<8x512xf32>
    %cst_5 = arith.constant 2.000000e-01 : f32
    %10 = vector.broadcast %cst_5 : f32 to vector<8x512xf32>
    %11 = arith.mulf %10, %7 : vector<8x512xf32>
    %12 = arith.select %9, %7, %11 : vector<8x512xi1>, vector<8x512xf32>
    %13 = arith.truncf %12 : vector<8x512xf32> to vector<8x512xbf16>
    %c0_6 = arith.constant 0 : index
    %c0_7 = arith.constant 0 : index
    %14 = vector.load %arg4[%c0_6, %c0_7] : memref<8x512xbf16, #tpu.memory_space<vmem>>, vector<8x512xbf16>
    tpu.vector_store %arg4[%c0_6, %c0_7], %13 {strides = array<i32>} : memref<8x512xbf16, #tpu.memory_space<vmem>>, vector<8x512xbf16>,
    return
  }
  func.func @transform_0(%arg0: i32) -> (i32, i32) {
    %c0_i32 = arith.constant 0 : i32
    %c0_i32_0 = arith.constant 0 : i32
    return %arg0, %c0_i32 : i32, i32
  }
  func.func @transform_1(%arg0: i32) -> (i32, i32) {
    %c0_i32 = arith.constant 0 : i32
    %c0_i32_0 = arith.constant 0 : i32
    %c0_i32_1 = arith.constant 0 : i32
    return %c0_i32, %c0_i32_0 : i32, i32
  }
  func.func @transform_2(%arg0: i32) -> (i32, i32) {
    %c0_i32 = arith.constant 0 : i32
    %c0_i32_0 = arith.constant 0 : i32
    %c0_i32_1 = arith.constant 0 : i32
    return %c0_i32, %c0_i32_0 : i32, i32
  }
  func.func @transform_3(%arg0: i32) -> (i32, i32) {
    %c0_i32 = arith.constant 0 : i32
    %c0_i32_0 = arith.constant 0 : i32
    return %arg0, %c0_i32 : i32, i32
  }
}

module attributes {stable_mosaic.version = 11 : i64} {
  func.func @kernel(%arg0: i32, %arg1: i32, %arg2: memref<8x2048xbf16, #tpu.memory_space<vmem>>, %arg3: memref<8192x128xbf16, #tpu.memory_space<vmem>>, %arg4: memref<1x128xf32, #tpu.memory_space<vmem>>, %arg5: memref<8x128xf32, #tpu.memory_space<vmem>>, %arg6: memref<8x128xf32, #tpu.memory_space<vmem>>) attributes {dimension_semantics = [#tpu.dimension_semantics<parallel>, #tpu.dimension_semantics<arbitrary>], iteration_bounds = array<i64: 1, 4>, scalar_prefetch = 0 : i64, scratch_operands = 1 : i64, tpu.core_type = #tpu.core_type<tc>, window_params = [{transform_indices = @transform_0, window_bounds = array<i64: 8, 2048>}, {pipeline_mode = #tpu.pipeline_mode<synchronous>, transform_indices = @transform_1, window_bounds = array<i64: 8192, 128>}, {pipeline_mode = #tpu.pipeline_mode<synchronous>, transform_indices = @transform_2, window_bounds = array<i64: 1, 128>}, {transform_indices = @transform_3, window_bounds = array<i64: 8, 128>}]} {
    %c0_i32 = arith.constant 0 : i32
    %0 = arith.cmpi eq, %arg1, %c0_i32 : i32
    %1 = arith.extui %0 : i1 to i32
    %c0_i32_0 = arith.constant 0 : i32
    %2 = arith.cmpi ne, %1, %c0_i32_0 : i32
    scf.if %2 {
      %cst_8 = arith.constant 0.000000e+00 : f32
      %15 = vector.broadcast %cst_8 : f32 to vector<8x128xf32>
      %c0_9 = arith.constant 0 : index
      %c0_10 = arith.constant 0 : index
      %16 = vector.load %arg6[%c0_9, %c0_10] : memref<8x128xf32, #tpu.memory_space<vmem>>, vector<8x128xf32>
      tpu.vector_store %arg6[%c0_9, %c0_10], %15 {strides = array<i32>} : memref<8x128xf32, #tpu.memory_space<vmem>>, vector<8x128xf32>,
    } else {
    }
    %c2048_i32 = arith.constant 2048 : i32
    %3 = arith.muli %arg1, %c2048_i32 : i32
    %4 = tpu.assume_multiple %3, 2048 : i32
    %5 = arith.index_cast %4 : i32 to index
    %c0 = arith.constant 0 : index
    %6 = vector.load %arg3[%5, %c0] : memref<8192x128xbf16, #tpu.memory_space<vmem>>, vector<2048x128xbf16>
    %c0_1 = arith.constant 0 : index
    %c0_2 = arith.constant 0 : index
    %7 = vector.load %arg6[%c0_1, %c0_2] : memref<8x128xf32, #tpu.memory_space<vmem>>, vector<8x128xf32>
    %c0_3 = arith.constant 0 : index
    %c0_4 = arith.constant 0 : index
    %8 = vector.load %arg2[%c0_3, %c0_4] : memref<8x2048xbf16, #tpu.memory_space<vmem>>, vector<8x2048xbf16>
    %cst = arith.constant dense<0.000000e+00> : vector<8x128xf32>
    %9 = tpu.matmul %8, %6, %cst {dimension_numbers = #tpu.dot_dimension_numbers<[1], [0], [0], [1], [0, 0, 1, 1], [], []>} : vector<8x2048xbf16>, vector<2048x128xbf16>, vector<8x128xf32> -> vector<8x128xf32>
    %10 = arith.addf %7, %9 : vector<8x128xf32>
    %c0_5 = arith.constant 0 : index
    %c0_6 = arith.constant 0 : index
    %11 = vector.load %arg6[%c0_5, %c0_6] : memref<8x128xf32, #tpu.memory_space<vmem>>, vector<8x128xf32>
    tpu.vector_store %arg6[%c0_5, %c0_6], %10 {strides = array<i32>} : memref<8x128xf32, #tpu.memory_space<vmem>>, vector<8x128xf32>,
    %c3_i32 = arith.constant 3 : i32
    %12 = arith.cmpi eq, %arg1, %c3_i32 : i32
    %13 = arith.extui %12 : i1 to i32
    %c0_i32_7 = arith.constant 0 : i32
    %14 = arith.cmpi ne, %13, %c0_i32_7 : i32
    scf.if %14 {
      %c0_8 = arith.constant 0 : index
      %c0_9 = arith.constant 0 : index
      %15 = vector.load %arg6[%c0_8, %c0_9] : memref<8x128xf32, #tpu.memory_space<vmem>>, vector<8x128xf32>
      %c0_10 = arith.constant 0 : index
      %c0_11 = arith.constant 0 : index
      %16 = vector.load %arg4[%c0_10, %c0_11] : memref<1x128xf32, #tpu.memory_space<vmem>>, vector<1x128xf32>
      %17 = vector.broadcast %16 : vector<1x128xf32> to vector<8x128xf32>
      %18 = arith.addf %15, %17 : vector<8x128xf32>
      %c0_12 = arith.constant 0 : index
      %c0_13 = arith.constant 0 : index
      %19 = vector.load %arg5[%c0_12, %c0_13] : memref<8x128xf32, #tpu.memory_space<vmem>>, vector<8x128xf32>
      tpu.vector_store %arg5[%c0_12, %c0_13], %18 {strides = array<i32>} : memref<8x128xf32, #tpu.memory_space<vmem>>, vector<8x128xf32>,
    } else {
    }
    return
  }
  func.func @transform_0(%arg0: i32, %arg1: i32) -> (i32, i32) {
    %c0_i32 = arith.constant 0 : i32
    return %arg0, %arg1 : i32, i32
  }
  func.func @transform_1(%arg0: i32, %arg1: i32) -> (i32, i32) {
    %c0_i32 = arith.constant 0 : i32
    %c0_i32_0 = arith.constant 0 : i32
    %c0_i32_1 = arith.constant 0 : i32
    return %c0_i32, %c0_i32_0 : i32, i32
  }
  func.func @transform_2(%arg0: i32, %arg1: i32) -> (i32, i32) {
    %c0_i32 = arith.constant 0 : i32
    %c0_i32_0 = arith.constant 0 : i32
    %c0_i32_1 = arith.constant 0 : i32
    return %c0_i32, %c0_i32_0 : i32, i32
  }
  func.func @transform_3(%arg0: i32, %arg1: i32) -> (i32, i32) {
    %c0_i32 = arith.constant 0 : i32
    %c0_i32_0 = arith.constant 0 : i32
    return %arg0, %c0_i32 : i32, i32
  }
}

</mosaic_0001>

<bundles_post_ra>
// kernel: _lambda_.8
= control target key start
LH: loop header
LB: loop body
LE: loop exit
PB: predicated region body
PF: predicated region fallthrough
CT: control target
= control target key end

     0   :  { %s1445_s12 = smov 0   ;;  %s1447_s13 = smov 0   ;;  %s1592_s0 = inlined_call_operand.vmem [shape: bf16[512,64], index: 0, kind: input, shape index: {}]   ;;  %s1593_s1 = inlined_call_operand.vmem [shape: bf16[64,128], index: 1, kind: input, shape index: {}]   ;;  %s1594_s2 = inlined_call_operand.vmem [shape: f32[1,128], index: 2, kind: input, shape index: {}]   ;;  %s1595_s3 = inlined_call_operand.vmem [shape: bf16[512,128], index: 3, kind: output, shape index: {}]  }
   0x1   :  { %s1449_s14 = smov 0  }
   0x2 LB: > { %s25_s15 = sadd.s32 1, %s1419_s13  ;;  %p1086_p0 = scmp.ge.s32.totalorder %s1423_s14, 1  ;;  %s1423_s14 = sphi %s1449_s14, %s13_s14   ;;  %s1419_s13 = sphi %s1447_s13, %s1597_s13   ;;  %s1415_s12 = sphi %s1445_s12, %s1596_s12  }
   0x3   : > { %p27_p1 = scmp.ge.s32.totalorder %s25_s15, 2  ;;  %p155_p2 = scmp.lt.s32.totalorder %s1423_s14, 3 }
   0x5   : > { %s1599_s15 = smov (%p27_p1, %s25_s15), 0  ;;  %p156_p3 = pnand %p1086_p0, %p155_p2 }
   0x6   : > { %v1381_v0 = vld [vmem:[%s1593_s1] sm:$0xff] (!%p156_p3)   ;;  %s1087_s18 = sshll.u32 (!%p156_p3), %s1415_s12, 5  ;;  %v1382_v1 = vld [vmem:[%s1593_s1 + $0x8] sm:$0xff] (!%p156_p3)   ;;  %v1383_v2 = vld [vmem:[%s1593_s1 + $0x10] sm:$0xff] (!%p156_p3)   ;;  %vm410_vm0 = vcmask (!%p156_p3), 523264  }
   0x7   : > { %159 = sbr.rel (%p156_p3) target bundleno = 278 (0x116), region = 32  ;;  %p183_p4 = scmp.lt.s32.totalorder (!%p156_p3), %s1087_s18, 63  ;;  %1309 = vmatprep.subr.bf16.mxu0 (!%p156_p3), %v1381_v0  ;;  %1349 = vmatprep.subr.bf16.mxu1 (!%p156_p3), %v1381_v0  ;;  %v1384_v3 = vld [vmem:[%s1593_s1 + $0x18] sm:$0xff] (!%p156_p3)   ;;  %v1520_v20 = vld [vmem:[%s1594_s2] ss:$0 sm:$0xff] (!%p156_p3) }
   0x8   : > { %1310 = vmatpush3.bf16.msra.mxu0 (!%p156_p3), %v1381_v0  ;;  %1353 = vmatpush3.bf16.msra.mxu1 (!%p156_p3), %v1381_v0 }
   0x9   : > { %1311 = vmatprep.subr.bf16.mxu0 (!%p156_p3), %v1382_v1  ;;  %1350 = vmatprep.subr.bf16.mxu1 (!%p156_p3), %v1382_v1 }
   0xc   : > { %1312 = vmatpush3.bf16.msra.mxu0 (!%p156_p3), %v1382_v1  ;;  %1354 = vmatpush3.bf16.msra.mxu1 (!%p156_p3), %v1382_v1 }
   0xd   : > { %1313 = vmatprep.subr.bf16.mxu0 (!%p156_p3), %v1383_v2  ;;  %1351 = vmatprep.subr.bf16.mxu1 (!%p156_p3), %v1383_v2 }
   0xe   : > { %s1601_s18 = smov (!%p183_p4, %s1087_s18), 63 }
   0xf   : > { %s1088_s23 = sshll.u32 %s1601_s18, 2 }
  0x10   : > { %s1483_s28 = scalar_lea.vmem %s1592_s0, %s1088_s23  ;;  %1314 = vmatpush3.bf16.msra.mxu0 %v1383_v2  ;;  %1355 = vmatpush3.bf16.msra.mxu1 %v1383_v2  ;;  %s1537_s6 = scalar_lea.vmem %s1595_s3, %s1088_s23 }
  0x11   : > { %v1385_v4 = vld [vmem:[%s1483_s28] sm:$0xff]   ;;  %1315 = vmatprep.subr.bf16.mxu0 %v1384_v3  ;;  %1352 = vmatprep.subr.bf16.mxu1 %v1384_v3  ;;  %v1387_v6 = vld [vmem:[%s1483_s28 + $0x8] sm:$0xff]   ;;  %v1389_v8 = vld [vmem:[%s1483_s28 + $0x10] sm:$0xff]  }
  0x12   : > { %v1386_v5 = vld [vmem:[%s1483_s28 + $0x40] sm:$0xff]   ;;  %1317 = vmatprep.mubr.msk.bf16.mxu0 %vm410_vm0, %v1385_v4  ;;  %v1388_v7 = vld [vmem:[%s1483_s28 + $0x48] sm:$0xff]   ;;  %v1390_v9 = vld [vmem:[%s1483_s28 + $0x50] sm:$0xff]  }
  0x13   : > { %1333 = vmatprep.mubr.msk.bf16.mxu1 %vm410_vm0, %v1386_v5  ;;  %v1391_v10 = vld [vmem:[%s1483_s28 + $0x18] sm:$0xff]   ;;  %v1393_v12 = vld [vmem:[%s1483_s28 + $0x20] sm:$0xff]   ;;  %v1395_v14 = vld [vmem:[%s1483_s28 + $0x28] sm:$0xff]  }
  0x14   : > { %1316 = vmatpush3.bf16.msra.mxu0 %v1384_v3  ;;  %1356 = vmatpush3.bf16.msra.mxu1 %v1384_v3  ;;  %v1392_v11 = vld [vmem:[%s1483_s28 + $0x58] sm:$0xff]   ;;  %v1394_v13 = vld [vmem:[%s1483_s28 + $0x60] sm:$0xff]   ;;  %v1396_v15 = vld [vmem:[%s1483_s28 + $0x68] sm:$0xff]  }
  0x15   : > { %v1397_v16 = vld [vmem:[%s1483_s28 + $0x30] sm:$0xff]   ;;  %v1399_v18 = vld [vmem:[%s1483_s28 + $0x38] sm:$0xff]  }
  0x16   : > { %v1398_v17 = vld [vmem:[%s1483_s28 + $0x70] sm:$0xff]   ;;  %v1400_v19 = vld [vmem:[%s1483_s28 + $0x78] sm:$0xff]  }
  0x17   : > { %1318 = vmatmul.mubr.msk.bf16.vlgmr.msra.gmra.mrb[0].mxu0 %vm410_vm0, %v1387_v6  ;;  %1334 = vmatmul.mubr.msk.bf16.vlgmr.msra.gmra.mrb[0].mxu1 %vm410_vm0, %v1388_v7 }
  0x18   : > { %1321 = vmatprep.mubr.msk.bf16.mxu0 %vm410_vm0, %v1389_v8  ;;  %1337 = vmatprep.mubr.msk.bf16.mxu1 %vm410_vm0, %v1390_v9 }
  0x1f   : > { %1322 = vmatmul.mubr.msk.bf16.gmra.mrb[4].mxu0 %vm410_vm0, %v1391_v10  ;;  %1338 = vmatmul.mubr.msk.bf16.gmra.mrb[4].mxu1 %vm410_vm0, %v1392_v11 }
  0x20   : > { %1325 = vmatprep.mubr.msk.bf16.mxu0 %vm410_vm0, %v1393_v12  ;;  %1341 = vmatprep.mubr.msk.bf16.mxu1 %vm410_vm0, %v1394_v13 }
  0x27   : > { %1326 = vmatmul.mubr.msk.bf16.gmra.mrb[8].mxu0 %vm410_vm0, %v1395_v14  ;;  %1342 = vmatmul.mubr.msk.bf16.gmra.mrb[8].mxu1 %vm410_vm0, %v1396_v15 }
  0x28   : > { %1329 = vmatprep.mubr.msk.bf16.mxu0 %vm410_vm0, %v1397_v16  ;;  %1345 = vmatprep.mubr.msk.bf16.mxu1 %vm410_vm0, %v1398_v17 }
  0x2f   : > { %1330 = vmatmul.mubr.msk.bf16.gmra.mrb[12].mxu0 %vm410_vm0, %v1399_v18  ;;  %1346 = vmatmul.mubr.msk.bf16.gmra.mrb[12].mxu1 %vm410_vm0, %v1400_v19 }
  0xea   : > { %v1319_v21 = vpop.f32.mrb[0].mxu0  ;;  %v1335_v22 = vpop.f32.mrb[0].mxu1 }
  0xeb   : > { %v728_v23 = vadd.f32 %v1319_v21, %v1520_v20  ;;  %v744_v24 = vadd.f32 %v1335_v22, %v1520_v20  ;;  %v493_v25 = vpop.f32.mrb[1].mxu0  ;;  %v557_v26 = vpop.f32.mrb[1].mxu1 }
  0xec   : > { %v726_v27 = vadd.f32 %v1520_v20, %v493_v25  ;;  %v742_v28 = vadd.f32 %v1520_v20, %v557_v26  ;;  %v1320_v29 = vpop.f32.mrb[2].mxu0  ;;  %v1336_v30 = vpop.f32.mrb[2].mxu1 }
  0xed   : > { %vm760_vm1 = vcmp.ge.f32.partialorder %v728_v23, 0.0  ;;  %v792_v31 = vmul.f32 0.2, %v728_v23  ;;  %vm776_vm2 = vcmp.ge.f32.partialorder %v744_v24, 0.0  ;;  %v808_v32 = vmul.f32 0.2, %v744_v24 }
  0xee   : > { %vm758_vm3 = vcmp.ge.f32.partialorder %v726_v27, 0.0  ;;  %v790_v33 = vmul.f32 0.2, %v726_v27  ;;  %vm774_vm4 = vcmp.ge.f32.partialorder %v742_v28, 0.0  ;;  %v806_v34 = vmul.f32 0.2, %v742_v28 }
  0xef   : > { %v729_v35 = vadd.f32 %v1320_v29, %v1520_v20  ;;  %v745_v36 = vadd.f32 %v1336_v30, %v1520_v20  ;;  %v496_v37 = vpop.f32.mrb[3].mxu0  ;;  %v560_v38 = vpop.f32.mrb[3].mxu1  ;;  %v824_v39 = vsel %vm760_vm1, %v728_v23, %v792_v31  ;;  %v840_v40 = vsel %vm776_vm2, %v744_v24, %v808_v32 }
  0xf0   : > { %v727_v41 = vadd.f32 %v1520_v20, %v496_v37  ;;  %v743_v42 = vadd.f32 %v1520_v20, %v560_v38  ;;  %v822_v47 = vsel %vm758_vm3, %v726_v27, %v790_v33  ;;  %v838_v48 = vsel %vm774_vm4, %v742_v28, %v806_v34 }
  0xf1   : > { %vm761_vm5 = vcmp.ge.f32.partialorder %v729_v35, 0.0  ;;  %v793_v43 = vmul.f32 0.2, %v729_v35  ;;  %vm777_vm6 = vcmp.ge.f32.partialorder %v745_v36, 0.0  ;;  %v809_v44 = vmul.f32 0.2, %v745_v36 }
  0xf2   : > { %vm759_vm7 = vcmp.ge.f32.partialorder %v727_v41, 0.0  ;;  %v791_v45 = vmul.f32 0.2, %v727_v41  ;;  %vm775_vm8 = vcmp.ge.f32.partialorder %v743_v42, 0.0  ;;  %v807_v46 = vmul.f32 0.2, %v743_v42 }
  0xf3   : > { %v825_v49 = vsel %vm761_vm5, %v729_v35, %v793_v43  ;;  %v841_v50 = vsel %vm777_vm6, %v745_v36, %v809_v44  ;;  %v1323_v51 = vpop.f32.mrb[4].mxu0  ;;  %v1339_v52 = vpop.f32.mrb[4].mxu1 }
  0xf4   : > { %v1202_v53 = vpack.c.bf16 %v825_v49, %v824_v39  ;;  %v1242_v54 = vpack.c.bf16 %v841_v50, %v840_v40  ;;  %v823_v55 = vsel %vm759_vm7, %v727_v41, %v791_v45  ;;  %v839_v56 = vsel %vm775_vm8, %v743_v42, %v807_v46  ;;  %v509_v57 = vpop.f32.mrb[5].mxu0  ;;  %v573_v58 = vpop.f32.mrb[5].mxu1 }
  0xf5   : > { %v1197_v59 = vpack.c.bf16 %v823_v55, %v822_v47  ;;  %v1237_v60 = vpack.c.bf16 %v839_v56, %v838_v48  ;;  %v732_v61 = vadd.f32 %v1323_v51, %v1520_v20  ;;  %v748_v62 = vadd.f32 %v1339_v52, %v1520_v20  ;;  %v1324_v63 = vpop.f32.mrb[6].mxu0  ;;  %v1340_v0 = vpop.f32.mrb[6].mxu1 }
  0xf6   : > { %1274 = vst [vmem:[%s1537_s6 + $0x8] sm:$0xff] %v1202_v53   ;;  %1282 = vst [vmem:[%s1537_s6 + $0x48] sm:$0xff] %v1242_v54   ;;  %v730_v1 = vadd.f32 %v1520_v20, %v509_v57  ;;  %v746_v2 = vadd.f32 %v1520_v20, %v573_v58  ;;  %v733_v3 = vadd.f32 %v1324_v63, %v1520_v20  ;;  %v512_v5 = vpop.f32.mrb[7].mxu0  ;;  %v576_v6 = vpop.f32.mrb[7].mxu1 }
  0xf7   : > { %v749_v4 = vadd.f32 %v1340_v0, %v1520_v20  ;;  %1198 = vst [vmem:[%s1537_s6] sm:$0xff] %v1197_v59   ;;  %1281 = vst [vmem:[%s1537_s6 + $0x40] sm:$0xff] %v1237_v60   ;;  %vm764_vm9 = vcmp.ge.f32.partialorder %v732_v61, 0.0  ;;  %v796_v7 = vmul.f32 0.2, %v732_v61  ;;  %vm780_vm10 = vcmp.ge.f32.partialorder %v748_v62, 0.0 }
  0xf8   : > { %v812_v8 = vmul.f32 0.2, %v748_v62  ;;  %vm762_vm11 = vcmp.ge.f32.partialorder %v730_v1, 0.0  ;;  %v794_v9 = vmul.f32 0.2, %v730_v1  ;;  %vm778_vm12 = vcmp.ge.f32.partialorder %v746_v2, 0.0 }
  0xf9   : > { %v828_v10 = vsel %vm764_vm9, %v732_v61, %v796_v7  ;;  %v810_v11 = vmul.f32 0.2, %v746_v2  ;;  %vm765_vm13 = vcmp.ge.f32.partialorder %v733_v3, 0.0  ;;  %v797_v12 = vmul.f32 0.2, %v733_v3 }
  0xfa   : > { %v844_v13 = vsel %vm780_vm10, %v748_v62, %v812_v8  ;;  %v826_v14 = vsel %vm762_vm11, %v730_v1, %v794_v9  ;;  %vm781_vm14 = vcmp.ge.f32.partialorder %v749_v4, 0.0  ;;  %v813_v15 = vmul.f32 0.2, %v749_v4  ;;  %v1327_v16 = vpop.f32.mrb[8].mxu0  ;;  %v1343_v17 = vpop.f32.mrb[8].mxu1 }
  0xfb   : > { %v829_v18 = vsel %vm765_vm13, %v733_v3, %v797_v12  ;;  %v731_v19 = vadd.f32 %v1520_v20, %v512_v5  ;;  %v747_v21 = vadd.f32 %v1520_v20, %v576_v6  ;;  %v736_v22 = vadd.f32 %v1327_v16, %v1520_v20  ;;  %v525_v23 = vpop.f32.mrb[9].mxu0  ;;  %v589_v24 = vpop.f32.mrb[9].mxu1 }
  0xfc   : > { %v1212_v25 = vpack.c.bf16 %v829_v18, %v828_v10  ;;  %v845_v26 = vsel %vm781_vm14, %v749_v4, %v813_v15  ;;  %v752_v27 = vadd.f32 %v1343_v17, %v1520_v20  ;;  %v734_v28 = vadd.f32 %v1520_v20, %v525_v23  ;;  %v1328_v29 = vpop.f32.mrb[10].mxu0  ;;  %v1344_v30 = vpop.f32.mrb[10].mxu1 }
  0xfd   : > { %v1252_v31 = vpack.c.bf16 %v845_v26, %v844_v13  ;;  %vm763_vm15 = vcmp.ge.f32.partialorder %v731_v19, 0.0  ;;  %v795_v32 = vmul.f32 0.2, %v731_v19  ;;  %vm779_vm0 = vcmp.ge.f32.partialorder %v747_v21, 0.0  ;;  %v528_v33 = vpop.f32.mrb[11].mxu0  ;;  %v592_v34 = vpop.f32.mrb[11].mxu1 }
  0xfe   : > { %1276 = vst [vmem:[%s1537_s6 + $0x18] sm:$0xff] %v1212_v25   ;;  %v811_v35 = vmul.f32 0.2, %v747_v21  ;;  %vm768_vm1 = vcmp.ge.f32.partialorder %v736_v22, 0.0  ;;  %v800_v36 = vmul.f32 0.2, %v736_v22  ;;  %v842_v37 = vsel %vm778_vm12, %v746_v2, %v810_v11 }
  0xff   : > { %vm784_vm2 = vcmp.ge.f32.partialorder %v752_v27, 0.0  ;;  %1284 = vst [vmem:[%s1537_s6 + $0x58] sm:$0xff] %v1252_v31   ;;  %v827_v38 = vsel %vm763_vm15, %v731_v19, %v795_v32  ;;  %v816_v39 = vmul.f32 0.2, %v752_v27  ;;  %vm766_vm3 = vcmp.ge.f32.partialorder %v734_v28, 0.0 }
 0x100   : > { %v1207_v40 = vpack.c.bf16 %v827_v38, %v826_v14  ;;  %v843_v41 = vsel %vm779_vm0, %v747_v21, %v811_v35  ;;  %v798_v42 = vmul.f32 0.2, %v734_v28  ;;  %v750_v43 = vadd.f32 %v1520_v20, %v589_v24 }
 0x101   : > { %v1247_v44 = vpack.c.bf16 %v843_v41, %v842_v37  ;;  %v832_v45 = vsel %vm768_vm1, %v736_v22, %v800_v36  ;;  %v848_v46 = vsel %vm784_vm2, %v752_v27, %v816_v39  ;;  %v737_v47 = vadd.f32 %v1328_v29, %v1520_v20 }
 0x102   : > { %1275 = vst [vmem:[%s1537_s6 + $0x10] sm:$0xff] %v1207_v40   ;;  %vm782_vm4 = vcmp.ge.f32.partialorder %v750_v43, 0.0  ;;  %v814_v48 = vmul.f32 0.2, %v750_v43  ;;  %v753_v49 = vadd.f32 %v1344_v30, %v1520_v20  ;;  %v735_v50 = vadd.f32 %v1520_v20, %v528_v33  ;;  %v1331_v51 = vpop.f32.mrb[12].mxu0  ;;  %v1347_v52 = vpop.f32.mrb[12].mxu1 }
 0x103   : > { %1283 = vst [vmem:[%s1537_s6 + $0x50] sm:$0xff] %v1247_v44   ;;  %vm769_vm5 = vcmp.ge.f32.partialorder %v737_v47, 0.0  ;;  %v801_v53 = vmul.f32 0.2, %v737_v47  ;;  %v751_v54 = vadd.f32 %v1520_v20, %v592_v34  ;;  %v740_v55 = vadd.f32 %v1331_v51, %v1520_v20  ;;  %v541_v56 = vpop.f32.mrb[13].mxu0  ;;  %v605_v57 = vpop.f32.mrb[13].mxu1 }
 0x104   : > { %v830_v58 = vsel %vm766_vm3, %v734_v28, %v798_v42  ;;  %vm785_vm6 = vcmp.ge.f32.partialorder %v753_v49, 0.0  ;;  %v817_v59 = vmul.f32 0.2, %v753_v49  ;;  %vm767_vm7 = vcmp.ge.f32.partialorder %v735_v50, 0.0  ;;  %v1332_v60 = vpop.f32.mrb[14].mxu0  ;;  %v1348_v61 = vpop.f32.mrb[14].mxu1 }
 0x105   : > { %v833_v62 = vsel %vm769_vm5, %v737_v47, %v801_v53  ;;  %v799_v63 = vmul.f32 0.2, %v735_v50  ;;  %vm783_vm8 = vcmp.ge.f32.partialorder %v751_v54, 0.0  ;;  %v815_v0 = vmul.f32 0.2, %v751_v54  ;;  %v544_v1 = vpop.f32.mrb[15].mxu0 }
 0x106   : > { %v846_v2 = vsel %vm782_vm4, %v750_v43, %v814_v48  ;;  %v1222_v3 = vpack.c.bf16 %v833_v62, %v832_v45  ;;  %v849_v4 = vsel %vm785_vm6, %v753_v49, %v817_v59  ;;  %v804_v5 = vmul.f32 0.2, %v740_v55  ;;  %v608_v6 = vpop.f32.mrb[15].mxu1 }
 0x107   : > { %v1262_v7 = vpack.c.bf16 %v849_v4, %v848_v46  ;;  %v831_v8 = vsel %vm767_vm7, %v735_v50, %v799_v63  ;;  %v847_v9 = vsel %vm783_vm8, %v751_v54, %v815_v0  ;;  %v756_v10 = vadd.f32 %v1347_v52, %v1520_v20 }
 0x108   : > { %1278 = vst [vmem:[%s1537_s6 + $0x28] sm:$0xff] %v1222_v3   ;;  %v1217_v11 = vpack.c.bf16 %v831_v8, %v830_v58  ;;  %v1257_v12 = vpack.c.bf16 %v847_v9, %v846_v2  ;;  %vm772_vm9 = vcmp.ge.f32.partialorder %v740_v55, 0.0  ;;  %v738_v13 = vadd.f32 %v1520_v20, %v541_v56 }
 0x109   : > { %1286 = vst [vmem:[%s1537_s6 + $0x68] sm:$0xff] %v1262_v7   ;;  %vm788_vm10 = vcmp.ge.f32.partialorder %v756_v10, 0.0  ;;  %v820_v14 = vmul.f32 0.2, %v756_v10  ;;  %v754_v15 = vadd.f32 %v1520_v20, %v605_v57  ;;  %v741_v16 = vadd.f32 %v1332_v60, %v1520_v20 }
 0x10a   : > { %1277 = vst [vmem:[%s1537_s6 + $0x20] sm:$0xff] %v1217_v11   ;;  %1285 = vst [vmem:[%s1537_s6 + $0x60] sm:$0xff] %v1257_v12   ;;  %v802_v17 = vmul.f32 0.2, %v738_v13  ;;  %v757_v18 = vadd.f32 %v1348_v61, %v1520_v20  ;;  %v739_v19 = vadd.f32 %v1520_v20, %v544_v1  ;;  %v836_v21 = vsel %vm772_vm9, %v740_v55, %v804_v5 }
 0x10b   : > { %vm770_vm11 = vcmp.ge.f32.partialorder %v738_v13, 0.0  ;;  %vm773_vm12 = vcmp.ge.f32.partialorder %v741_v16, 0.0  ;;  %v852_v22 = vsel %vm788_vm10, %v756_v10, %v820_v14  ;;  %v805_v23 = vmul.f32 0.2, %v741_v16 }
 0x10c   : > { %vm789_vm13 = vcmp.ge.f32.partialorder %v757_v18, 0.0  ;;  %v821_v24 = vmul.f32 0.2, %v757_v18  ;;  %vm786_vm14 = vcmp.ge.f32.partialorder %v754_v15, 0.0  ;;  %vm771_vm15 = vcmp.ge.f32.partialorder %v739_v19, 0.0 }
 0x10d   : > { %v803_v25 = vmul.f32 0.2, %v739_v19  ;;  %v755_v26 = vadd.f32 %v1520_v20, %v608_v6  ;;  %v834_v27 = vsel %vm770_vm11, %v738_v13, %v802_v17  ;;  %v818_v28 = vmul.f32 0.2, %v754_v15 }
 0x10e   : > { %v837_v29 = vsel %vm773_vm12, %v741_v16, %v805_v23  ;;  %v853_v30 = vsel %vm789_vm13, %v757_v18, %v821_v24 }
 0x10f   : > { %v1232_v31 = vpack.c.bf16 %v837_v29, %v836_v21  ;;  %v1272_v32 = vpack.c.bf16 %v853_v30, %v852_v22  ;;  %v835_v33 = vsel %vm771_vm15, %v739_v19, %v803_v25  ;;  %vm787_vm0 = vcmp.ge.f32.partialorder %v755_v26, 0.0 }
 0x110   : > { %v1227_v34 = vpack.c.bf16 %v835_v33, %v834_v27  ;;  %v819_v35 = vmul.f32 0.2, %v755_v26  ;;  %v850_v36 = vsel %vm786_vm14, %v754_v15, %v818_v28 }
 0x111   : > { %1280 = vst [vmem:[%s1537_s6 + $0x38] sm:$0xff] %v1232_v31   ;;  %1288 = vst [vmem:[%s1537_s6 + $0x78] sm:$0xff] %v1272_v32  }
 0x112   : > { %1279 = vst [vmem:[%s1537_s6 + $0x30] sm:$0xff] %v1227_v34   ;;  %v851_v37 = vsel %vm787_vm0, %v755_v26, %v819_v35 }
 0x113   : > { %v1267_v38 = vpack.c.bf16 %v851_v37, %v850_v36 }
 0x115   : > { %1287 = vst [vmem:[%s1537_s6 + $0x70] sm:$0xff] %v1267_v38  }
 0x116 PF: > { %s13_s14 = sadd.s32 1, %s1423_s14   ;;  %s1596_s12 = smov %s1419_s13 }
 0x117   : > { %p10_p5 = scmp.ge.s32.totalorder %s13_s14, 4   ;;  %s1597_s13 = smov %s1599_s15 }
 0x119   :  { %12 = sbr.rel (!%p10_p5) target bundleno = 2 (0x2), region = 70 }

// kernel: _lambda_.9
= control target key start
LH: loop header
LB: loop body
LE: loop exit
PB: predicated region body
PF: predicated region fallthrough
CT: control target
= control target key end

     0   :  { %s2542_s1 = inlined_call_operand.vmem [shape: bf16[1024,128], index: 1, kind: input, shape index: {}]   ;;  %s2543_s0 = inlined_call_operand.vmem [shape: bf16[128,1024], index: 0, kind: input, shape index: {}]   ;;  %s2544_s2 = inlined_call_operand.vmem [shape: bf16[128,128], index: 2, kind: output, shape index: {0}]   ;;  %s2545_s3 = inlined_call_operand.vmem [shape: f32[1,2,128], index: 3, kind: output, shape index: {1}]  }
   0x1   :  { %v1996_v0 = vld [vmem:[%s2542_s1 + $0x40] sm:$0xff]   ;;  %v2000_v4 = vld [vmem:[%s2542_s1 + $0x48] sm:$0xff]   ;;  %v2004_v8 = vld [vmem:[%s2542_s1 + $0x50] sm:$0xff]  }
   0x2   :  { %v1997_v1 = vld [vmem:[%s2542_s1 + $0xc0] sm:$0xff]   ;;  %1740 = vmatprep.subr.bf16.mxu0 %v1996_v0  ;;  %v2001_v5 = vld [vmem:[%s2542_s1 + $0xc8] sm:$0xff]   ;;  %v2005_v9 = vld [vmem:[%s2542_s1 + $0xd0] sm:$0xff]  }
   0x3   :  { %v1998_v2 = vld [vmem:[%s2542_s1] sm:$0xff]   ;;  %1804 = vmatprep.subr.bf16.mxu1 %v1997_v1  ;;  %v2002_v6 = vld [vmem:[%s2542_s1 + $0x8] sm:$0xff]   ;;  %v2006_v10 = vld [vmem:[%s2542_s1 + $0x10] sm:$0xff]  }
   0x4   :  { %v1999_v3 = vld [vmem:[%s2542_s1 + $0x80] sm:$0xff]   ;;  %1741 = vmatpush3.bf16.msra.mxu0 %v1998_v2  ;;  %v2003_v7 = vld [vmem:[%s2542_s1 + $0x88] sm:$0xff]   ;;  %v2007_v11 = vld [vmem:[%s2542_s1 + $0x90] sm:$0xff]  }
   0x5   :  { %1805 = vmatpush3.bf16.msra.mxu1 %v1999_v3  ;;  %1742 = vmatprep.subr.bf16.mxu0 %v2000_v4  ;;  %v2008_v12 = vld [vmem:[%s2542_s1 + $0x58] sm:$0xff]   ;;  %v2012_v16 = vld [vmem:[%s2542_s1 + $0x60] sm:$0xff]   ;;  %v2016_v20 = vld [vmem:[%s2542_s1 + $0x68] sm:$0xff]  }
   0x6   :  { %1806 = vmatprep.subr.bf16.mxu1 %v2001_v5  ;;  %v2009_v13 = vld [vmem:[%s2542_s1 + $0xd8] sm:$0xff]   ;;  %v2013_v17 = vld [vmem:[%s2542_s1 + $0xe0] sm:$0xff]   ;;  %v2017_v21 = vld [vmem:[%s2542_s1 + $0xe8] sm:$0xff]  }
   0x7   :  { %v2010_v14 = vld [vmem:[%s2542_s1 + $0x18] sm:$0xff]   ;;  %v2014_v18 = vld [vmem:[%s2542_s1 + $0x20] sm:$0xff]   ;;  %v2018_v22 = vld [vmem:[%s2542_s1 + $0x28] sm:$0xff]  }
   0x8   :  { %1743 = vmatpush3.bf16.msra.mxu0 %v2002_v6  ;;  %v2011_v15 = vld [vmem:[%s2542_s1 + $0x98] sm:$0xff]   ;;  %v2015_v19 = vld [vmem:[%s2542_s1 + $0xa0] sm:$0xff]   ;;  %v2019_v23 = vld [vmem:[%s2542_s1 + $0xa8] sm:$0xff]  }
   0x9   :  { %1807 = vmatpush3.bf16.msra.mxu1 %v2003_v7  ;;  %1744 = vmatprep.subr.bf16.mxu0 %v2004_v8  ;;  %v2020_v24 = vld [vmem:[%s2542_s1 + $0x70] sm:$0xff]   ;;  %v2024_v28 = vld [vmem:[%s2542_s1 + $0x78] sm:$0xff]   ;;  %v178_v32 = vld [vmem:[%s2543_s0] sm:$0xff] }
   0xa   :  { %1808 = vmatprep.subr.bf16.mxu1 %v2005_v9  ;;  %v2021_v25 = vld [vmem:[%s2542_s1 + $0xf0] sm:$0xff]   ;;  %v2025_v29 = vld [vmem:[%s2542_s1 + $0xf8] sm:$0xff]   ;;  %v182_v33 = vld [vmem:[%s2543_s0 + $0x20] sm:$0xff] }
   0xb   :  { %v2022_v26 = vld [vmem:[%s2542_s1 + $0x30] sm:$0xff]   ;;  %v2026_v30 = vld [vmem:[%s2542_s1 + $0x38] sm:$0xff]   ;;  %v179_v34 = vld [vmem:[%s2543_s0 + $0x8] sm:$0xff]  ;;  %v1533_v35 = vcombine.low %v178_v32, %v182_v33  ;;  %v1534_v36 = vcombine.high %v178_v32, %v182_v33 }
   0xc   :  { %1745 = vmatpush3.bf16.msra.mxu0 %v2006_v10  ;;  %v2023_v27 = vld [vmem:[%s2542_s1 + $0xb0] sm:$0xff]   ;;  %v2027_v31 = vld [vmem:[%s2542_s1 + $0xb8] sm:$0xff]   ;;  %v183_v37 = vld [vmem:[%s2543_s0 + $0x28] sm:$0xff] }
   0xd   :  { %1809 = vmatpush3.bf16.msra.mxu1 %v2007_v11  ;;  %1746 = vmatprep.subr.bf16.mxu0 %v2008_v12  ;;  %v1535_v38 = vcombine.low %v179_v34, %v183_v37  ;;  %v1536_v39 = vcombine.high %v179_v34, %v183_v37  ;;  %v2028_v40 = vld [vmem:[%s2542_s1 + $0x140] sm:$0xff]   ;;  %v187_v47 = vld [vmem:[%s2543_s0 + $0x48] sm:$0xff]  ;;  %v2036_v62 = vld [vmem:[%s2542_s1 + $0x150] sm:$0xff]  }
   0xe   :  { %1810 = vmatprep.subr.bf16.mxu1 %v2009_v13  ;;  %978 = vmatprep.mubr.bf16.mxu0 %v1534_v36  ;;  %v2029_v41 = vld [vmem:[%s2542_s1 + $0x100] sm:$0xff]   ;;  %v191_v48 = vld [vmem:[%s2543_s0 + $0x68] sm:$0xff]  ;;  %v2037_v63 = vld [vmem:[%s2542_s1 + $0x110] sm:$0xff]  }
   0xf   :  { %1075 = vmatprep.mubr.bf16.mxu1 %v1536_v39  ;;  %v2030_v42 = vld [vmem:[%s2542_s1 + $0x1c0] sm:$0xff]   ;;  %v1544_v49 = vcombine.high %v187_v47, %v191_v48  ;;  %v2032_v50 = vld [vmem:[%s2542_s1 + $0x148] sm:$0xff]   ;;  %v1543_v53 = vcombine.low %v187_v47, %v191_v48  ;;  %v2038_v0 = vld [vmem:[%s2542_s1 + $0x1d0] sm:$0xff]  }
  0x10   :  { %1747 = vmatpush3.bf16.msra.mxu0 %v2010_v14  ;;  %v2031_v43 = vld [vmem:[%s2542_s1 + $0x180] sm:$0xff]   ;;  %v2033_v52 = vld [vmem:[%s2542_s1 + $0x108] sm:$0xff]   ;;  %v2039_v1 = vld [vmem:[%s2542_s1 + $0x190] sm:$0xff]  }
  0x11   :  { %1811 = vmatpush3.bf16.msra.mxu1 %v2011_v15  ;;  %1748 = vmatprep.subr.bf16.mxu0 %v2012_v16  ;;  %v186_v44 = vld [vmem:[%s2543_s0 + $0x40] sm:$0xff]  ;;  %v2034_v54 = vld [vmem:[%s2542_s1 + $0x1c8] sm:$0xff]   ;;  %v2040_v10 = vld [vmem:[%s2542_s1 + $0x158] sm:$0xff]  }
  0x12   :  { %1812 = vmatprep.subr.bf16.mxu1 %v2013_v17  ;;  %v190_v45 = vld [vmem:[%s2543_s0 + $0x60] sm:$0xff]  ;;  %v2035_v55 = vld [vmem:[%s2542_s1 + $0x188] sm:$0xff]   ;;  %v2041_v11 = vld [vmem:[%s2542_s1 + $0x118] sm:$0xff]  }
  0x13   :  { %v1542_v46 = vcombine.high %v186_v44, %v190_v45  ;;  %v1541_v51 = vcombine.low %v186_v44, %v190_v45  ;;  %v194_v56 = vld [vmem:[%s2543_s0 + $0x80] sm:$0xff]  ;;  %v195_v58 = vld [vmem:[%s2543_s0 + $0x88] sm:$0xff]  ;;  %v2042_v12 = vld [vmem:[%s2542_s1 + $0x1d8] sm:$0xff]  }
  0x14   :  { %1749 = vmatpush3.bf16.msra.mxu0 %v2014_v18  ;;  %v198_v57 = vld [vmem:[%s2543_s0 + $0xa0] sm:$0xff]  ;;  %v199_v59 = vld [vmem:[%s2543_s0 + $0xa8] sm:$0xff]  ;;  %v2043_v13 = vld [vmem:[%s2542_s1 + $0x198] sm:$0xff]  }
  0x15   :  { %1813 = vmatpush3.bf16.msra.mxu1 %v2015_v19  ;;  %1750 = vmatprep.subr.bf16.mxu0 %v2016_v20  ;;  %v1550_v60 = vcombine.high %v194_v56, %v198_v57  ;;  %v1552_v61 = vcombine.high %v195_v58, %v199_v59  ;;  %v1549_v2 = vcombine.low %v194_v56, %v198_v57  ;;  %v202_v3 = vld [vmem:[%s2543_s0 + $0xc0] sm:$0xff]  ;;  %v203_v5 = vld [vmem:[%s2543_s0 + $0xc8] sm:$0xff]  ;;  %v2053_v39 = vld [vmem:[%s2542_s1 + $0x130] sm:$0xff]  }
  0x16   :  { %1814 = vmatprep.subr.bf16.mxu1 %v2017_v21  ;;  %v206_v4 = vld [vmem:[%s2543_s0 + $0xe0] sm:$0xff]  ;;  %v1551_v6 = vcombine.low %v195_v58, %v199_v59  ;;  %v207_v8 = vld [vmem:[%s2543_s0 + $0xe8] sm:$0xff]  ;;  %v2057_v48 = vld [vmem:[%s2542_s1 + $0x138] sm:$0xff]  }
  0x17   :  { %v1558_v7 = vcombine.high %v202_v3, %v206_v4  ;;  %v1560_v9 = vcombine.high %v203_v5, %v207_v8  ;;  %v210_v14 = vld [vmem:[%s2543_s0 + $0x100] sm:$0xff]  ;;  %v211_v16 = vld [vmem:[%s2543_s0 + $0x108] sm:$0xff]  ;;  %v1557_v19 = vcombine.low %v202_v3, %v206_v4  ;;  %v1559_v21 = vcombine.low %v203_v5, %v207_v8  ;;  %v189_v8 = vld [vmem:[%s2543_s0 + $0x58] sm:$0xff] }
  0x18   :  { %1751 = vmatpush3.bf16.msra.mxu0 %v2018_v22  ;;  %v214_v15 = vld [vmem:[%s2543_s0 + $0x120] sm:$0xff]  ;;  %v215_v17 = vld [vmem:[%s2543_s0 + $0x128] sm:$0xff] }
  0x19   :  { %1815 = vmatpush3.bf16.msra.mxu1 %v2019_v23  ;;  %1752 = vmatprep.subr.bf16.mxu0 %v2020_v24  ;;  %v2044_v18 = vld [vmem:[%s2542_s1 + $0x160] sm:$0xff]   ;;  %v1566_v22 = vcombine.high %v210_v14, %v214_v15  ;;  %v1568_v24 = vcombine.high %v211_v16, %v215_v17  ;;  %v2050_v32 = vld [vmem:[%s2542_s1 + $0x1e8] sm:$0xff]   ;;  %v1565_v34 = vcombine.low %v210_v14, %v214_v15  ;;  %v196_v14 = vld [vmem:[%s2543_s0 + $0x90] sm:$0xff] }
  0x1a   :  { %1816 = vmatprep.subr.bf16.mxu1 %v2021_v25  ;;  %v2045_v20 = vld [vmem:[%s2542_s1 + $0x120] sm:$0xff]   ;;  %v2051_v33 = vld [vmem:[%s2542_s1 + $0x1a8] sm:$0xff]   ;;  %v200_v15 = vld [vmem:[%s2543_s0 + $0xb0] sm:$0xff] }
  0x1b   :  { %v2046_v23 = vld [vmem:[%s2542_s1 + $0x1e0] sm:$0xff]   ;;  %v227_v44 = vld [vmem:[%s2543_s0 + $0x188] sm:$0xff] }
  0x1c   :  { %1753 = vmatpush3.bf16.msra.mxu0 %v2022_v26  ;;  %v2047_v25 = vld [vmem:[%s2542_s1 + $0x1a0] sm:$0xff]   ;;  %v231_v45 = vld [vmem:[%s2543_s0 + $0x1a8] sm:$0xff] }
  0x1d   :  { %1817 = vmatpush3.bf16.msra.mxu1 %v2023_v27  ;;  %1754 = vmatprep.subr.bf16.mxu0 %v2024_v28  ;;  %v218_v26 = vld [vmem:[%s2543_s0 + $0x140] sm:$0xff]  ;;  %v2048_v28 = vld [vmem:[%s2542_s1 + $0x168] sm:$0xff]   ;;  %v1583_v59 = vcombine.low %v227_v44, %v231_v45 }
  0x1e   :  { %1818 = vmatprep.subr.bf16.mxu1 %v2025_v29  ;;  %v222_v27 = vld [vmem:[%s2543_s0 + $0x160] sm:$0xff]  ;;  %v219_v29 = vld [vmem:[%s2543_s0 + $0x148] sm:$0xff] }
  0x1f   :  { %v1574_v36 = vcombine.high %v218_v26, %v222_v27  ;;  %v1573_v47 = vcombine.low %v218_v26, %v222_v27  ;;  %v235_v56 = vld [vmem:[%s2543_s0 + $0x1c8] sm:$0xff]  ;;  %v1553_v26 = vcombine.low %v196_v14, %v200_v15 }
  0x20   :  { %1755 = vmatpush3.bf16.msra.mxu0 %v2026_v30  ;;  %v223_v30 = vld [vmem:[%s2543_s0 + $0x168] sm:$0xff] }
  0x21   :  { %1819 = vmatpush3.bf16.msra.mxu1 %v2027_v31  ;;  %1868 = vmatprep.subr.bf16.mxu0 %v2028_v40  ;;  %v2049_v31 = vld [vmem:[%s2542_s1 + $0x128] sm:$0xff]   ;;  %v1576_v37 = vcombine.high %v219_v29, %v223_v30  ;;  %v2054_v40 = vld [vmem:[%s2542_s1 + $0x1f0] sm:$0xff]  }
  0x22   :  { %1932 = vmatprep.subr.bf16.mxu1 %v2030_v42  ;;  %v230_v42 = vld [vmem:[%s2543_s0 + $0x1a0] sm:$0xff]  ;;  %v239_v57 = vld [vmem:[%s2543_s0 + $0x1e8] sm:$0xff] }
  0x23   :  { %979 = vmatmul.mubr.bf16.vlgmr.msra.gmra.mrb[0].mxu0 %v1533_v35  ;;  %v1567_v35 = vcombine.low %v211_v16, %v215_v17  ;;  %v1591_v3 = vcombine.low %v235_v56, %v239_v57  ;;  %v197_v16 = vld [vmem:[%s2543_s0 + $0x98] sm:$0xff] }
  0x24   :  { %1076 = vmatmul.mubr.bf16.vlgmr.msra.gmra.mrb[0].mxu1 %v1535_v38  ;;  %1869 = vmatpush3.bf16.msra.mxu0 %v2029_v41  ;;  %v2052_v38 = vld [vmem:[%s2542_s1 + $0x170] sm:$0xff]   ;;  %v226_v41 = vld [vmem:[%s2543_s0 + $0x180] sm:$0xff]  ;;  %v201_v17 = vld [vmem:[%s2543_s0 + $0xb8] sm:$0xff] }
  0x25   :  { %1933 = vmatpush3.bf16.msra.mxu1 %v2031_v43  ;;  %986 = vmatprep.mubr.bf16.mxu0 %v1542_v46  ;;  %v2055_v43 = vld [vmem:[%s2542_s1 + $0x1b0] sm:$0xff]   ;;  %v2056_v46 = vld [vmem:[%s2542_s1 + $0x178] sm:$0xff]   ;;  %v1581_v58 = vcombine.low %v226_v41, %v230_v42  ;;  %v1555_v27 = vcombine.low %v197_v16, %v201_v17 }
  0x26   :  { %1083 = vmatprep.mubr.bf16.mxu1 %v1544_v49  ;;  %1870 = vmatprep.subr.bf16.mxu0 %v2032_v50  ;;  %v1575_v49 = vcombine.low %v219_v29, %v223_v30  ;;  %v1582_v50 = vcombine.high %v226_v41, %v230_v42  ;;  %v212_v30 = vld [vmem:[%s2543_s0 + $0x110] sm:$0xff]  ;;  %v225_v41 = vld [vmem:[%s2543_s0 + $0x178] sm:$0xff] }
  0x27   :  { %1934 = vmatprep.subr.bf16.mxu1 %v2034_v54  ;;  %v234_v54 = vld [vmem:[%s2543_s0 + $0x1c0] sm:$0xff] }
  0x28   :  { %1871 = vmatpush3.bf16.msra.mxu0 %v2033_v52  ;;  %v1584_v52 = vcombine.high %v227_v44, %v231_v45 }
  0x29   :  { %1935 = vmatpush3.bf16.msra.mxu1 %v2035_v55  ;;  %1872 = vmatprep.subr.bf16.mxu0 %v2036_v62  ;;  %v238_v55 = vld [vmem:[%s2543_s0 + $0x1e0] sm:$0xff]  ;;  %v180_v62 = vld [vmem:[%s2543_s0 + $0x10] sm:$0xff] }
  0x2a   :  { %1936 = vmatprep.subr.bf16.mxu1 %v2038_v0  ;;  %v181_v0 = vld [vmem:[%s2543_s0 + $0x18] sm:$0xff] }
  0x2b   :  { %987 = vmatmul.mubr.bf16.gmra.mrb[4].mxu0 %v1541_v51  ;;  %v2058_v51 = vld [vmem:[%s2542_s1 + $0x1f8] sm:$0xff]  }
  0x2c   :  { %1084 = vmatmul.mubr.bf16.gmra.mrb[4].mxu1 %v1543_v53  ;;  %994 = vmatprep.mubr.bf16.mxu0 %v1550_v60  ;;  %v2059_v53 = vld [vmem:[%s2542_s1 + $0x1b8] sm:$0xff]   ;;  %v1590_v60 = vcombine.high %v234_v54, %v238_v55 }
  0x2d   :  { %1091 = vmatprep.mubr.bf16.mxu1 %v1552_v61  ;;  %1873 = vmatpush3.bf16.msra.mxu0 %v2037_v63  ;;  %v1592_v61 = vcombine.high %v235_v56, %v239_v57  ;;  %v184_v63 = vld [vmem:[%s2543_s0 + $0x30] sm:$0xff]  ;;  %v237_v56 = vld [vmem:[%s2543_s0 + $0x1d8] sm:$0xff] }
  0x2e   :  { %1937 = vmatpush3.bf16.msra.mxu1 %v2039_v1  ;;  %1874 = vmatprep.subr.bf16.mxu0 %v2040_v10  ;;  %v185_v1 = vld [vmem:[%s2543_s0 + $0x38] sm:$0xff]  ;;  %v1538_v4 = vcombine.high %v180_v62, %v184_v63  ;;  %v1537_v10 = vcombine.low %v180_v62, %v184_v63 }
  0x2f   :  { %1938 = vmatprep.subr.bf16.mxu1 %v2042_v12  ;;  %v1540_v5 = vcombine.high %v181_v0, %v185_v1  ;;  %v241_v57 = vld [vmem:[%s2543_s0 + $0x1f8] sm:$0xff] }
  0x30   :  { %v1595_v63 = vcombine.low %v237_v56, %v241_v57 }
  0x31   :  { %1875 = vmatpush3.bf16.msra.mxu0 %v2041_v11  ;;  %v1539_v11 = vcombine.low %v181_v0, %v185_v1 }
  0x32   :  { %1939 = vmatpush3.bf16.msra.mxu1 %v2043_v13  ;;  %1876 = vmatprep.subr.bf16.mxu0 %v2044_v18 }
  0x33   :  { %995 = vmatmul.mubr.bf16.gmra.mrb[8].mxu0 %v1549_v2  ;;  %1940 = vmatprep.subr.bf16.mxu1 %v2046_v23  ;;  %v1589_v2 = vcombine.low %v234_v54, %v238_v55  ;;  %v208_v23 = vld [vmem:[%s2543_s0 + $0xf0] sm:$0xff] }
  0x34   :  { %1092 = vmatmul.mubr.bf16.gmra.mrb[8].mxu1 %v1551_v6  ;;  %1002 = vmatprep.mubr.bf16.mxu0 %v1558_v7  ;;  %v188_v6 = vld [vmem:[%s2543_s0 + $0x50] sm:$0xff] }
  0x35   :  { %1099 = vmatprep.mubr.bf16.mxu1 %v1560_v9  ;;  %1877 = vmatpush3.bf16.msra.mxu0 %v2045_v20  ;;  %v192_v7 = vld [vmem:[%s2543_s0 + $0x70] sm:$0xff]  ;;  %v193_v9 = vld [vmem:[%s2543_s0 + $0x78] sm:$0xff]  ;;  %v1554_v20 = vcombine.high %v196_v14, %v200_v15 }
  0x36   :  { %1941 = vmatpush3.bf16.msra.mxu1 %v2047_v25  ;;  %1878 = vmatprep.subr.bf16.mxu0 %v2048_v28  ;;  %v1546_v12 = vcombine.high %v188_v6, %v192_v7  ;;  %v1548_v13 = vcombine.high %v189_v8, %v193_v9  ;;  %v1545_v18 = vcombine.low %v188_v6, %v192_v7  ;;  %v209_v25 = vld [vmem:[%s2543_s0 + $0xf8] sm:$0xff]  ;;  %v236_v54 = vld [vmem:[%s2543_s0 + $0x1d0] sm:$0xff] }
  0x37   :  { %1942 = vmatprep.subr.bf16.mxu1 %v2050_v32  ;;  %v213_v32 = vld [vmem:[%s2543_s0 + $0x118] sm:$0xff]  ;;  %v240_v55 = vld [vmem:[%s2543_s0 + $0x1f0] sm:$0xff] }
  0x38   :  { %v1593_v62 = vcombine.low %v236_v54, %v240_v55 }
  0x39   :  { %1879 = vmatpush3.bf16.msra.mxu0 %v2049_v31  ;;  %v216_v31 = vld [vmem:[%s2543_s0 + $0x130] sm:$0xff] }
  0x3a   :  { %1943 = vmatpush3.bf16.msra.mxu1 %v2051_v33  ;;  %1880 = vmatprep.subr.bf16.mxu0 %v2052_v38  ;;  %v217_v33 = vld [vmem:[%s2543_s0 + $0x138] sm:$0xff]  ;;  %v220_v38 = vld [vmem:[%s2543_s0 + $0x150] sm:$0xff]  ;;  %v1569_v42 = vcombine.low %v212_v30, %v216_v31 }
  0x3b   :  { %1003 = vmatmul.mubr.bf16.gmra.mrb[12].mxu0 %v1557_v19  ;;  %1944 = vmatprep.subr.bf16.mxu1 %v2054_v40  ;;  %v1547_v19 = vcombine.low %v189_v8, %v193_v9  ;;  %v221_v40 = vld [vmem:[%s2543_s0 + $0x158] sm:$0xff] }
  0x3c   :  { %1100 = vmatmul.mubr.bf16.gmra.mrb[12].mxu1 %v1559_v21  ;;  %1010 = vmatprep.mubr.bf16.mxu0 %v1566_v22  ;;  %v1556_v21 = vcombine.high %v197_v16, %v201_v17  ;;  %v204_v22 = vld [vmem:[%s2543_s0 + $0xd0] sm:$0xff]  ;;  %v1580_v45 = vcombine.high %v221_v40, %v225_v41 }
  0x3d   :  { %1107 = vmatprep.mubr.bf16.mxu1 %v1568_v24  ;;  %1881 = vmatpush3.bf16.msra.mxu0 %v2053_v39  ;;  %v205_v24 = vld [vmem:[%s2543_s0 + $0xd8] sm:$0xff]  ;;  %v1562_v28 = vcombine.high %v204_v22, %v208_v23  ;;  %v224_v39 = vld [vmem:[%s2543_s0 + $0x170] sm:$0xff] }
  0x3e   :  { %1945 = vmatpush3.bf16.msra.mxu1 %v2055_v43  ;;  %1882 = vmatprep.subr.bf16.mxu0 %v2056_v46  ;;  %v1564_v29 = vcombine.high %v205_v24, %v209_v25  ;;  %v1571_v43 = vcombine.low %v213_v32, %v217_v33  ;;  %v1578_v44 = vcombine.high %v220_v38, %v224_v39  ;;  %v228_v46 = vld [vmem:[%s2543_s0 + $0x190] sm:$0xff] }
  0x3f   :  { %1946 = vmatprep.subr.bf16.mxu1 %v2058_v51  ;;  %v1579_v51 = vcombine.low %v221_v40, %v225_v41 }
  0x41   :  { %1883 = vmatpush3.bf16.msra.mxu0 %v2057_v48  ;;  %v229_v48 = vld [vmem:[%s2543_s0 + $0x198] sm:$0xff] }
  0x42   :  { %1947 = vmatpush3.bf16.msra.mxu1 %v2059_v53 }
  0x43   :  { %1011 = vmatmul.mubr.bf16.gmra.mrb[16].mxu0 %v1565_v34  ;;  %v1561_v34 = vcombine.low %v204_v22, %v208_v23 }
  0x44   :  { %1108 = vmatmul.mubr.bf16.gmra.mrb[16].mxu1 %v1567_v35  ;;  %1018 = vmatprep.mubr.bf16.mxu0 %v1574_v36  ;;  %v1563_v35 = vcombine.low %v205_v24, %v209_v25  ;;  %v1570_v36 = vcombine.high %v212_v30, %v216_v31 }
  0x45   :  { %1115 = vmatprep.mubr.bf16.mxu1 %v1576_v37  ;;  %v1572_v37 = vcombine.high %v213_v32, %v217_v33 }
  0x4b   :  { %1019 = vmatmul.mubr.bf16.gmra.mrb[20].mxu0 %v1573_v47  ;;  %v232_v47 = vld [vmem:[%s2543_s0 + $0x1b0] sm:$0xff] }
  0x4c   :  { %1116 = vmatmul.mubr.bf16.gmra.mrb[20].mxu1 %v1575_v49  ;;  %1026 = vmatprep.mubr.bf16.mxu0 %v1582_v50  ;;  %v233_v49 = vld [vmem:[%s2543_s0 + $0x1b8] sm:$0xff]  ;;  %v1577_v50 = vcombine.low %v220_v38, %v224_v39 }
  0x4d   :  { %1123 = vmatprep.mubr.bf16.mxu1 %v1584_v52  ;;  %v1586_v52 = vcombine.high %v228_v46, %v232_v47  ;;  %v1588_v53 = vcombine.high %v229_v48, %v233_v49 }
  0x53   :  { %1027 = vmatmul.mubr.bf16.gmra.mrb[24].mxu0 %v1581_v58  ;;  %v1585_v58 = vcombine.low %v228_v46, %v232_v47 }
  0x54   :  { %1124 = vmatmul.mubr.bf16.gmra.mrb[24].mxu1 %v1583_v59  ;;  %1034 = vmatprep.mubr.bf16.mxu0 %v1590_v60  ;;  %v1587_v59 = vcombine.low %v229_v48, %v233_v49  ;;  %v1594_v60 = vcombine.high %v236_v54, %v240_v55 }
  0x55   :  { %1131 = vmatprep.mubr.bf16.mxu1 %v1592_v61  ;;  %v1596_v61 = vcombine.high %v237_v56, %v241_v57 }
  0x5b   :  { %1035 = vmatmul.mubr.bf16.gmra.mrb[28].mxu0 %v1589_v2 }
  0x5c   :  { %1132 = vmatmul.mubr.bf16.gmra.mrb[28].mxu1 %v1591_v3  ;;  %1172 = vmatprep.mubr.bf16.mxu0 %v1538_v4 }
  0x5d   :  { %1269 = vmatprep.mubr.bf16.mxu1 %v1540_v5 }
  0x63   :  { %1173 = vmatmul.mubr.bf16.vlgmr.msra.gmra.mrb[32].mxu0 %v1537_v10 }
  0x64   :  { %1270 = vmatmul.mubr.bf16.vlgmr.msra.gmra.mrb[32].mxu1 %v1539_v11  ;;  %1180 = vmatprep.mubr.bf16.mxu0 %v1546_v12 }
  0x65   :  { %1277 = vmatprep.mubr.bf16.mxu1 %v1548_v13 }
  0x6b   :  { %1181 = vmatmul.mubr.bf16.gmra.mrb[36].mxu0 %v1545_v18 }
  0x6c   :  { %1278 = vmatmul.mubr.bf16.gmra.mrb[36].mxu1 %v1547_v19  ;;  %1188 = vmatprep.mubr.bf16.mxu0 %v1554_v20 }
  0x6d   :  { %1285 = vmatprep.mubr.bf16.mxu1 %v1556_v21 }
  0x73   :  { %1189 = vmatmul.mubr.bf16.gmra.mrb[40].mxu0 %v1553_v26 }
  0x74   :  { %1286 = vmatmul.mubr.bf16.gmra.mrb[40].mxu1 %v1555_v27  ;;  %1196 = vmatprep.mubr.bf16.mxu0 %v1562_v28 }
  0x75   :  { %1293 = vmatprep.mubr.bf16.mxu1 %v1564_v29 }
  0x7b   :  { %1197 = vmatmul.mubr.bf16.gmra.mrb[44].mxu0 %v1561_v34 }
  0x7c   :  { %1294 = vmatmul.mubr.bf16.gmra.mrb[44].mxu1 %v1563_v35  ;;  %1204 = vmatprep.mubr.bf16.mxu0 %v1570_v36 }
  0x7d   :  { %1301 = vmatprep.mubr.bf16.mxu1 %v1572_v37 }
  0x83   :  { %1205 = vmatmul.mubr.bf16.gmra.mrb[48].mxu0 %v1569_v42 }
  0x84   :  { %1302 = vmatmul.mubr.bf16.gmra.mrb[48].mxu1 %v1571_v43  ;;  %1212 = vmatprep.mubr.bf16.mxu0 %v1578_v44 }
  0x85   :  { %1309 = vmatprep.mubr.bf16.mxu1 %v1580_v45 }
  0x8b   :  { %1213 = vmatmul.mubr.bf16.gmra.mrb[52].mxu0 %v1577_v50 }
  0x8c   :  { %1310 = vmatmul.mubr.bf16.gmra.mrb[52].mxu1 %v1579_v51  ;;  %1220 = vmatprep.mubr.bf16.mxu0 %v1586_v52 }
  0x8d   :  { %1317 = vmatprep.mubr.bf16.mxu1 %v1588_v53 }
  0x93   :  { %1221 = vmatmul.mubr.bf16.gmra.mrb[56].mxu0 %v1585_v58 }
  0x94   :  { %1318 = vmatmul.mubr.bf16.gmra.mrb[56].mxu1 %v1587_v59  ;;  %1228 = vmatprep.mubr.bf16.mxu0 %v1594_v60 }
  0x95   :  { %1325 = vmatprep.mubr.bf16.mxu1 %v1596_v61 }
  0x9b   :  { %1229 = vmatmul.mubr.bf16.gmra.mrb[60].mxu0 %v1593_v62 }
  0x9c   :  { %1326 = vmatmul.mubr.bf16.gmra.mrb[60].mxu1 %v1595_v63 }
  0xf6   :  { %v1756_v0 = vpop.f32.mrb[0].mxu0 }
  0xf7   :  { %v1820_v1 = vpop.f32.mrb[0].mxu1  ;;  %v1757_v2 = vpop.f32.mrb[1].mxu0 }
  0xf8   :  { %v1758_v3 = vadd.f32 %v1757_v2, %v1756_v0  ;;  %v1821_v4 = vpop.f32.mrb[1].mxu1  ;;  %v1759_v5 = vpop.f32.mrb[2].mxu0 }
  0xf9   :  { %v1822_v6 = vadd.f32 %v1821_v4, %v1820_v1  ;;  %v1823_v7 = vpop.f32.mrb[2].mxu1  ;;  %v1760_v8 = vpop.f32.mrb[3].mxu0 }
  0xfa   :  { %v1761_v9 = vadd.f32 %v1760_v8, %v1759_v5  ;;  %v1824_v10 = vpop.f32.mrb[3].mxu1 }
  0xfb   :  { %v2464_v11 = vadd.f32 %v1822_v6, %v1758_v3  ;;  %v1825_v12 = vadd.f32 %v1824_v10, %v1823_v7 }
  0xfd   :  { %v2466_v13 = vadd.f32 %v1825_v12, %v1761_v9 }
  0xfe   :  { %v1762_v14 = vpop.f32.mrb[4].mxu0 }
  0xff   :  { %v1826_v15 = vpop.f32.mrb[4].mxu1  ;;  %v1763_v16 = vpop.f32.mrb[5].mxu0 }
 0x100   :  { %v1764_v17 = vadd.f32 %v1763_v16, %v1762_v14  ;;  %v1827_v18 = vpop.f32.mrb[5].mxu1  ;;  %v1765_v19 = vpop.f32.mrb[6].mxu0 }
 0x101   :  { %v1828_v20 = vadd.f32 %v1827_v18, %v1826_v15  ;;  %v1829_v21 = vpop.f32.mrb[6].mxu1  ;;  %v1766_v22 = vpop.f32.mrb[7].mxu0 }
 0x102   :  { %v1767_v23 = vadd.f32 %v1766_v22, %v1765_v19  ;;  %v1830_v24 = vpop.f32.mrb[7].mxu1 }
 0x103   :  { %v2468_v25 = vadd.f32 %v1828_v20, %v1764_v17  ;;  %v1831_v26 = vadd.f32 %v1830_v24, %v1829_v21 }
 0x105   :  { %v2470_v27 = vadd.f32 %v1831_v26, %v1767_v23 }
 0x106   :  { %v1768_v28 = vpop.f32.mrb[8].mxu0 }
 0x107   :  { %v1832_v29 = vpop.f32.mrb[8].mxu1  ;;  %v1769_v30 = vpop.f32.mrb[9].mxu0 }
 0x108   :  { %v1770_v31 = vadd.f32 %v1769_v30, %v1768_v28  ;;  %v1833_v32 = vpop.f32.mrb[9].mxu1  ;;  %v1771_v33 = vpop.f32.mrb[10].mxu0 }
 0x109   :  { %v1834_v34 = vadd.f32 %v1833_v32, %v1832_v29  ;;  %v1835_v35 = vpop.f32.mrb[10].mxu1  ;;  %v1772_v36 = vpop.f32.mrb[11].mxu0 }
 0x10a   :  { %v1773_v37 = vadd.f32 %v1772_v36, %v1771_v33  ;;  %v1836_v38 = vpop.f32.mrb[11].mxu1 }
 0x10b   :  { %v2472_v39 = vadd.f32 %v1834_v34, %v1770_v31  ;;  %v1837_v40 = vadd.f32 %v1836_v38, %v1835_v35 }
 0x10d   :  { %v2474_v41 = vadd.f32 %v1837_v40, %v1773_v37 }
 0x10e   :  { %v1774_v42 = vpop.f32.mrb[12].mxu0 }
 0x10f   :  { %v1838_v43 = vpop.f32.mrb[12].mxu1  ;;  %v1775_v44 = vpop.f32.mrb[13].mxu0 }
 0x110   :  { %v1776_v45 = vadd.f32 %v1775_v44, %v1774_v42  ;;  %v1839_v46 = vpop.f32.mrb[13].mxu1  ;;  %v1777_v47 = vpop.f32.mrb[14].mxu0 }
 0x111   :  { %v1840_v48 = vadd.f32 %v1839_v46, %v1838_v43  ;;  %v1841_v49 = vpop.f32.mrb[14].mxu1  ;;  %v1778_v50 = vpop.f32.mrb[15].mxu0 }
 0x112   :  { %v1779_v51 = vadd.f32 %v1778_v50, %v1777_v47  ;;  %v1842_v52 = vpop.f32.mrb[15].mxu1 }
 0x113   :  { %v2476_v53 = vadd.f32 %v1840_v48, %v1776_v45  ;;  %v1843_v54 = vadd.f32 %v1842_v52, %v1841_v49 }
 0x115   :  { %v2478_v55 = vadd.f32 %v1843_v54, %v1779_v51 }
 0x116   :  { %v1780_v56 = vpop.f32.mrb[16].mxu0 }
 0x117   :  { %v1844_v57 = vpop.f32.mrb[16].mxu1  ;;  %v1781_v58 = vpop.f32.mrb[17].mxu0 }
 0x118   :  { %v1782_v59 = vadd.f32 %v1781_v58, %v1780_v56  ;;  %v1845_v60 = vpop.f32.mrb[17].mxu1  ;;  %v1783_v61 = vpop.f32.mrb[18].mxu0 }
 0x119   :  { %v1846_v62 = vadd.f32 %v1845_v60, %v1844_v57  ;;  %v1847_v63 = vpop.f32.mrb[18].mxu1  ;;  %v1784_v0 = vpop.f32.mrb[19].mxu0 }
 0x11a   :  { %v1785_v1 = vadd.f32 %v1784_v0, %v1783_v61  ;;  %v1848_v2 = vpop.f32.mrb[19].mxu1 }
 0x11b   :  { %v2480_v3 = vadd.f32 %v1846_v62, %v1782_v59  ;;  %v1849_v4 = vadd.f32 %v1848_v2, %v1847_v63 }
 0x11d   :  { %v2482_v5 = vadd.f32 %v1849_v4, %v1785_v1 }
 0x11e   :  { %v1786_v6 = vpop.f32.mrb[20].mxu0 }
 0x11f   :  { %v1850_v7 = vpop.f32.mrb[20].mxu1  ;;  %v1787_v8 = vpop.f32.mrb[21].mxu0 }
 0x120   :  { %v1788_v9 = vadd.f32 %v1787_v8, %v1786_v6  ;;  %v1851_v10 = vpop.f32.mrb[21].mxu1  ;;  %v1789_v12 = vpop.f32.mrb[22].mxu0 }
 0x121   :  { %v1852_v14 = vadd.f32 %v1851_v10, %v1850_v7  ;;  %v1853_v15 = vpop.f32.mrb[22].mxu1  ;;  %v1790_v16 = vpop.f32.mrb[23].mxu0 }
 0x122   :  { %v1791_v17 = vadd.f32 %v1790_v16, %v1789_v12  ;;  %v1854_v18 = vpop.f32.mrb[23].mxu1 }
 0x123   :  { %v2484_v19 = vadd.f32 %v1852_v14, %v1788_v9  ;;  %v1855_v20 = vadd.f32 %v1854_v18, %v1853_v15 }
 0x125   :  { %v2486_v21 = vadd.f32 %v1855_v20, %v1791_v17 }
 0x126   :  { %v1792_v22 = vpop.f32.mrb[24].mxu0 }
 0x127   :  { %v1856_v23 = vpop.f32.mrb[24].mxu1  ;;  %v1793_v24 = vpop.f32.mrb[25].mxu0 }
 0x128   :  { %v1794_v26 = vadd.f32 %v1793_v24, %v1792_v22  ;;  %v1857_v28 = vpop.f32.mrb[25].mxu1  ;;  %v1795_v29 = vpop.f32.mrb[26].mxu0 }
 0x129   :  { %v1858_v30 = vadd.f32 %v1857_v28, %v1856_v23  ;;  %v1859_v31 = vpop.f32.mrb[26].mxu1  ;;  %v1796_v32 = vpop.f32.mrb[27].mxu0 }
 0x12a   :  { %v1797_v33 = vadd.f32 %v1796_v32, %v1795_v29  ;;  %v1860_v34 = vpop.f32.mrb[27].mxu1 }
 0x12b   :  { %v2488_v35 = vadd.f32 %v1858_v30, %v1794_v26  ;;  %v1861_v36 = vadd.f32 %v1860_v34, %v1859_v31 }
 0x12d   :  { %v2490_v37 = vadd.f32 %v1861_v36, %v1797_v33 }
 0x12e   :  { %v1798_v38 = vpop.f32.mrb[28].mxu0 }
 0x12f   :  { %v1862_v40 = vpop.f32.mrb[28].mxu1  ;;  %v1799_v42 = vpop.f32.mrb[29].mxu0 }
 0x130   :  { %v1800_v43 = vadd.f32 %v1799_v42, %v1798_v38  ;;  %v1863_v44 = vpop.f32.mrb[29].mxu1  ;;  %v1801_v45 = vpop.f32.mrb[30].mxu0 }
 0x131   :  { %v1864_v46 = vadd.f32 %v1863_v44, %v1862_v40  ;;  %v1865_v47 = vpop.f32.mrb[30].mxu1  ;;  %v1802_v48 = vpop.f32.mrb[31].mxu0 }
 0x132   :  { %v1803_v49 = vadd.f32 %v1802_v48, %v1801_v45  ;;  %v1866_v50 = vpop.f32.mrb[31].mxu1 }
 0x133   :  { %v2492_v51 = vadd.f32 %v1864_v46, %v1800_v43  ;;  %v1867_v52 = vadd.f32 %v1866_v50, %v1865_v47 }
 0x135   :  { %v2494_v54 = vadd.f32 %v1867_v52, %v1803_v49 }
 0x136   :  { %v1884_v56 = vpop.f32.mrb[32].mxu0 }
 0x137   :  { %v1948_v57 = vpop.f32.mrb[32].mxu1  ;;  %v1885_v58 = vpop.f32.mrb[33].mxu0 }
 0x138   :  { %v1886_v59 = vadd.f32 %v1885_v58, %v1884_v56  ;;  %v1949_v60 = vpop.f32.mrb[33].mxu1  ;;  %v1887_v61 = vpop.f32.mrb[34].mxu0 }
 0x139   :  { %v1950_v62 = vadd.f32 %v1949_v60, %v1948_v57  ;;  %v1951_v63 = vpop.f32.mrb[34].mxu1  ;;  %v1888_v0 = vpop.f32.mrb[35].mxu0 }
 0x13a   :  { %v1175_v1 = vadd.f32 %v1886_v59, %v2464_v11  ;;  %v1889_v2 = vadd.f32 %v1888_v0, %v1887_v61  ;;  %v1952_v4 = vpop.f32.mrb[35].mxu1 }
 0x13b   :  { %v1953_v6 = vadd.f32 %v1952_v4, %v1951_v63 }
 0x13c   :  { %v1272_v7 = vadd.f32 %v1950_v62, %v1175_v1  ;;  %v1178_v8 = vadd.f32 %v1889_v2, %v2466_v13 }
 0x13e   :  { %v1275_v9 = vadd.f32 %v1953_v6, %v1178_v8  ;;  %v1890_v10 = vpop.f32.mrb[36].mxu0  ;;  %v1407_v12 = vmul.f32 %v1272_v7, %v1272_v7 }
 0x13f   :  { %v1954_v14 = vpop.f32.mrb[36].mxu1  ;;  %v1891_v15 = vpop.f32.mrb[37].mxu0 }
 0x140   :  { %v1385_v16 = vadd.f32 %v1275_v9, %v1272_v7  ;;  %v1408_v17 = vmul.f32 %v1275_v9, %v1275_v9  ;;  %v1696_v18 = vpack.c.bf16 %v1275_v9, %v1272_v7  ;;  %v1892_v20 = vadd.f32 %v1891_v15, %v1890_v10  ;;  %v1955_v22 = vpop.f32.mrb[37].mxu1  ;;  %v1893_v23 = vpop.f32.mrb[38].mxu0 }
 0x141   :  { %v1956_v24 = vadd.f32 %v1955_v22, %v1954_v14  ;;  %v1957_v26 = vpop.f32.mrb[38].mxu1  ;;  %v1894_v11 = vpop.f32.mrb[39].mxu0 }
 0x142   :  { %v1423_v28 = vadd.f32 %v1408_v17, %v1407_v12  ;;  %1697 = vst [vmem:[%s2544_s2] sm:$0xff] %v1696_v18   ;;  %v1183_v13 = vadd.f32 %v1892_v20, %v2468_v25  ;;  %v1895_v29 = vadd.f32 %v1894_v11, %v1893_v23  ;;  %v1958_v30 = vpop.f32.mrb[39].mxu1 }
 0x143   :  { %v1959_v31 = vadd.f32 %v1958_v30, %v1957_v26 }
 0x144   :  { %v1280_v32 = vadd.f32 %v1956_v24, %v1183_v13  ;;  %v1186_v33 = vadd.f32 %v1895_v29, %v2470_v27 }
 0x146   :  { %v1386_v34 = vadd.f32 %v1385_v16, %v1280_v32  ;;  %v1409_v36 = vmul.f32 %v1280_v32, %v1280_v32  ;;  %v1283_v38 = vadd.f32 %v1959_v31, %v1186_v33  ;;  %v1896_v40 = vpop.f32.mrb[40].mxu0 }
 0x147   :  { %v1960_v42 = vpop.f32.mrb[40].mxu1  ;;  %v1897_v43 = vpop.f32.mrb[41].mxu0 }
 0x148   :  { %v1424_v44 = vadd.f32 %v1423_v28, %v1409_v36  ;;  %v1387_v45 = vadd.f32 %v1386_v34, %v1283_v38  ;;  %v1410_v46 = vmul.f32 %v1283_v38, %v1283_v38  ;;  %v1701_v47 = vpack.c.bf16 %v1283_v38, %v1280_v32  ;;  %v1961_v48 = vpop.f32.mrb[41].mxu1  ;;  %v1899_v49 = vpop.f32.mrb[42].mxu0 }
 0x149   :  { %v1898_v50 = vadd.f32 %v1897_v43, %v1896_v40  ;;  %v1962_v25 = vadd.f32 %v1961_v48, %v1960_v42  ;;  %v1963_v52 = vpop.f32.mrb[42].mxu1  ;;  %v1900_v56 = vpop.f32.mrb[43].mxu0 }
 0x14a   :  { %v1425_v57 = vadd.f32 %v1424_v44, %v1410_v46  ;;  %1733 = vst [vmem:[%s2544_s2 + $0x8] sm:$0xff] %v1701_v47   ;;  %v1901_v27 = vadd.f32 %v1900_v56, %v1899_v49  ;;  %v1964_v58 = vpop.f32.mrb[43].mxu1 }
 0x14b   :  { %v1191_v59 = vadd.f32 %v1898_v50, %v2472_v39  ;;  %v1965_v60 = vadd.f32 %v1964_v58, %v1963_v52 }
 0x14c   :  { %v1194_v61 = vadd.f32 %v1901_v27, %v2474_v41 }
 0x14d   :  { %v1288_v62 = vadd.f32 %v1962_v25, %v1191_v59 }
 0x14e   :  { %v1291_v63 = vadd.f32 %v1965_v60, %v1194_v61  ;;  %v1902_v0 = vpop.f32.mrb[44].mxu0 }
 0x14f   :  { %v1388_v1 = vadd.f32 %v1387_v45, %v1288_v62  ;;  %v1411_v2 = vmul.f32 %v1288_v62, %v1288_v62  ;;  %v1966_v4 = vpop.f32.mrb[44].mxu1  ;;  %v1903_v6 = vpop.f32.mrb[45].mxu0 }
 0x150   :  { %v1412_v7 = vmul.f32 %v1291_v63, %v1291_v63  ;;  %v1706_v8 = vpack.c.bf16 %v1291_v63, %v1288_v62  ;;  %v1904_v9 = vadd.f32 %v1903_v6, %v1902_v0  ;;  %v1967_v10 = vpop.f32.mrb[45].mxu1  ;;  %v1905_v12 = vpop.f32.mrb[46].mxu0 }
 0x151   :  { %v1426_v14 = vadd.f32 %v1425_v57, %v1411_v2  ;;  %v1389_v15 = vadd.f32 %v1388_v1, %v1291_v63  ;;  %v1968_v16 = vadd.f32 %v1967_v10, %v1966_v4  ;;  %v1969_v17 = vpop.f32.mrb[46].mxu1  ;;  %v1906_v39 = vpop.f32.mrb[47].mxu0 }
 0x152   :  { %1734 = vst [vmem:[%s2544_s2 + $0x10] sm:$0xff] %v1706_v8   ;;  %v1199_v41 = vadd.f32 %v1904_v9, %v2476_v53  ;;  %v1907_v18 = vadd.f32 %v1906_v39, %v1905_v12  ;;  %v1970_v20 = vpop.f32.mrb[47].mxu1 }
 0x153   :  { %v1427_v22 = vadd.f32 %v1426_v14, %v1412_v7  ;;  %v1971_v23 = vadd.f32 %v1970_v20, %v1969_v17 }
 0x154   :  { %v1296_v24 = vadd.f32 %v1968_v16, %v1199_v41  ;;  %v1202_v26 = vadd.f32 %v1907_v18, %v2478_v55 }
 0x156   :  { %v1390_v11 = vadd.f32 %v1389_v15, %v1296_v24  ;;  %v1413_v28 = vmul.f32 %v1296_v24, %v1296_v24  ;;  %v1299_v13 = vadd.f32 %v1971_v23, %v1202_v26  ;;  %v1908_v29 = vpop.f32.mrb[48].mxu0 }
 0x157   :  { %v1972_v30 = vpop.f32.mrb[48].mxu1  ;;  %v1909_v31 = vpop.f32.mrb[49].mxu0 }
 0x158   :  { %v1428_v32 = vadd.f32 %v1427_v22, %v1413_v28  ;;  %v1391_v33 = vadd.f32 %v1390_v11, %v1299_v13  ;;  %v1414_v34 = vmul.f32 %v1299_v13, %v1299_v13  ;;  %v1711_v36 = vpack.c.bf16 %v1299_v13, %v1296_v24  ;;  %v1973_v38 = vpop.f32.mrb[49].mxu1  ;;  %v1911_v40 = vpop.f32.mrb[50].mxu0 }
 0x159   :  { %v1910_v53 = vadd.f32 %v1909_v31, %v1908_v29  ;;  %v1974_v42 = vadd.f32 %v1973_v38, %v1972_v30  ;;  %v1975_v43 = vpop.f32.mrb[50].mxu1  ;;  %v1912_v44 = vpop.f32.mrb[51].mxu0 }
 0x15a   :  { %v1429_v45 = vadd.f32 %v1428_v32, %v1414_v34  ;;  %1735 = vst [vmem:[%s2544_s2 + $0x18] sm:$0xff] %v1711_v36   ;;  %v1913_v55 = vadd.f32 %v1912_v44, %v1911_v40  ;;  %v1976_v46 = vpop.f32.mrb[51].mxu1 }
 0x15b   :  { %v1207_v47 = vadd.f32 %v1910_v53, %v2480_v3  ;;  %v1977_v48 = vadd.f32 %v1976_v46, %v1975_v43 }
 0x15c   :  { %v1210_v49 = vadd.f32 %v1913_v55, %v2482_v5 }
 0x15d   :  { %v1304_v50 = vadd.f32 %v1974_v42, %v1207_v47 }
 0x15e   :  { %v1307_v25 = vadd.f32 %v1977_v48, %v1210_v49  ;;  %v1914_v52 = vpop.f32.mrb[52].mxu0 }
 0x15f   :  { %v1392_v56 = vadd.f32 %v1391_v33, %v1304_v50  ;;  %v1415_v57 = vmul.f32 %v1304_v50, %v1304_v50  ;;  %v1978_v27 = vpop.f32.mrb[52].mxu1  ;;  %v1915_v58 = vpop.f32.mrb[53].mxu0 }
 0x160   :  { %v1416_v59 = vmul.f32 %v1307_v25, %v1307_v25  ;;  %v1716_v60 = vpack.c.bf16 %v1307_v25, %v1304_v50  ;;  %v1916_v61 = vadd.f32 %v1915_v58, %v1914_v52  ;;  %v1979_v62 = vpop.f32.mrb[53].mxu1  ;;  %v1917_v63 = vpop.f32.mrb[54].mxu0 }
 0x161   :  { %v1430_v0 = vadd.f32 %v1429_v45, %v1415_v57  ;;  %v1393_v1 = vadd.f32 %v1392_v56, %v1307_v25  ;;  %v1980_v2 = vadd.f32 %v1979_v62, %v1978_v27  ;;  %v1981_v4 = vpop.f32.mrb[54].mxu1  ;;  %v1918_v3 = vpop.f32.mrb[55].mxu0 }
 0x162   :  { %1736 = vst [vmem:[%s2544_s2 + $0x20] sm:$0xff] %v1716_v60   ;;  %v1215_v5 = vadd.f32 %v1916_v61, %v2484_v19  ;;  %v1919_v6 = vadd.f32 %v1918_v3, %v1917_v63  ;;  %v1982_v7 = vpop.f32.mrb[55].mxu1 }
 0x163   :  { %v1431_v8 = vadd.f32 %v1430_v0, %v1416_v59  ;;  %v1983_v9 = vadd.f32 %v1982_v7, %v1981_v4 }
 0x164   :  { %v1312_v10 = vadd.f32 %v1980_v2, %v1215_v5  ;;  %v1218_v12 = vadd.f32 %v1919_v6, %v2486_v21 }
 0x166   :  { %v1394_v14 = vadd.f32 %v1393_v1, %v1312_v10  ;;  %v1417_v15 = vmul.f32 %v1312_v10, %v1312_v10  ;;  %v1315_v16 = vadd.f32 %v1983_v9, %v1218_v12  ;;  %v1920_v17 = vpop.f32.mrb[56].mxu0 }
 0x167   :  { %v1984_v39 = vpop.f32.mrb[56].mxu1  ;;  %v1921_v41 = vpop.f32.mrb[57].mxu0 }
 0x168   :  { %v1432_v18 = vadd.f32 %v1431_v8, %v1417_v15  ;;  %v1395_v20 = vadd.f32 %v1394_v14, %v1315_v16  ;;  %v1418_v22 = vmul.f32 %v1315_v16, %v1315_v16  ;;  %v1721_v23 = vpack.c.bf16 %v1315_v16, %v1312_v10  ;;  %v1985_v24 = vpop.f32.mrb[57].mxu1  ;;  %v1923_v26 = vpop.f32.mrb[58].mxu0 }
 0x169   :  { %v1922_v19 = vadd.f32 %v1921_v41, %v1920_v17  ;;  %v1986_v11 = vadd.f32 %v1985_v24, %v1984_v39  ;;  %v1987_v28 = vpop.f32.mrb[58].mxu1  ;;  %v1924_v13 = vpop.f32.mrb[59].mxu0 }
 0x16a   :  { %v1433_v29 = vadd.f32 %v1432_v18, %v1418_v22  ;;  %1737 = vst [vmem:[%s2544_s2 + $0x28] sm:$0xff] %v1721_v23   ;;  %v1925_v21 = vadd.f32 %v1924_v13, %v1923_v26  ;;  %v1988_v30 = vpop.f32.mrb[59].mxu1 }
 0x16b   :  { %v1223_v31 = vadd.f32 %v1922_v19, %v2488_v35  ;;  %v1989_v32 = vadd.f32 %v1988_v30, %v1987_v28 }
 0x16c   :  { %v1226_v33 = vadd.f32 %v1925_v21, %v2490_v37 }
 0x16d   :  { %v1320_v34 = vadd.f32 %v1986_v11, %v1223_v31 }
 0x16e   :  { %v1323_v36 = vadd.f32 %v1989_v32, %v1226_v33  ;;  %v1926_v38 = vpop.f32.mrb[60].mxu0 }
 0x16f   :  { %v1396_v40 = vadd.f32 %v1395_v20, %v1320_v34  ;;  %v1419_v53 = vmul.f32 %v1320_v34, %v1320_v34  ;;  %v1990_v42 = vpop.f32.mrb[60].mxu1  ;;  %v1927_v43 = vpop.f32.mrb[61].mxu0 }
 0x170   :  { %v1420_v44 = vmul.f32 %v1323_v36, %v1323_v36  ;;  %v1726_v45 = vpack.c.bf16 %v1323_v36, %v1320_v34  ;;  %v1928_v55 = vadd.f32 %v1927_v43, %v1926_v38  ;;  %v1991_v46 = vpop.f32.mrb[61].mxu1  ;;  %v1929_v47 = vpop.f32.mrb[62].mxu0 }
 0x171   :  { %v1434_v48 = vadd.f32 %v1433_v29, %v1419_v53  ;;  %v1397_v49 = vadd.f32 %v1396_v40, %v1323_v36  ;;  %v1992_v50 = vadd.f32 %v1991_v46, %v1990_v42  ;;  %v1993_v25 = vpop.f32.mrb[62].mxu1  ;;  %v1930_v35 = vpop.f32.mrb[63].mxu0 }
 0x172   :  { %1738 = vst [vmem:[%s2544_s2 + $0x30] sm:$0xff] %v1726_v45   ;;  %v1231_v37 = vadd.f32 %v1928_v55, %v2492_v51  ;;  %v1931_v52 = vadd.f32 %v1930_v35, %v1929_v47  ;;  %v1994_v56 = vpop.f32.mrb[63].mxu1 }
 0x173   :  { %v1435_v57 = vadd.f32 %v1434_v48, %v1420_v44  ;;  %v1995_v27 = vadd.f32 %v1994_v56, %v1993_v25 }
 0x174   :  { %v1328_v58 = vadd.f32 %v1992_v50, %v1231_v37  ;;  %v1234_v59 = vadd.f32 %v1931_v52, %v2494_v54 }
 0x176   :  { %v1398_v60 = vadd.f32 %v1397_v49, %v1328_v58  ;;  %v1421_v61 = vmul.f32 %v1328_v58, %v1328_v58  ;;  %v1331_v62 = vadd.f32 %v1995_v27, %v1234_v59 }
 0x178   :  { %v1436_v63 = vadd.f32 %v1435_v57, %v1421_v61  ;;  %v1399_v0 = vadd.f32 %v1398_v60, %v1331_v62  ;;  %v1422_v1 = vmul.f32 %v1331_v62, %v1331_v62  ;;  %v1731_v2 = vpack.c.bf16 %v1331_v62, %v1328_v58 }
 0x17a   :  { %v1400_v4 = vrot.slane %v1399_v0, 4  ;;  %v1437_v3 = vadd.f32 %v1436_v63, %v1422_v1  ;;  %1739 = vst [vmem:[%s2544_s2 + $0x38] sm:$0xff] %v1731_v2  }
 0x17c   :  { %v1401_v51 = vadd.f32 %v1400_v4, %v1399_v0  ;;  %v1438_v5 = vrot.slane %v1437_v3, 4 }
 0x17e   :  { %v1402_v6 = vrot.slane %v1401_v51, 2  ;;  %v1439_v7 = vadd.f32 %v1438_v5, %v1437_v3 }
 0x180   :  { %v1403_v8 = vadd.f32 %v1402_v6, %v1401_v51  ;;  %v1440_v9 = vrot.slane %v1439_v7, 2 }
 0x182   :  { %v1404_v54 = vrot.slane %v1403_v8, 1  ;;  %v1441_v10 = vadd.f32 %v1440_v9, %v1439_v7 }
 0x184   :  { %v1405_v12 = vadd.f32 %v1404_v54, %v1403_v8  ;;  %v1442_v14 = vrot.slane %v1441_v10, 1 }
 0x186   :  { %1406 = vst [vmem:[%s2545_s3] sm:$0x1] %v1405_v12  ;;  %v1443_v15 = vadd.f32 %v1442_v14, %v1441_v10 }
 0x188   :  { %1444 = vst [vmem:[%s2545_s3 + $0x1] sm:$0x1] %v1443_v15 }

// kernel: _lambda_.10
= control target key start
LH: loop header
LB: loop body
LE: loop exit
PB: predicated region body
PF: predicated region fallthrough
CT: control target
= control target key end

     0   :  { %s455_s0 = inlined_call_operand.vmem [shape: bf16[128,128], index: 0, kind: input, shape index: {}, may-alias: {0,3}]   ;;  %s456_s1 = inlined_call_operand.vmem [shape: f32[1,128], index: 1, kind: input, shape index: {}]   ;;  %s457_s2 = inlined_call_operand.vmem [shape: f32[1,128], index: 2, kind: input, shape index: {}]   ;;  %s458_s3 = inlined_call_operand.vmem [shape: bf16[128,128], index: 3, kind: output, shape index: {}, may-alias: {0,3}]  }
   0x1   :  { %v259_v0 = vld [vmem:[%s455_s0] sm:$0xff]   ;;  %v330_v4 = vld [vmem:[%s455_s0 + $0x8] sm:$0xff]   ;;  %v331_v5 = vld [vmem:[%s455_s0 + $0x10] sm:$0xff]  }
   0x2   :  { %v370_v1 = vld [vmem:[%s456_s1] ss:$0 sm:$0xff]  ;;  %v260_v2 = vunpack.c.l.bf16 %v259_v0  ;;  %v261_v3 = vunpack.c.h.bf16 %v259_v0  ;;  %v332_v6 = vld [vmem:[%s455_s0 + $0x18] sm:$0xff]   ;;  %v264_v8 = vunpack.c.l.bf16 %v330_v4  ;;  %v265_v9 = vunpack.c.h.bf16 %v330_v4  ;;  %v334_v35 = vld [vmem:[%s455_s0 + $0x28] sm:$0xff]  }
   0x3   :  { %v384_v7 = vld [vmem:[%s457_s2] ss:$0 sm:$0xff]  ;;  %v268_v10 = vunpack.c.l.bf16 %v331_v5  ;;  %v269_v11 = vunpack.c.h.bf16 %v331_v5  ;;  %v272_v14 = vunpack.c.l.bf16 %v332_v6  ;;  %v273_v15 = vunpack.c.h.bf16 %v332_v6 }
   0x4   :  { %v53_v12 = vmul.f32 %v260_v2, %v370_v1  ;;  %v54_v13 = vmul.f32 %v261_v3, %v370_v1  ;;  %v55_v16 = vmul.f32 %v264_v8, %v370_v1  ;;  %v56_v17 = vmul.f32 %v265_v9, %v370_v1  ;;  %v333_v34 = vld [vmem:[%s455_s0 + $0x20] sm:$0xff]  }
   0x5   :  { %v57_v18 = vmul.f32 %v268_v10, %v370_v1  ;;  %v58_v19 = vmul.f32 %v269_v11, %v370_v1  ;;  %v59_v22 = vmul.f32 %v272_v14, %v370_v1  ;;  %v60_v23 = vmul.f32 %v273_v15, %v370_v1 }
   0x6   :  { %v76_v20 = vadd.f32 %v384_v7, %v53_v12  ;;  %v77_v21 = vadd.f32 %v384_v7, %v54_v13  ;;  %v78_v24 = vadd.f32 %v384_v7, %v55_v16  ;;  %v79_v25 = vadd.f32 %v384_v7, %v56_v17 }
   0x7   :  { %v80_v26 = vadd.f32 %v384_v7, %v57_v18  ;;  %v81_v27 = vadd.f32 %v384_v7, %v58_v19  ;;  %v82_v42 = vadd.f32 %v384_v7, %v59_v22  ;;  %v83_v43 = vadd.f32 %v384_v7, %v60_v23 }
   0x8   :  { %vm92_vm0 = vcmp.ge.f32.partialorder %v76_v20, 0.0  ;;  %vm93_vm1 = vcmp.ge.f32.partialorder %v77_v21, 0.0  ;;  %v108_v28 = vmul.f32 0.2, %v76_v20  ;;  %v109_v29 = vmul.f32 0.2, %v77_v21 }
   0x9   :  { %vm94_vm2 = vcmp.ge.f32.partialorder %v78_v24, 0.0  ;;  %vm95_vm3 = vcmp.ge.f32.partialorder %v79_v25, 0.0  ;;  %v110_v30 = vmul.f32 0.2, %v78_v24  ;;  %v111_v31 = vmul.f32 0.2, %v79_v25 }
   0xa   :  { %v124_v32 = vsel %vm92_vm0, %v76_v20, %v108_v28  ;;  %v125_v33 = vsel %vm93_vm1, %v77_v21, %v109_v29  ;;  %vm96_vm4 = vcmp.ge.f32.partialorder %v80_v26, 0.0  ;;  %vm97_vm5 = vcmp.ge.f32.partialorder %v81_v27, 0.0 }
   0xb   :  { %v293_v36 = vpack.c.bf16 %v125_v33, %v124_v32  ;;  %v126_v37 = vsel %vm94_vm2, %v78_v24, %v110_v30  ;;  %v127_v38 = vsel %vm95_vm3, %v79_v25, %v111_v31  ;;  %v112_v39 = vmul.f32 0.2, %v80_v26 }
   0xc   :  { %v298_v40 = vpack.c.bf16 %v127_v38, %v126_v37  ;;  %v113_v41 = vmul.f32 0.2, %v81_v27  ;;  %v276_v45 = vunpack.c.l.bf16 %v333_v34  ;;  %v277_v46 = vunpack.c.h.bf16 %v333_v34 }
   0xd   :  { %294 = vst [vmem:[%s458_s3] sm:$0xff] %v293_v36   ;;  %v128_v44 = vsel %vm96_vm4, %v80_v26, %v112_v39  ;;  %v280_v47 = vunpack.c.l.bf16 %v334_v35  ;;  %vm98_vm6 = vcmp.ge.f32.partialorder %v82_v42, 0.0  ;;  %vm99_vm7 = vcmp.ge.f32.partialorder %v83_v43, 0.0 }
   0xe   :  { %v129_v49 = vsel %vm97_vm5, %v81_v27, %v113_v41  ;;  %v114_v50 = vmul.f32 0.2, %v82_v42  ;;  %v115_v52 = vmul.f32 0.2, %v83_v43  ;;  %v61_v53 = vmul.f32 %v276_v45, %v370_v1 }
   0xf   :  { %v303_v51 = vpack.c.bf16 %v129_v49, %v128_v44  ;;  %v62_v54 = vmul.f32 %v277_v46, %v370_v1  ;;  %v281_v56 = vunpack.c.h.bf16 %v334_v35  ;;  %v63_v57 = vmul.f32 %v280_v47, %v370_v1 }
  0x10   :  { %v130_v55 = vsel %vm98_vm6, %v82_v42, %v114_v50  ;;  %v131_v59 = vsel %vm99_vm7, %v83_v43, %v115_v52  ;;  %v84_v60 = vadd.f32 %v384_v7, %v61_v53 }
  0x11   :  { %v85_v61 = vadd.f32 %v384_v7, %v62_v54  ;;  %v308_v63 = vpack.c.bf16 %v131_v59, %v130_v55  ;;  %v64_v0 = vmul.f32 %v281_v56, %v370_v1  ;;  %v86_v2 = vadd.f32 %v384_v7, %v63_v57 }
  0x12   :  { %vm100_vm8 = vcmp.ge.f32.partialorder %v84_v60, 0.0  ;;  %v116_v5 = vmul.f32 0.2, %v84_v60 }
  0x13   :  { %vm101_vm9 = vcmp.ge.f32.partialorder %v85_v61, 0.0  ;;  %v117_v6 = vmul.f32 0.2, %v85_v61  ;;  %v87_v8 = vadd.f32 %v384_v7, %v64_v0  ;;  %vm102_vm10 = vcmp.ge.f32.partialorder %v86_v2, 0.0 }
  0x14   :  { %v335_v48 = vld [vmem:[%s455_s0 + $0x30] sm:$0xff]   ;;  %v118_v9 = vmul.f32 0.2, %v86_v2  ;;  %v132_v11 = vsel %vm100_vm8, %v84_v60, %v116_v5 }
  0x15   :  { %337 = vst [vmem:[%s458_s3 + $0x8] sm:$0xff] %v298_v40   ;;  %v284_v58 = vunpack.c.l.bf16 %v335_v48  ;;  %338 = vst [vmem:[%s458_s3 + $0x10] sm:$0xff] %v303_v51   ;;  %v285_v62 = vunpack.c.h.bf16 %v335_v48  ;;  %v133_v12 = vsel %vm101_vm9, %v85_v61, %v117_v6  ;;  %vm103_vm11 = vcmp.ge.f32.partialorder %v87_v8, 0.0 }
  0x16   :  { %v313_v15 = vpack.c.bf16 %v133_v12, %v132_v11  ;;  %v119_v16 = vmul.f32 0.2, %v87_v8  ;;  %v134_v17 = vsel %vm102_vm10, %v86_v2, %v118_v9 }
  0x17   :  { %v65_v3 = vmul.f32 %v284_v58, %v370_v1  ;;  %v66_v10 = vmul.f32 %v285_v62, %v370_v1 }
  0x18   :  { %v135_v21 = vsel %vm103_vm11, %v87_v8, %v119_v16 }
  0x19   :  { %v88_v13 = vadd.f32 %v384_v7, %v65_v3  ;;  %v89_v18 = vadd.f32 %v384_v7, %v66_v10  ;;  %v318_v23 = vpack.c.bf16 %v135_v21, %v134_v17 }
  0x1b   :  { %vm104_vm12 = vcmp.ge.f32.partialorder %v88_v13, 0.0  ;;  %v120_v19 = vmul.f32 0.2, %v88_v13  ;;  %vm105_vm13 = vcmp.ge.f32.partialorder %v89_v18, 0.0  ;;  %v121_v24 = vmul.f32 0.2, %v89_v18 }
  0x1c   :  { %v336_v4 = vld [vmem:[%s455_s0 + $0x38] sm:$0xff]  }
  0x1d   :  { %339 = vst [vmem:[%s458_s3 + $0x18] sm:$0xff] %v308_v63   ;;  %v288_v14 = vunpack.c.l.bf16 %v336_v4  ;;  %v289_v20 = vunpack.c.h.bf16 %v336_v4  ;;  %340 = vst [vmem:[%s458_s3 + $0x20] sm:$0xff] %v313_v15   ;;  %v136_v25 = vsel %vm104_vm12, %v88_v13, %v120_v19  ;;  %v137_v28 = vsel %vm105_vm13, %v89_v18, %v121_v24 }
  0x1e   :  { %341 = vst [vmem:[%s458_s3 + $0x28] sm:$0xff] %v318_v23   ;;  %v323_v29 = vpack.c.bf16 %v137_v28, %v136_v25 }
  0x1f   :  { %v67_v22 = vmul.f32 %v288_v14, %v370_v1  ;;  %v68_v26 = vmul.f32 %v289_v20, %v370_v1 }
  0x20   :  { %342 = vst [vmem:[%s458_s3 + $0x30] sm:$0xff] %v323_v29  }
  0x21   :  { %v90_v27 = vadd.f32 %v384_v7, %v67_v22  ;;  %v91_v30 = vadd.f32 %v384_v7, %v68_v26 }
  0x23   :  { %vm106_vm14 = vcmp.ge.f32.partialorder %v90_v27, 0.0  ;;  %v122_v31 = vmul.f32 0.2, %v90_v27  ;;  %vm107_vm15 = vcmp.ge.f32.partialorder %v91_v30, 0.0  ;;  %v123_v32 = vmul.f32 0.2, %v91_v30 }
  0x25   :  { %v138_v33 = vsel %vm106_vm14, %v90_v27, %v122_v31  ;;  %v139_v1 = vsel %vm107_vm15, %v91_v30, %v123_v32 }
  0x26   :  { %v328_v34 = vpack.c.bf16 %v139_v1, %v138_v33 }
  0x28   :  { %343 = vst [vmem:[%s458_s3 + $0x38] sm:$0xff] %v328_v34  }

// kernel: _lambda_.12
= control target key start
LH: loop header
LB: loop body
LE: loop exit
PB: predicated region body
PF: predicated region fallthrough
CT: control target
= control target key end

     0   :  { %v28_v0 = vlaneseq  ;;  %s180_s0 = inlined_call_operand.vmem [shape: bf16[32,256], index: 0, kind: input, shape index: {}, may-alias: {0,3}]   ;;  %s181_s1 = inlined_call_operand.vmem [shape: f32[1,256], index: 1, kind: input, shape index: {}]   ;;  %s182_s2 = inlined_call_operand.vmem [shape: f32[1,256], index: 2, kind: input, shape index: {}]   ;;  %s183_s3 = inlined_call_operand.vmem [shape: bf16[32,256], index: 3, kind: output, shape index: {}, may-alias: {0,3}]  }
   0x1   :  { %v14_v1 = vld [vmem:[%s180_s0] sm:$0xff]  ;;  %v15_v3 = vld [vmem:[%s180_s0 + $0x8] sm:$0xff]  ;;  %v16_v4 = vld [vmem:[%s180_s0 + $0x10] sm:$0xff] }
   0x2   :  { %v29_v2 = vshrl.u32 %v28_v0, 7  ;;  %v17_v5 = vld [vmem:[%s180_s0 + $0x18] sm:$0xff]  ;;  %v18_v6 = vunpack.c.l.bf16 %v14_v1  ;;  %v19_v7 = vunpack.c.h.bf16 %v14_v1  ;;  %v26_v8 = vld [vmem:[%s181_s1] sm:$0x3]  ;;  %v20_v12 = vunpack.c.l.bf16 %v15_v3 }
   0x3   :  { %v46_v9 = vld [vmem:[%s182_s2] sm:$0x3]  ;;  %v21_v13 = vunpack.c.h.bf16 %v15_v3  ;;  %v22_v14 = vunpack.c.l.bf16 %v16_v4  ;;  %v23_v15 = vunpack.c.h.bf16 %v16_v4  ;;  %v24_v16 = vunpack.c.l.bf16 %v17_v5 }
   0x4   :  { %v30_v10 = vsub.s32 0, %v29_v2  ;;  %v34_v11 = vsub.s32 1, %v29_v2  ;;  %v25_v17 = vunpack.c.h.bf16 %v17_v5 }
   0x6   :  { %v31_v18 = vrot.slane %v26_v8, %v30_v10  ;;  %v35_v19 = vrot.slane %v26_v8, %v34_v11  ;;  %v51_v20 = vrot.slane %v46_v9, %v30_v10  ;;  %v55_v21 = vrot.slane %v46_v9, %v34_v11 }
   0x8   :  { %v38_v22 = vmul.f32 %v31_v18, %v18_v6  ;;  %v39_v23 = vmul.f32 %v35_v19, %v19_v7  ;;  %v40_v24 = vmul.f32 %v31_v18, %v20_v12  ;;  %v41_v25 = vmul.f32 %v35_v19, %v21_v13 }
   0x9   :  { %v42_v26 = vmul.f32 %v31_v18, %v22_v14  ;;  %v43_v27 = vmul.f32 %v35_v19, %v23_v15  ;;  %v44_v28 = vmul.f32 %v31_v18, %v24_v16  ;;  %v45_v29 = vmul.f32 %v35_v19, %v25_v17 }
   0xa   :  { %v58_v30 = vadd.f32 %v51_v20, %v38_v22  ;;  %v59_v31 = vadd.f32 %v55_v21, %v39_v23  ;;  %v60_v32 = vadd.f32 %v51_v20, %v40_v24  ;;  %v61_v33 = vadd.f32 %v55_v21, %v41_v25 }
   0xb   :  { %v62_v34 = vadd.f32 %v51_v20, %v42_v26  ;;  %v63_v35 = vadd.f32 %v55_v21, %v43_v27  ;;  %v64_v36 = vadd.f32 %v51_v20, %v44_v28  ;;  %v65_v37 = vadd.f32 %v55_v21, %v45_v29 }
   0xc   :  { %vm66_vm0 = vcmp.ge.f32.partialorder %v58_v30, 0.0  ;;  %vm67_vm1 = vcmp.ge.f32.partialorder %v59_v31, 0.0  ;;  %v74_v38 = vmul.f32 0.2, %v58_v30  ;;  %v75_v39 = vmul.f32 0.2, %v59_v31 }
   0xd   :  { %vm68_vm2 = vcmp.ge.f32.partialorder %v60_v32, 0.0  ;;  %vm69_vm3 = vcmp.ge.f32.partialorder %v61_v33, 0.0  ;;  %v76_v40 = vmul.f32 0.2, %v60_v32  ;;  %v77_v41 = vmul.f32 0.2, %v61_v33 }
   0xe   :  { %v82_v42 = vsel %vm66_vm0, %v58_v30, %v74_v38  ;;  %v83_v43 = vsel %vm67_vm1, %v59_v31, %v75_v39  ;;  %vm70_vm4 = vcmp.ge.f32.partialorder %v62_v34, 0.0  ;;  %vm71_vm5 = vcmp.ge.f32.partialorder %v63_v35, 0.0 }
   0xf   :  { %v126_v44 = vpack.c.bf16 %v83_v43, %v82_v42  ;;  %v84_v45 = vsel %vm68_vm2, %v60_v32, %v76_v40  ;;  %v85_v46 = vsel %vm69_vm3, %v61_v33, %v77_v41  ;;  %v78_v47 = vmul.f32 0.2, %v62_v34 }
  0x10   :  { %v127_v48 = vpack.c.bf16 %v85_v46, %v84_v45  ;;  %v79_v49 = vmul.f32 0.2, %v63_v35  ;;  %vm72_vm6 = vcmp.ge.f32.partialorder %v64_v36, 0.0  ;;  %vm73_vm7 = vcmp.ge.f32.partialorder %v65_v37, 0.0 }
  0x11   :  { %114 = vst [vmem:[%s183_s3] sm:$0xff] %v126_v44  ;;  %v86_v50 = vsel %vm70_vm4, %v62_v34, %v78_v47  ;;  %v80_v51 = vmul.f32 0.2, %v64_v36  ;;  %v81_v52 = vmul.f32 0.2, %v65_v37 }
  0x12   :  { %115 = vst [vmem:[%s183_s3 + $0x8] sm:$0xff] %v127_v48  ;;  %v87_v53 = vsel %vm71_vm5, %v63_v35, %v79_v49 }
  0x13   :  { %v128_v54 = vpack.c.bf16 %v87_v53, %v86_v50  ;;  %v88_v55 = vsel %vm72_vm6, %v64_v36, %v80_v51  ;;  %v89_v56 = vsel %vm73_vm7, %v65_v37, %v81_v52 }
  0x14   :  { %v129_v57 = vpack.c.bf16 %v89_v56, %v88_v55 }
  0x15   :  { %116 = vst [vmem:[%s183_s3 + $0x10] sm:$0xff] %v128_v54 }
  0x16   :  { %117 = vst [vmem:[%s183_s3 + $0x18] sm:$0xff] %v129_v57 }

// kernel: _lambda_.11
= control target key start
LH: loop header
LB: loop body
LE: loop exit
PB: predicated region body
PF: predicated region fallthrough
CT: control target
= control target key end

     0   :  { %s4024_s1 = inlined_call_operand.vmem [shape: bf16[2048,256], index: 1, kind: input, shape index: {}]   ;;  %s4025_s0 = inlined_call_operand.vmem [shape: bf16[32,2048], index: 0, kind: input, shape index: {}]   ;;  %s4026_s2 = inlined_call_operand.vmem [shape: bf16[32,256], index: 2, kind: output, shape index: {0}]   ;;  %s4027_s3 = inlined_call_operand.vmem [shape: f32[1,2,256], index: 3, kind: output, shape index: {1}]  }
   0x1   :  { %v2689_v0 = vld [vmem:[%s4024_s1 + $0x4] ss:$8 sps:$4 sm:$0xff]   ;;  %v2693_v2 = vld [vmem:[%s4024_s1] ss:$8 sps:$4 sm:$0xff]   ;;  %v2695_v4 = vld [vmem:[%s4024_s1 + $0x14] ss:$8 sps:$4 sm:$0xff]  }
   0x2   :  { %v2691_v1 = vld [vmem:[%s4024_s1 + $0x404] ss:$8 sps:$4 sm:$0xff]   ;;  %1761 = vmatprep.subr.bf16.mxu1 %v2689_v0  ;;  %v2694_v3 = vld [vmem:[%s4024_s1 + $0x400] ss:$8 sps:$4 sm:$0xff]   ;;  %v2697_v5 = vld [vmem:[%s4024_s1 + $0x414] ss:$8 sps:$4 sm:$0xff]  }
   0x3   :  { %1973 = vmatprep.subr.bf16.mxu0 %v2691_v1  ;;  %1762 = vmatpush1.bf16.msra.mxu1 %v2693_v2  ;;  %v2699_v6 = vld [vmem:[%s4024_s1 + $0x10] ss:$8 sps:$4 sm:$0xff]   ;;  %v2701_v8 = vld [vmem:[%s4024_s1 + $0x24] ss:$8 sps:$4 sm:$0xff]   ;;  %v2705_v10 = vld [vmem:[%s4024_s1 + $0x20] ss:$8 sps:$4 sm:$0xff]  }
   0x4   :  { %1974 = vmatpush1.bf16.msra.mxu0 %v2694_v3  ;;  %1763 = vmatprep.subr.bf16.mxu1 %v2695_v4  ;;  %v2700_v7 = vld [vmem:[%s4024_s1 + $0x410] ss:$8 sps:$4 sm:$0xff]   ;;  %v2703_v9 = vld [vmem:[%s4024_s1 + $0x424] ss:$8 sps:$4 sm:$0xff]   ;;  %v2706_v11 = vld [vmem:[%s4024_s1 + $0x420] ss:$8 sps:$4 sm:$0xff]  }
   0x5   :  { %1975 = vmatprep.subr.bf16.mxu0 %v2697_v5  ;;  %v2707_v12 = vld [vmem:[%s4024_s1 + $0x34] ss:$8 sps:$4 sm:$0xff]   ;;  %v2711_v14 = vld [vmem:[%s4024_s1 + $0x30] ss:$8 sps:$4 sm:$0xff]   ;;  %v2713_v16 = vld [vmem:[%s4024_s1 + $0x44] ss:$8 sps:$4 sm:$0xff]  }
   0x6   :  { %v2709_v13 = vld [vmem:[%s4024_s1 + $0x434] ss:$8 sps:$4 sm:$0xff]   ;;  %v2712_v15 = vld [vmem:[%s4024_s1 + $0x430] ss:$8 sps:$4 sm:$0xff]   ;;  %v2715_v17 = vld [vmem:[%s4024_s1 + $0x444] ss:$8 sps:$4 sm:$0xff]  }
   0x7   :  { %1764 = vmatpush1.bf16.msra.mxu1 %v2699_v6  ;;  %v2717_v18 = vld [vmem:[%s4024_s1 + $0x40] ss:$8 sps:$4 sm:$0xff]   ;;  %v2719_v20 = vld [vmem:[%s4024_s1 + $0x54] ss:$8 sps:$4 sm:$0xff]   ;;  %v2723_v22 = vld [vmem:[%s4024_s1 + $0x50] ss:$8 sps:$4 sm:$0xff]  }
   0x8   :  { %1976 = vmatpush1.bf16.msra.mxu0 %v2700_v7  ;;  %1765 = vmatprep.subr.bf16.mxu1 %v2701_v8  ;;  %v2718_v19 = vld [vmem:[%s4024_s1 + $0x440] ss:$8 sps:$4 sm:$0xff]   ;;  %v2721_v21 = vld [vmem:[%s4024_s1 + $0x454] ss:$8 sps:$4 sm:$0xff]   ;;  %v2724_v23 = vld [vmem:[%s4024_s1 + $0x450] ss:$8 sps:$4 sm:$0xff]  }
   0x9   :  { %1977 = vmatprep.subr.bf16.mxu0 %v2703_v9  ;;  %v2725_v24 = vld [vmem:[%s4024_s1 + $0x64] ss:$8 sps:$4 sm:$0xff]   ;;  %v2729_v26 = vld [vmem:[%s4024_s1 + $0x60] ss:$8 sps:$4 sm:$0xff]   ;;  %v2731_v28 = vld [vmem:[%s4024_s1 + $0x74] ss:$8 sps:$4 sm:$0xff]  }
   0xa   :  { %v2727_v25 = vld [vmem:[%s4024_s1 + $0x464] ss:$8 sps:$4 sm:$0xff]   ;;  %v2730_v27 = vld [vmem:[%s4024_s1 + $0x460] ss:$8 sps:$4 sm:$0xff]   ;;  %v2733_v29 = vld [vmem:[%s4024_s1 + $0x474] ss:$8 sps:$4 sm:$0xff]  }
   0xb   :  { %1766 = vmatpush1.bf16.msra.mxu1 %v2705_v10  ;;  %v2735_v30 = vld [vmem:[%s4024_s1 + $0x70] ss:$8 sps:$4 sm:$0xff]   ;;  %v2737_v32 = vld [vmem:[%s4024_s1 + $0x84] ss:$8 sps:$4 sm:$0xff]   ;;  %v2741_v34 = vld [vmem:[%s4024_s1 + $0x80] ss:$8 sps:$4 sm:$0xff]  }
   0xc   :  { %1978 = vmatpush1.bf16.msra.mxu0 %v2706_v11  ;;  %1767 = vmatprep.subr.bf16.mxu1 %v2707_v12  ;;  %v2736_v31 = vld [vmem:[%s4024_s1 + $0x470] ss:$8 sps:$4 sm:$0xff]   ;;  %v2739_v33 = vld [vmem:[%s4024_s1 + $0x484] ss:$8 sps:$4 sm:$0xff]   ;;  %v2742_v35 = vld [vmem:[%s4024_s1 + $0x480] ss:$8 sps:$4 sm:$0xff]  }
   0xd   :  { %1979 = vmatprep.subr.bf16.mxu0 %v2709_v13  ;;  %v2743_v36 = vld [vmem:[%s4024_s1 + $0x94] ss:$8 sps:$4 sm:$0xff]   ;;  %v2747_v38 = vld [vmem:[%s4024_s1 + $0x90] ss:$8 sps:$4 sm:$0xff]   ;;  %v2749_v40 = vld [vmem:[%s4024_s1 + $0xa4] ss:$8 sps:$4 sm:$0xff]  }
   0xe   :  { %v2745_v37 = vld [vmem:[%s4024_s1 + $0x494] ss:$8 sps:$4 sm:$0xff]   ;;  %v2748_v39 = vld [vmem:[%s4024_s1 + $0x490] ss:$8 sps:$4 sm:$0xff]   ;;  %v2751_v41 = vld [vmem:[%s4024_s1 + $0x4a4] ss:$8 sps:$4 sm:$0xff]  }
   0xf   :  { %1768 = vmatpush1.bf16.msra.mxu1 %v2711_v14  ;;  %v2753_v42 = vld [vmem:[%s4024_s1 + $0xa0] ss:$8 sps:$4 sm:$0xff]   ;;  %v2755_v44 = vld [vmem:[%s4024_s1 + $0xb4] ss:$8 sps:$4 sm:$0xff]   ;;  %v2759_v46 = vld [vmem:[%s4024_s1 + $0xb0] ss:$8 sps:$4 sm:$0xff]  }
  0x10   :  { %1980 = vmatpush1.bf16.msra.mxu0 %v2712_v15  ;;  %1769 = vmatprep.subr.bf16.mxu1 %v2713_v16  ;;  %v2754_v43 = vld [vmem:[%s4024_s1 + $0x4a0] ss:$8 sps:$4 sm:$0xff]   ;;  %v2757_v45 = vld [vmem:[%s4024_s1 + $0x4b4] ss:$8 sps:$4 sm:$0xff]   ;;  %v2760_v47 = vld [vmem:[%s4024_s1 + $0x4b0] ss:$8 sps:$4 sm:$0xff]  }
  0x11   :  { %1981 = vmatprep.subr.bf16.mxu0 %v2715_v17  ;;  %v289_v48 = vld [vmem:[%s4025_s0] sm:$0xff]  ;;  %v2767_v58 = vld [vmem:[%s4024_s1 + $0xd4] ss:$8 sps:$4 sm:$0xff]   ;;  %v2771_v60 = vld [vmem:[%s4024_s1 + $0xd0] ss:$8 sps:$4 sm:$0xff]  }
  0x12   :  { %v297_v49 = vld [vmem:[%s4025_s0 + $0x40] sm:$0xff]  ;;  %v2769_v59 = vld [vmem:[%s4024_s1 + $0x4d4] ss:$8 sps:$4 sm:$0xff]   ;;  %v2772_v61 = vld [vmem:[%s4024_s1 + $0x4d0] ss:$8 sps:$4 sm:$0xff]  }
  0x13   :  { %1770 = vmatpush1.bf16.msra.mxu1 %v2717_v18  ;;  %v2761_v50 = vld [vmem:[%s4024_s1 + $0xc4] ss:$8 sps:$4 sm:$0xff]   ;;  %v2336_v52 = vcombine.high %v289_v48, %v297_v49  ;;  %v2765_v56 = vld [vmem:[%s4024_s1 + $0xc0] ss:$8 sps:$4 sm:$0xff]   ;;  %v2779_v2 = vld [vmem:[%s4024_s1 + $0xf4] ss:$8 sps:$4 sm:$0xff]   ;;  %v2335_v8 = vcombine.low %v289_v48, %v297_v49 }
  0x14   :  { %1982 = vmatpush1.bf16.msra.mxu0 %v2718_v19  ;;  %1771 = vmatprep.subr.bf16.mxu1 %v2719_v20  ;;  %v2763_v51 = vld [vmem:[%s4024_s1 + $0x4c4] ss:$8 sps:$4 sm:$0xff]   ;;  %v2766_v57 = vld [vmem:[%s4024_s1 + $0x4c0] ss:$8 sps:$4 sm:$0xff]   ;;  %v2781_v3 = vld [vmem:[%s4024_s1 + $0x4f4] ss:$8 sps:$4 sm:$0xff]  }
  0x15   :  { %1983 = vmatprep.subr.bf16.mxu0 %v2721_v21  ;;  %v293_v53 = vld [vmem:[%s4025_s0 + $0x20] sm:$0xff]  ;;  %1793 = vmatprep.mubr.bf16.mxu1 %v2336_v52  ;;  %v2783_v4 = vld [vmem:[%s4024_s1 + $0xf0] ss:$8 sps:$4 sm:$0xff]   ;;  %v2793_v12 = vld [vmem:[%s4024_s1 + $0x114] ss:$8 sps:$4 sm:$0xff]  }
  0x16   :  { %v301_v54 = vld [vmem:[%s4025_s0 + $0x60] sm:$0xff]  ;;  %v2784_v5 = vld [vmem:[%s4024_s1 + $0x4f0] ss:$8 sps:$4 sm:$0xff]   ;;  %v2796_v13 = vld [vmem:[%s4024_s1 + $0x514] ss:$8 sps:$4 sm:$0xff]  }
  0x17   :  { %1772 = vmatpush1.bf16.msra.mxu1 %v2723_v22  ;;  %v2344_v55 = vcombine.high %v293_v53, %v301_v54  ;;  %v2773_v62 = vld [vmem:[%s4024_s1 + $0xe4] ss:$8 sps:$4 sm:$0xff]   ;;  %v2777_v0 = vld [vmem:[%s4024_s1 + $0xe0] ss:$8 sps:$4 sm:$0xff]   ;;  %v2343_v10 = vcombine.low %v293_v53, %v301_v54  ;;  %v2791_v14 = vld [vmem:[%s4024_s1 + $0x110] ss:$8 sps:$4 sm:$0xff]  }
  0x18   :  { %1984 = vmatpush1.bf16.msra.mxu0 %v2724_v23  ;;  %1773 = vmatprep.subr.bf16.mxu1 %v2725_v24  ;;  %v2775_v63 = vld [vmem:[%s4024_s1 + $0x4e4] ss:$8 sps:$4 sm:$0xff]   ;;  %v2778_v1 = vld [vmem:[%s4024_s1 + $0x4e0] ss:$8 sps:$4 sm:$0xff]   ;;  %v2794_v15 = vld [vmem:[%s4024_s1 + $0x510] ss:$8 sps:$4 sm:$0xff]  }
  0x19   :  { %1985 = vmatprep.subr.bf16.mxu0 %v2727_v25  ;;  %2005 = vmatprep.mubr.bf16.mxu0 %v2344_v55  ;;  %v2787_v6 = vld [vmem:[%s4024_s1 + $0x104] ss:$8 sps:$4 sm:$0xff]   ;;  %v2785_v9 = vld [vmem:[%s4024_s1 + $0x100] ss:$8 sps:$4 sm:$0xff]   ;;  %v2805_v20 = vld [vmem:[%s4024_s1 + $0x134] ss:$8 sps:$4 sm:$0xff]  }
  0x1a   :  { %v2790_v7 = vld [vmem:[%s4024_s1 + $0x504] ss:$8 sps:$4 sm:$0xff]   ;;  %v2788_v11 = vld [vmem:[%s4024_s1 + $0x500] ss:$8 sps:$4 sm:$0xff]   ;;  %v2808_v21 = vld [vmem:[%s4024_s1 + $0x534] ss:$8 sps:$4 sm:$0xff]  }
  0x1b   :  { %1774 = vmatpush1.bf16.msra.mxu1 %v2729_v26  ;;  %v2799_v16 = vld [vmem:[%s4024_s1 + $0x124] ss:$8 sps:$4 sm:$0xff]   ;;  %v2797_v18 = vld [vmem:[%s4024_s1 + $0x120] ss:$8 sps:$4 sm:$0xff]   ;;  %v2803_v22 = vld [vmem:[%s4024_s1 + $0x130] ss:$8 sps:$4 sm:$0xff]  }
  0x1c   :  { %1986 = vmatpush1.bf16.msra.mxu0 %v2730_v27  ;;  %1775 = vmatprep.subr.bf16.mxu1 %v2731_v28  ;;  %v2802_v17 = vld [vmem:[%s4024_s1 + $0x524] ss:$8 sps:$4 sm:$0xff]   ;;  %v2800_v19 = vld [vmem:[%s4024_s1 + $0x520] ss:$8 sps:$4 sm:$0xff]   ;;  %v2806_v23 = vld [vmem:[%s4024_s1 + $0x530] ss:$8 sps:$4 sm:$0xff]  }
  0x1d   :  { %1987 = vmatprep.subr.bf16.mxu0 %v2733_v29  ;;  %v2811_v24 = vld [vmem:[%s4024_s1 + $0x144] ss:$8 sps:$4 sm:$0xff]   ;;  %v2809_v26 = vld [vmem:[%s4024_s1 + $0x140] ss:$8 sps:$4 sm:$0xff]   ;;  %v2817_v28 = vld [vmem:[%s4024_s1 + $0x154] ss:$8 sps:$4 sm:$0xff]  }
  0x1e   :  { %v2814_v25 = vld [vmem:[%s4024_s1 + $0x544] ss:$8 sps:$4 sm:$0xff]   ;;  %v2812_v27 = vld [vmem:[%s4024_s1 + $0x540] ss:$8 sps:$4 sm:$0xff]   ;;  %v2820_v29 = vld [vmem:[%s4024_s1 + $0x554] ss:$8 sps:$4 sm:$0xff]  }
  0x1f   :  { %1776 = vmatpush1.bf16.msra.mxu1 %v2735_v30  ;;  %v305_v30 = vld [vmem:[%s4025_s0 + $0x80] sm:$0xff]  ;;  %v3415_v49 = vld [vmem:[%s4025_s0 + $0x28] sm:$0xff]  ;;  %v2830_v52 = vld [vmem:[%s4024_s1 + $0x570] ss:$8 sps:$4 sm:$0xff]  }
  0x20   :  { %1988 = vmatpush1.bf16.msra.mxu0 %v2736_v31  ;;  %1777 = vmatprep.subr.bf16.mxu1 %v2737_v32  ;;  %v313_v31 = vld [vmem:[%s4025_s0 + $0xc0] sm:$0xff]  ;;  %v2815_v32 = vld [vmem:[%s4024_s1 + $0x150] ss:$8 sps:$4 sm:$0xff]  }
  0x21   :  { %1989 = vmatprep.subr.bf16.mxu0 %v2739_v33  ;;  %v2352_v33 = vcombine.high %v305_v30, %v313_v31  ;;  %v2835_v54 = vld [vmem:[%s4024_s1 + $0x184] ss:$8 sps:$4 sm:$0xff]  }
  0x22   :  { %v2838_v55 = vld [vmem:[%s4024_s1 + $0x584] ss:$8 sps:$4 sm:$0xff]  }
  0x23   :  { %1778 = vmatpush1.bf16.msra.mxu1 %v2741_v34  ;;  %v2818_v34 = vld [vmem:[%s4024_s1 + $0x550] ss:$8 sps:$4 sm:$0xff]  }
  0x24   :  { %1990 = vmatpush1.bf16.msra.mxu0 %v2742_v35  ;;  %1779 = vmatprep.subr.bf16.mxu1 %v2743_v36  ;;  %v309_v35 = vld [vmem:[%s4025_s0 + $0xa0] sm:$0xff] }
  0x25   :  { %1991 = vmatprep.subr.bf16.mxu0 %v2745_v37  ;;  %v317_v36 = vld [vmem:[%s4025_s0 + $0xe0] sm:$0xff]  ;;  %v2351_v37 = vcombine.low %v305_v30, %v313_v31  ;;  %v2889_v30 = vld [vmem:[%s4024_s1 + $0x214] ss:$8 sps:$4 sm:$0xff]  }
  0x26   :  { %v2892_v31 = vld [vmem:[%s4024_s1 + $0x614] ss:$8 sps:$4 sm:$0xff]  }
  0x27   :  { %1780 = vmatpush1.bf16.msra.mxu1 %v2747_v38  ;;  %v2823_v38 = vld [vmem:[%s4024_s1 + $0x164] ss:$8 sps:$4 sm:$0xff]  }
  0x28   :  { %1992 = vmatpush1.bf16.msra.mxu0 %v2748_v39  ;;  %1781 = vmatprep.subr.bf16.mxu1 %v2749_v40  ;;  %v2360_v39 = vcombine.high %v309_v35, %v317_v36  ;;  %v2359_v40 = vcombine.low %v309_v35, %v317_v36  ;;  %v2887_v36 = vld [vmem:[%s4024_s1 + $0x210] ss:$8 sps:$4 sm:$0xff]  }
  0x29   :  { %1993 = vmatprep.subr.bf16.mxu0 %v2751_v41  ;;  %v2826_v41 = vld [vmem:[%s4024_s1 + $0x564] ss:$8 sps:$4 sm:$0xff]  }
  0x2b   :  { %1782 = vmatpush1.bf16.msra.mxu1 %v2753_v42  ;;  %v2821_v42 = vld [vmem:[%s4024_s1 + $0x160] ss:$8 sps:$4 sm:$0xff]  }
  0x2c   :  { %1994 = vmatpush1.bf16.msra.mxu0 %v2754_v43  ;;  %1783 = vmatprep.subr.bf16.mxu1 %v2755_v44  ;;  %v2824_v43 = vld [vmem:[%s4024_s1 + $0x560] ss:$8 sps:$4 sm:$0xff]  }
  0x2d   :  { %1995 = vmatprep.subr.bf16.mxu0 %v2757_v45  ;;  %v3397_v44 = vld [vmem:[%s4025_s0 + $0x8] sm:$0xff] }
  0x2e   :  { %v3402_v45 = vld [vmem:[%s4025_s0 + $0x48] sm:$0xff] }
  0x2f   :  { %1784 = vmatpush1.bf16.msra.mxu1 %v2759_v46  ;;  %v2829_v46 = vld [vmem:[%s4024_s1 + $0x174] ss:$8 sps:$4 sm:$0xff]   ;;  %v2338_v48 = vcombine.high %v3397_v44, %v3402_v45 }
  0x30   :  { %1996 = vmatpush1.bf16.msra.mxu0 %v2760_v47  ;;  %1785 = vmatprep.subr.bf16.mxu1 %v2761_v50  ;;  %v2832_v47 = vld [vmem:[%s4024_s1 + $0x574] ss:$8 sps:$4 sm:$0xff]   ;;  %v3420_v50 = vld [vmem:[%s4025_s0 + $0x68] sm:$0xff] }
  0x31   :  { %1997 = vmatprep.subr.bf16.mxu0 %v2763_v51  ;;  %v2827_v51 = vld [vmem:[%s4024_s1 + $0x170] ss:$8 sps:$4 sm:$0xff]   ;;  %v2346_v53 = vcombine.high %v3415_v49, %v3420_v50 }
  0x33   :  { %1786 = vmatpush1.bf16.msra.mxu1 %v2765_v56  ;;  %v2833_v56 = vld [vmem:[%s4024_s1 + $0x180] ss:$8 sps:$4 sm:$0xff]  }
  0x34   :  { %1998 = vmatpush1.bf16.msra.mxu0 %v2766_v57  ;;  %1787 = vmatprep.subr.bf16.mxu1 %v2767_v58  ;;  %v2836_v57 = vld [vmem:[%s4024_s1 + $0x580] ss:$8 sps:$4 sm:$0xff]   ;;  %v2841_v58 = vld [vmem:[%s4024_s1 + $0x194] ss:$8 sps:$4 sm:$0xff]  }
  0x35   :  { %1999 = vmatprep.subr.bf16.mxu0 %v2769_v59  ;;  %v2844_v59 = vld [vmem:[%s4024_s1 + $0x594] ss:$8 sps:$4 sm:$0xff]  }
  0x37   :  { %1788 = vmatpush1.bf16.msra.mxu1 %v2771_v60  ;;  %v2839_v60 = vld [vmem:[%s4024_s1 + $0x190] ss:$8 sps:$4 sm:$0xff]  }
  0x38   :  { %2000 = vmatpush1.bf16.msra.mxu0 %v2772_v61  ;;  %1789 = vmatprep.subr.bf16.mxu1 %v2773_v62  ;;  %v2842_v61 = vld [vmem:[%s4024_s1 + $0x590] ss:$8 sps:$4 sm:$0xff]   ;;  %v2847_v62 = vld [vmem:[%s4024_s1 + $0x1a4] ss:$8 sps:$4 sm:$0xff]  }
  0x39   :  { %2001 = vmatprep.subr.bf16.mxu0 %v2775_v63  ;;  %v2850_v63 = vld [vmem:[%s4024_s1 + $0x5a4] ss:$8 sps:$4 sm:$0xff]  }
  0x3b   :  { %1790 = vmatpush1.bf16.msra.mxu1 %v2777_v0  ;;  %v2845_v0 = vld [vmem:[%s4024_s1 + $0x1a0] ss:$8 sps:$4 sm:$0xff]  }
  0x3c   :  { %2002 = vmatpush1.bf16.msra.mxu0 %v2778_v1  ;;  %1791 = vmatprep.subr.bf16.mxu1 %v2779_v2  ;;  %v2848_v1 = vld [vmem:[%s4024_s1 + $0x5a0] ss:$8 sps:$4 sm:$0xff]   ;;  %v2853_v2 = vld [vmem:[%s4024_s1 + $0x1b4] ss:$8 sps:$4 sm:$0xff]  }
  0x3d   :  { %2003 = vmatprep.subr.bf16.mxu0 %v2781_v3  ;;  %v2856_v3 = vld [vmem:[%s4024_s1 + $0x5b4] ss:$8 sps:$4 sm:$0xff]  }
  0x3f   :  { %1792 = vmatpush1.bf16.msra.mxu1 %v2783_v4  ;;  %v2851_v4 = vld [vmem:[%s4024_s1 + $0x1b0] ss:$8 sps:$4 sm:$0xff]  }
  0x40   :  { %2004 = vmatpush1.bf16.msra.mxu0 %v2784_v5  ;;  %1814 = vmatprep.subr.bf16.mxu1 %v2787_v6  ;;  %v2854_v5 = vld [vmem:[%s4024_s1 + $0x5b0] ss:$8 sps:$4 sm:$0xff]   ;;  %v2859_v6 = vld [vmem:[%s4024_s1 + $0x1c4] ss:$8 sps:$4 sm:$0xff]  }
  0x41   :  { %2026 = vmatprep.subr.bf16.mxu0 %v2790_v7  ;;  %v2862_v7 = vld [vmem:[%s4024_s1 + $0x5c4] ss:$8 sps:$4 sm:$0xff]  }
  0x42   :  { %1794 = vmatmul.mubr.bf16.vlgmr.msra.gmra.mrb[0].mxu1 %v2335_v8  ;;  %v2857_v8 = vld [vmem:[%s4024_s1 + $0x1c0] ss:$8 sps:$4 sm:$0xff]  }
  0x43   :  { %2006 = vmatmul.mubr.bf16.vlgmr.msra.gmra.mrb[0].mxu0 %v2343_v10  ;;  %1815 = vmatpush1.bf16.msra.mxu1 %v2785_v9  ;;  %v2860_v9 = vld [vmem:[%s4024_s1 + $0x5c0] ss:$8 sps:$4 sm:$0xff]   ;;  %v2865_v10 = vld [vmem:[%s4024_s1 + $0x1d4] ss:$8 sps:$4 sm:$0xff]  }
  0x44   :  { %2027 = vmatpush1.bf16.msra.mxu0 %v2788_v11  ;;  %1816 = vmatprep.subr.bf16.mxu1 %v2793_v12  ;;  %v2868_v11 = vld [vmem:[%s4024_s1 + $0x5d4] ss:$8 sps:$4 sm:$0xff]   ;;  %v2863_v12 = vld [vmem:[%s4024_s1 + $0x1d0] ss:$8 sps:$4 sm:$0xff]  }
  0x45   :  { %2028 = vmatprep.subr.bf16.mxu0 %v2796_v13  ;;  %1803 = vmatprep.mubr.bf16.mxu1 %v2352_v33  ;;  %v2866_v13 = vld [vmem:[%s4024_s1 + $0x5d0] ss:$8 sps:$4 sm:$0xff]   ;;  %v318_v33 = vld [vmem:[%s4025_s0 + $0xe8] sm:$0xff] }
  0x46   :  { %2015 = vmatprep.mubr.bf16.mxu0 %v2360_v39  ;;  %v2898_v39 = vld [vmem:[%s4024_s1 + $0x624] ss:$8 sps:$4 sm:$0xff]  }
  0x47   :  { %1817 = vmatpush1.bf16.msra.mxu1 %v2791_v14  ;;  %v2871_v14 = vld [vmem:[%s4024_s1 + $0x1e4] ss:$8 sps:$4 sm:$0xff]  }
  0x48   :  { %2029 = vmatpush1.bf16.msra.mxu0 %v2794_v15  ;;  %1818 = vmatprep.subr.bf16.mxu1 %v2799_v16  ;;  %v2874_v15 = vld [vmem:[%s4024_s1 + $0x5e4] ss:$8 sps:$4 sm:$0xff]   ;;  %v2869_v16 = vld [vmem:[%s4024_s1 + $0x1e0] ss:$8 sps:$4 sm:$0xff]  }
  0x49   :  { %2030 = vmatprep.subr.bf16.mxu0 %v2802_v17  ;;  %v2872_v17 = vld [vmem:[%s4024_s1 + $0x5e0] ss:$8 sps:$4 sm:$0xff]  }
  0x4a   :  { %1804 = vmatmul.mubr.bf16.gmra.mrb[4].mxu1 %v2351_v37  ;;  %v2890_v37 = vld [vmem:[%s4024_s1 + $0x610] ss:$8 sps:$4 sm:$0xff]  }
  0x4b   :  { %1819 = vmatpush1.bf16.msra.mxu1 %v2797_v18  ;;  %2016 = vmatmul.mubr.bf16.gmra.mrb[4].mxu0 %v2359_v40  ;;  %v2877_v18 = vld [vmem:[%s4024_s1 + $0x1f4] ss:$8 sps:$4 sm:$0xff]   ;;  %v2893_v40 = vld [vmem:[%s4024_s1 + $0x220] ss:$8 sps:$4 sm:$0xff]  }
  0x4c   :  { %2031 = vmatpush1.bf16.msra.mxu0 %v2800_v19  ;;  %1820 = vmatprep.subr.bf16.mxu1 %v2805_v20  ;;  %v2880_v19 = vld [vmem:[%s4024_s1 + $0x5f4] ss:$8 sps:$4 sm:$0xff]   ;;  %v2875_v20 = vld [vmem:[%s4024_s1 + $0x1f0] ss:$8 sps:$4 sm:$0xff]  }
  0x4d   :  { %2032 = vmatprep.subr.bf16.mxu0 %v2808_v21  ;;  %1846 = vmatprep.mubr.bf16.mxu1 %v2338_v48  ;;  %v2878_v21 = vld [vmem:[%s4024_s1 + $0x5f0] ss:$8 sps:$4 sm:$0xff]   ;;  %v2901_v48 = vld [vmem:[%s4024_s1 + $0x234] ss:$8 sps:$4 sm:$0xff]  }
  0x4e   :  { %2058 = vmatprep.mubr.bf16.mxu0 %v2346_v53  ;;  %v2902_v53 = vld [vmem:[%s4024_s1 + $0x630] ss:$8 sps:$4 sm:$0xff]  }
  0x4f   :  { %1821 = vmatpush1.bf16.msra.mxu1 %v2803_v22  ;;  %v2883_v22 = vld [vmem:[%s4024_s1 + $0x204] ss:$8 sps:$4 sm:$0xff]  }
  0x50   :  { %2033 = vmatpush1.bf16.msra.mxu0 %v2806_v23  ;;  %1822 = vmatprep.subr.bf16.mxu1 %v2811_v24  ;;  %v2886_v23 = vld [vmem:[%s4024_s1 + $0x604] ss:$8 sps:$4 sm:$0xff]   ;;  %v2881_v24 = vld [vmem:[%s4024_s1 + $0x200] ss:$8 sps:$4 sm:$0xff]  }
  0x51   :  { %2034 = vmatprep.subr.bf16.mxu0 %v2814_v25  ;;  %v2884_v25 = vld [vmem:[%s4024_s1 + $0x600] ss:$8 sps:$4 sm:$0xff]  }
  0x53   :  { %1823 = vmatpush1.bf16.msra.mxu1 %v2809_v26  ;;  %v306_v26 = vld [vmem:[%s4025_s0 + $0x88] sm:$0xff] }
  0x54   :  { %2035 = vmatpush1.bf16.msra.mxu0 %v2812_v27  ;;  %1824 = vmatprep.subr.bf16.mxu1 %v2817_v28  ;;  %v2337_v27 = vcombine.low %v3397_v44, %v3402_v45  ;;  %v2345_v28 = vcombine.low %v3415_v49, %v3420_v50  ;;  %v3586_v45 = vld [vmem:[%s4025_s0 + $0x50] sm:$0xff] }
  0x55   :  { %2036 = vmatprep.subr.bf16.mxu0 %v2820_v29  ;;  %v314_v29 = vld [vmem:[%s4025_s0 + $0xc8] sm:$0xff]  ;;  %v2904_v49 = vld [vmem:[%s4024_s1 + $0x634] ss:$8 sps:$4 sm:$0xff]  }
  0x57   :  { %1825 = vmatpush1.bf16.msra.mxu1 %v2815_v32  ;;  %v310_v32 = vld [vmem:[%s4025_s0 + $0xa8] sm:$0xff] }
  0x58   :  { %2037 = vmatpush1.bf16.msra.mxu0 %v2818_v34  ;;  %1826 = vmatprep.subr.bf16.mxu1 %v2823_v38  ;;  %v2354_v34 = vcombine.high %v306_v26, %v314_v29  ;;  %v2362_v35 = vcombine.high %v310_v32, %v318_v33  ;;  %v2895_v38 = vld [vmem:[%s4024_s1 + $0x224] ss:$8 sps:$4 sm:$0xff]   ;;  %v2361_v44 = vcombine.low %v310_v32, %v318_v33  ;;  %v2965_v32 = vld [vmem:[%s4024_s1 + $0x2e0] ss:$8 sps:$4 sm:$0xff]  }
  0x59   :  { %2038 = vmatprep.subr.bf16.mxu0 %v2826_v41  ;;  %v2896_v41 = vld [vmem:[%s4024_s1 + $0x620] ss:$8 sps:$4 sm:$0xff]  }
  0x5a   :  { %v2968_v33 = vld [vmem:[%s4024_s1 + $0x6e0] ss:$8 sps:$4 sm:$0xff]  }
  0x5b   :  { %1827 = vmatpush1.bf16.msra.mxu1 %v2821_v42  ;;  %v3581_v42 = vld [vmem:[%s4025_s0 + $0x10] sm:$0xff] }
  0x5c   :  { %2039 = vmatpush1.bf16.msra.mxu0 %v2824_v43  ;;  %1828 = vmatprep.subr.bf16.mxu1 %v2829_v46  ;;  %v2353_v43 = vcombine.low %v306_v26, %v314_v29  ;;  %v3591_v46 = vld [vmem:[%s4025_s0 + $0x30] sm:$0xff]  ;;  %v2340_v50 = vcombine.high %v3581_v42, %v3586_v45 }
  0x5d   :  { %2040 = vmatprep.subr.bf16.mxu0 %v2832_v47  ;;  %v3596_v47 = vld [vmem:[%s4025_s0 + $0x70] sm:$0xff] }
  0x5e   :  { %v2961_v26 = vld [vmem:[%s4024_s1 + $0x2d4] ss:$8 sps:$4 sm:$0xff]   ;;  %v2962_v29 = vld [vmem:[%s4024_s1 + $0x6d0] ss:$8 sps:$4 sm:$0xff]  }
  0x5f   :  { %1829 = vmatpush1.bf16.msra.mxu1 %v2827_v51  ;;  %v2348_v51 = vcombine.high %v3591_v46, %v3596_v47 }
  0x60   :  { %2041 = vmatpush1.bf16.msra.mxu0 %v2830_v52  ;;  %1830 = vmatprep.subr.bf16.mxu1 %v2835_v54  ;;  %v2899_v52 = vld [vmem:[%s4024_s1 + $0x230] ss:$8 sps:$4 sm:$0xff]   ;;  %v2907_v54 = vld [vmem:[%s4024_s1 + $0x244] ss:$8 sps:$4 sm:$0xff]  }
  0x61   :  { %2042 = vmatprep.subr.bf16.mxu0 %v2838_v55  ;;  %v2910_v55 = vld [vmem:[%s4024_s1 + $0x644] ss:$8 sps:$4 sm:$0xff]  }
  0x63   :  { %1831 = vmatpush1.bf16.msra.mxu1 %v2833_v56  ;;  %v2905_v56 = vld [vmem:[%s4024_s1 + $0x240] ss:$8 sps:$4 sm:$0xff]  }
  0x64   :  { %2043 = vmatpush1.bf16.msra.mxu0 %v2836_v57  ;;  %1832 = vmatprep.subr.bf16.mxu1 %v2841_v58  ;;  %v2908_v57 = vld [vmem:[%s4024_s1 + $0x640] ss:$8 sps:$4 sm:$0xff]   ;;  %v2913_v58 = vld [vmem:[%s4024_s1 + $0x254] ss:$8 sps:$4 sm:$0xff]  }
  0x65   :  { %2044 = vmatprep.subr.bf16.mxu0 %v2844_v59  ;;  %v2916_v59 = vld [vmem:[%s4024_s1 + $0x654] ss:$8 sps:$4 sm:$0xff]  }
  0x67   :  { %1833 = vmatpush1.bf16.msra.mxu1 %v2839_v60  ;;  %v2911_v60 = vld [vmem:[%s4024_s1 + $0x250] ss:$8 sps:$4 sm:$0xff]  }
  0x68   :  { %2045 = vmatpush1.bf16.msra.mxu0 %v2842_v61  ;;  %1834 = vmatprep.subr.bf16.mxu1 %v2847_v62  ;;  %v2914_v61 = vld [vmem:[%s4024_s1 + $0x650] ss:$8 sps:$4 sm:$0xff]   ;;  %v2919_v62 = vld [vmem:[%s4024_s1 + $0x264] ss:$8 sps:$4 sm:$0xff]  }
  0x69   :  { %2046 = vmatprep.subr.bf16.mxu0 %v2850_v63  ;;  %v2922_v63 = vld [vmem:[%s4024_s1 + $0x664] ss:$8 sps:$4 sm:$0xff]  }
  0x6b   :  { %1835 = vmatpush1.bf16.msra.mxu1 %v2845_v0  ;;  %v2917_v0 = vld [vmem:[%s4024_s1 + $0x260] ss:$8 sps:$4 sm:$0xff]  }
  0x6c   :  { %2047 = vmatpush1.bf16.msra.mxu0 %v2848_v1  ;;  %1836 = vmatprep.subr.bf16.mxu1 %v2853_v2  ;;  %v2920_v1 = vld [vmem:[%s4024_s1 + $0x660] ss:$8 sps:$4 sm:$0xff]   ;;  %v2925_v2 = vld [vmem:[%s4024_s1 + $0x274] ss:$8 sps:$4 sm:$0xff]  }
  0x6d   :  { %2048 = vmatprep.subr.bf16.mxu0 %v2856_v3  ;;  %v2928_v3 = vld [vmem:[%s4024_s1 + $0x674] ss:$8 sps:$4 sm:$0xff]  }
  0x6f   :  { %1837 = vmatpush1.bf16.msra.mxu1 %v2851_v4  ;;  %v2923_v4 = vld [vmem:[%s4024_s1 + $0x270] ss:$8 sps:$4 sm:$0xff]  }
  0x70   :  { %2049 = vmatpush1.bf16.msra.mxu0 %v2854_v5  ;;  %1838 = vmatprep.subr.bf16.mxu1 %v2859_v6  ;;  %v2926_v5 = vld [vmem:[%s4024_s1 + $0x670] ss:$8 sps:$4 sm:$0xff]   ;;  %v2931_v6 = vld [vmem:[%s4024_s1 + $0x284] ss:$8 sps:$4 sm:$0xff]  }
  0x71   :  { %2050 = vmatprep.subr.bf16.mxu0 %v2862_v7  ;;  %v2934_v7 = vld [vmem:[%s4024_s1 + $0x684] ss:$8 sps:$4 sm:$0xff]  }
  0x73   :  { %1839 = vmatpush1.bf16.msra.mxu1 %v2857_v8  ;;  %v2929_v8 = vld [vmem:[%s4024_s1 + $0x280] ss:$8 sps:$4 sm:$0xff]  }
  0x74   :  { %2051 = vmatpush1.bf16.msra.mxu0 %v2860_v9  ;;  %1840 = vmatprep.subr.bf16.mxu1 %v2865_v10  ;;  %v2932_v9 = vld [vmem:[%s4024_s1 + $0x680] ss:$8 sps:$4 sm:$0xff]   ;;  %v2937_v10 = vld [vmem:[%s4024_s1 + $0x294] ss:$8 sps:$4 sm:$0xff]  }
  0x75   :  { %2052 = vmatprep.subr.bf16.mxu0 %v2868_v11  ;;  %v2940_v11 = vld [vmem:[%s4024_s1 + $0x694] ss:$8 sps:$4 sm:$0xff]  }
  0x77   :  { %1841 = vmatpush1.bf16.msra.mxu1 %v2863_v12  ;;  %v2935_v12 = vld [vmem:[%s4024_s1 + $0x290] ss:$8 sps:$4 sm:$0xff]  }
  0x78   :  { %2053 = vmatpush1.bf16.msra.mxu0 %v2866_v13  ;;  %1842 = vmatprep.subr.bf16.mxu1 %v2871_v14  ;;  %v2938_v13 = vld [vmem:[%s4024_s1 + $0x690] ss:$8 sps:$4 sm:$0xff]   ;;  %v2943_v14 = vld [vmem:[%s4024_s1 + $0x2a4] ss:$8 sps:$4 sm:$0xff]  }
  0x79   :  { %2054 = vmatprep.subr.bf16.mxu0 %v2874_v15  ;;  %v2946_v15 = vld [vmem:[%s4024_s1 + $0x6a4] ss:$8 sps:$4 sm:$0xff]  }
  0x7b   :  { %1843 = vmatpush1.bf16.msra.mxu1 %v2869_v16  ;;  %v2941_v16 = vld [vmem:[%s4024_s1 + $0x2a0] ss:$8 sps:$4 sm:$0xff]  }
  0x7c   :  { %2055 = vmatpush1.bf16.msra.mxu0 %v2872_v17  ;;  %1844 = vmatprep.subr.bf16.mxu1 %v2877_v18  ;;  %v2944_v17 = vld [vmem:[%s4024_s1 + $0x6a0] ss:$8 sps:$4 sm:$0xff]   ;;  %v2949_v18 = vld [vmem:[%s4024_s1 + $0x2b4] ss:$8 sps:$4 sm:$0xff]  }
  0x7d   :  { %2056 = vmatprep.subr.bf16.mxu0 %v2880_v19  ;;  %v2952_v19 = vld [vmem:[%s4024_s1 + $0x6b4] ss:$8 sps:$4 sm:$0xff]  }
  0x7f   :  { %1845 = vmatpush1.bf16.msra.mxu1 %v2875_v20  ;;  %v2947_v20 = vld [vmem:[%s4024_s1 + $0x2b0] ss:$8 sps:$4 sm:$0xff]  }
  0x80   :  { %2057 = vmatpush1.bf16.msra.mxu0 %v2878_v21  ;;  %1867 = vmatprep.subr.bf16.mxu1 %v2883_v22  ;;  %v2950_v21 = vld [vmem:[%s4024_s1 + $0x6b0] ss:$8 sps:$4 sm:$0xff]   ;;  %v2955_v22 = vld [vmem:[%s4024_s1 + $0x2c4] ss:$8 sps:$4 sm:$0xff]  }
  0x81   :  { %2079 = vmatprep.subr.bf16.mxu0 %v2886_v23  ;;  %v2958_v23 = vld [vmem:[%s4024_s1 + $0x6c4] ss:$8 sps:$4 sm:$0xff]  }
  0x82   :  { %1847 = vmatmul.mubr.bf16.vlgmr.msra.gmra.mrb[0].mxu1 %v2337_v27  ;;  %v2964_v27 = vld [vmem:[%s4024_s1 + $0x6d4] ss:$8 sps:$4 sm:$0xff]  }
  0x83   :  { %2059 = vmatmul.mubr.bf16.vlgmr.msra.gmra.mrb[0].mxu0 %v2345_v28  ;;  %1868 = vmatpush1.bf16.msra.mxu1 %v2881_v24  ;;  %v2953_v24 = vld [vmem:[%s4024_s1 + $0x2c0] ss:$8 sps:$4 sm:$0xff]   ;;  %v2959_v28 = vld [vmem:[%s4024_s1 + $0x2d0] ss:$8 sps:$4 sm:$0xff]  }
  0x84   :  { %2080 = vmatpush1.bf16.msra.mxu0 %v2884_v25  ;;  %1869 = vmatprep.subr.bf16.mxu1 %v2889_v30  ;;  %v2956_v25 = vld [vmem:[%s4024_s1 + $0x6c0] ss:$8 sps:$4 sm:$0xff]   ;;  %v2967_v30 = vld [vmem:[%s4024_s1 + $0x2e4] ss:$8 sps:$4 sm:$0xff]  }
  0x85   :  { %2081 = vmatprep.subr.bf16.mxu0 %v2892_v31  ;;  %1856 = vmatprep.mubr.bf16.mxu1 %v2354_v34  ;;  %v2970_v31 = vld [vmem:[%s4024_s1 + $0x6e4] ss:$8 sps:$4 sm:$0xff]   ;;  %v2973_v34 = vld [vmem:[%s4024_s1 + $0x2f4] ss:$8 sps:$4 sm:$0xff]  }
  0x86   :  { %2068 = vmatprep.mubr.bf16.mxu0 %v2362_v35  ;;  %v2976_v35 = vld [vmem:[%s4024_s1 + $0x6f4] ss:$8 sps:$4 sm:$0xff]  }
  0x87   :  { %1870 = vmatpush1.bf16.msra.mxu1 %v2887_v36  ;;  %v2971_v36 = vld [vmem:[%s4024_s1 + $0x2f0] ss:$8 sps:$4 sm:$0xff]  }
  0x88   :  { %2082 = vmatpush1.bf16.msra.mxu0 %v2890_v37  ;;  %1871 = vmatprep.subr.bf16.mxu1 %v2895_v38  ;;  %v2974_v37 = vld [vmem:[%s4024_s1 + $0x6f0] ss:$8 sps:$4 sm:$0xff]   ;;  %v2979_v38 = vld [vmem:[%s4024_s1 + $0x304] ss:$8 sps:$4 sm:$0xff]  }
  0x89   :  { %2083 = vmatprep.subr.bf16.mxu0 %v2898_v39  ;;  %v2982_v39 = vld [vmem:[%s4024_s1 + $0x704] ss:$8 sps:$4 sm:$0xff]  }
  0x8a   :  { %1857 = vmatmul.mubr.bf16.gmra.mrb[4].mxu1 %v2353_v43  ;;  %v2347_v43 = vcombine.low %v3591_v46, %v3596_v47  ;;  %v2985_v46 = vld [vmem:[%s4024_s1 + $0x314] ss:$8 sps:$4 sm:$0xff]  }
  0x8b   :  { %2069 = vmatmul.mubr.bf16.gmra.mrb[4].mxu0 %v2361_v44  ;;  %1872 = vmatpush1.bf16.msra.mxu1 %v2893_v40  ;;  %v307_v40 = vld [vmem:[%s4025_s0 + $0x90] sm:$0xff] }
  0x8c   :  { %2084 = vmatpush1.bf16.msra.mxu0 %v2896_v41  ;;  %1873 = vmatprep.subr.bf16.mxu1 %v2901_v48  ;;  %v2339_v41 = vcombine.low %v3581_v42, %v3586_v45  ;;  %v315_v44 = vld [vmem:[%s4025_s0 + $0xd0] sm:$0xff]  ;;  %v2977_v42 = vld [vmem:[%s4024_s1 + $0x300] ss:$8 sps:$4 sm:$0xff]  }
  0x8d   :  { %2085 = vmatprep.subr.bf16.mxu0 %v2904_v49  ;;  %1899 = vmatprep.mubr.bf16.mxu1 %v2340_v50  ;;  %v311_v48 = vld [vmem:[%s4025_s0 + $0xb0] sm:$0xff]  ;;  %v2980_v45 = vld [vmem:[%s4024_s1 + $0x700] ss:$8 sps:$4 sm:$0xff]   ;;  %v2356_v50 = vcombine.high %v307_v40, %v315_v44 }
  0x8e   :  { %2111 = vmatprep.mubr.bf16.mxu0 %v2348_v51  ;;  %v319_v49 = vld [vmem:[%s4025_s0 + $0xf0] sm:$0xff] }
  0x8f   :  { %1874 = vmatpush1.bf16.msra.mxu1 %v2899_v52  ;;  %v2988_v47 = vld [vmem:[%s4024_s1 + $0x714] ss:$8 sps:$4 sm:$0xff]   ;;  %v2364_v51 = vcombine.high %v311_v48, %v319_v49  ;;  %v2983_v52 = vld [vmem:[%s4024_s1 + $0x310] ss:$8 sps:$4 sm:$0xff]  }
  0x90   :  { %2086 = vmatpush1.bf16.msra.mxu0 %v2902_v53  ;;  %1875 = vmatprep.subr.bf16.mxu1 %v2907_v54  ;;  %v2986_v53 = vld [vmem:[%s4024_s1 + $0x710] ss:$8 sps:$4 sm:$0xff]   ;;  %v2991_v54 = vld [vmem:[%s4024_s1 + $0x324] ss:$8 sps:$4 sm:$0xff]  }
  0x91   :  { %2087 = vmatprep.subr.bf16.mxu0 %v2910_v55  ;;  %v2994_v55 = vld [vmem:[%s4024_s1 + $0x724] ss:$8 sps:$4 sm:$0xff]  }
  0x93   :  { %1876 = vmatpush1.bf16.msra.mxu1 %v2905_v56  ;;  %v3807_v56 = vld [vmem:[%s4025_s0 + $0x18] sm:$0xff] }
  0x94   :  { %2088 = vmatpush1.bf16.msra.mxu0 %v2908_v57  ;;  %1877 = vmatprep.subr.bf16.mxu1 %v2913_v58  ;;  %v2355_v57 = vcombine.low %v307_v40, %v315_v44  ;;  %v2363_v58 = vcombine.low %v311_v48, %v319_v49  ;;  %v3049_v40 = vld [vmem:[%s4024_s1 + $0x3c0] ss:$8 sps:$4 sm:$0xff]   ;;  %v3060_v44 = vld [vmem:[%s4024_s1 + $0x7d4] ss:$8 sps:$4 sm:$0xff]   ;;  %v3055_v48 = vld [vmem:[%s4024_s1 + $0x3d0] ss:$8 sps:$4 sm:$0xff]  }
  0x95   :  { %2089 = vmatprep.subr.bf16.mxu0 %v2916_v59  ;;  %v3812_v59 = vld [vmem:[%s4025_s0 + $0x58] sm:$0xff] }
  0x96   :  { %v3058_v49 = vld [vmem:[%s4024_s1 + $0x7d0] ss:$8 sps:$4 sm:$0xff]  }
  0x97   :  { %1878 = vmatpush1.bf16.msra.mxu1 %v2911_v60  ;;  %v3817_v60 = vld [vmem:[%s4025_s0 + $0x38] sm:$0xff] }
  0x98   :  { %2090 = vmatpush1.bf16.msra.mxu0 %v2914_v61  ;;  %1879 = vmatprep.subr.bf16.mxu1 %v2919_v62  ;;  %v3822_v61 = vld [vmem:[%s4025_s0 + $0x78] sm:$0xff]  ;;  %v2989_v62 = vld [vmem:[%s4024_s1 + $0x320] ss:$8 sps:$4 sm:$0xff]  }
  0x99   :  { %2091 = vmatprep.subr.bf16.mxu0 %v2922_v63  ;;  %v2992_v63 = vld [vmem:[%s4024_s1 + $0x720] ss:$8 sps:$4 sm:$0xff]  }
  0x9b   :  { %1880 = vmatpush1.bf16.msra.mxu1 %v2917_v0  ;;  %v2997_v0 = vld [vmem:[%s4024_s1 + $0x334] ss:$8 sps:$4 sm:$0xff]  }
  0x9c   :  { %2092 = vmatpush1.bf16.msra.mxu0 %v2920_v1  ;;  %1881 = vmatprep.subr.bf16.mxu1 %v2925_v2  ;;  %v3000_v1 = vld [vmem:[%s4024_s1 + $0x734] ss:$8 sps:$4 sm:$0xff]   ;;  %v2342_v2 = vcombine.high %v3807_v56, %v3812_v59 }
  0x9d   :  { %2093 = vmatprep.subr.bf16.mxu0 %v2928_v3  ;;  %v2350_v3 = vcombine.high %v3817_v60, %v3822_v61 }
  0x9f   :  { %1882 = vmatpush1.bf16.msra.mxu1 %v2923_v4  ;;  %v2995_v4 = vld [vmem:[%s4024_s1 + $0x330] ss:$8 sps:$4 sm:$0xff]  }
  0xa0   :  { %2094 = vmatpush1.bf16.msra.mxu0 %v2926_v5  ;;  %1883 = vmatprep.subr.bf16.mxu1 %v2931_v6  ;;  %v2998_v5 = vld [vmem:[%s4024_s1 + $0x730] ss:$8 sps:$4 sm:$0xff]   ;;  %v3003_v6 = vld [vmem:[%s4024_s1 + $0x344] ss:$8 sps:$4 sm:$0xff]  }
  0xa1   :  { %2095 = vmatprep.subr.bf16.mxu0 %v2934_v7  ;;  %v3006_v7 = vld [vmem:[%s4024_s1 + $0x744] ss:$8 sps:$4 sm:$0xff]  }
  0xa3   :  { %1884 = vmatpush1.bf16.msra.mxu1 %v2929_v8  ;;  %v3001_v8 = vld [vmem:[%s4024_s1 + $0x340] ss:$8 sps:$4 sm:$0xff]  }
  0xa4   :  { %2096 = vmatpush1.bf16.msra.mxu0 %v2932_v9  ;;  %1885 = vmatprep.subr.bf16.mxu1 %v2937_v10  ;;  %v3004_v9 = vld [vmem:[%s4024_s1 + $0x740] ss:$8 sps:$4 sm:$0xff]   ;;  %v3009_v10 = vld [vmem:[%s4024_s1 + $0x354] ss:$8 sps:$4 sm:$0xff]  }
  0xa5   :  { %2097 = vmatprep.subr.bf16.mxu0 %v2940_v11  ;;  %v3012_v11 = vld [vmem:[%s4024_s1 + $0x754] ss:$8 sps:$4 sm:$0xff]  }
  0xa7   :  { %1886 = vmatpush1.bf16.msra.mxu1 %v2935_v12  ;;  %v3007_v12 = vld [vmem:[%s4024_s1 + $0x350] ss:$8 sps:$4 sm:$0xff]  }
  0xa8   :  { %2098 = vmatpush1.bf16.msra.mxu0 %v2938_v13  ;;  %1887 = vmatprep.subr.bf16.mxu1 %v2943_v14  ;;  %v3010_v13 = vld [vmem:[%s4024_s1 + $0x750] ss:$8 sps:$4 sm:$0xff]   ;;  %v3015_v14 = vld [vmem:[%s4024_s1 + $0x364] ss:$8 sps:$4 sm:$0xff]  }
  0xa9   :  { %2099 = vmatprep.subr.bf16.mxu0 %v2946_v15  ;;  %v3018_v15 = vld [vmem:[%s4024_s1 + $0x764] ss:$8 sps:$4 sm:$0xff]  }
  0xab   :  { %1888 = vmatpush1.bf16.msra.mxu1 %v2941_v16  ;;  %v3013_v16 = vld [vmem:[%s4024_s1 + $0x360] ss:$8 sps:$4 sm:$0xff]  }
  0xac   :  { %2100 = vmatpush1.bf16.msra.mxu0 %v2944_v17  ;;  %1889 = vmatprep.subr.bf16.mxu1 %v2949_v18  ;;  %v3016_v17 = vld [vmem:[%s4024_s1 + $0x760] ss:$8 sps:$4 sm:$0xff]   ;;  %v3021_v18 = vld [vmem:[%s4024_s1 + $0x374] ss:$8 sps:$4 sm:$0xff]  }
  0xad   :  { %2101 = vmatprep.subr.bf16.mxu0 %v2952_v19  ;;  %v3024_v19 = vld [vmem:[%s4024_s1 + $0x774] ss:$8 sps:$4 sm:$0xff]  }
  0xaf   :  { %1890 = vmatpush1.bf16.msra.mxu1 %v2947_v20  ;;  %v3019_v20 = vld [vmem:[%s4024_s1 + $0x370] ss:$8 sps:$4 sm:$0xff]  }
  0xb0   :  { %2102 = vmatpush1.bf16.msra.mxu0 %v2950_v21  ;;  %1891 = vmatprep.subr.bf16.mxu1 %v2955_v22  ;;  %v3022_v21 = vld [vmem:[%s4024_s1 + $0x770] ss:$8 sps:$4 sm:$0xff]   ;;  %v3027_v22 = vld [vmem:[%s4024_s1 + $0x384] ss:$8 sps:$4 sm:$0xff]  }
  0xb1   :  { %2103 = vmatprep.subr.bf16.mxu0 %v2958_v23  ;;  %v3030_v23 = vld [vmem:[%s4024_s1 + $0x784] ss:$8 sps:$4 sm:$0xff]  }
  0xb3   :  { %1892 = vmatpush1.bf16.msra.mxu1 %v2953_v24  ;;  %v3025_v24 = vld [vmem:[%s4024_s1 + $0x380] ss:$8 sps:$4 sm:$0xff]  }
  0xb4   :  { %2104 = vmatpush1.bf16.msra.mxu0 %v2956_v25  ;;  %1893 = vmatprep.subr.bf16.mxu1 %v2961_v26  ;;  %v3028_v25 = vld [vmem:[%s4024_s1 + $0x780] ss:$8 sps:$4 sm:$0xff]   ;;  %v3033_v26 = vld [vmem:[%s4024_s1 + $0x394] ss:$8 sps:$4 sm:$0xff]  }
  0xb5   :  { %2105 = vmatprep.subr.bf16.mxu0 %v2964_v27  ;;  %v3036_v27 = vld [vmem:[%s4024_s1 + $0x794] ss:$8 sps:$4 sm:$0xff]  }
  0xb7   :  { %1894 = vmatpush1.bf16.msra.mxu1 %v2959_v28  ;;  %v3031_v28 = vld [vmem:[%s4024_s1 + $0x390] ss:$8 sps:$4 sm:$0xff]  }
  0xb8   :  { %2106 = vmatpush1.bf16.msra.mxu0 %v2962_v29  ;;  %1895 = vmatprep.subr.bf16.mxu1 %v2967_v30  ;;  %v3034_v29 = vld [vmem:[%s4024_s1 + $0x790] ss:$8 sps:$4 sm:$0xff]   ;;  %v3039_v30 = vld [vmem:[%s4024_s1 + $0x3a4] ss:$8 sps:$4 sm:$0xff]  }
  0xb9   :  { %2107 = vmatprep.subr.bf16.mxu0 %v2970_v31  ;;  %v3042_v31 = vld [vmem:[%s4024_s1 + $0x7a4] ss:$8 sps:$4 sm:$0xff]  }
  0xbb   :  { %1896 = vmatpush1.bf16.msra.mxu1 %v2965_v32  ;;  %v3037_v32 = vld [vmem:[%s4024_s1 + $0x3a0] ss:$8 sps:$4 sm:$0xff]  }
  0xbc   :  { %2108 = vmatpush1.bf16.msra.mxu0 %v2968_v33  ;;  %1897 = vmatprep.subr.bf16.mxu1 %v2973_v34  ;;  %v3040_v33 = vld [vmem:[%s4024_s1 + $0x7a0] ss:$8 sps:$4 sm:$0xff]   ;;  %v3045_v34 = vld [vmem:[%s4024_s1 + $0x3b4] ss:$8 sps:$4 sm:$0xff]  }
  0xbd   :  { %2109 = vmatprep.subr.bf16.mxu0 %v2976_v35  ;;  %v3048_v35 = vld [vmem:[%s4024_s1 + $0x7b4] ss:$8 sps:$4 sm:$0xff]  }
  0xbf   :  { %1898 = vmatpush1.bf16.msra.mxu1 %v2971_v36  ;;  %v3043_v36 = vld [vmem:[%s4024_s1 + $0x3b0] ss:$8 sps:$4 sm:$0xff]  }
  0xc0   :  { %2110 = vmatpush1.bf16.msra.mxu0 %v2974_v37  ;;  %1920 = vmatprep.subr.bf16.mxu1 %v2979_v38  ;;  %v3046_v37 = vld [vmem:[%s4024_s1 + $0x7b0] ss:$8 sps:$4 sm:$0xff]   ;;  %v3051_v38 = vld [vmem:[%s4024_s1 + $0x3c4] ss:$8 sps:$4 sm:$0xff]  }
  0xc1   :  { %2132 = vmatprep.subr.bf16.mxu0 %v2982_v39  ;;  %v3054_v39 = vld [vmem:[%s4024_s1 + $0x7c4] ss:$8 sps:$4 sm:$0xff]  }
  0xc2   :  { %1900 = vmatmul.mubr.bf16.vlgmr.msra.gmra.mrb[0].mxu1 %v2339_v41  ;;  %v3052_v41 = vld [vmem:[%s4024_s1 + $0x7c0] ss:$8 sps:$4 sm:$0xff]  }
  0xc3   :  { %2112 = vmatmul.mubr.bf16.vlgmr.msra.gmra.mrb[0].mxu0 %v2347_v43  ;;  %1921 = vmatpush1.bf16.msra.mxu1 %v2977_v42  ;;  %v3057_v43 = vld [vmem:[%s4024_s1 + $0x3d4] ss:$8 sps:$4 sm:$0xff]   ;;  %v3063_v42 = vld [vmem:[%s4024_s1 + $0x3e4] ss:$8 sps:$4 sm:$0xff]  }
  0xc4   :  { %2133 = vmatpush1.bf16.msra.mxu0 %v2980_v45  ;;  %1922 = vmatprep.subr.bf16.mxu1 %v2985_v46  ;;  %v3066_v45 = vld [vmem:[%s4024_s1 + $0x7e4] ss:$8 sps:$4 sm:$0xff]   ;;  %v3061_v46 = vld [vmem:[%s4024_s1 + $0x3e0] ss:$8 sps:$4 sm:$0xff]  }
  0xc5   :  { %2134 = vmatprep.subr.bf16.mxu0 %v2988_v47  ;;  %1909 = vmatprep.mubr.bf16.mxu1 %v2356_v50  ;;  %v3064_v47 = vld [vmem:[%s4024_s1 + $0x7e0] ss:$8 sps:$4 sm:$0xff]   ;;  %v3069_v50 = vld [vmem:[%s4024_s1 + $0x3f4] ss:$8 sps:$4 sm:$0xff]  }
  0xc6   :  { %2121 = vmatprep.mubr.bf16.mxu0 %v2364_v51  ;;  %v3072_v51 = vld [vmem:[%s4024_s1 + $0x7f4] ss:$8 sps:$4 sm:$0xff]  }
  0xc7   :  { %1923 = vmatpush1.bf16.msra.mxu1 %v2983_v52  ;;  %v3067_v52 = vld [vmem:[%s4024_s1 + $0x3f0] ss:$8 sps:$4 sm:$0xff]  }
  0xc8   :  { %2135 = vmatpush1.bf16.msra.mxu0 %v2986_v53  ;;  %1924 = vmatprep.subr.bf16.mxu1 %v2991_v54  ;;  %v3070_v53 = vld [vmem:[%s4024_s1 + $0x7f0] ss:$8 sps:$4 sm:$0xff]  }
  0xc9   :  { %2136 = vmatprep.subr.bf16.mxu0 %v2994_v55  ;;  %v308_v54 = vld [vmem:[%s4025_s0 + $0x98] sm:$0xff] }
  0xca   :  { %1910 = vmatmul.mubr.bf16.gmra.mrb[4].mxu1 %v2355_v57  ;;  %v316_v55 = vld [vmem:[%s4025_s0 + $0xd8] sm:$0xff] }
  0xcb   :  { %2122 = vmatmul.mubr.bf16.gmra.mrb[4].mxu0 %v2363_v58  ;;  %1925 = vmatpush1.bf16.msra.mxu1 %v2989_v62  ;;  %v312_v57 = vld [vmem:[%s4025_s0 + $0xb8] sm:$0xff]  ;;  %v2341_v62 = vcombine.low %v3807_v56, %v3812_v59 }
  0xcc   :  { %2137 = vmatpush1.bf16.msra.mxu0 %v2992_v63  ;;  %1926 = vmatprep.subr.bf16.mxu1 %v2997_v0  ;;  %v320_v58 = vld [vmem:[%s4025_s0 + $0xf8] sm:$0xff]  ;;  %v2349_v63 = vcombine.low %v3817_v60, %v3822_v61  ;;  %v2358_v0 = vcombine.high %v308_v54, %v316_v55 }
  0xcd   :  { %2138 = vmatprep.subr.bf16.mxu0 %v3000_v1  ;;  %1952 = vmatprep.mubr.bf16.mxu1 %v2342_v2  ;;  %v2366_v1 = vcombine.high %v312_v57, %v320_v58  ;;  %v2357_v2 = vcombine.low %v308_v54, %v316_v55  ;;  %v2236_v55 = vlaneseq }
  0xce   :  { %2164 = vmatprep.mubr.bf16.mxu0 %v2350_v3  ;;  %v2365_v3 = vcombine.low %v312_v57, %v320_v58 }
  0xcf   :  { %1927 = vmatpush1.bf16.msra.mxu1 %v2995_v4  ;;  %vm2250_vm0 = vcmp.lt.s32.totalorder %v2236_v55, 256 }
  0xd0   :  { %2139 = vmatpush1.bf16.msra.mxu0 %v2998_v5  ;;  %1928 = vmatprep.subr.bf16.mxu1 %v3003_v6 }
  0xd1   :  { %2140 = vmatprep.subr.bf16.mxu0 %v3006_v7 }
  0xd3   :  { %1929 = vmatpush1.bf16.msra.mxu1 %v3001_v8 }
  0xd4   :  { %2141 = vmatpush1.bf16.msra.mxu0 %v3004_v9  ;;  %1930 = vmatprep.subr.bf16.mxu1 %v3009_v10 }
  0xd5   :  { %2142 = vmatprep.subr.bf16.mxu0 %v3012_v11 }
  0xd7   :  { %1931 = vmatpush1.bf16.msra.mxu1 %v3007_v12 }
  0xd8   :  { %2143 = vmatpush1.bf16.msra.mxu0 %v3010_v13  ;;  %1932 = vmatprep.subr.bf16.mxu1 %v3015_v14 }
  0xd9   :  { %2144 = vmatprep.subr.bf16.mxu0 %v3018_v15 }
  0xdb   :  { %1933 = vmatpush1.bf16.msra.mxu1 %v3013_v16 }
  0xdc   :  { %2145 = vmatpush1.bf16.msra.mxu0 %v3016_v17  ;;  %1934 = vmatprep.subr.bf16.mxu1 %v3021_v18 }
  0xdd   :  { %2146 = vmatprep.subr.bf16.mxu0 %v3024_v19 }
  0xdf   :  { %1935 = vmatpush1.bf16.msra.mxu1 %v3019_v20 }
  0xe0   :  { %2147 = vmatpush1.bf16.msra.mxu0 %v3022_v21  ;;  %1936 = vmatprep.subr.bf16.mxu1 %v3027_v22 }
  0xe1   :  { %2148 = vmatprep.subr.bf16.mxu0 %v3030_v23 }
  0xe3   :  { %1937 = vmatpush1.bf16.msra.mxu1 %v3025_v24 }
  0xe4   :  { %2149 = vmatpush1.bf16.msra.mxu0 %v3028_v25  ;;  %1938 = vmatprep.subr.bf16.mxu1 %v3033_v26 }
  0xe5   :  { %2150 = vmatprep.subr.bf16.mxu0 %v3036_v27 }
  0xe7   :  { %1939 = vmatpush1.bf16.msra.mxu1 %v3031_v28 }
  0xe8   :  { %2151 = vmatpush1.bf16.msra.mxu0 %v3034_v29  ;;  %1940 = vmatprep.subr.bf16.mxu1 %v3039_v30 }
  0xe9   :  { %2152 = vmatprep.subr.bf16.mxu0 %v3042_v31 }
  0xeb   :  { %1941 = vmatpush1.bf16.msra.mxu1 %v3037_v32 }
  0xec   :  { %2153 = vmatpush1.bf16.msra.mxu0 %v3040_v33  ;;  %1942 = vmatprep.subr.bf16.mxu1 %v3045_v34 }
  0xed   :  { %2154 = vmatprep.subr.bf16.mxu0 %v3048_v35 }
  0xef   :  { %1943 = vmatpush1.bf16.msra.mxu1 %v3043_v36 }
  0xf0   :  { %2155 = vmatpush1.bf16.msra.mxu0 %v3046_v37  ;;  %1944 = vmatprep.subr.bf16.mxu1 %v3051_v38 }
  0xf1   :  { %2156 = vmatprep.subr.bf16.mxu0 %v3054_v39 }
  0xf3   :  { %1945 = vmatpush1.bf16.msra.mxu1 %v3049_v40 }
  0xf4   :  { %2157 = vmatpush1.bf16.msra.mxu0 %v3052_v41  ;;  %1946 = vmatprep.subr.bf16.mxu1 %v3057_v43 }
  0xf5   :  { %2158 = vmatprep.subr.bf16.mxu0 %v3060_v44 }
  0xf7   :  { %1947 = vmatpush1.bf16.msra.mxu1 %v3055_v48 }
  0xf8   :  { %2159 = vmatpush1.bf16.msra.mxu0 %v3058_v49  ;;  %1948 = vmatprep.subr.bf16.mxu1 %v3063_v42 }
  0xf9   :  { %2160 = vmatprep.subr.bf16.mxu0 %v3066_v45 }
  0xfb   :  { %1949 = vmatpush1.bf16.msra.mxu1 %v3061_v46 }
  0xfc   :  { %2161 = vmatpush1.bf16.msra.mxu0 %v3064_v47  ;;  %1950 = vmatprep.subr.bf16.mxu1 %v3069_v50 }
  0xfd   :  { %2162 = vmatprep.subr.bf16.mxu0 %v3072_v51 }
  0xff   :  { %1951 = vmatpush1.bf16.msra.mxu1 %v3067_v52 }
 0x100   :  { %2163 = vmatpush1.bf16.msra.mxu0 %v3070_v53  ;;  %v3073_v53 = vmov 1966171168  }
 0x101   :  { %v2234_v54 = vunpack.c.l.s4 %v3073_v53 }
 0x102   :  { %1953 = vmatmul.mubr.bf16.vlgmr.msra.gmra.mrb[0].mxu1 %v2341_v62 }
 0x103   :  { %2165 = vmatmul.mubr.bf16.vlgmr.msra.gmra.mrb[0].mxu0 %v2349_v63  ;;  %1962 = vmatprep.mubr.bf16.mxu1 %v2358_v0 }
 0x104   :  { %2174 = vmatprep.mubr.bf16.mxu0 %v2366_v1 }
 0x10a   :  { %1963 = vmatmul.mubr.bf16.gmra.mrb[4].mxu1 %v2357_v2 }
 0x10b   :  { %2175 = vmatmul.mubr.bf16.gmra.mrb[4].mxu0 %v2365_v3 }
 0x1d5   :  { %v1954_v4 = vpop.f32.mrb[0].mxu1 }
 0x1d6   :  { %v2166_v5 = vpop.f32.mrb[0].mxu0  ;;  %v1956_v7 = vpop.f32.mrb[1].mxu1 }
 0x1d7   :  { %v2632_v6 = vadd.f32 %v2166_v5, %v1954_v4  ;;  %v2168_v56 = vpop.f32.mrb[1].mxu0  ;;  %v1958_v8 = vpop.f32.mrb[2].mxu1  ;;  %v2235_v4 = vunpack.c.0.s8 %v2234_v54  ;;  %v2237_v5 = vshrl.u32 %v2236_v55, 7 }
 0x1d8   :  { %v2633_v59 = vadd.f32 %v2168_v56, %v1956_v7  ;;  %v2170_v60 = vpop.f32.mrb[2].mxu0  ;;  %v1960_v9 = vpop.f32.mrb[3].mxu1 }
 0x1d9   :  { %v2634_v61 = vadd.f32 %v2170_v60, %v1958_v8  ;;  %v2172_v10 = vpop.f32.mrb[3].mxu0  ;;  %v2253_v13 = vmul.f32 %v2632_v6, %v2632_v6 }
 0x1da   :  { %v2628_v11 = vpack.c.bf16 %v2633_v59, %v2632_v6  ;;  %v2635_v12 = vadd.f32 %v2172_v10, %v1960_v9  ;;  %v2254_v16 = vmul.f32 %v2633_v59, %v2633_v59  ;;  %v2238_v10 = vsub.s32 %v2235_v4, %v2237_v5 }
 0x1db   :  { %v2212_v14 = vadd.f32 %v2634_v61, %v2632_v6  ;;  %v2255_v15 = vmul.f32 %v2634_v61, %v2634_v61 }
 0x1dc   :  { %2323 = vst [vmem:[%s4026_s2] sm:$0xff] %v2628_v11  ;;  %v2221_v17 = vadd.f32 %v2635_v12, %v2633_v59  ;;  %v2256_v18 = vmul.f32 %v2635_v12, %v2635_v12  ;;  %v2629_v19 = vpack.c.bf16 %v2635_v12, %v2634_v61 }
 0x1dd   :  { %v2261_v20 = vadd.f32 %v2255_v15, %v2253_v13  ;;  %v1964_v22 = vpop.f32.mrb[4].mxu1 }
 0x1de   :  { %v2270_v21 = vadd.f32 %v2256_v18, %v2254_v16  ;;  %2324 = vst [vmem:[%s4026_s2 + $0x8] sm:$0xff] %v2629_v19  ;;  %v2176_v23 = vpop.f32.mrb[4].mxu0  ;;  %v1966_v25 = vpop.f32.mrb[5].mxu1 }
 0x1df   :  { %v2636_v24 = vadd.f32 %v2176_v23, %v1964_v22  ;;  %v2178_v26 = vpop.f32.mrb[5].mxu0  ;;  %v1968_v28 = vpop.f32.mrb[6].mxu1 }
 0x1e0   :  { %v2637_v27 = vadd.f32 %v2178_v26, %v1966_v25  ;;  %v2180_v29 = vpop.f32.mrb[6].mxu0  ;;  %v1970_v33 = vpop.f32.mrb[7].mxu1 }
 0x1e1   :  { %v2213_v30 = vadd.f32 %v2636_v24, %v2212_v14  ;;  %v2257_v31 = vmul.f32 %v2636_v24, %v2636_v24  ;;  %v2638_v32 = vadd.f32 %v2180_v29, %v1968_v28  ;;  %v2182_v34 = vpop.f32.mrb[7].mxu0 }
 0x1e2   :  { %v2222_v35 = vadd.f32 %v2637_v27, %v2221_v17  ;;  %v2258_v36 = vmul.f32 %v2637_v27, %v2637_v27  ;;  %v2630_v37 = vpack.c.bf16 %v2637_v27, %v2636_v24  ;;  %v2639_v38 = vadd.f32 %v2182_v34, %v1970_v33 }
 0x1e3   :  { %v2262_v39 = vadd.f32 %v2261_v20, %v2257_v31  ;;  %v2214_v40 = vadd.f32 %v2638_v32, %v2213_v30  ;;  %v2259_v41 = vmul.f32 %v2638_v32, %v2638_v32 }
 0x1e4   :  { %v2271_v43 = vadd.f32 %v2270_v21, %v2258_v36  ;;  %2325 = vst [vmem:[%s4026_s2 + $0x10] sm:$0xff] %v2630_v37  ;;  %v2223_v44 = vadd.f32 %v2639_v38, %v2222_v35  ;;  %v2260_v48 = vmul.f32 %v2639_v38, %v2639_v38  ;;  %v2631_v49 = vpack.c.bf16 %v2639_v38, %v2638_v32 }
 0x1e5   :  { %v2215_v42 = vrot.slane %v2214_v40, 4  ;;  %v2263_v45 = vadd.f32 %v2262_v39, %v2259_v41 }
 0x1e6   :  { %v2224_v46 = vrot.slane %v2223_v44, 4  ;;  %v2272_v47 = vadd.f32 %v2271_v43, %v2260_v48  ;;  %2326 = vst [vmem:[%s4026_s2 + $0x18] sm:$0xff] %v2631_v49 }
 0x1e7   :  { %v2216_v50 = vadd.f32 %v2215_v42, %v2214_v40  ;;  %v2264_v51 = vrot.slane %v2263_v45, 4 }
 0x1e8   :  { %v2225_v52 = vadd.f32 %v2224_v46, %v2223_v44  ;;  %v2273_v57 = vrot.slane %v2272_v47, 4 }
 0x1e9   :  { %v2217_v58 = vrot.slane %v2216_v50, 2  ;;  %v2265_v62 = vadd.f32 %v2264_v51, %v2263_v45 }
 0x1ea   :  { %v2226_v63 = vrot.slane %v2225_v52, 2  ;;  %v2274_v0 = vadd.f32 %v2273_v57, %v2272_v47 }
 0x1eb   :  { %v2218_v1 = vadd.f32 %v2217_v58, %v2216_v50  ;;  %v2266_v2 = vrot.slane %v2265_v62, 2 }
 0x1ec   :  { %v2227_v3 = vadd.f32 %v2226_v63, %v2225_v52  ;;  %v2275_v6 = vrot.slane %v2274_v0, 2 }
 0x1ed   :  { %v2219_v7 = vrot.slane %v2218_v1, 1  ;;  %v2267_v56 = vadd.f32 %v2266_v2, %v2265_v62 }
 0x1ee   :  { %v2228_v59 = vrot.slane %v2227_v3, 1  ;;  %v2276_v8 = vadd.f32 %v2275_v6, %v2274_v0 }
 0x1ef   :  { %v2220_v60 = vadd.f32 %v2219_v7, %v2218_v1  ;;  %v2268_v61 = vrot.slane %v2267_v56, 1 }
 0x1f0   :  { %v2229_v9 = vadd.f32 %v2228_v59, %v2227_v3  ;;  %v2277_v11 = vrot.slane %v2276_v8, 1 }
 0x1f1   :  { %v2269_v12 = vadd.f32 %v2268_v61, %v2267_v56 }
 0x1f2   :  { %v2232_v13 = vcombine.low %v2220_v60, %v2229_v9  ;;  %v2278_v14 = vadd.f32 %v2277_v11, %v2276_v8 }
 0x1f4   :  { %v2239_v15 = vrot.slane %v2232_v13, %v2238_v10  ;;  %v2281_v16 = vcombine.low %v2269_v12, %v2278_v14 }
 0x1f6   :  { %v2246_v17 = vrot.slane %v2239_v15, %v2238_v10  ;;  %v2288_v18 = vrot.slane %v2281_v16, %v2238_v10 }
 0x1f8   :  { %2252 = vst.msk [vmem:[%s4027_s3] ss:$2 sm:$0x3] %vm2250_vm0, %v2246_v17  ;;  %v2295_v19 = vrot.slane %v2288_v18, %v2238_v10 }
 0x1fa   :  { %2623 = vst.msk [vmem:[%s4027_s3 + $0x1] ss:$2 sm:$0x3] %vm2250_vm0, %v2295_v19 }

// kernel: _lambda_.14
= control target key start
LH: loop header
LB: loop body
LE: loop exit
PB: predicated region body
PF: predicated region fallthrough
CT: control target
= control target key end

     0   :  { %s367_s12 = smov 0   ;;  %s397_s0 = inlined_call_operand.vmem [shape: bf16[24,512], index: 0, kind: input, shape index: {}, may-alias: {0,3}]   ;;  %s398_s1 = inlined_call_operand.vmem [shape: f32[1,512], index: 1, kind: input, shape index: {}]   ;;  %s399_s2 = inlined_call_operand.vmem [shape: f32[1,512], index: 2, kind: input, shape index: {}]   ;;  %s400_s3 = inlined_call_operand.vmem [shape: bf16[24,512], index: 3, kind: output, shape index: {}, may-alias: {0,3}]  }
   0x1 LB: > { %s314_s13 = sadd.s32 4294967295, %s345_s12   ;;  %p318_p0 = scmp.ge.s32.totalorder %s345_s12, 1  ;;  %s345_s12 = sphi %s367_s12, %s13_s12  }
   0x2   : > { %p137_p1 = scmp.lt.s32.totalorder %s345_s12, 4 }
   0x4   : > { %p138_p2 = pnand %p318_p0, %p137_p1 }
   0x5   : > { %p161_p3 = scmp.lt.s32.totalorder (!%p138_p2), %s314_s13, 2  ;;  %v179_v0 = vlaneseq (!%p138_p2)  ;;  %v177_v2 = vld [vmem:[%s398_s1] sm:$0xf] (!%p138_p2) }
   0x6   : > { %141 = sbr.rel (%p138_p2) target bundleno = 30 (0x1e), region = 32  ;;  %v203_v7 = vld [vmem:[%s399_s2] sm:$0xf] (!%p138_p2) }
   0x7   : > { %v180_v1 = vshrl.u32 (!%p138_p2), %v179_v0, 7 }
   0x9   : > { %v181_v3 = vsub.s32 (!%p138_p2), 0, %v180_v1  ;;  %v185_v4 = vsub.s32 (!%p138_p2), 1, %v180_v1  ;;  %v189_v5 = vsub.s32 (!%p138_p2), 2, %v180_v1  ;;  %v193_v6 = vsub.s32 (!%p138_p2), 3, %v180_v1 }
   0xb   : > { %v182_v10 = vrot.slane (!%p138_p2), %v177_v2, %v181_v3  ;;  %v186_v11 = vrot.slane (!%p138_p2), %v177_v2, %v185_v4  ;;  %v190_v12 = vrot.slane (!%p138_p2), %v177_v2, %v189_v5  ;;  %v194_v13 = vrot.slane (!%p138_p2), %v177_v2, %v193_v6 }
   0xc   : > { %v208_v18 = vrot.slane (!%p138_p2), %v203_v7, %v181_v3  ;;  %v212_v19 = vrot.slane (!%p138_p2), %v203_v7, %v185_v4  ;;  %v216_v20 = vrot.slane (!%p138_p2), %v203_v7, %v189_v5  ;;  %v220_v21 = vrot.slane (!%p138_p2), %v203_v7, %v193_v6 }
   0xd   : > { %s402_s13 = smov (!%p161_p3, %s314_s13), 2 }
   0xe   : > { %s327_s16 = sshll.u32 %s402_s13, 4 }
   0xf   : > { %s165_s19 = scalar_lea.vmem %s397_s0, %s327_s16  ;;  %s170_s24 = scalar_lea.vmem %s400_s3, %s327_s16 }
  0x10   : > { %v171_v8 = vld [vmem:[%s165_s19] sm:$0xff]  ;;  %v172_v9 = vld [vmem:[%s165_s19 + $0x8] sm:$0xff] }
  0x11   : > { %v173_v14 = vunpack.c.l.bf16 %v171_v8  ;;  %v174_v15 = vunpack.c.h.bf16 %v171_v8  ;;  %v175_v16 = vunpack.c.l.bf16 %v172_v9  ;;  %v176_v17 = vunpack.c.h.bf16 %v172_v9 }
  0x13   : > { %v199_v22 = vmul.f32 %v182_v10, %v173_v14  ;;  %v200_v23 = vmul.f32 %v186_v11, %v174_v15  ;;  %v201_v24 = vmul.f32 %v190_v12, %v175_v16  ;;  %v202_v25 = vmul.f32 %v194_v13, %v176_v17 }
  0x15   : > { %v225_v26 = vadd.f32 %v208_v18, %v199_v22  ;;  %v226_v27 = vadd.f32 %v212_v19, %v200_v23  ;;  %v227_v28 = vadd.f32 %v216_v20, %v201_v24  ;;  %v228_v29 = vadd.f32 %v220_v21, %v202_v25 }
  0x17   : > { %vm229_vm0 = vcmp.ge.f32.partialorder %v225_v26, 0.0  ;;  %vm230_vm1 = vcmp.ge.f32.partialorder %v226_v27, 0.0  ;;  %v233_v30 = vmul.f32 0.2, %v225_v26  ;;  %v234_v31 = vmul.f32 0.2, %v226_v27 }
  0x18   : > { %vm231_vm2 = vcmp.ge.f32.partialorder %v227_v28, 0.0  ;;  %vm232_vm3 = vcmp.ge.f32.partialorder %v228_v29, 0.0  ;;  %v235_v32 = vmul.f32 0.2, %v227_v28  ;;  %v236_v33 = vmul.f32 0.2, %v228_v29 }
  0x19   : > { %v237_v34 = vsel %vm229_vm0, %v225_v26, %v233_v30  ;;  %v238_v35 = vsel %vm230_vm1, %v226_v27, %v234_v31 }
  0x1a   : > { %v329_v36 = vpack.c.bf16 %v238_v35, %v237_v34  ;;  %v239_v37 = vsel %vm231_vm2, %v227_v28, %v235_v32  ;;  %v240_v38 = vsel %vm232_vm3, %v228_v29, %v236_v33 }
  0x1b   : > { %v330_v39 = vpack.c.bf16 %v240_v38, %v239_v37 }
  0x1c   : > { %257 = vst [vmem:[%s170_s24] sm:$0xff] %v329_v36 }
  0x1d   : > { %258 = vst [vmem:[%s170_s24 + $0x8] sm:$0xff] %v330_v39 }
  0x1e PF: > { %s13_s12 = sadd.s32 1, %s345_s12  }
  0x1f   : > { %p10_p4 = scmp.ge.s32.totalorder %s13_s12, 5  }
  0x21   :  { %12 = sbr.rel (!%p10_p4) target bundleno = 1 (0x1), region = 62 }

// kernel: _lambda_.15
= control target key start
LH: loop header
LB: loop body
LE: loop exit
PB: predicated region body
PF: predicated region fallthrough
CT: control target
= control target key end

     0   :  { %s2248_s12 = smov 0   ;;  %s2250_s13 = smov 0   ;;  %s2469_s0 = inlined_call_operand.vmem [shape: bf16[8,8192], index: 0, kind: input, shape index: {}]   ;;  %s2470_s1 = inlined_call_operand.vmem [shape: bf16[8192,128], index: 1, kind: input, shape index: {}]   ;;  %s2471_s2 = inlined_call_operand.vmem [shape: f32[1,128], index: 2, kind: input, shape index: {}]   ;;  %s2472_s3 = inlined_call_operand.vmem [shape: f32[8,128], index: 3, kind: output, shape index: {}]  }
   0x1   :  { %s2252_s14 = smov 0  }
   0x2 LB: > { %s22_s15 = sadd.s32 1, %s2221_s13  ;;  %p1703_p0 = scmp.ge.s32.totalorder %s2225_s14, 1  ;;  %s2225_s14 = sphi %s2252_s14, %s13_s14   ;;  %s2221_s13 = sphi %s2250_s13, %s2474_s13   ;;  %s2217_s12 = sphi %s2248_s12, %s2473_s12  }
   0x3   : > { %p23_p1 = scmp.ge.s32.totalorder %s22_s15, 4  ;;  %p156_p2 = scmp.lt.s32.totalorder %s2225_s14, 5 }
   0x5   : > { %s2476_s15 = smov (%p23_p1, %s22_s15), 0  ;;  %p157_p3 = pnand %p1703_p0, %p156_p2 }
   0x6   : > { %s1704_s16 = sshll.u32 (!%p157_p3), %s2217_s12, 4  ;;  %p1706_p5 = scmp.ne.s32.totalorder (!%p157_p3), %s2217_s12, 0 }
   0x7   : > { %160 = sbr.rel (%p157_p3) target bundleno = 387 (0x183), region = 32  ;;  %p186_p4 = scmp.lt.s32.totalorder (!%p157_p3), %s1704_s16, 63 }
   0xe   : > { %s2478_s16 = smov (!%p186_p4, %s1704_s16), 63  ;;  %201 = sbr.rel (%p1706_p5) target bundleno = 21 (0x15), region = 36 }
   0xf   : > { %s1705_s17 = sshll.u32 %s2478_s16, 2  ;;  %v2227_v0 = vmov (!%p1706_p5), 0.0  }
  0x10   : > { %s2272_s20 = scalar_lea.vmem %s2469_s0, %s1705_s17  ;;  %202 = vst [vmem:[#allocation2] sm:$0xff] (!%p1706_p5), %v2227_v0 }
  0x15 PF: > { %s1707_s21 = sshll.u32 %s2217_s12, 11  ;;  %v2277_v1 = vld [vmem:[%s2272_s20] sm:$0xff]  ;;  %v2280_v2 = vld [vmem:[%s2272_s20 + $0x8] sm:$0xff]  ;;  %v2321_v34 = vld [vmem:[%s2272_s20 + $0x10] sm:$0xff]  ;;  %p1853_p6 = scmp.ne.s32.totalorder %s2217_s12, 3 }
  0x16   : > { %s204_s22 = sshra.s32 %s1707_s21, 3  ;;  %v1710_v3 = vcombine.high %v2277_v1, %v2277_v1  ;;  %v1712_v4 = vcombine.high %v2280_v2, %v2280_v2  ;;  %v2325_v36 = vld [vmem:[%s2272_s20 + $0x18] sm:$0xff]  ;;  %v1709_v39 = vcombine.low %v2277_v1, %v2277_v1  ;;  %v1711_v40 = vcombine.low %v2280_v2, %v2280_v2 }
  0x17   : > { %s1708_s23 = sshll.u32 %s204_s22, 2  ;;  %v1714_v43 = vcombine.high %v2321_v34, %v2321_v34  ;;  %v1716_v45 = vcombine.high %v2325_v36, %v2325_v36 }
  0x18   : > { %s2289_s26 = scalar_lea.vmem %s2470_s1, %s1708_s23  ;;  %1329 = vmatprep.mubr.bf16.mxu0 %v1710_v3  ;;  %1369 = vmatprep.mubr.bf16.mxu1 %v1712_v4 }
  0x19   : > { %v2059_v5 = vld [vmem:[%s2289_s26 + $0x40] sm:$0xff]   ;;  %v2063_v9 = vld [vmem:[%s2289_s26 + $0x48] sm:$0xff]   ;;  %v2067_v13 = vld [vmem:[%s2289_s26 + $0x50] sm:$0xff]  }
  0x1a   : > { %v2060_v6 = vld [vmem:[%s2289_s26 + $0xc0] sm:$0xff]   ;;  %1858 = vmatprep.subr.bf16.mxu0 %v2059_v5  ;;  %v2064_v10 = vld [vmem:[%s2289_s26 + $0xc8] sm:$0xff]   ;;  %v2068_v14 = vld [vmem:[%s2289_s26 + $0xd0] sm:$0xff]  }
  0x1b   : > { %v2061_v7 = vld [vmem:[%s2289_s26] sm:$0xff]   ;;  %1880 = vmatprep.subr.bf16.mxu1 %v2060_v6  ;;  %v2065_v11 = vld [vmem:[%s2289_s26 + $0x8] sm:$0xff]   ;;  %v2069_v15 = vld [vmem:[%s2289_s26 + $0x10] sm:$0xff]  }
  0x1c   : > { %v2062_v8 = vld [vmem:[%s2289_s26 + $0x80] sm:$0xff]   ;;  %1859 = vmatpush3.bf16.msra.mxu0 %v2061_v7  ;;  %v2066_v12 = vld [vmem:[%s2289_s26 + $0x88] sm:$0xff]   ;;  %v2070_v16 = vld [vmem:[%s2289_s26 + $0x90] sm:$0xff]  }
  0x1d   : > { %1881 = vmatpush3.bf16.msra.mxu1 %v2062_v8  ;;  %1860 = vmatprep.subr.bf16.mxu0 %v2063_v9  ;;  %v2071_v17 = vld [vmem:[%s2289_s26 + $0x58] sm:$0xff]   ;;  %v2075_v21 = vld [vmem:[%s2289_s26 + $0x60] sm:$0xff]   ;;  %v2079_v25 = vld [vmem:[%s2289_s26 + $0x68] sm:$0xff]  }
  0x1e   : > { %1882 = vmatprep.subr.bf16.mxu1 %v2064_v10  ;;  %v2072_v18 = vld [vmem:[%s2289_s26 + $0xd8] sm:$0xff]   ;;  %v2076_v22 = vld [vmem:[%s2289_s26 + $0xe0] sm:$0xff]   ;;  %v2080_v26 = vld [vmem:[%s2289_s26 + $0xe8] sm:$0xff]  }
  0x1f   : > { %v2073_v19 = vld [vmem:[%s2289_s26 + $0x18] sm:$0xff]   ;;  %v2077_v23 = vld [vmem:[%s2289_s26 + $0x20] sm:$0xff]   ;;  %v2081_v27 = vld [vmem:[%s2289_s26 + $0x28] sm:$0xff]  }
  0x20   : > { %1861 = vmatpush3.bf16.msra.mxu0 %v2065_v11  ;;  %v2074_v20 = vld [vmem:[%s2289_s26 + $0x98] sm:$0xff]   ;;  %v2078_v24 = vld [vmem:[%s2289_s26 + $0xa0] sm:$0xff]   ;;  %v2082_v28 = vld [vmem:[%s2289_s26 + $0xa8] sm:$0xff]  }
  0x21   : > { %1883 = vmatpush3.bf16.msra.mxu1 %v2066_v12  ;;  %1862 = vmatprep.subr.bf16.mxu0 %v2067_v13  ;;  %v2083_v29 = vld [vmem:[%s2289_s26 + $0x70] sm:$0xff]   ;;  %v2087_v33 = vld [vmem:[%s2289_s26 + $0x78] sm:$0xff]   ;;  %v2095_v41 = vld [vmem:[%s2289_s26 + $0x140] sm:$0xff]   ;;  %v1713_v13 = vcombine.low %v2321_v34, %v2321_v34 }
  0x22   : > { %1884 = vmatprep.subr.bf16.mxu1 %v2068_v14  ;;  %v2084_v30 = vld [vmem:[%s2289_s26 + $0xf0] sm:$0xff]   ;;  %v2088_v35 = vld [vmem:[%s2289_s26 + $0xf8] sm:$0xff]   ;;  %v2096_v42 = vld [vmem:[%s2289_s26 + $0x1c0] sm:$0xff]   ;;  %v1715_v14 = vcombine.low %v2325_v36, %v2325_v36 }
  0x23   : > { %v2085_v31 = vld [vmem:[%s2289_s26 + $0x30] sm:$0xff]   ;;  %v2089_v37 = vld [vmem:[%s2289_s26 + $0x38] sm:$0xff]   ;;  %v2097_v44 = vld [vmem:[%s2289_s26 + $0x100] sm:$0xff]  }
  0x24   : > { %1863 = vmatpush3.bf16.msra.mxu0 %v2069_v15  ;;  %v2086_v32 = vld [vmem:[%s2289_s26 + $0xb0] sm:$0xff]   ;;  %v2090_v38 = vld [vmem:[%s2289_s26 + $0xb8] sm:$0xff]   ;;  %v2098_v46 = vld [vmem:[%s2289_s26 + $0x180] sm:$0xff]  }
  0x25   : > { %1885 = vmatpush3.bf16.msra.mxu1 %v2070_v16  ;;  %1864 = vmatprep.subr.bf16.mxu0 %v2071_v17  ;;  %v2099_v47 = vld [vmem:[%s2289_s26 + $0x148] sm:$0xff]   ;;  %v2103_v51 = vld [vmem:[%s2289_s26 + $0x150] sm:$0xff]   ;;  %v2107_v55 = vld [vmem:[%s2289_s26 + $0x158] sm:$0xff]  }
  0x26   : > { %1886 = vmatprep.subr.bf16.mxu1 %v2072_v18  ;;  %v2100_v48 = vld [vmem:[%s2289_s26 + $0x1c8] sm:$0xff]   ;;  %v2104_v52 = vld [vmem:[%s2289_s26 + $0x1d0] sm:$0xff]   ;;  %v2108_v56 = vld [vmem:[%s2289_s26 + $0x1d8] sm:$0xff]  }
  0x27   : > { %v2101_v49 = vld [vmem:[%s2289_s26 + $0x108] sm:$0xff]   ;;  %v2105_v53 = vld [vmem:[%s2289_s26 + $0x110] sm:$0xff]   ;;  %v2109_v57 = vld [vmem:[%s2289_s26 + $0x118] sm:$0xff]  }
  0x28   : > { %1865 = vmatpush3.bf16.msra.mxu0 %v2073_v19  ;;  %v2102_v50 = vld [vmem:[%s2289_s26 + $0x188] sm:$0xff]   ;;  %v2106_v54 = vld [vmem:[%s2289_s26 + $0x190] sm:$0xff]   ;;  %v2110_v58 = vld [vmem:[%s2289_s26 + $0x198] sm:$0xff]  }
  0x29   : > { %1887 = vmatpush3.bf16.msra.mxu1 %v2074_v20  ;;  %1866 = vmatprep.subr.bf16.mxu0 %v2075_v21  ;;  %v2111_v59 = vld [vmem:[%s2289_s26 + $0x160] sm:$0xff]   ;;  %v2115_v63 = vld [vmem:[%s2289_s26 + $0x168] sm:$0xff]   ;;  %v2119_v3 = vld [vmem:[%s2289_s26 + $0x170] sm:$0xff]  }
  0x2a   : > { %1888 = vmatprep.subr.bf16.mxu1 %v2076_v22  ;;  %v2112_v60 = vld [vmem:[%s2289_s26 + $0x1e0] sm:$0xff]   ;;  %v2116_v0 = vld [vmem:[%s2289_s26 + $0x1e8] sm:$0xff]   ;;  %v2120_v4 = vld [vmem:[%s2289_s26 + $0x1f0] sm:$0xff]  }
  0x2b   : > { %v2113_v61 = vld [vmem:[%s2289_s26 + $0x120] sm:$0xff]   ;;  %v2117_v1 = vld [vmem:[%s2289_s26 + $0x128] sm:$0xff]   ;;  %v2121_v5 = vld [vmem:[%s2289_s26 + $0x130] sm:$0xff]  }
  0x2c   : > { %1867 = vmatpush3.bf16.msra.mxu0 %v2077_v23  ;;  %v2114_v62 = vld [vmem:[%s2289_s26 + $0x1a0] sm:$0xff]   ;;  %v2118_v2 = vld [vmem:[%s2289_s26 + $0x1a8] sm:$0xff]   ;;  %v2122_v6 = vld [vmem:[%s2289_s26 + $0x1b0] sm:$0xff]  }
  0x2d   : > { %1889 = vmatpush3.bf16.msra.mxu1 %v2078_v24  ;;  %1868 = vmatprep.subr.bf16.mxu0 %v2079_v25  ;;  %v2123_v7 = vld [vmem:[%s2289_s26 + $0x178] sm:$0xff]   ;;  %v2367_v8 = vld [vmem:[%s2272_s20 + $0x20] sm:$0xff]  ;;  %v2371_v10 = vld [vmem:[%s2272_s20 + $0x28] sm:$0xff] }
  0x2e   : > { %1890 = vmatprep.subr.bf16.mxu1 %v2080_v26  ;;  %v2124_v9 = vld [vmem:[%s2289_s26 + $0x1f8] sm:$0xff]   ;;  %v2131_v15 = vld [vmem:[%s2289_s26 + $0x240] sm:$0xff]   ;;  %v1718_v17 = vcombine.high %v2367_v8, %v2367_v8  ;;  %v1720_v19 = vcombine.high %v2371_v10, %v2371_v10  ;;  %v2135_v21 = vld [vmem:[%s2289_s26 + $0x248] sm:$0xff]  }
  0x2f   : > { %v2125_v11 = vld [vmem:[%s2289_s26 + $0x138] sm:$0xff]   ;;  %v2132_v16 = vld [vmem:[%s2289_s26 + $0x2c0] sm:$0xff]   ;;  %v2136_v22 = vld [vmem:[%s2289_s26 + $0x2c8] sm:$0xff]  }
  0x30   : > { %1869 = vmatpush3.bf16.msra.mxu0 %v2081_v27  ;;  %v2126_v12 = vld [vmem:[%s2289_s26 + $0x1b8] sm:$0xff]   ;;  %v2133_v18 = vld [vmem:[%s2289_s26 + $0x200] sm:$0xff]   ;;  %v2137_v23 = vld [vmem:[%s2289_s26 + $0x208] sm:$0xff]  }
  0x31   : > { %1891 = vmatpush3.bf16.msra.mxu1 %v2082_v28  ;;  %1870 = vmatprep.subr.bf16.mxu0 %v2083_v29  ;;  %v2134_v20 = vld [vmem:[%s2289_s26 + $0x280] sm:$0xff]   ;;  %v2138_v24 = vld [vmem:[%s2289_s26 + $0x288] sm:$0xff]   ;;  %v2139_v25 = vld [vmem:[%s2289_s26 + $0x250] sm:$0xff]  }
  0x32   : > { %1892 = vmatprep.subr.bf16.mxu1 %v2084_v30  ;;  %v2140_v26 = vld [vmem:[%s2289_s26 + $0x2d0] sm:$0xff]   ;;  %v2143_v29 = vld [vmem:[%s2289_s26 + $0x258] sm:$0xff]   ;;  %v2148_v34 = vld [vmem:[%s2289_s26 + $0x2e0] sm:$0xff]  }
  0x33   : > { %v2141_v27 = vld [vmem:[%s2289_s26 + $0x210] sm:$0xff]   ;;  %v2144_v30 = vld [vmem:[%s2289_s26 + $0x2d8] sm:$0xff]   ;;  %v2150_v36 = vld [vmem:[%s2289_s26 + $0x2a0] sm:$0xff]  }
  0x34   : > { %1871 = vmatpush3.bf16.msra.mxu0 %v2085_v31  ;;  %v2142_v28 = vld [vmem:[%s2289_s26 + $0x290] sm:$0xff]   ;;  %v2145_v31 = vld [vmem:[%s2289_s26 + $0x218] sm:$0xff]  }
  0x35   : > { %1893 = vmatpush3.bf16.msra.mxu1 %v2086_v32  ;;  %1872 = vmatprep.subr.bf16.mxu0 %v2087_v33  ;;  %v2146_v32 = vld [vmem:[%s2289_s26 + $0x298] sm:$0xff]   ;;  %v2147_v33 = vld [vmem:[%s2289_s26 + $0x260] sm:$0xff]  }
  0x36   : > { %1894 = vmatprep.subr.bf16.mxu1 %v2088_v35  ;;  %v2149_v35 = vld [vmem:[%s2289_s26 + $0x220] sm:$0xff]  }
  0x38   : > { %1873 = vmatpush3.bf16.msra.mxu0 %v2089_v37  ;;  %v2151_v37 = vld [vmem:[%s2289_s26 + $0x268] sm:$0xff]  }
  0x39   : > { %1895 = vmatpush3.bf16.msra.mxu1 %v2090_v38  ;;  %1902 = vmatprep.subr.bf16.mxu0 %v2095_v41  ;;  %v2152_v38 = vld [vmem:[%s2289_s26 + $0x2e8] sm:$0xff]   ;;  %v2155_v41 = vld [vmem:[%s2289_s26 + $0x270] sm:$0xff]  }
  0x3a   : > { %1924 = vmatprep.subr.bf16.mxu1 %v2096_v42  ;;  %v2156_v42 = vld [vmem:[%s2289_s26 + $0x2f0] sm:$0xff]  }
  0x3b   : > { %1330 = vmatmul.mubr.bf16.vlgmr.msra.gmra.mrb[0].mxu0 %v1709_v39  ;;  %v2153_v39 = vld [vmem:[%s2289_s26 + $0x228] sm:$0xff]  }
  0x3c   : > { %1370 = vmatmul.mubr.bf16.vlgmr.msra.gmra.mrb[0].mxu1 %v1711_v40  ;;  %1903 = vmatpush3.bf16.msra.mxu0 %v2097_v44  ;;  %v2154_v40 = vld [vmem:[%s2289_s26 + $0x2a8] sm:$0xff]   ;;  %v2158_v44 = vld [vmem:[%s2289_s26 + $0x2b0] sm:$0xff]  }
  0x3d   : > { %1925 = vmatpush3.bf16.msra.mxu1 %v2098_v46  ;;  %1409 = vmatprep.mubr.bf16.mxu0 %v1714_v43  ;;  %v2157_v43 = vld [vmem:[%s2289_s26 + $0x230] sm:$0xff]   ;;  %v2160_v46 = vld [vmem:[%s2289_s26 + $0x2f8] sm:$0xff]  }
  0x3e   : > { %1904 = vmatprep.subr.bf16.mxu0 %v2099_v47  ;;  %1449 = vmatprep.mubr.bf16.mxu1 %v1716_v45  ;;  %v2159_v45 = vld [vmem:[%s2289_s26 + $0x278] sm:$0xff]  }
  0x3f   : > { %1926 = vmatprep.subr.bf16.mxu1 %v2100_v48  ;;  %v2161_v47 = vld [vmem:[%s2289_s26 + $0x238] sm:$0xff]  }
  0x40   : > { %1905 = vmatpush3.bf16.msra.mxu0 %v2101_v49  ;;  %v2162_v48 = vld [vmem:[%s2289_s26 + $0x2b8] sm:$0xff]   ;;  %v1717_v49 = vcombine.low %v2367_v8, %v2367_v8  ;;  %v2188_v8 = vld [vmem:[%s2289_s26 + $0x3e8] sm:$0xff]  }
  0x41   : > { %1927 = vmatpush3.bf16.msra.mxu1 %v2102_v50  ;;  %1906 = vmatprep.subr.bf16.mxu0 %v2103_v51  ;;  %v1719_v50 = vcombine.low %v2371_v10, %v2371_v10  ;;  %v2167_v51 = vld [vmem:[%s2289_s26 + $0x340] sm:$0xff]   ;;  %v2190_v10 = vld [vmem:[%s2289_s26 + $0x3a8] sm:$0xff]  }
  0x42   : > { %1928 = vmatprep.subr.bf16.mxu1 %v2104_v52  ;;  %v2168_v52 = vld [vmem:[%s2289_s26 + $0x3c0] sm:$0xff]  }
  0x44   : > { %1907 = vmatpush3.bf16.msra.mxu0 %v2105_v53  ;;  %v2169_v53 = vld [vmem:[%s2289_s26 + $0x300] sm:$0xff]  }
  0x45   : > { %1929 = vmatpush3.bf16.msra.mxu1 %v2106_v54  ;;  %1908 = vmatprep.subr.bf16.mxu0 %v2107_v55  ;;  %v2170_v54 = vld [vmem:[%s2289_s26 + $0x380] sm:$0xff]   ;;  %v2171_v55 = vld [vmem:[%s2289_s26 + $0x348] sm:$0xff]  }
  0x46   : > { %1930 = vmatprep.subr.bf16.mxu1 %v2108_v56  ;;  %v2172_v56 = vld [vmem:[%s2289_s26 + $0x3c8] sm:$0xff]  }
  0x48   : > { %1909 = vmatpush3.bf16.msra.mxu0 %v2109_v57  ;;  %v2173_v57 = vld [vmem:[%s2289_s26 + $0x308] sm:$0xff]  }
  0x49   : > { %1931 = vmatpush3.bf16.msra.mxu1 %v2110_v58  ;;  %1910 = vmatprep.subr.bf16.mxu0 %v2111_v59  ;;  %v2174_v58 = vld [vmem:[%s2289_s26 + $0x388] sm:$0xff]   ;;  %v2175_v59 = vld [vmem:[%s2289_s26 + $0x350] sm:$0xff]  }
  0x4a   : > { %1932 = vmatprep.subr.bf16.mxu1 %v2112_v60  ;;  %v2176_v60 = vld [vmem:[%s2289_s26 + $0x3d0] sm:$0xff]  }
  0x4c   : > { %1911 = vmatpush3.bf16.msra.mxu0 %v2113_v61  ;;  %v2177_v61 = vld [vmem:[%s2289_s26 + $0x310] sm:$0xff]  }
  0x4d   : > { %1933 = vmatpush3.bf16.msra.mxu1 %v2114_v62  ;;  %1912 = vmatprep.subr.bf16.mxu0 %v2115_v63  ;;  %v2178_v62 = vld [vmem:[%s2289_s26 + $0x390] sm:$0xff]   ;;  %v2179_v63 = vld [vmem:[%s2289_s26 + $0x358] sm:$0xff]  }
  0x4e   : > { %1934 = vmatprep.subr.bf16.mxu1 %v2116_v0  ;;  %v2180_v0 = vld [vmem:[%s2289_s26 + $0x3d8] sm:$0xff]  }
  0x50   : > { %1913 = vmatpush3.bf16.msra.mxu0 %v2117_v1  ;;  %v2181_v1 = vld [vmem:[%s2289_s26 + $0x318] sm:$0xff]  }
  0x51   : > { %1935 = vmatpush3.bf16.msra.mxu1 %v2118_v2  ;;  %1914 = vmatprep.subr.bf16.mxu0 %v2119_v3  ;;  %v2182_v2 = vld [vmem:[%s2289_s26 + $0x398] sm:$0xff]   ;;  %v2183_v3 = vld [vmem:[%s2289_s26 + $0x360] sm:$0xff]  }
  0x52   : > { %1936 = vmatprep.subr.bf16.mxu1 %v2120_v4  ;;  %v2184_v4 = vld [vmem:[%s2289_s26 + $0x3e0] sm:$0xff]  }
  0x54   : > { %1915 = vmatpush3.bf16.msra.mxu0 %v2121_v5  ;;  %v2185_v5 = vld [vmem:[%s2289_s26 + $0x320] sm:$0xff]  }
  0x55   : > { %1937 = vmatpush3.bf16.msra.mxu1 %v2122_v6  ;;  %1916 = vmatprep.subr.bf16.mxu0 %v2123_v7  ;;  %v2186_v6 = vld [vmem:[%s2289_s26 + $0x3a0] sm:$0xff]   ;;  %v2187_v7 = vld [vmem:[%s2289_s26 + $0x368] sm:$0xff]  }
  0x56   : > { %1938 = vmatprep.subr.bf16.mxu1 %v2124_v9  ;;  %v2189_v9 = vld [vmem:[%s2289_s26 + $0x328] sm:$0xff]  }
  0x58   : > { %1917 = vmatpush3.bf16.msra.mxu0 %v2125_v11  ;;  %v2191_v11 = vld [vmem:[%s2289_s26 + $0x370] sm:$0xff]  }
  0x59   : > { %1939 = vmatpush3.bf16.msra.mxu1 %v2126_v12  ;;  %1946 = vmatprep.subr.bf16.mxu0 %v2131_v15  ;;  %v2192_v12 = vld [vmem:[%s2289_s26 + $0x3f0] sm:$0xff]   ;;  %v2195_v15 = vld [vmem:[%s2289_s26 + $0x378] sm:$0xff]  }
  0x5a   : > { %1968 = vmatprep.subr.bf16.mxu1 %v2132_v16  ;;  %v2196_v16 = vld [vmem:[%s2289_s26 + $0x3f8] sm:$0xff]  }
  0x5b   : > { %1410 = vmatmul.mubr.bf16.vlgmr.msra.gmra.mrb[4].mxu0 %v1713_v13  ;;  %v2193_v13 = vld [vmem:[%s2289_s26 + $0x330] sm:$0xff]  }
  0x5c   : > { %1450 = vmatmul.mubr.bf16.vlgmr.msra.gmra.mrb[4].mxu1 %v1715_v14  ;;  %1947 = vmatpush3.bf16.msra.mxu0 %v2133_v18  ;;  %v2194_v14 = vld [vmem:[%s2289_s26 + $0x3b0] sm:$0xff]   ;;  %v2198_v18 = vld [vmem:[%s2289_s26 + $0x3b8] sm:$0xff]  }
  0x5d   : > { %1969 = vmatpush3.bf16.msra.mxu1 %v2134_v20  ;;  %1489 = vmatprep.mubr.bf16.mxu0 %v1718_v17  ;;  %v2197_v17 = vld [vmem:[%s2289_s26 + $0x338] sm:$0xff]  }
  0x5e   : > { %1948 = vmatprep.subr.bf16.mxu0 %v2135_v21  ;;  %1529 = vmatprep.mubr.bf16.mxu1 %v1720_v19  ;;  %v471_v19 = vld [vmem:[%s2272_s20 + $0x30] sm:$0xff]  ;;  %v472_v20 = vld [vmem:[%s2272_s20 + $0x38] sm:$0xff] }
  0x5f   : > { %1970 = vmatprep.subr.bf16.mxu1 %v2136_v22  ;;  %v1721_v21 = vcombine.low %v471_v19, %v471_v19  ;;  %v1722_v22 = vcombine.high %v471_v19, %v471_v19 }
  0x60   : > { %1949 = vmatpush3.bf16.msra.mxu0 %v2137_v23  ;;  %v1723_v23 = vcombine.low %v472_v20, %v472_v20 }
  0x61   : > { %1971 = vmatpush3.bf16.msra.mxu1 %v2138_v24  ;;  %1950 = vmatprep.subr.bf16.mxu0 %v2139_v25  ;;  %v1724_v24 = vcombine.high %v472_v20, %v472_v20 }
  0x62   : > { %1972 = vmatprep.subr.bf16.mxu1 %v2140_v26 }
  0x64   : > { %1951 = vmatpush3.bf16.msra.mxu0 %v2141_v27 }
  0x65   : > { %1973 = vmatpush3.bf16.msra.mxu1 %v2142_v28  ;;  %1952 = vmatprep.subr.bf16.mxu0 %v2143_v29 }
  0x66   : > { %1974 = vmatprep.subr.bf16.mxu1 %v2144_v30 }
  0x68   : > { %1953 = vmatpush3.bf16.msra.mxu0 %v2145_v31 }
  0x69   : > { %1975 = vmatpush3.bf16.msra.mxu1 %v2146_v32  ;;  %1954 = vmatprep.subr.bf16.mxu0 %v2147_v33 }
  0x6a   : > { %1976 = vmatprep.subr.bf16.mxu1 %v2148_v34 }
  0x6c   : > { %1955 = vmatpush3.bf16.msra.mxu0 %v2149_v35 }
  0x6d   : > { %1977 = vmatpush3.bf16.msra.mxu1 %v2150_v36  ;;  %1956 = vmatprep.subr.bf16.mxu0 %v2151_v37 }
  0x6e   : > { %1978 = vmatprep.subr.bf16.mxu1 %v2152_v38 }
  0x70   : > { %1957 = vmatpush3.bf16.msra.mxu0 %v2153_v39 }
  0x71   : > { %1979 = vmatpush3.bf16.msra.mxu1 %v2154_v40  ;;  %1958 = vmatprep.subr.bf16.mxu0 %v2155_v41 }
  0x72   : > { %1980 = vmatprep.subr.bf16.mxu1 %v2156_v42 }
  0x74   : > { %1959 = vmatpush3.bf16.msra.mxu0 %v2157_v43 }
  0x75   : > { %1981 = vmatpush3.bf16.msra.mxu1 %v2158_v44  ;;  %1960 = vmatprep.subr.bf16.mxu0 %v2159_v45 }
  0x76   : > { %1982 = vmatprep.subr.bf16.mxu1 %v2160_v46 }
  0x78   : > { %1961 = vmatpush3.bf16.msra.mxu0 %v2161_v47 }
  0x79   : > { %1983 = vmatpush3.bf16.msra.mxu1 %v2162_v48  ;;  %1990 = vmatprep.subr.bf16.mxu0 %v2167_v51 }
  0x7a   : > { %2012 = vmatprep.subr.bf16.mxu1 %v2168_v52 }
  0x7b   : > { %1490 = vmatmul.mubr.bf16.vlgmr.msra.gmra.mrb[8].mxu0 %v1717_v49 }
  0x7c   : > { %1530 = vmatmul.mubr.bf16.vlgmr.msra.gmra.mrb[8].mxu1 %v1719_v50  ;;  %1991 = vmatpush3.bf16.msra.mxu0 %v2169_v53 }
  0x7d   : > { %2013 = vmatpush3.bf16.msra.mxu1 %v2170_v54  ;;  %1992 = vmatprep.subr.bf16.mxu0 %v2171_v55 }
  0x7e   : > { %2014 = vmatprep.subr.bf16.mxu1 %v2172_v56  ;;  %1569 = vmatprep.mubr.bf16.mxu0 %v1722_v22 }
  0x7f   : > { %1609 = vmatprep.mubr.bf16.mxu1 %v1724_v24 }
  0x80   : > { %1993 = vmatpush3.bf16.msra.mxu0 %v2173_v57 }
  0x81   : > { %2015 = vmatpush3.bf16.msra.mxu1 %v2174_v58  ;;  %1994 = vmatprep.subr.bf16.mxu0 %v2175_v59 }
  0x82   : > { %2016 = vmatprep.subr.bf16.mxu1 %v2176_v60 }
  0x84   : > { %1995 = vmatpush3.bf16.msra.mxu0 %v2177_v61 }
  0x85   : > { %2017 = vmatpush3.bf16.msra.mxu1 %v2178_v62  ;;  %1996 = vmatprep.subr.bf16.mxu0 %v2179_v63 }
  0x86   : > { %2018 = vmatprep.subr.bf16.mxu1 %v2180_v0 }
  0x88   : > { %1997 = vmatpush3.bf16.msra.mxu0 %v2181_v1 }
  0x89   : > { %2019 = vmatpush3.bf16.msra.mxu1 %v2182_v2  ;;  %1998 = vmatprep.subr.bf16.mxu0 %v2183_v3 }
  0x8a   : > { %2020 = vmatprep.subr.bf16.mxu1 %v2184_v4 }
  0x8c   : > { %1999 = vmatpush3.bf16.msra.mxu0 %v2185_v5 }
  0x8d   : > { %2021 = vmatpush3.bf16.msra.mxu1 %v2186_v6  ;;  %2000 = vmatprep.subr.bf16.mxu0 %v2187_v7  ;;  %v464_v7 = vld [vmem:[#allocation2] sm:$0xff] }
  0x8e   : > { %2022 = vmatprep.subr.bf16.mxu1 %v2188_v8 }
  0x90   : > { %2001 = vmatpush3.bf16.msra.mxu0 %v2189_v9 }
  0x91   : > { %2023 = vmatpush3.bf16.msra.mxu1 %v2190_v10  ;;  %2002 = vmatprep.subr.bf16.mxu0 %v2191_v11  ;;  %v1854_v11 = vld [vmem:[%s2471_s2] ss:$0 sm:$0xff] (!%p1853_p6) }
  0x92   : > { %2024 = vmatprep.subr.bf16.mxu1 %v2192_v12 }
  0x94   : > { %2003 = vmatpush3.bf16.msra.mxu0 %v2193_v13 }
  0x95   : > { %2025 = vmatpush3.bf16.msra.mxu1 %v2194_v14  ;;  %2004 = vmatprep.subr.bf16.mxu0 %v2195_v15 }
  0x96   : > { %2026 = vmatprep.subr.bf16.mxu1 %v2196_v16 }
  0x98   : > { %2005 = vmatpush3.bf16.msra.mxu0 %v2197_v17 }
  0x99   : > { %2027 = vmatpush3.bf16.msra.mxu1 %v2198_v18 }
  0x9b   : > { %1570 = vmatmul.mubr.bf16.vlgmr.msra.gmra.mrb[12].mxu0 %v1721_v21 }
  0x9c   : > { %1610 = vmatmul.mubr.bf16.vlgmr.msra.gmra.mrb[12].mxu1 %v1723_v23 }
 0x10e   : > { %v1874_v25 = vpop.f32.mrb[0].mxu0 }
 0x10f   : > { %v1896_v26 = vpop.f32.mrb[0].mxu1  ;;  %v1875_v27 = vpop.f32.mrb[1].mxu0 }
 0x110   : > { %v1876_v28 = vadd.f32 %v1875_v27, %v1874_v25  ;;  %v1897_v29 = vpop.f32.mrb[1].mxu1  ;;  %v1877_v30 = vpop.f32.mrb[2].mxu0 }
 0x111   : > { %v1898_v31 = vadd.f32 %v1897_v29, %v1896_v26  ;;  %v1899_v32 = vpop.f32.mrb[2].mxu1  ;;  %v1878_v33 = vpop.f32.mrb[3].mxu0 }
 0x112   : > { %v1900_v34 = vpop.f32.mrb[3].mxu1 }
 0x113   : > { %v1372_v35 = vadd.f32 %v1898_v31, %v1876_v28 }
 0x12e   : > { %v1918_v36 = vpop.f32.mrb[4].mxu0 }
 0x12f   : > { %v1940_v37 = vpop.f32.mrb[4].mxu1  ;;  %v1919_v38 = vpop.f32.mrb[5].mxu0 }
 0x130   : > { %v1920_v39 = vadd.f32 %v1919_v38, %v1918_v36  ;;  %v1941_v40 = vpop.f32.mrb[5].mxu1  ;;  %v1921_v41 = vpop.f32.mrb[6].mxu0 }
 0x131   : > { %v1942_v42 = vadd.f32 %v1941_v40, %v1940_v37  ;;  %v1943_v43 = vpop.f32.mrb[6].mxu1  ;;  %v1922_v44 = vpop.f32.mrb[7].mxu0 }
 0x132   : > { %v1412_v45 = vadd.f32 %v1920_v39, %v1372_v35  ;;  %v1944_v46 = vpop.f32.mrb[7].mxu1 }
 0x134   : > { %v1452_v47 = vadd.f32 %v1942_v42, %v1412_v45 }
 0x14e   : > { %v1962_v48 = vpop.f32.mrb[8].mxu0 }
 0x14f   : > { %v1984_v49 = vpop.f32.mrb[8].mxu1  ;;  %v1963_v50 = vpop.f32.mrb[9].mxu0 }
 0x150   : > { %v1964_v51 = vadd.f32 %v1963_v50, %v1962_v48  ;;  %v1985_v52 = vpop.f32.mrb[9].mxu1  ;;  %v1965_v53 = vpop.f32.mrb[10].mxu0 }
 0x151   : > { %v1986_v54 = vadd.f32 %v1985_v52, %v1984_v49  ;;  %v1987_v55 = vpop.f32.mrb[10].mxu1  ;;  %v1966_v56 = vpop.f32.mrb[11].mxu0 }
 0x152   : > { %v1492_v57 = vadd.f32 %v1964_v51, %v1452_v47  ;;  %v1988_v58 = vpop.f32.mrb[11].mxu1 }
 0x154   : > { %v1532_v59 = vadd.f32 %v1986_v54, %v1492_v57 }
 0x16e   : > { %v2006_v60 = vpop.f32.mrb[12].mxu0 }
 0x16f   : > { %v2028_v61 = vpop.f32.mrb[12].mxu1  ;;  %v2007_v62 = vpop.f32.mrb[13].mxu0 }
 0x170   : > { %v2029_v63 = vpop.f32.mrb[13].mxu1  ;;  %v2008_v0 = vadd.f32 %v2007_v62, %v2006_v60  ;;  %v2009_v2 = vpop.f32.mrb[14].mxu0 }
 0x171   : > { %v2030_v1 = vadd.f32 %v2029_v63, %v2028_v61  ;;  %v2031_v3 = vpop.f32.mrb[14].mxu1  ;;  %v2010_v4 = vpop.f32.mrb[15].mxu0 }
 0x172   : > { %v2032_v5 = vpop.f32.mrb[15].mxu1  ;;  %v1572_v6 = vadd.f32 %v2008_v0, %v1532_v59  ;;  %1622 = sbr.rel (%p1853_p6) target bundleno = 387 (0x183), region = 40 }
 0x174   : > { %v1612_v8 = vadd.f32 %v2030_v1, %v1572_v6 }
 0x176   : > { %v1617_v9 = vadd.f32 %v1612_v8, %v464_v7 }
 0x178   : > { %1618 = vst [vmem:[#allocation2] sm:$0xff] %v1617_v9 }
 0x17f   : > { %v1623_v10 = vld [vmem:[#allocation2] sm:$0xff] }
 0x180   : > { %v1631_v12 = vadd.f32 %v1854_v11, %v1623_v10 }
 0x182   : > { %1632 = vst [vmem:[%s2472_s3] sm:$0xff] %v1631_v12 }
 0x183 PF: > { %s13_s14 = sadd.s32 1, %s2225_s14   ;;  %s2473_s12 = smov %s2221_s13 }
 0x184   : > { %p10_p7 = scmp.ge.s32.totalorder %s13_s14, 6   ;;  %s2474_s13 = smov %s2476_s15 }
 0x186   :  { %12 = sbr.rel (!%p10_p7) target bundleno = 2 (0x2), region = 71 }

// kernel: _lambda_.13
= control target key start
LH: loop header
LB: loop body
LE: loop exit
PB: predicated region body
PF: predicated region fallthrough
CT: control target
= control target key end

     0   :  { %s6207_s12 = smov 0   ;;  %s6209_s13 = smov 0   ;;  %s7080_s0 = inlined_call_operand.vmem [shape: bf16[24,4096], index: 0, kind: input, shape index: {}]   ;;  %s7081_s1 = inlined_call_operand.vmem [shape: bf16[4096,512], index: 1, kind: input, shape index: {}]   ;;  %s7082_s2 = inlined_call_operand.vmem [shape: bf16[24,512], index: 2, kind: output, shape index: {0}]   ;;  %s7083_s3 = inlined_call_operand.vmem [shape: f32[1,2,512], index: 3, kind: output, shape index: {1}]  }
   0x1   :  { %s6211_s14 = smov 0   ;;  %s6213_s15 = smov 0  }
   0x2   :  { %s6215_s16 = smov 0  }
   0x3 LB: > { %s23_s17 = sadd.s32 1, %s6179_s15  ;;  %p42_p1 = scmp.ne.s32.totalorder %s6171_s13, %s6167_s12  ;;  %s6183_s16 = sphi %s6215_s16, %s14_s16   ;;  %s6179_s15 = sphi %s6213_s15, %s7087_s15   ;;  %s6175_s14 = sphi %s6211_s14, %s7086_s14   ;;  %s6171_s13 = sphi %s6209_s13, %s7085_s13   ;;  %s6167_s12 = sphi %s6207_s12, %s7084_s12  }
   0x4   : > { %p24_p0 = scmp.ge.s32.totalorder %s23_s17, 2  ;;  %p43_p2 = scmp.eq.s32.totalorder %s6183_s16, 0 }
   0x5   : > { %s35_s19 = sadd.s32 1, %s6171_s13  ;;  %p4688_p5 = scmp.ge.s32.totalorder %s6183_s16, 2 }
   0x6   : > { %s7089_s17 = smov (%p24_p0, %s23_s17), 0  ;;  %p44_p3 = por %p43_p2, %p42_p1 }
   0x7   : > { %s31_s18 = ssub.s32 %s6179_s15, %s7089_s17  ;;  %144 = sbr.rel (%p4688_p5) target bundleno = 31 (0x1f), region = 20 }
   0x8   : > { %p33_p4 = scmp.eq.s32.totalorder %s31_s18, 0 }
   0xa   : > { %s6242_s20 = scalar_select %p33_p4, %s6171_s13, %s35_s19  }
   0xe   : > { %147 = sbr.rel (!%p44_p3) target bundleno = 31 (0x1f), region = 24  ;;  %s149_s21 = sand.u32 (%p44_p3), 1, %s6171_s13  }
   0xf   : > { %s5253_s22 = sshll.u32 (%p44_p3), %s6179_s15, 6  ;;  %s5317_s23 = smul.u32 (%p44_p3), 192, %s149_s21 }
  0x10   : > { %s6250_s26 = scalar_lea.vmem (%p44_p3), %s7080_s0, %s5253_s22 }
  0x11   : > { %v170_v0 = vld [vmem:[%s6250_s26] sm:$0xff] (%p44_p3)  ;;  %v172_v1 = vld [vmem:[%s6250_s26 + $0x8] sm:$0xff] (%p44_p3)  ;;  %v174_v2 = vld [vmem:[%s6250_s26 + $0x10] sm:$0xff] (%p44_p3)  ;;  %s6258_s27 = scalar_lea.vmem (%p44_p3), [#allocation3], %s5317_s23 }
  0x12   : > { %v176_v3 = vld [vmem:[%s6250_s26 + $0x18] sm:$0xff] (%p44_p3)  ;;  %v178_v4 = vld [vmem:[%s6250_s26 + $0x20] sm:$0xff] (%p44_p3)  ;;  %v180_v5 = vld [vmem:[%s6250_s26 + $0x28] sm:$0xff] (%p44_p3)  ;;  %171 = vst [vmem:[%s6258_s27] sm:$0xff] (%p44_p3), %v170_v0 }
  0x13   : > { %173 = vst [vmem:[%s6258_s27 + $0x8] sm:$0xff] (%p44_p3), %v172_v1  ;;  %175 = vst [vmem:[%s6258_s27 + $0x10] sm:$0xff] (%p44_p3), %v174_v2  ;;  %v182_v6 = vld [vmem:[%s6250_s26 + $0x30] sm:$0xff] (%p44_p3)  ;;  %v184_v7 = vld [vmem:[%s6250_s26 + $0x38] sm:$0xff] (%p44_p3) }
  0x14   : > { %177 = vst [vmem:[%s6258_s27 + $0x18] sm:$0xff] (%p44_p3), %v176_v3  ;;  %179 = vst [vmem:[%s6258_s27 + $0x20] sm:$0xff] (%p44_p3), %v178_v4  ;;  %v186_v8 = vld [vmem:[%s6250_s26 + $0x80] sm:$0xff] (%p44_p3)  ;;  %v188_v9 = vld [vmem:[%s6250_s26 + $0x88] sm:$0xff] (%p44_p3) }
  0x15   : > { %181 = vst [vmem:[%s6258_s27 + $0x28] sm:$0xff] %v180_v5  ;;  %183 = vst [vmem:[%s6258_s27 + $0x30] sm:$0xff] %v182_v6  ;;  %v190_v10 = vld [vmem:[%s6250_s26 + $0x90] sm:$0xff]  ;;  %v192_v11 = vld [vmem:[%s6250_s26 + $0x98] sm:$0xff] }
  0x16   : > { %185 = vst [vmem:[%s6258_s27 + $0x38] sm:$0xff] %v184_v7  ;;  %187 = vst [vmem:[%s6258_s27 + $0x40] sm:$0xff] %v186_v8  ;;  %v194_v12 = vld [vmem:[%s6250_s26 + $0xa0] sm:$0xff]  ;;  %v196_v13 = vld [vmem:[%s6250_s26 + $0xa8] sm:$0xff] }
  0x17   : > { %189 = vst [vmem:[%s6258_s27 + $0x48] sm:$0xff] %v188_v9  ;;  %191 = vst [vmem:[%s6258_s27 + $0x50] sm:$0xff] %v190_v10  ;;  %v198_v14 = vld [vmem:[%s6250_s26 + $0xb0] sm:$0xff]  ;;  %v200_v15 = vld [vmem:[%s6250_s26 + $0xb8] sm:$0xff] }
  0x18   : > { %193 = vst [vmem:[%s6258_s27 + $0x58] sm:$0xff] %v192_v11  ;;  %195 = vst [vmem:[%s6258_s27 + $0x60] sm:$0xff] %v194_v12  ;;  %v202_v16 = vld [vmem:[%s6250_s26 + $0x100] sm:$0xff]  ;;  %v204_v17 = vld [vmem:[%s6250_s26 + $0x108] sm:$0xff] }
  0x19   : > { %197 = vst [vmem:[%s6258_s27 + $0x68] sm:$0xff] %v196_v13  ;;  %199 = vst [vmem:[%s6258_s27 + $0x70] sm:$0xff] %v198_v14  ;;  %v206_v18 = vld [vmem:[%s6250_s26 + $0x110] sm:$0xff]  ;;  %v208_v19 = vld [vmem:[%s6250_s26 + $0x118] sm:$0xff] }
  0x1a   : > { %201 = vst [vmem:[%s6258_s27 + $0x78] sm:$0xff] %v200_v15  ;;  %203 = vst [vmem:[%s6258_s27 + $0x80] sm:$0xff] %v202_v16  ;;  %v210_v20 = vld [vmem:[%s6250_s26 + $0x120] sm:$0xff]  ;;  %v212_v21 = vld [vmem:[%s6250_s26 + $0x128] sm:$0xff] }
  0x1b   : > { %205 = vst [vmem:[%s6258_s27 + $0x88] sm:$0xff] %v204_v17  ;;  %207 = vst [vmem:[%s6258_s27 + $0x90] sm:$0xff] %v206_v18  ;;  %v214_v22 = vld [vmem:[%s6250_s26 + $0x130] sm:$0xff]  ;;  %v216_v23 = vld [vmem:[%s6250_s26 + $0x138] sm:$0xff] }
  0x1c   : > { %209 = vst [vmem:[%s6258_s27 + $0x98] sm:$0xff] %v208_v19  ;;  %211 = vst [vmem:[%s6258_s27 + $0xa0] sm:$0xff] %v210_v20 }
  0x1d   : > { %213 = vst [vmem:[%s6258_s27 + $0xa8] sm:$0xff] %v212_v21  ;;  %215 = vst [vmem:[%s6258_s27 + $0xb0] sm:$0xff] %v214_v22 }
  0x1e   : > { %217 = vst [vmem:[%s6258_s27 + $0xb8] sm:$0xff] %v216_v23 }
  0x1f PF: > { %p4691_p6 = scmp.ge.s32.totalorder %s6183_s16, 1  ;;  %p222_p7 = scmp.lt.s32.totalorder %s6183_s16, 3 }
  0x21   : > { %p223_p8 = pnand %p4691_p6, %p222_p7 }
  0x22   : > { %s229_s28 = sand.u32 (!%p223_p8), 1, %s6167_s12   ;;  %p4692_p9 = scmp.ne.s32.totalorder (!%p223_p8), %s6175_s14, 0 }
  0x23   : > { %226 = sbr.rel (%p223_p8) target bundleno = 826 (0x33a), region = 47 }
  0x24   : > { %s5318_s29 = smul.u32 (!%p223_p8), 192, %s229_s28 }
  0x26   : > { %s6305_s30 = scalar_lea.vmem (!%p223_p8), [#allocation3], %s5318_s29 }
  0x2a   : > { %275 = sbr.rel (%p4692_p9) target bundleno = 49 (0x31), region = 55  ;;  %v6185_v24 = vmov (!%p4692_p9), 0.0  }
  0x2b   : > { %276 = vst [vmem:[#allocation2] sm:$0xff] (!%p4692_p9), %v6185_v24  ;;  %277 = vst [vmem:[#allocation2 + $0x8] sm:$0xff] (!%p4692_p9), %v6185_v24 }
  0x2c   : > { %278 = vst [vmem:[#allocation2 + $0x10] sm:$0xff] (!%p4692_p9), %v6185_v24  ;;  %279 = vst [vmem:[#allocation2 + $0x18] sm:$0xff] (!%p4692_p9), %v6185_v24 }
  0x2d   : > { %280 = vst [vmem:[#allocation2 + $0x20] sm:$0xff] (!%p4692_p9), %v6185_v24  ;;  %281 = vst [vmem:[#allocation2 + $0x28] sm:$0xff] (!%p4692_p9), %v6185_v24 }
  0x2e   : > { %282 = vst [vmem:[#allocation2 + $0x30] sm:$0xff] (!%p4692_p9), %v6185_v24  ;;  %283 = vst [vmem:[#allocation2 + $0x38] sm:$0xff] (!%p4692_p9), %v6185_v24 }
  0x2f   : > { %284 = vst [vmem:[#allocation2 + $0x40] sm:$0xff] (!%p4692_p9), %v6185_v24  ;;  %285 = vst [vmem:[#allocation2 + $0x48] sm:$0xff] (!%p4692_p9), %v6185_v24 }
  0x30   : > { %286 = vst [vmem:[#allocation2 + $0x50] sm:$0xff] (!%p4692_p9), %v6185_v24  ;;  %287 = vst [vmem:[#allocation2 + $0x58] sm:$0xff] (!%p4692_p9), %v6185_v24 }
  0x31 PF: > { %s4693_s4 = sshll.u32 %s6175_s14, 11  ;;  %v818_v25 = vld [vmem:[%s6305_s30] sm:$0xff]  ;;  %p5240_p10 = scmp.ne.s32.totalorder %s6175_s14, 1 }
  0x32   : > { %v826_v26 = vld [vmem:[%s6305_s30 + $0x40] sm:$0xff]  ;;  %s289_s5 = sshra.s32 %s4693_s4, 3 }
  0x33   : > { %v6311_v27 = vcombine.low %v818_v25, %v826_v26  ;;  %v4697_v28 = vcombine.high %v818_v25, %v826_v26  ;;  %s5254_s6 = sshll.u32 %s289_s5, 4 }
  0x34   : > { %s6316_s9 = scalar_lea.vmem %s7081_s1, %s5254_s6 }
  0x35   : > { %3570 = vmatprep.mubr.bf16.mxu0 %v4697_v28  ;;  %3978 = vmatprep.mubr.bf16.mxu1 %v4697_v28  ;;  %v5361_v29 = vld [vmem:[%s6316_s9 + $0x4] ss:$16 sps:$4 sm:$0xff]   ;;  %v5363_v30 = vld [vmem:[%s6316_s9 + $0xc] ss:$16 sps:$4 sm:$0xff]   ;;  %v5365_v31 = vld [vmem:[%s6316_s9] ss:$16 sps:$4 sm:$0xff]  }
  0x36   : > { %3538 = vmatprep.subr.bf16.mxu0 %v5361_v29  ;;  %v5366_v32 = vld [vmem:[%s6316_s9 + $0x8] ss:$16 sps:$4 sm:$0xff]   ;;  %3946 = vmatprep.subr.bf16.mxu1 %v5363_v30  ;;  %v5367_v33 = vld [vmem:[%s6316_s9 + $0x24] ss:$16 sps:$4 sm:$0xff]   ;;  %v5369_v34 = vld [vmem:[%s6316_s9 + $0x2c] ss:$16 sps:$4 sm:$0xff]  }
  0x37   : > { %3539 = vmatpush1.bf16.msra.mxu0 %v5365_v31  ;;  %3947 = vmatpush1.bf16.msra.mxu1 %v5366_v32  ;;  %v5371_v35 = vld [vmem:[%s6316_s9 + $0x20] ss:$16 sps:$4 sm:$0xff]   ;;  %v5372_v36 = vld [vmem:[%s6316_s9 + $0x28] ss:$16 sps:$4 sm:$0xff]   ;;  %v5373_v37 = vld [vmem:[%s6316_s9 + $0x44] ss:$16 sps:$4 sm:$0xff]  }
  0x38   : > { %3540 = vmatprep.subr.bf16.mxu0 %v5367_v33  ;;  %3948 = vmatprep.subr.bf16.mxu1 %v5369_v34  ;;  %v5375_v38 = vld [vmem:[%s6316_s9 + $0x4c] ss:$16 sps:$4 sm:$0xff]   ;;  %v5377_v39 = vld [vmem:[%s6316_s9 + $0x40] ss:$16 sps:$4 sm:$0xff]   ;;  %v5378_v40 = vld [vmem:[%s6316_s9 + $0x48] ss:$16 sps:$4 sm:$0xff]  }
  0x39   : > { %v5379_v41 = vld [vmem:[%s6316_s9 + $0x64] ss:$16 sps:$4 sm:$0xff]   ;;  %v5381_v42 = vld [vmem:[%s6316_s9 + $0x6c] ss:$16 sps:$4 sm:$0xff]   ;;  %v5383_v43 = vld [vmem:[%s6316_s9 + $0x60] ss:$16 sps:$4 sm:$0xff]  }
  0x3a   : > { %v5384_v44 = vld [vmem:[%s6316_s9 + $0x68] ss:$16 sps:$4 sm:$0xff]   ;;  %v5385_v45 = vld [vmem:[%s6316_s9 + $0x84] ss:$16 sps:$4 sm:$0xff]   ;;  %v5387_v46 = vld [vmem:[%s6316_s9 + $0x8c] ss:$16 sps:$4 sm:$0xff]  }
  0x3b   : > { %3541 = vmatpush1.bf16.msra.mxu0 %v5371_v35  ;;  %3949 = vmatpush1.bf16.msra.mxu1 %v5372_v36  ;;  %v5389_v47 = vld [vmem:[%s6316_s9 + $0x80] ss:$16 sps:$4 sm:$0xff]   ;;  %v5390_v48 = vld [vmem:[%s6316_s9 + $0x88] ss:$16 sps:$4 sm:$0xff]   ;;  %v5391_v49 = vld [vmem:[%s6316_s9 + $0xa4] ss:$16 sps:$4 sm:$0xff]  }
  0x3c   : > { %3542 = vmatprep.subr.bf16.mxu0 %v5373_v37  ;;  %3950 = vmatprep.subr.bf16.mxu1 %v5375_v38  ;;  %v5393_v50 = vld [vmem:[%s6316_s9 + $0xac] ss:$16 sps:$4 sm:$0xff]   ;;  %v5395_v51 = vld [vmem:[%s6316_s9 + $0xa0] ss:$16 sps:$4 sm:$0xff]   ;;  %v5396_v52 = vld [vmem:[%s6316_s9 + $0xa8] ss:$16 sps:$4 sm:$0xff]  }
  0x3d   : > { %v5397_v53 = vld [vmem:[%s6316_s9 + $0xc4] ss:$16 sps:$4 sm:$0xff]   ;;  %v5399_v54 = vld [vmem:[%s6316_s9 + $0xcc] ss:$16 sps:$4 sm:$0xff]   ;;  %v5401_v55 = vld [vmem:[%s6316_s9 + $0xc0] ss:$16 sps:$4 sm:$0xff]  }
  0x3e   : > { %v5402_v56 = vld [vmem:[%s6316_s9 + $0xc8] ss:$16 sps:$4 sm:$0xff]   ;;  %v5403_v57 = vld [vmem:[%s6316_s9 + $0xe4] ss:$16 sps:$4 sm:$0xff]   ;;  %v5405_v58 = vld [vmem:[%s6316_s9 + $0xec] ss:$16 sps:$4 sm:$0xff]  }
  0x3f   : > { %3543 = vmatpush1.bf16.msra.mxu0 %v5377_v39  ;;  %3951 = vmatpush1.bf16.msra.mxu1 %v5378_v40  ;;  %v5407_v59 = vld [vmem:[%s6316_s9 + $0xe0] ss:$16 sps:$4 sm:$0xff]   ;;  %v5408_v60 = vld [vmem:[%s6316_s9 + $0xe8] ss:$16 sps:$4 sm:$0xff]   ;;  %v5409_v61 = vld [vmem:[%s6316_s9 + $0x104] ss:$16 sps:$4 sm:$0xff]  }
  0x40   : > { %3544 = vmatprep.subr.bf16.mxu0 %v5379_v41  ;;  %3952 = vmatprep.subr.bf16.mxu1 %v5381_v42  ;;  %v5411_v62 = vld [vmem:[%s6316_s9 + $0x10c] ss:$16 sps:$4 sm:$0xff]   ;;  %v5413_v63 = vld [vmem:[%s6316_s9 + $0x100] ss:$16 sps:$4 sm:$0xff]   ;;  %v5414_v0 = vld [vmem:[%s6316_s9 + $0x108] ss:$16 sps:$4 sm:$0xff]  }
  0x41   : > { %v5415_v1 = vld [vmem:[%s6316_s9 + $0x124] ss:$16 sps:$4 sm:$0xff]   ;;  %v5417_v2 = vld [vmem:[%s6316_s9 + $0x12c] ss:$16 sps:$4 sm:$0xff]   ;;  %v5419_v3 = vld [vmem:[%s6316_s9 + $0x120] ss:$16 sps:$4 sm:$0xff]  }
  0x42   : > { %v5420_v4 = vld [vmem:[%s6316_s9 + $0x128] ss:$16 sps:$4 sm:$0xff]   ;;  %v5421_v5 = vld [vmem:[%s6316_s9 + $0x144] ss:$16 sps:$4 sm:$0xff]   ;;  %v5423_v6 = vld [vmem:[%s6316_s9 + $0x14c] ss:$16 sps:$4 sm:$0xff]  }
  0x43   : > { %3545 = vmatpush1.bf16.msra.mxu0 %v5383_v43  ;;  %3953 = vmatpush1.bf16.msra.mxu1 %v5384_v44  ;;  %v5425_v7 = vld [vmem:[%s6316_s9 + $0x140] ss:$16 sps:$4 sm:$0xff]   ;;  %v5426_v8 = vld [vmem:[%s6316_s9 + $0x148] ss:$16 sps:$4 sm:$0xff]   ;;  %v5427_v9 = vld [vmem:[%s6316_s9 + $0x164] ss:$16 sps:$4 sm:$0xff]  }
  0x44   : > { %3546 = vmatprep.subr.bf16.mxu0 %v5385_v45  ;;  %3954 = vmatprep.subr.bf16.mxu1 %v5387_v46  ;;  %v5429_v10 = vld [vmem:[%s6316_s9 + $0x16c] ss:$16 sps:$4 sm:$0xff]   ;;  %v5431_v11 = vld [vmem:[%s6316_s9 + $0x160] ss:$16 sps:$4 sm:$0xff]   ;;  %v5432_v12 = vld [vmem:[%s6316_s9 + $0x168] ss:$16 sps:$4 sm:$0xff]  }
  0x45   : > { %v5433_v13 = vld [vmem:[%s6316_s9 + $0x184] ss:$16 sps:$4 sm:$0xff]   ;;  %v5435_v14 = vld [vmem:[%s6316_s9 + $0x18c] ss:$16 sps:$4 sm:$0xff]   ;;  %v5437_v15 = vld [vmem:[%s6316_s9 + $0x180] ss:$16 sps:$4 sm:$0xff]  }
  0x46   : > { %v5438_v16 = vld [vmem:[%s6316_s9 + $0x188] ss:$16 sps:$4 sm:$0xff]   ;;  %v5439_v17 = vld [vmem:[%s6316_s9 + $0x1a4] ss:$16 sps:$4 sm:$0xff]   ;;  %v5441_v18 = vld [vmem:[%s6316_s9 + $0x1ac] ss:$16 sps:$4 sm:$0xff]  }
  0x47   : > { %3547 = vmatpush1.bf16.msra.mxu0 %v5389_v47  ;;  %3955 = vmatpush1.bf16.msra.mxu1 %v5390_v48  ;;  %v5443_v19 = vld [vmem:[%s6316_s9 + $0x1a0] ss:$16 sps:$4 sm:$0xff]   ;;  %v5444_v20 = vld [vmem:[%s6316_s9 + $0x1a8] ss:$16 sps:$4 sm:$0xff]   ;;  %v5445_v21 = vld [vmem:[%s6316_s9 + $0x1c4] ss:$16 sps:$4 sm:$0xff]  }
  0x48   : > { %3548 = vmatprep.subr.bf16.mxu0 %v5391_v49  ;;  %3956 = vmatprep.subr.bf16.mxu1 %v5393_v50  ;;  %v5447_v22 = vld [vmem:[%s6316_s9 + $0x1cc] ss:$16 sps:$4 sm:$0xff]   ;;  %v5449_v23 = vld [vmem:[%s6316_s9 + $0x1c0] ss:$16 sps:$4 sm:$0xff]   ;;  %v5450_v24 = vld [vmem:[%s6316_s9 + $0x1c8] ss:$16 sps:$4 sm:$0xff]  }
  0x49   : > { %v5451_v25 = vld [vmem:[%s6316_s9 + $0x1e4] ss:$16 sps:$4 sm:$0xff]   ;;  %v5453_v26 = vld [vmem:[%s6316_s9 + $0x1ec] ss:$16 sps:$4 sm:$0xff]   ;;  %v5455_v28 = vld [vmem:[%s6316_s9 + $0x1e0] ss:$16 sps:$4 sm:$0xff]  }
  0x4a   : > { %v5456_v29 = vld [vmem:[%s6316_s9 + $0x1e8] ss:$16 sps:$4 sm:$0xff]   ;;  %v5459_v30 = vld [vmem:[%s6316_s9 + $0x204] ss:$16 sps:$4 sm:$0xff]   ;;  %v5462_v31 = vld [vmem:[%s6316_s9 + $0x20c] ss:$16 sps:$4 sm:$0xff]  }
  0x4b   : > { %3549 = vmatpush1.bf16.msra.mxu0 %v5395_v51  ;;  %3957 = vmatpush1.bf16.msra.mxu1 %v5396_v52  ;;  %v834_v32 = vld [vmem:[%s6305_s30 + $0x80] sm:$0xff]  ;;  %v5460_v34 = vld [vmem:[%s6316_s9 + $0x208] ss:$16 sps:$4 sm:$0xff]   ;;  %v5468_v36 = vld [vmem:[%s6316_s9 + $0x22c] ss:$16 sps:$4 sm:$0xff]  }
  0x4c   : > { %3550 = vmatprep.subr.bf16.mxu0 %v5397_v53  ;;  %3958 = vmatprep.subr.bf16.mxu1 %v5399_v54  ;;  %v5457_v33 = vld [vmem:[%s6316_s9 + $0x200] ss:$16 sps:$4 sm:$0xff]   ;;  %v5465_v35 = vld [vmem:[%s6316_s9 + $0x224] ss:$16 sps:$4 sm:$0xff]   ;;  %v4713_v37 = vcombine.high %v834_v32, %v834_v32  ;;  %v5466_v39 = vld [vmem:[%s6316_s9 + $0x228] ss:$16 sps:$4 sm:$0xff]   ;;  %v4712_v45 = vcombine.low %v834_v32, %v834_v32 }
  0x4d   : > { %v5463_v38 = vld [vmem:[%s6316_s9 + $0x220] ss:$16 sps:$4 sm:$0xff]   ;;  %v5471_v40 = vld [vmem:[%s6316_s9 + $0x244] ss:$16 sps:$4 sm:$0xff]   ;;  %v5474_v41 = vld [vmem:[%s6316_s9 + $0x24c] ss:$16 sps:$4 sm:$0xff]  }
  0x4e   : > { %v6396_v42 = vld [vmem:[%s6305_s30 + $0x8] sm:$0xff]  ;;  %v5469_v44 = vld [vmem:[%s6316_s9 + $0x240] ss:$16 sps:$4 sm:$0xff]   ;;  %v5477_v46 = vld [vmem:[%s6316_s9 + $0x264] ss:$16 sps:$4 sm:$0xff]  }
  0x4f   : > { %3551 = vmatpush1.bf16.msra.mxu0 %v5401_v55  ;;  %3959 = vmatpush1.bf16.msra.mxu1 %v5402_v56  ;;  %v6399_v43 = vld [vmem:[%s6305_s30 + $0x48] sm:$0xff]  ;;  %v5475_v49 = vld [vmem:[%s6316_s9 + $0x260] ss:$16 sps:$4 sm:$0xff]   ;;  %v5483_v51 = vld [vmem:[%s6316_s9 + $0x284] ss:$16 sps:$4 sm:$0xff]  }
  0x50   : > { %3552 = vmatprep.subr.bf16.mxu0 %v5403_v57  ;;  %3960 = vmatprep.subr.bf16.mxu1 %v5405_v58  ;;  %v5480_v47 = vld [vmem:[%s6316_s9 + $0x26c] ss:$16 sps:$4 sm:$0xff]   ;;  %v4699_v48 = vcombine.high %v6396_v42, %v6399_v43  ;;  %v5478_v50 = vld [vmem:[%s6316_s9 + $0x268] ss:$16 sps:$4 sm:$0xff]   ;;  %v5481_v53 = vld [vmem:[%s6316_s9 + $0x280] ss:$16 sps:$4 sm:$0xff]  }
  0x51   : > { %v5486_v52 = vld [vmem:[%s6316_s9 + $0x28c] ss:$16 sps:$4 sm:$0xff]   ;;  %v5484_v54 = vld [vmem:[%s6316_s9 + $0x288] ss:$16 sps:$4 sm:$0xff]   ;;  %v5489_v55 = vld [vmem:[%s6316_s9 + $0x2a4] ss:$16 sps:$4 sm:$0xff]  }
  0x52   : > { %v5492_v56 = vld [vmem:[%s6316_s9 + $0x2ac] ss:$16 sps:$4 sm:$0xff]   ;;  %v5487_v57 = vld [vmem:[%s6316_s9 + $0x2a0] ss:$16 sps:$4 sm:$0xff]   ;;  %v5490_v58 = vld [vmem:[%s6316_s9 + $0x2a8] ss:$16 sps:$4 sm:$0xff]  }
  0x53   : > { %3553 = vmatpush1.bf16.msra.mxu0 %v5407_v59  ;;  %3961 = vmatpush1.bf16.msra.mxu1 %v5408_v60  ;;  %v5495_v59 = vld [vmem:[%s6316_s9 + $0x2c4] ss:$16 sps:$4 sm:$0xff]   ;;  %v5498_v60 = vld [vmem:[%s6316_s9 + $0x2cc] ss:$16 sps:$4 sm:$0xff]  }
  0x54   : > { %3554 = vmatprep.subr.bf16.mxu0 %v5409_v61  ;;  %3962 = vmatprep.subr.bf16.mxu1 %v5411_v62  ;;  %v5493_v61 = vld [vmem:[%s6316_s9 + $0x2c0] ss:$16 sps:$4 sm:$0xff]   ;;  %v5496_v62 = vld [vmem:[%s6316_s9 + $0x2c8] ss:$16 sps:$4 sm:$0xff]   ;;  %v5551_v32 = vld [vmem:[%s6316_s9 + $0x3e4] ss:$16 sps:$4 sm:$0xff]  }
  0x57   : > { %3555 = vmatpush1.bf16.msra.mxu0 %v5413_v63  ;;  %3963 = vmatpush1.bf16.msra.mxu1 %v5414_v0  ;;  %v5501_v63 = vld [vmem:[%s6316_s9 + $0x2e4] ss:$16 sps:$4 sm:$0xff]   ;;  %v5504_v0 = vld [vmem:[%s6316_s9 + $0x2ec] ss:$16 sps:$4 sm:$0xff]  }
  0x58   : > { %3556 = vmatprep.subr.bf16.mxu0 %v5415_v1  ;;  %3964 = vmatprep.subr.bf16.mxu1 %v5417_v2  ;;  %v5499_v1 = vld [vmem:[%s6316_s9 + $0x2e0] ss:$16 sps:$4 sm:$0xff]   ;;  %v5502_v2 = vld [vmem:[%s6316_s9 + $0x2e8] ss:$16 sps:$4 sm:$0xff]  }
  0x5b   : > { %3557 = vmatpush1.bf16.msra.mxu0 %v5419_v3  ;;  %3965 = vmatpush1.bf16.msra.mxu1 %v5420_v4  ;;  %v5507_v3 = vld [vmem:[%s6316_s9 + $0x304] ss:$16 sps:$4 sm:$0xff]   ;;  %v5510_v4 = vld [vmem:[%s6316_s9 + $0x30c] ss:$16 sps:$4 sm:$0xff]  }
  0x5c   : > { %3558 = vmatprep.subr.bf16.mxu0 %v5421_v5  ;;  %3966 = vmatprep.subr.bf16.mxu1 %v5423_v6  ;;  %v5505_v5 = vld [vmem:[%s6316_s9 + $0x300] ss:$16 sps:$4 sm:$0xff]   ;;  %v5508_v6 = vld [vmem:[%s6316_s9 + $0x308] ss:$16 sps:$4 sm:$0xff]  }
  0x5f   : > { %3559 = vmatpush1.bf16.msra.mxu0 %v5425_v7  ;;  %3967 = vmatpush1.bf16.msra.mxu1 %v5426_v8  ;;  %v5513_v7 = vld [vmem:[%s6316_s9 + $0x324] ss:$16 sps:$4 sm:$0xff]   ;;  %v5516_v8 = vld [vmem:[%s6316_s9 + $0x32c] ss:$16 sps:$4 sm:$0xff]  }
  0x60   : > { %3560 = vmatprep.subr.bf16.mxu0 %v5427_v9  ;;  %3968 = vmatprep.subr.bf16.mxu1 %v5429_v10  ;;  %v5511_v9 = vld [vmem:[%s6316_s9 + $0x320] ss:$16 sps:$4 sm:$0xff]   ;;  %v5514_v10 = vld [vmem:[%s6316_s9 + $0x328] ss:$16 sps:$4 sm:$0xff]  }
  0x63   : > { %3561 = vmatpush1.bf16.msra.mxu0 %v5431_v11  ;;  %3969 = vmatpush1.bf16.msra.mxu1 %v5432_v12  ;;  %v5519_v11 = vld [vmem:[%s6316_s9 + $0x344] ss:$16 sps:$4 sm:$0xff]   ;;  %v5522_v12 = vld [vmem:[%s6316_s9 + $0x34c] ss:$16 sps:$4 sm:$0xff]  }
  0x64   : > { %3562 = vmatprep.subr.bf16.mxu0 %v5433_v13  ;;  %3970 = vmatprep.subr.bf16.mxu1 %v5435_v14  ;;  %v5517_v13 = vld [vmem:[%s6316_s9 + $0x340] ss:$16 sps:$4 sm:$0xff]   ;;  %v5520_v14 = vld [vmem:[%s6316_s9 + $0x348] ss:$16 sps:$4 sm:$0xff]  }
  0x67   : > { %3563 = vmatpush1.bf16.msra.mxu0 %v5437_v15  ;;  %3971 = vmatpush1.bf16.msra.mxu1 %v5438_v16  ;;  %v5525_v15 = vld [vmem:[%s6316_s9 + $0x364] ss:$16 sps:$4 sm:$0xff]   ;;  %v5528_v16 = vld [vmem:[%s6316_s9 + $0x36c] ss:$16 sps:$4 sm:$0xff]  }
  0x68   : > { %3564 = vmatprep.subr.bf16.mxu0 %v5439_v17  ;;  %3972 = vmatprep.subr.bf16.mxu1 %v5441_v18  ;;  %v5523_v17 = vld [vmem:[%s6316_s9 + $0x360] ss:$16 sps:$4 sm:$0xff]   ;;  %v5526_v18 = vld [vmem:[%s6316_s9 + $0x368] ss:$16 sps:$4 sm:$0xff]  }
  0x6b   : > { %3565 = vmatpush1.bf16.msra.mxu0 %v5443_v19  ;;  %3973 = vmatpush1.bf16.msra.mxu1 %v5444_v20  ;;  %v5531_v19 = vld [vmem:[%s6316_s9 + $0x384] ss:$16 sps:$4 sm:$0xff]   ;;  %v5534_v20 = vld [vmem:[%s6316_s9 + $0x38c] ss:$16 sps:$4 sm:$0xff]  }
  0x6c   : > { %3566 = vmatprep.subr.bf16.mxu0 %v5445_v21  ;;  %3974 = vmatprep.subr.bf16.mxu1 %v5447_v22  ;;  %v5529_v21 = vld [vmem:[%s6316_s9 + $0x380] ss:$16 sps:$4 sm:$0xff]   ;;  %v5532_v22 = vld [vmem:[%s6316_s9 + $0x388] ss:$16 sps:$4 sm:$0xff]  }
  0x6f   : > { %3567 = vmatpush1.bf16.msra.mxu0 %v5449_v23  ;;  %3975 = vmatpush1.bf16.msra.mxu1 %v5450_v24  ;;  %v5537_v23 = vld [vmem:[%s6316_s9 + $0x3a4] ss:$16 sps:$4 sm:$0xff]   ;;  %v5540_v24 = vld [vmem:[%s6316_s9 + $0x3ac] ss:$16 sps:$4 sm:$0xff]  }
  0x70   : > { %3568 = vmatprep.subr.bf16.mxu0 %v5451_v25  ;;  %3976 = vmatprep.subr.bf16.mxu1 %v5453_v26  ;;  %v5535_v25 = vld [vmem:[%s6316_s9 + $0x3a0] ss:$16 sps:$4 sm:$0xff]   ;;  %v5538_v26 = vld [vmem:[%s6316_s9 + $0x3a8] ss:$16 sps:$4 sm:$0xff]  }
  0x73   : > { %3569 = vmatpush1.bf16.msra.mxu0 %v5455_v28  ;;  %3977 = vmatpush1.bf16.msra.mxu1 %v5456_v29  ;;  %v5545_v28 = vld [vmem:[%s6316_s9 + $0x3c4] ss:$16 sps:$4 sm:$0xff]   ;;  %v5548_v29 = vld [vmem:[%s6316_s9 + $0x3cc] ss:$16 sps:$4 sm:$0xff]  }
  0x74   : > { %3589 = vmatprep.subr.bf16.mxu0 %v5459_v30  ;;  %3997 = vmatprep.subr.bf16.mxu1 %v5462_v31  ;;  %v5543_v30 = vld [vmem:[%s6316_s9 + $0x3c0] ss:$16 sps:$4 sm:$0xff]   ;;  %v5546_v31 = vld [vmem:[%s6316_s9 + $0x3c8] ss:$16 sps:$4 sm:$0xff]  }
  0x76   : > { %3571 = vmatmul.mubr.bf16.vlgmr.msra.gmra.mrb[0].mxu0 %v6311_v27  ;;  %3979 = vmatmul.mubr.bf16.vlgmr.msra.gmra.mrb[0].mxu1 %v6311_v27  ;;  %v5472_v27 = vld [vmem:[%s6316_s9 + $0x248] ss:$16 sps:$4 sm:$0xff]  }
  0x77   : > { %3590 = vmatpush1.bf16.msra.mxu0 %v5457_v33  ;;  %3998 = vmatpush1.bf16.msra.mxu1 %v5460_v34  ;;  %v5554_v33 = vld [vmem:[%s6316_s9 + $0x3ec] ss:$16 sps:$4 sm:$0xff]   ;;  %v5549_v34 = vld [vmem:[%s6316_s9 + $0x3e0] ss:$16 sps:$4 sm:$0xff]  }
  0x78   : > { %3591 = vmatprep.subr.bf16.mxu0 %v5465_v35  ;;  %3999 = vmatprep.subr.bf16.mxu1 %v5468_v36  ;;  %v5552_v35 = vld [vmem:[%s6316_s9 + $0x3e8] ss:$16 sps:$4 sm:$0xff]   ;;  %v5557_v36 = vld [vmem:[%s6316_s9 + $0x404] ss:$16 sps:$4 sm:$0xff]  }
  0x79   : > { %3580 = vmatprep.mubr.bf16.mxu0 %v4713_v37  ;;  %3988 = vmatprep.mubr.bf16.mxu1 %v4713_v37  ;;  %v5560_v37 = vld [vmem:[%s6316_s9 + $0x40c] ss:$16 sps:$4 sm:$0xff]  }
  0x7b   : > { %3592 = vmatpush1.bf16.msra.mxu0 %v5463_v38  ;;  %4000 = vmatpush1.bf16.msra.mxu1 %v5466_v39  ;;  %v4698_v38 = vcombine.low %v6396_v42, %v6399_v43  ;;  %v835_v39 = vld [vmem:[%s6305_s30 + $0x88] sm:$0xff]  ;;  %v5561_v42 = vld [vmem:[%s6316_s9 + $0x420] ss:$16 sps:$4 sm:$0xff]  }
  0x7c   : > { %3593 = vmatprep.subr.bf16.mxu0 %v5471_v40  ;;  %4001 = vmatprep.subr.bf16.mxu1 %v5474_v41  ;;  %v5555_v40 = vld [vmem:[%s6316_s9 + $0x400] ss:$16 sps:$4 sm:$0xff]   ;;  %v5558_v41 = vld [vmem:[%s6316_s9 + $0x408] ss:$16 sps:$4 sm:$0xff]  }
  0x7d   : > { %v5564_v43 = vld [vmem:[%s6316_s9 + $0x428] ss:$16 sps:$4 sm:$0xff]  }
  0x7e   : > { %3581 = vmatmul.mubr.bf16.gmra.mrb[4].mxu0 %v4712_v45  ;;  %3989 = vmatmul.mubr.bf16.gmra.mrb[4].mxu1 %v4712_v45  ;;  %v4715_v45 = vcombine.high %v835_v39, %v835_v39 }
  0x7f   : > { %3594 = vmatpush1.bf16.msra.mxu0 %v5469_v44  ;;  %4002 = vmatpush1.bf16.msra.mxu1 %v5472_v27  ;;  %v5563_v44 = vld [vmem:[%s6316_s9 + $0x424] ss:$16 sps:$4 sm:$0xff]   ;;  %v5566_v27 = vld [vmem:[%s6316_s9 + $0x42c] ss:$16 sps:$4 sm:$0xff]  }
  0x80   : > { %3595 = vmatprep.subr.bf16.mxu0 %v5477_v46  ;;  %4003 = vmatprep.subr.bf16.mxu1 %v5480_v47  ;;  %v5571_v46 = vld [vmem:[%s6316_s9 + $0x444] ss:$16 sps:$4 sm:$0xff]   ;;  %v5574_v47 = vld [vmem:[%s6316_s9 + $0x44c] ss:$16 sps:$4 sm:$0xff]  }
  0x81   : > { %3621 = vmatprep.mubr.bf16.mxu0 %v4699_v48  ;;  %4029 = vmatprep.mubr.bf16.mxu1 %v4699_v48  ;;  %v5569_v48 = vld [vmem:[%s6316_s9 + $0x440] ss:$16 sps:$4 sm:$0xff]  }
  0x83   : > { %3596 = vmatpush1.bf16.msra.mxu0 %v5475_v49  ;;  %4004 = vmatpush1.bf16.msra.mxu1 %v5478_v50  ;;  %v5572_v49 = vld [vmem:[%s6316_s9 + $0x448] ss:$16 sps:$4 sm:$0xff]   ;;  %v4714_v50 = vcombine.low %v835_v39, %v835_v39  ;;  %v5649_v39 = vld [vmem:[%s6316_s9 + $0x5e4] ss:$16 sps:$4 sm:$0xff]  }
  0x84   : > { %3597 = vmatprep.subr.bf16.mxu0 %v5483_v51  ;;  %4005 = vmatprep.subr.bf16.mxu1 %v5486_v52  ;;  %v6473_v51 = vld [vmem:[%s6305_s30 + $0x10] sm:$0xff] }
  0x85   : > { %v6476_v52 = vld [vmem:[%s6305_s30 + $0x50] sm:$0xff] }
  0x87   : > { %3598 = vmatpush1.bf16.msra.mxu0 %v5481_v53  ;;  %4006 = vmatpush1.bf16.msra.mxu1 %v5484_v54  ;;  %v5577_v53 = vld [vmem:[%s6316_s9 + $0x464] ss:$16 sps:$4 sm:$0xff]   ;;  %v5580_v54 = vld [vmem:[%s6316_s9 + $0x46c] ss:$16 sps:$4 sm:$0xff]  }
  0x88   : > { %3599 = vmatprep.subr.bf16.mxu0 %v5489_v55  ;;  %4007 = vmatprep.subr.bf16.mxu1 %v5492_v56  ;;  %v4701_v55 = vcombine.high %v6473_v51, %v6476_v52  ;;  %v5575_v56 = vld [vmem:[%s6316_s9 + $0x460] ss:$16 sps:$4 sm:$0xff]  }
  0x8b   : > { %3600 = vmatpush1.bf16.msra.mxu0 %v5487_v57  ;;  %4008 = vmatpush1.bf16.msra.mxu1 %v5490_v58  ;;  %v5578_v57 = vld [vmem:[%s6316_s9 + $0x468] ss:$16 sps:$4 sm:$0xff]   ;;  %v5583_v58 = vld [vmem:[%s6316_s9 + $0x484] ss:$16 sps:$4 sm:$0xff]  }
  0x8c   : > { %3601 = vmatprep.subr.bf16.mxu0 %v5495_v59  ;;  %4009 = vmatprep.subr.bf16.mxu1 %v5498_v60  ;;  %v5586_v59 = vld [vmem:[%s6316_s9 + $0x48c] ss:$16 sps:$4 sm:$0xff]   ;;  %v5581_v60 = vld [vmem:[%s6316_s9 + $0x480] ss:$16 sps:$4 sm:$0xff]  }
  0x8f   : > { %3602 = vmatpush1.bf16.msra.mxu0 %v5493_v61  ;;  %4010 = vmatpush1.bf16.msra.mxu1 %v5496_v62  ;;  %v5584_v61 = vld [vmem:[%s6316_s9 + $0x488] ss:$16 sps:$4 sm:$0xff]   ;;  %v5589_v62 = vld [vmem:[%s6316_s9 + $0x4a4] ss:$16 sps:$4 sm:$0xff]  }
  0x90   : > { %3603 = vmatprep.subr.bf16.mxu0 %v5501_v63  ;;  %4011 = vmatprep.subr.bf16.mxu1 %v5504_v0  ;;  %v5592_v63 = vld [vmem:[%s6316_s9 + $0x4ac] ss:$16 sps:$4 sm:$0xff]   ;;  %v5587_v0 = vld [vmem:[%s6316_s9 + $0x4a0] ss:$16 sps:$4 sm:$0xff]  }
  0x93   : > { %3604 = vmatpush1.bf16.msra.mxu0 %v5499_v1  ;;  %4012 = vmatpush1.bf16.msra.mxu1 %v5502_v2  ;;  %v5590_v1 = vld [vmem:[%s6316_s9 + $0x4a8] ss:$16 sps:$4 sm:$0xff]   ;;  %v5595_v2 = vld [vmem:[%s6316_s9 + $0x4c4] ss:$16 sps:$4 sm:$0xff]  }
  0x94   : > { %3605 = vmatprep.subr.bf16.mxu0 %v5507_v3  ;;  %4013 = vmatprep.subr.bf16.mxu1 %v5510_v4  ;;  %v5598_v3 = vld [vmem:[%s6316_s9 + $0x4cc] ss:$16 sps:$4 sm:$0xff]   ;;  %v5593_v4 = vld [vmem:[%s6316_s9 + $0x4c0] ss:$16 sps:$4 sm:$0xff]  }
  0x97   : > { %3606 = vmatpush1.bf16.msra.mxu0 %v5505_v5  ;;  %4014 = vmatpush1.bf16.msra.mxu1 %v5508_v6  ;;  %v5596_v5 = vld [vmem:[%s6316_s9 + $0x4c8] ss:$16 sps:$4 sm:$0xff]   ;;  %v5601_v6 = vld [vmem:[%s6316_s9 + $0x4e4] ss:$16 sps:$4 sm:$0xff]  }
  0x98   : > { %3607 = vmatprep.subr.bf16.mxu0 %v5513_v7  ;;  %4015 = vmatprep.subr.bf16.mxu1 %v5516_v8  ;;  %v5604_v7 = vld [vmem:[%s6316_s9 + $0x4ec] ss:$16 sps:$4 sm:$0xff]   ;;  %v5599_v8 = vld [vmem:[%s6316_s9 + $0x4e0] ss:$16 sps:$4 sm:$0xff]  }
  0x9b   : > { %3608 = vmatpush1.bf16.msra.mxu0 %v5511_v9  ;;  %4016 = vmatpush1.bf16.msra.mxu1 %v5514_v10  ;;  %v5602_v9 = vld [vmem:[%s6316_s9 + $0x4e8] ss:$16 sps:$4 sm:$0xff]   ;;  %v5607_v10 = vld [vmem:[%s6316_s9 + $0x504] ss:$16 sps:$4 sm:$0xff]  }
  0x9c   : > { %3609 = vmatprep.subr.bf16.mxu0 %v5519_v11  ;;  %4017 = vmatprep.subr.bf16.mxu1 %v5522_v12  ;;  %v5610_v11 = vld [vmem:[%s6316_s9 + $0x50c] ss:$16 sps:$4 sm:$0xff]   ;;  %v5605_v12 = vld [vmem:[%s6316_s9 + $0x500] ss:$16 sps:$4 sm:$0xff]  }
  0x9f   : > { %3610 = vmatpush1.bf16.msra.mxu0 %v5517_v13  ;;  %4018 = vmatpush1.bf16.msra.mxu1 %v5520_v14  ;;  %v5608_v13 = vld [vmem:[%s6316_s9 + $0x508] ss:$16 sps:$4 sm:$0xff]   ;;  %v5613_v14 = vld [vmem:[%s6316_s9 + $0x524] ss:$16 sps:$4 sm:$0xff]  }
  0xa0   : > { %3611 = vmatprep.subr.bf16.mxu0 %v5525_v15  ;;  %4019 = vmatprep.subr.bf16.mxu1 %v5528_v16  ;;  %v5616_v15 = vld [vmem:[%s6316_s9 + $0x52c] ss:$16 sps:$4 sm:$0xff]   ;;  %v5611_v16 = vld [vmem:[%s6316_s9 + $0x520] ss:$16 sps:$4 sm:$0xff]  }
  0xa3   : > { %3612 = vmatpush1.bf16.msra.mxu0 %v5523_v17  ;;  %4020 = vmatpush1.bf16.msra.mxu1 %v5526_v18  ;;  %v5614_v17 = vld [vmem:[%s6316_s9 + $0x528] ss:$16 sps:$4 sm:$0xff]   ;;  %v5619_v18 = vld [vmem:[%s6316_s9 + $0x544] ss:$16 sps:$4 sm:$0xff]  }
  0xa4   : > { %3613 = vmatprep.subr.bf16.mxu0 %v5531_v19  ;;  %4021 = vmatprep.subr.bf16.mxu1 %v5534_v20  ;;  %v5622_v19 = vld [vmem:[%s6316_s9 + $0x54c] ss:$16 sps:$4 sm:$0xff]   ;;  %v5617_v20 = vld [vmem:[%s6316_s9 + $0x540] ss:$16 sps:$4 sm:$0xff]  }
  0xa7   : > { %3614 = vmatpush1.bf16.msra.mxu0 %v5529_v21  ;;  %4022 = vmatpush1.bf16.msra.mxu1 %v5532_v22  ;;  %v5620_v21 = vld [vmem:[%s6316_s9 + $0x548] ss:$16 sps:$4 sm:$0xff]   ;;  %v5625_v22 = vld [vmem:[%s6316_s9 + $0x564] ss:$16 sps:$4 sm:$0xff]  }
  0xa8   : > { %3615 = vmatprep.subr.bf16.mxu0 %v5537_v23  ;;  %4023 = vmatprep.subr.bf16.mxu1 %v5540_v24  ;;  %v5628_v23 = vld [vmem:[%s6316_s9 + $0x56c] ss:$16 sps:$4 sm:$0xff]   ;;  %v5623_v24 = vld [vmem:[%s6316_s9 + $0x560] ss:$16 sps:$4 sm:$0xff]  }
  0xab   : > { %3616 = vmatpush1.bf16.msra.mxu0 %v5535_v25  ;;  %4024 = vmatpush1.bf16.msra.mxu1 %v5538_v26  ;;  %v5626_v25 = vld [vmem:[%s6316_s9 + $0x568] ss:$16 sps:$4 sm:$0xff]   ;;  %v5631_v26 = vld [vmem:[%s6316_s9 + $0x584] ss:$16 sps:$4 sm:$0xff]  }
  0xac   : > { %3617 = vmatprep.subr.bf16.mxu0 %v5545_v28  ;;  %4025 = vmatprep.subr.bf16.mxu1 %v5548_v29  ;;  %v5634_v28 = vld [vmem:[%s6316_s9 + $0x58c] ss:$16 sps:$4 sm:$0xff]   ;;  %v5629_v29 = vld [vmem:[%s6316_s9 + $0x580] ss:$16 sps:$4 sm:$0xff]  }
  0xaf   : > { %3618 = vmatpush1.bf16.msra.mxu0 %v5543_v30  ;;  %4026 = vmatpush1.bf16.msra.mxu1 %v5546_v31  ;;  %v5632_v30 = vld [vmem:[%s6316_s9 + $0x588] ss:$16 sps:$4 sm:$0xff]   ;;  %v5637_v31 = vld [vmem:[%s6316_s9 + $0x5a4] ss:$16 sps:$4 sm:$0xff]  }
  0xb0   : > { %3619 = vmatprep.subr.bf16.mxu0 %v5551_v32  ;;  %4027 = vmatprep.subr.bf16.mxu1 %v5554_v33  ;;  %v5640_v32 = vld [vmem:[%s6316_s9 + $0x5ac] ss:$16 sps:$4 sm:$0xff]   ;;  %v5635_v33 = vld [vmem:[%s6316_s9 + $0x5a0] ss:$16 sps:$4 sm:$0xff]  }
  0xb3   : > { %3620 = vmatpush1.bf16.msra.mxu0 %v5549_v34  ;;  %4028 = vmatpush1.bf16.msra.mxu1 %v5552_v35  ;;  %v5638_v34 = vld [vmem:[%s6316_s9 + $0x5a8] ss:$16 sps:$4 sm:$0xff]   ;;  %v5643_v35 = vld [vmem:[%s6316_s9 + $0x5c4] ss:$16 sps:$4 sm:$0xff]  }
  0xb4   : > { %3640 = vmatprep.subr.bf16.mxu0 %v5557_v36  ;;  %4048 = vmatprep.subr.bf16.mxu1 %v5560_v37  ;;  %v5646_v36 = vld [vmem:[%s6316_s9 + $0x5cc] ss:$16 sps:$4 sm:$0xff]   ;;  %v5641_v37 = vld [vmem:[%s6316_s9 + $0x5c0] ss:$16 sps:$4 sm:$0xff]  }
  0xb6   : > { %3622 = vmatmul.mubr.bf16.vlgmr.msra.gmra.mrb[0].mxu0 %v4698_v38  ;;  %4030 = vmatmul.mubr.bf16.vlgmr.msra.gmra.mrb[0].mxu1 %v4698_v38  ;;  %v5644_v38 = vld [vmem:[%s6316_s9 + $0x5c8] ss:$16 sps:$4 sm:$0xff]  }
  0xb7   : > { %3641 = vmatpush1.bf16.msra.mxu0 %v5555_v40  ;;  %4049 = vmatpush1.bf16.msra.mxu1 %v5558_v41  ;;  %v5652_v40 = vld [vmem:[%s6316_s9 + $0x5ec] ss:$16 sps:$4 sm:$0xff]   ;;  %v5647_v41 = vld [vmem:[%s6316_s9 + $0x5e0] ss:$16 sps:$4 sm:$0xff]  }
  0xb8   : > { %3642 = vmatprep.subr.bf16.mxu0 %v5563_v44  ;;  %4050 = vmatprep.subr.bf16.mxu1 %v5566_v27  ;;  %v5650_v44 = vld [vmem:[%s6316_s9 + $0x5e8] ss:$16 sps:$4 sm:$0xff]   ;;  %v5655_v27 = vld [vmem:[%s6316_s9 + $0x604] ss:$16 sps:$4 sm:$0xff]  }
  0xb9   : > { %3631 = vmatprep.mubr.bf16.mxu0 %v4715_v45  ;;  %4039 = vmatprep.mubr.bf16.mxu1 %v4715_v45  ;;  %v5658_v45 = vld [vmem:[%s6316_s9 + $0x60c] ss:$16 sps:$4 sm:$0xff]  }
  0xbb   : > { %3643 = vmatpush1.bf16.msra.mxu0 %v5561_v42  ;;  %4051 = vmatpush1.bf16.msra.mxu1 %v5564_v43  ;;  %v4700_v42 = vcombine.low %v6473_v51, %v6476_v52  ;;  %v5653_v43 = vld [vmem:[%s6316_s9 + $0x600] ss:$16 sps:$4 sm:$0xff]   ;;  %v5662_v51 = vld [vmem:[%s6316_s9 + $0x628] ss:$16 sps:$4 sm:$0xff]   ;;  %v5669_v52 = vld [vmem:[%s6316_s9 + $0x644] ss:$16 sps:$4 sm:$0xff]  }
  0xbc   : > { %3644 = vmatprep.subr.bf16.mxu0 %v5571_v46  ;;  %4052 = vmatprep.subr.bf16.mxu1 %v5574_v47  ;;  %v836_v46 = vld [vmem:[%s6305_s30 + $0x90] sm:$0xff]  ;;  %v5656_v47 = vld [vmem:[%s6316_s9 + $0x608] ss:$16 sps:$4 sm:$0xff]  }
  0xbe   : > { %3632 = vmatmul.mubr.bf16.gmra.mrb[8].mxu0 %v4714_v50  ;;  %4040 = vmatmul.mubr.bf16.gmra.mrb[8].mxu1 %v4714_v50  ;;  %v4717_v50 = vcombine.high %v836_v46, %v836_v46 }
  0xbf   : > { %3645 = vmatpush1.bf16.msra.mxu0 %v5569_v48  ;;  %4053 = vmatpush1.bf16.msra.mxu1 %v5572_v49  ;;  %v5661_v48 = vld [vmem:[%s6316_s9 + $0x624] ss:$16 sps:$4 sm:$0xff]   ;;  %v5664_v49 = vld [vmem:[%s6316_s9 + $0x62c] ss:$16 sps:$4 sm:$0xff]  }
  0xc0   : > { %3646 = vmatprep.subr.bf16.mxu0 %v5577_v53  ;;  %4054 = vmatprep.subr.bf16.mxu1 %v5580_v54  ;;  %v5659_v53 = vld [vmem:[%s6316_s9 + $0x620] ss:$16 sps:$4 sm:$0xff]   ;;  %v5672_v54 = vld [vmem:[%s6316_s9 + $0x64c] ss:$16 sps:$4 sm:$0xff]  }
  0xc1   : > { %3672 = vmatprep.mubr.bf16.mxu0 %v4701_v55  ;;  %4080 = vmatprep.mubr.bf16.mxu1 %v4701_v55  ;;  %v5667_v55 = vld [vmem:[%s6316_s9 + $0x640] ss:$16 sps:$4 sm:$0xff]  }
  0xc3   : > { %3647 = vmatpush1.bf16.msra.mxu0 %v5575_v56  ;;  %4055 = vmatpush1.bf16.msra.mxu1 %v5578_v57  ;;  %v4716_v56 = vcombine.low %v836_v46, %v836_v46  ;;  %v6547_v57 = vld [vmem:[%s6305_s30 + $0x18] sm:$0xff] }
  0xc4   : > { %3648 = vmatprep.subr.bf16.mxu0 %v5583_v58  ;;  %4056 = vmatprep.subr.bf16.mxu1 %v5586_v59  ;;  %v6550_v58 = vld [vmem:[%s6305_s30 + $0x58] sm:$0xff] }
  0xc5   : > { %v5670_v59 = vld [vmem:[%s6316_s9 + $0x648] ss:$16 sps:$4 sm:$0xff]   ;;  %v5750_v46 = vld [vmem:[%s6316_s9 + $0x7ec] ss:$16 sps:$4 sm:$0xff]  }
  0xc7   : > { %3649 = vmatpush1.bf16.msra.mxu0 %v5581_v60  ;;  %4057 = vmatpush1.bf16.msra.mxu1 %v5584_v61  ;;  %v5675_v60 = vld [vmem:[%s6316_s9 + $0x664] ss:$16 sps:$4 sm:$0xff]   ;;  %v5678_v61 = vld [vmem:[%s6316_s9 + $0x66c] ss:$16 sps:$4 sm:$0xff]  }
  0xc8   : > { %3650 = vmatprep.subr.bf16.mxu0 %v5589_v62  ;;  %4058 = vmatprep.subr.bf16.mxu1 %v5592_v63  ;;  %v4703_v62 = vcombine.high %v6547_v57, %v6550_v58  ;;  %v5673_v63 = vld [vmem:[%s6316_s9 + $0x660] ss:$16 sps:$4 sm:$0xff]  }
  0xcb   : > { %3651 = vmatpush1.bf16.msra.mxu0 %v5587_v0  ;;  %4059 = vmatpush1.bf16.msra.mxu1 %v5590_v1  ;;  %v5676_v0 = vld [vmem:[%s6316_s9 + $0x668] ss:$16 sps:$4 sm:$0xff]   ;;  %v5681_v1 = vld [vmem:[%s6316_s9 + $0x684] ss:$16 sps:$4 sm:$0xff]  }
  0xcc   : > { %3652 = vmatprep.subr.bf16.mxu0 %v5595_v2  ;;  %4060 = vmatprep.subr.bf16.mxu1 %v5598_v3  ;;  %v5684_v2 = vld [vmem:[%s6316_s9 + $0x68c] ss:$16 sps:$4 sm:$0xff]   ;;  %v5679_v3 = vld [vmem:[%s6316_s9 + $0x680] ss:$16 sps:$4 sm:$0xff]  }
  0xcf   : > { %3653 = vmatpush1.bf16.msra.mxu0 %v5593_v4  ;;  %4061 = vmatpush1.bf16.msra.mxu1 %v5596_v5  ;;  %v5682_v4 = vld [vmem:[%s6316_s9 + $0x688] ss:$16 sps:$4 sm:$0xff]   ;;  %v5687_v5 = vld [vmem:[%s6316_s9 + $0x6a4] ss:$16 sps:$4 sm:$0xff]  }
  0xd0   : > { %3654 = vmatprep.subr.bf16.mxu0 %v5601_v6  ;;  %4062 = vmatprep.subr.bf16.mxu1 %v5604_v7  ;;  %v5690_v6 = vld [vmem:[%s6316_s9 + $0x6ac] ss:$16 sps:$4 sm:$0xff]   ;;  %v5685_v7 = vld [vmem:[%s6316_s9 + $0x6a0] ss:$16 sps:$4 sm:$0xff]  }
  0xd3   : > { %3655 = vmatpush1.bf16.msra.mxu0 %v5599_v8  ;;  %4063 = vmatpush1.bf16.msra.mxu1 %v5602_v9  ;;  %v5688_v8 = vld [vmem:[%s6316_s9 + $0x6a8] ss:$16 sps:$4 sm:$0xff]   ;;  %v5693_v9 = vld [vmem:[%s6316_s9 + $0x6c4] ss:$16 sps:$4 sm:$0xff]  }
  0xd4   : > { %3656 = vmatprep.subr.bf16.mxu0 %v5607_v10  ;;  %4064 = vmatprep.subr.bf16.mxu1 %v5610_v11  ;;  %v5696_v10 = vld [vmem:[%s6316_s9 + $0x6cc] ss:$16 sps:$4 sm:$0xff]   ;;  %v5691_v11 = vld [vmem:[%s6316_s9 + $0x6c0] ss:$16 sps:$4 sm:$0xff]  }
  0xd7   : > { %3657 = vmatpush1.bf16.msra.mxu0 %v5605_v12  ;;  %4065 = vmatpush1.bf16.msra.mxu1 %v5608_v13  ;;  %v5694_v12 = vld [vmem:[%s6316_s9 + $0x6c8] ss:$16 sps:$4 sm:$0xff]   ;;  %v5699_v13 = vld [vmem:[%s6316_s9 + $0x6e4] ss:$16 sps:$4 sm:$0xff]  }
  0xd8   : > { %3658 = vmatprep.subr.bf16.mxu0 %v5613_v14  ;;  %4066 = vmatprep.subr.bf16.mxu1 %v5616_v15  ;;  %v5702_v14 = vld [vmem:[%s6316_s9 + $0x6ec] ss:$16 sps:$4 sm:$0xff]   ;;  %v5697_v15 = vld [vmem:[%s6316_s9 + $0x6e0] ss:$16 sps:$4 sm:$0xff]  }
  0xdb   : > { %3659 = vmatpush1.bf16.msra.mxu0 %v5611_v16  ;;  %4067 = vmatpush1.bf16.msra.mxu1 %v5614_v17  ;;  %v5700_v16 = vld [vmem:[%s6316_s9 + $0x6e8] ss:$16 sps:$4 sm:$0xff]   ;;  %v5705_v17 = vld [vmem:[%s6316_s9 + $0x704] ss:$16 sps:$4 sm:$0xff]  }
  0xdc   : > { %3660 = vmatprep.subr.bf16.mxu0 %v5619_v18  ;;  %4068 = vmatprep.subr.bf16.mxu1 %v5622_v19  ;;  %v5708_v18 = vld [vmem:[%s6316_s9 + $0x70c] ss:$16 sps:$4 sm:$0xff]   ;;  %v5703_v19 = vld [vmem:[%s6316_s9 + $0x700] ss:$16 sps:$4 sm:$0xff]  }
  0xdf   : > { %3661 = vmatpush1.bf16.msra.mxu0 %v5617_v20  ;;  %4069 = vmatpush1.bf16.msra.mxu1 %v5620_v21  ;;  %v5706_v20 = vld [vmem:[%s6316_s9 + $0x708] ss:$16 sps:$4 sm:$0xff]   ;;  %v5711_v21 = vld [vmem:[%s6316_s9 + $0x724] ss:$16 sps:$4 sm:$0xff]  }
  0xe0   : > { %3662 = vmatprep.subr.bf16.mxu0 %v5625_v22  ;;  %4070 = vmatprep.subr.bf16.mxu1 %v5628_v23  ;;  %v5714_v22 = vld [vmem:[%s6316_s9 + $0x72c] ss:$16 sps:$4 sm:$0xff]   ;;  %v5709_v23 = vld [vmem:[%s6316_s9 + $0x720] ss:$16 sps:$4 sm:$0xff]  }
  0xe3   : > { %3663 = vmatpush1.bf16.msra.mxu0 %v5623_v24  ;;  %4071 = vmatpush1.bf16.msra.mxu1 %v5626_v25  ;;  %v5712_v24 = vld [vmem:[%s6316_s9 + $0x728] ss:$16 sps:$4 sm:$0xff]   ;;  %v5717_v25 = vld [vmem:[%s6316_s9 + $0x744] ss:$16 sps:$4 sm:$0xff]  }
  0xe4   : > { %3664 = vmatprep.subr.bf16.mxu0 %v5631_v26  ;;  %4072 = vmatprep.subr.bf16.mxu1 %v5634_v28  ;;  %v5720_v26 = vld [vmem:[%s6316_s9 + $0x74c] ss:$16 sps:$4 sm:$0xff]   ;;  %v5715_v28 = vld [vmem:[%s6316_s9 + $0x740] ss:$16 sps:$4 sm:$0xff]  }
  0xe7   : > { %3665 = vmatpush1.bf16.msra.mxu0 %v5629_v29  ;;  %4073 = vmatpush1.bf16.msra.mxu1 %v5632_v30  ;;  %v5718_v29 = vld [vmem:[%s6316_s9 + $0x748] ss:$16 sps:$4 sm:$0xff]   ;;  %v5723_v30 = vld [vmem:[%s6316_s9 + $0x764] ss:$16 sps:$4 sm:$0xff]  }
  0xe8   : > { %3666 = vmatprep.subr.bf16.mxu0 %v5637_v31  ;;  %4074 = vmatprep.subr.bf16.mxu1 %v5640_v32  ;;  %v5726_v31 = vld [vmem:[%s6316_s9 + $0x76c] ss:$16 sps:$4 sm:$0xff]   ;;  %v5721_v32 = vld [vmem:[%s6316_s9 + $0x760] ss:$16 sps:$4 sm:$0xff]  }
  0xeb   : > { %3667 = vmatpush1.bf16.msra.mxu0 %v5635_v33  ;;  %4075 = vmatpush1.bf16.msra.mxu1 %v5638_v34  ;;  %v5724_v33 = vld [vmem:[%s6316_s9 + $0x768] ss:$16 sps:$4 sm:$0xff]   ;;  %v5729_v34 = vld [vmem:[%s6316_s9 + $0x784] ss:$16 sps:$4 sm:$0xff]  }
  0xec   : > { %3668 = vmatprep.subr.bf16.mxu0 %v5643_v35  ;;  %4076 = vmatprep.subr.bf16.mxu1 %v5646_v36  ;;  %v5732_v35 = vld [vmem:[%s6316_s9 + $0x78c] ss:$16 sps:$4 sm:$0xff]   ;;  %v5727_v36 = vld [vmem:[%s6316_s9 + $0x780] ss:$16 sps:$4 sm:$0xff]  }
  0xef   : > { %3669 = vmatpush1.bf16.msra.mxu0 %v5641_v37  ;;  %4077 = vmatpush1.bf16.msra.mxu1 %v5644_v38  ;;  %v5730_v37 = vld [vmem:[%s6316_s9 + $0x788] ss:$16 sps:$4 sm:$0xff]   ;;  %v5735_v38 = vld [vmem:[%s6316_s9 + $0x7a4] ss:$16 sps:$4 sm:$0xff]  }
  0xf0   : > { %3670 = vmatprep.subr.bf16.mxu0 %v5649_v39  ;;  %4078 = vmatprep.subr.bf16.mxu1 %v5652_v40  ;;  %v5738_v39 = vld [vmem:[%s6316_s9 + $0x7ac] ss:$16 sps:$4 sm:$0xff]   ;;  %v5733_v40 = vld [vmem:[%s6316_s9 + $0x7a0] ss:$16 sps:$4 sm:$0xff]  }
  0xf3   : > { %3671 = vmatpush1.bf16.msra.mxu0 %v5647_v41  ;;  %4079 = vmatpush1.bf16.msra.mxu1 %v5650_v44  ;;  %v5736_v41 = vld [vmem:[%s6316_s9 + $0x7a8] ss:$16 sps:$4 sm:$0xff]   ;;  %v5741_v44 = vld [vmem:[%s6316_s9 + $0x7c4] ss:$16 sps:$4 sm:$0xff]  }
  0xf4   : > { %3691 = vmatprep.subr.bf16.mxu0 %v5655_v27  ;;  %4099 = vmatprep.subr.bf16.mxu1 %v5658_v45  ;;  %v5744_v27 = vld [vmem:[%s6316_s9 + $0x7cc] ss:$16 sps:$4 sm:$0xff]   ;;  %v5739_v45 = vld [vmem:[%s6316_s9 + $0x7c0] ss:$16 sps:$4 sm:$0xff]  }
  0xf6   : > { %3673 = vmatmul.mubr.bf16.vlgmr.msra.gmra.mrb[0].mxu0 %v4700_v42  ;;  %4081 = vmatmul.mubr.bf16.vlgmr.msra.gmra.mrb[0].mxu1 %v4700_v42  ;;  %v5742_v42 = vld [vmem:[%s6316_s9 + $0x7c8] ss:$16 sps:$4 sm:$0xff]  }
  0xf7   : > { %3692 = vmatpush1.bf16.msra.mxu0 %v5653_v43  ;;  %4100 = vmatpush1.bf16.msra.mxu1 %v5656_v47  ;;  %v5747_v43 = vld [vmem:[%s6316_s9 + $0x7e4] ss:$16 sps:$4 sm:$0xff]   ;;  %v5745_v47 = vld [vmem:[%s6316_s9 + $0x7e0] ss:$16 sps:$4 sm:$0xff]  }
  0xf8   : > { %3693 = vmatprep.subr.bf16.mxu0 %v5661_v48  ;;  %4101 = vmatprep.subr.bf16.mxu1 %v5664_v49  ;;  %v5748_v48 = vld [vmem:[%s6316_s9 + $0x7e8] ss:$16 sps:$4 sm:$0xff]   ;;  %v5753_v49 = vld [vmem:[%s6316_s9 + $0x804] ss:$16 sps:$4 sm:$0xff]  }
  0xf9   : > { %3682 = vmatprep.mubr.bf16.mxu0 %v4717_v50  ;;  %4090 = vmatprep.mubr.bf16.mxu1 %v4717_v50  ;;  %v5756_v50 = vld [vmem:[%s6316_s9 + $0x80c] ss:$16 sps:$4 sm:$0xff]  }
  0xfb   : > { %3694 = vmatpush1.bf16.msra.mxu0 %v5659_v53  ;;  %4102 = vmatpush1.bf16.msra.mxu1 %v5662_v51  ;;  %v4702_v53 = vcombine.low %v6547_v57, %v6550_v58  ;;  %v837_v51 = vld [vmem:[%s6305_s30 + $0x98] sm:$0xff]  ;;  %v5767_v58 = vld [vmem:[%s6316_s9 + $0x844] ss:$16 sps:$4 sm:$0xff]  }
  0xfc   : > { %3695 = vmatprep.subr.bf16.mxu0 %v5669_v52  ;;  %4103 = vmatprep.subr.bf16.mxu1 %v5672_v54  ;;  %v5751_v52 = vld [vmem:[%s6316_s9 + $0x800] ss:$16 sps:$4 sm:$0xff]   ;;  %v5754_v54 = vld [vmem:[%s6316_s9 + $0x808] ss:$16 sps:$4 sm:$0xff]  }
  0xfd   : > { %v5760_v57 = vld [vmem:[%s6316_s9 + $0x828] ss:$16 sps:$4 sm:$0xff]  }
  0xfe   : > { %3683 = vmatmul.mubr.bf16.gmra.mrb[12].mxu0 %v4716_v56  ;;  %4091 = vmatmul.mubr.bf16.gmra.mrb[12].mxu1 %v4716_v56  ;;  %v5762_v56 = vld [vmem:[%s6316_s9 + $0x82c] ss:$16 sps:$4 sm:$0xff]  }
  0xff   : > { %3696 = vmatpush1.bf16.msra.mxu0 %v5667_v55  ;;  %4104 = vmatpush1.bf16.msra.mxu1 %v5670_v59  ;;  %v5759_v55 = vld [vmem:[%s6316_s9 + $0x824] ss:$16 sps:$4 sm:$0xff]   ;;  %v4719_v59 = vcombine.high %v837_v51, %v837_v51 }
 0x100   : > { %3697 = vmatprep.subr.bf16.mxu0 %v5675_v60  ;;  %4105 = vmatprep.subr.bf16.mxu1 %v5678_v61  ;;  %v5757_v60 = vld [vmem:[%s6316_s9 + $0x820] ss:$16 sps:$4 sm:$0xff]   ;;  %v5770_v61 = vld [vmem:[%s6316_s9 + $0x84c] ss:$16 sps:$4 sm:$0xff]  }
 0x101   : > { %3723 = vmatprep.mubr.bf16.mxu0 %v4703_v62  ;;  %4131 = vmatprep.mubr.bf16.mxu1 %v4703_v62  ;;  %v5765_v62 = vld [vmem:[%s6316_s9 + $0x840] ss:$16 sps:$4 sm:$0xff]  }
 0x103   : > { %3698 = vmatpush1.bf16.msra.mxu0 %v5673_v63  ;;  %4106 = vmatpush1.bf16.msra.mxu1 %v5676_v0  ;;  %v4718_v63 = vcombine.low %v837_v51, %v837_v51  ;;  %v6622_v0 = vld [vmem:[%s6305_s30 + $0x20] sm:$0xff] }
 0x104   : > { %3699 = vmatprep.subr.bf16.mxu0 %v5681_v1  ;;  %4107 = vmatprep.subr.bf16.mxu1 %v5684_v2  ;;  %v6625_v1 = vld [vmem:[%s6305_s30 + $0x60] sm:$0xff]  ;;  %v5768_v2 = vld [vmem:[%s6316_s9 + $0x848] ss:$16 sps:$4 sm:$0xff]  }
 0x105   : > { %v5833_v51 = vld [vmem:[%s6316_s9 + $0x9a4] ss:$16 sps:$4 sm:$0xff]  }
 0x107   : > { %3700 = vmatpush1.bf16.msra.mxu0 %v5679_v3  ;;  %4108 = vmatpush1.bf16.msra.mxu1 %v5682_v4  ;;  %v5773_v3 = vld [vmem:[%s6316_s9 + $0x864] ss:$16 sps:$4 sm:$0xff]   ;;  %v5776_v4 = vld [vmem:[%s6316_s9 + $0x86c] ss:$16 sps:$4 sm:$0xff]  }
 0x108   : > { %3701 = vmatprep.subr.bf16.mxu0 %v5687_v5  ;;  %4109 = vmatprep.subr.bf16.mxu1 %v5690_v6  ;;  %v4705_v5 = vcombine.high %v6622_v0, %v6625_v1  ;;  %v5771_v6 = vld [vmem:[%s6316_s9 + $0x860] ss:$16 sps:$4 sm:$0xff]  }
 0x10b   : > { %3702 = vmatpush1.bf16.msra.mxu0 %v5685_v7  ;;  %4110 = vmatpush1.bf16.msra.mxu1 %v5688_v8  ;;  %v5774_v7 = vld [vmem:[%s6316_s9 + $0x868] ss:$16 sps:$4 sm:$0xff]   ;;  %v5779_v8 = vld [vmem:[%s6316_s9 + $0x884] ss:$16 sps:$4 sm:$0xff]  }
 0x10c   : > { %3703 = vmatprep.subr.bf16.mxu0 %v5693_v9  ;;  %4111 = vmatprep.subr.bf16.mxu1 %v5696_v10  ;;  %v5782_v9 = vld [vmem:[%s6316_s9 + $0x88c] ss:$16 sps:$4 sm:$0xff]   ;;  %v5777_v10 = vld [vmem:[%s6316_s9 + $0x880] ss:$16 sps:$4 sm:$0xff]  }
 0x10f   : > { %3704 = vmatpush1.bf16.msra.mxu0 %v5691_v11  ;;  %4112 = vmatpush1.bf16.msra.mxu1 %v5694_v12  ;;  %v5780_v11 = vld [vmem:[%s6316_s9 + $0x888] ss:$16 sps:$4 sm:$0xff]   ;;  %v5785_v12 = vld [vmem:[%s6316_s9 + $0x8a4] ss:$16 sps:$4 sm:$0xff]  }
 0x110   : > { %3705 = vmatprep.subr.bf16.mxu0 %v5699_v13  ;;  %4113 = vmatprep.subr.bf16.mxu1 %v5702_v14  ;;  %v5788_v13 = vld [vmem:[%s6316_s9 + $0x8ac] ss:$16 sps:$4 sm:$0xff]   ;;  %v5783_v14 = vld [vmem:[%s6316_s9 + $0x8a0] ss:$16 sps:$4 sm:$0xff]  }
 0x113   : > { %3706 = vmatpush1.bf16.msra.mxu0 %v5697_v15  ;;  %4114 = vmatpush1.bf16.msra.mxu1 %v5700_v16  ;;  %v5786_v15 = vld [vmem:[%s6316_s9 + $0x8a8] ss:$16 sps:$4 sm:$0xff]   ;;  %v5791_v16 = vld [vmem:[%s6316_s9 + $0x8c4] ss:$16 sps:$4 sm:$0xff]  }
 0x114   : > { %3707 = vmatprep.subr.bf16.mxu0 %v5705_v17  ;;  %4115 = vmatprep.subr.bf16.mxu1 %v5708_v18  ;;  %v5794_v17 = vld [vmem:[%s6316_s9 + $0x8cc] ss:$16 sps:$4 sm:$0xff]   ;;  %v5789_v18 = vld [vmem:[%s6316_s9 + $0x8c0] ss:$16 sps:$4 sm:$0xff]  }
 0x117   : > { %3708 = vmatpush1.bf16.msra.mxu0 %v5703_v19  ;;  %4116 = vmatpush1.bf16.msra.mxu1 %v5706_v20  ;;  %v5792_v19 = vld [vmem:[%s6316_s9 + $0x8c8] ss:$16 sps:$4 sm:$0xff]   ;;  %v5797_v20 = vld [vmem:[%s6316_s9 + $0x8e4] ss:$16 sps:$4 sm:$0xff]  }
 0x118   : > { %3709 = vmatprep.subr.bf16.mxu0 %v5711_v21  ;;  %4117 = vmatprep.subr.bf16.mxu1 %v5714_v22  ;;  %v5800_v21 = vld [vmem:[%s6316_s9 + $0x8ec] ss:$16 sps:$4 sm:$0xff]   ;;  %v5795_v22 = vld [vmem:[%s6316_s9 + $0x8e0] ss:$16 sps:$4 sm:$0xff]  }
 0x11b   : > { %3710 = vmatpush1.bf16.msra.mxu0 %v5709_v23  ;;  %4118 = vmatpush1.bf16.msra.mxu1 %v5712_v24  ;;  %v5798_v23 = vld [vmem:[%s6316_s9 + $0x8e8] ss:$16 sps:$4 sm:$0xff]   ;;  %v5803_v24 = vld [vmem:[%s6316_s9 + $0x904] ss:$16 sps:$4 sm:$0xff]  }
 0x11c   : > { %3711 = vmatprep.subr.bf16.mxu0 %v5717_v25  ;;  %4119 = vmatprep.subr.bf16.mxu1 %v5720_v26  ;;  %v5806_v25 = vld [vmem:[%s6316_s9 + $0x90c] ss:$16 sps:$4 sm:$0xff]  }
 0x11f   : > { %3712 = vmatpush1.bf16.msra.mxu0 %v5715_v28  ;;  %4120 = vmatpush1.bf16.msra.mxu1 %v5718_v29 }
 0x120   : > { %3713 = vmatprep.subr.bf16.mxu0 %v5723_v30  ;;  %4121 = vmatprep.subr.bf16.mxu1 %v5726_v31  ;;  %v5801_v31 = vld [vmem:[%s6316_s9 + $0x900] ss:$16 sps:$4 sm:$0xff]  }
 0x123   : > { %3714 = vmatpush1.bf16.msra.mxu0 %v5721_v32  ;;  %4122 = vmatpush1.bf16.msra.mxu1 %v5724_v33  ;;  %v5804_v32 = vld [vmem:[%s6316_s9 + $0x908] ss:$16 sps:$4 sm:$0xff]  }
 0x124   : > { %3715 = vmatprep.subr.bf16.mxu0 %v5729_v34  ;;  %4123 = vmatprep.subr.bf16.mxu1 %v5732_v35  ;;  %v5809_v35 = vld [vmem:[%s6316_s9 + $0x924] ss:$16 sps:$4 sm:$0xff]  }
 0x127   : > { %3716 = vmatpush1.bf16.msra.mxu0 %v5727_v36  ;;  %4124 = vmatpush1.bf16.msra.mxu1 %v5730_v37  ;;  %v5812_v36 = vld [vmem:[%s6316_s9 + $0x92c] ss:$16 sps:$4 sm:$0xff]  }
 0x128   : > { %3717 = vmatprep.subr.bf16.mxu0 %v5735_v38  ;;  %4125 = vmatprep.subr.bf16.mxu1 %v5738_v39  ;;  %v5807_v39 = vld [vmem:[%s6316_s9 + $0x920] ss:$16 sps:$4 sm:$0xff]  }
 0x12b   : > { %3718 = vmatpush1.bf16.msra.mxu0 %v5733_v40  ;;  %4126 = vmatpush1.bf16.msra.mxu1 %v5736_v41  ;;  %v5810_v40 = vld [vmem:[%s6316_s9 + $0x928] ss:$16 sps:$4 sm:$0xff]   ;;  %v5815_v41 = vld [vmem:[%s6316_s9 + $0x944] ss:$16 sps:$4 sm:$0xff]  }
 0x12c   : > { %3719 = vmatprep.subr.bf16.mxu0 %v5741_v44  ;;  %4127 = vmatprep.subr.bf16.mxu1 %v5744_v27  ;;  %v5818_v44 = vld [vmem:[%s6316_s9 + $0x94c] ss:$16 sps:$4 sm:$0xff]   ;;  %v5813_v27 = vld [vmem:[%s6316_s9 + $0x940] ss:$16 sps:$4 sm:$0xff]  }
 0x12f   : > { %3720 = vmatpush1.bf16.msra.mxu0 %v5739_v45  ;;  %4128 = vmatpush1.bf16.msra.mxu1 %v5742_v42  ;;  %v5816_v45 = vld [vmem:[%s6316_s9 + $0x948] ss:$16 sps:$4 sm:$0xff]   ;;  %v5821_v42 = vld [vmem:[%s6316_s9 + $0x964] ss:$16 sps:$4 sm:$0xff]  }
 0x130   : > { %3721 = vmatprep.subr.bf16.mxu0 %v5747_v43  ;;  %4129 = vmatprep.subr.bf16.mxu1 %v5750_v46  ;;  %v5824_v43 = vld [vmem:[%s6316_s9 + $0x96c] ss:$16 sps:$4 sm:$0xff]   ;;  %v5819_v46 = vld [vmem:[%s6316_s9 + $0x960] ss:$16 sps:$4 sm:$0xff]  }
 0x133   : > { %3722 = vmatpush1.bf16.msra.mxu0 %v5745_v47  ;;  %4130 = vmatpush1.bf16.msra.mxu1 %v5748_v48  ;;  %v5822_v47 = vld [vmem:[%s6316_s9 + $0x968] ss:$16 sps:$4 sm:$0xff]   ;;  %v5827_v48 = vld [vmem:[%s6316_s9 + $0x984] ss:$16 sps:$4 sm:$0xff]  }
 0x134   : > { %3742 = vmatprep.subr.bf16.mxu0 %v5753_v49  ;;  %4150 = vmatprep.subr.bf16.mxu1 %v5756_v50  ;;  %v5830_v49 = vld [vmem:[%s6316_s9 + $0x98c] ss:$16 sps:$4 sm:$0xff]   ;;  %v5825_v50 = vld [vmem:[%s6316_s9 + $0x980] ss:$16 sps:$4 sm:$0xff]  }
 0x136   : > { %3724 = vmatmul.mubr.bf16.vlgmr.msra.gmra.mrb[0].mxu0 %v4702_v53  ;;  %4132 = vmatmul.mubr.bf16.vlgmr.msra.gmra.mrb[0].mxu1 %v4702_v53  ;;  %v5828_v53 = vld [vmem:[%s6316_s9 + $0x988] ss:$16 sps:$4 sm:$0xff]  }
 0x137   : > { %3743 = vmatpush1.bf16.msra.mxu0 %v5751_v52  ;;  %4151 = vmatpush1.bf16.msra.mxu1 %v5754_v54  ;;  %v5836_v52 = vld [vmem:[%s6316_s9 + $0x9ac] ss:$16 sps:$4 sm:$0xff]   ;;  %v5831_v54 = vld [vmem:[%s6316_s9 + $0x9a0] ss:$16 sps:$4 sm:$0xff]  }
 0x138   : > { %3744 = vmatprep.subr.bf16.mxu0 %v5759_v55  ;;  %4152 = vmatprep.subr.bf16.mxu1 %v5762_v56  ;;  %v5834_v55 = vld [vmem:[%s6316_s9 + $0x9a8] ss:$16 sps:$4 sm:$0xff]   ;;  %v5839_v56 = vld [vmem:[%s6316_s9 + $0x9c4] ss:$16 sps:$4 sm:$0xff]  }
 0x139   : > { %3733 = vmatprep.mubr.bf16.mxu0 %v4719_v59  ;;  %4141 = vmatprep.mubr.bf16.mxu1 %v4719_v59  ;;  %v5842_v59 = vld [vmem:[%s6316_s9 + $0x9cc] ss:$16 sps:$4 sm:$0xff]  }
 0x13b   : > { %3745 = vmatpush1.bf16.msra.mxu0 %v5757_v60  ;;  %4153 = vmatpush1.bf16.msra.mxu1 %v5760_v57  ;;  %v5837_v60 = vld [vmem:[%s6316_s9 + $0x9c0] ss:$16 sps:$4 sm:$0xff]   ;;  %v5840_v57 = vld [vmem:[%s6316_s9 + $0x9c8] ss:$16 sps:$4 sm:$0xff]  }
 0x13c   : > { %3746 = vmatprep.subr.bf16.mxu0 %v5767_v58  ;;  %4154 = vmatprep.subr.bf16.mxu1 %v5770_v61  ;;  %v5845_v58 = vld [vmem:[%s6316_s9 + $0x9e4] ss:$16 sps:$4 sm:$0xff]   ;;  %v5848_v61 = vld [vmem:[%s6316_s9 + $0x9ec] ss:$16 sps:$4 sm:$0xff]  }
 0x13e   : > { %3734 = vmatmul.mubr.bf16.gmra.mrb[16].mxu0 %v4718_v63  ;;  %4142 = vmatmul.mubr.bf16.gmra.mrb[16].mxu1 %v4718_v63  ;;  %v5846_v63 = vld [vmem:[%s6316_s9 + $0x9e8] ss:$16 sps:$4 sm:$0xff]  }
 0x13f   : > { %3747 = vmatpush1.bf16.msra.mxu0 %v5765_v62  ;;  %4155 = vmatpush1.bf16.msra.mxu1 %v5768_v2  ;;  %v5843_v62 = vld [vmem:[%s6316_s9 + $0x9e0] ss:$16 sps:$4 sm:$0xff]   ;;  %v5851_v2 = vld [vmem:[%s6316_s9 + $0xa04] ss:$16 sps:$4 sm:$0xff]  }
 0x140   : > { %3748 = vmatprep.subr.bf16.mxu0 %v5773_v3  ;;  %4156 = vmatprep.subr.bf16.mxu1 %v5776_v4  ;;  %v5854_v3 = vld [vmem:[%s6316_s9 + $0xa0c] ss:$16 sps:$4 sm:$0xff]   ;;  %v5849_v4 = vld [vmem:[%s6316_s9 + $0xa00] ss:$16 sps:$4 sm:$0xff]  }
 0x141   : > { %3774 = vmatprep.mubr.bf16.mxu0 %v4705_v5  ;;  %4182 = vmatprep.mubr.bf16.mxu1 %v4705_v5  ;;  %v4704_v5 = vcombine.low %v6622_v0, %v6625_v1  ;;  %v5858_v0 = vld [vmem:[%s6316_s9 + $0xa28] ss:$16 sps:$4 sm:$0xff]   ;;  %v5865_v1 = vld [vmem:[%s6316_s9 + $0xa44] ss:$16 sps:$4 sm:$0xff]  }
 0x143   : > { %3749 = vmatpush1.bf16.msra.mxu0 %v5771_v6  ;;  %4157 = vmatpush1.bf16.msra.mxu1 %v5774_v7  ;;  %v5852_v6 = vld [vmem:[%s6316_s9 + $0xa08] ss:$16 sps:$4 sm:$0xff]   ;;  %v838_v7 = vld [vmem:[%s6305_s30 + $0xa0] sm:$0xff] }
 0x144   : > { %3750 = vmatprep.subr.bf16.mxu0 %v5779_v8  ;;  %4158 = vmatprep.subr.bf16.mxu1 %v5782_v9  ;;  %v5857_v8 = vld [vmem:[%s6316_s9 + $0xa24] ss:$16 sps:$4 sm:$0xff]   ;;  %v5860_v9 = vld [vmem:[%s6316_s9 + $0xa2c] ss:$16 sps:$4 sm:$0xff]  }
 0x147   : > { %3751 = vmatpush1.bf16.msra.mxu0 %v5777_v10  ;;  %4159 = vmatpush1.bf16.msra.mxu1 %v5780_v11  ;;  %v5855_v10 = vld [vmem:[%s6316_s9 + $0xa20] ss:$16 sps:$4 sm:$0xff]   ;;  %v4721_v11 = vcombine.high %v838_v7, %v838_v7 }
 0x148   : > { %3752 = vmatprep.subr.bf16.mxu0 %v5785_v12  ;;  %4160 = vmatprep.subr.bf16.mxu1 %v5788_v13  ;;  %v5868_v12 = vld [vmem:[%s6316_s9 + $0xa4c] ss:$16 sps:$4 sm:$0xff]  }
 0x149   : > { %v6704_v13 = vld [vmem:[%s6305_s30 + $0x28] sm:$0xff] }
 0x14b   : > { %3753 = vmatpush1.bf16.msra.mxu0 %v5783_v14  ;;  %4161 = vmatpush1.bf16.msra.mxu1 %v5786_v15  ;;  %v5863_v14 = vld [vmem:[%s6316_s9 + $0xa40] ss:$16 sps:$4 sm:$0xff]   ;;  %v5866_v15 = vld [vmem:[%s6316_s9 + $0xa48] ss:$16 sps:$4 sm:$0xff]  }
 0x14c   : > { %3754 = vmatprep.subr.bf16.mxu0 %v5791_v16  ;;  %4162 = vmatprep.subr.bf16.mxu1 %v5794_v17  ;;  %v4720_v16 = vcombine.low %v838_v7, %v838_v7  ;;  %v6709_v17 = vld [vmem:[%s6305_s30 + $0x68] sm:$0xff]  ;;  %v5923_v7 = vld [vmem:[%s6316_s9 + $0xb80] ss:$16 sps:$4 sm:$0xff]  }
 0x14f   : > { %3755 = vmatpush1.bf16.msra.mxu0 %v5789_v18  ;;  %4163 = vmatpush1.bf16.msra.mxu1 %v5792_v19  ;;  %v5871_v18 = vld [vmem:[%s6316_s9 + $0xa64] ss:$16 sps:$4 sm:$0xff]   ;;  %v5874_v19 = vld [vmem:[%s6316_s9 + $0xa6c] ss:$16 sps:$4 sm:$0xff]  }
 0x150   : > { %3756 = vmatprep.subr.bf16.mxu0 %v5797_v20  ;;  %4164 = vmatprep.subr.bf16.mxu1 %v5800_v21  ;;  %v4707_v20 = vcombine.high %v6704_v13, %v6709_v17  ;;  %v5869_v21 = vld [vmem:[%s6316_s9 + $0xa60] ss:$16 sps:$4 sm:$0xff]  }
 0x151   : > { %v6652_v26 = vpop.f32.mrb[4].mxu0  ;;  %v6654_v28 = vpop.f32.mrb[4].mxu1 }
 0x152   : > { %v6656_v29 = vpop.f32.mrb[5].mxu0  ;;  %v6658_v30 = vpop.f32.mrb[5].mxu1 }
 0x153   : > { %3757 = vmatpush1.bf16.msra.mxu0 %v5795_v22  ;;  %4165 = vmatpush1.bf16.msra.mxu1 %v5798_v23  ;;  %v3586_v33 = vpop.f32.mrb[6].mxu0  ;;  %v3994_v34 = vpop.f32.mrb[6].mxu1  ;;  %v5872_v22 = vld [vmem:[%s6316_s9 + $0xa68] ss:$16 sps:$4 sm:$0xff]   ;;  %v5877_v23 = vld [vmem:[%s6316_s9 + $0xa84] ss:$16 sps:$4 sm:$0xff]  }
 0x154   : > { %3758 = vmatprep.subr.bf16.mxu0 %v5803_v24  ;;  %4166 = vmatprep.subr.bf16.mxu1 %v5806_v25  ;;  %v3587_v37 = vpop.f32.mrb[7].mxu0  ;;  %v3995_v38 = vpop.f32.mrb[7].mxu1  ;;  %v5880_v24 = vld [vmem:[%s6316_s9 + $0xa8c] ss:$16 sps:$4 sm:$0xff]   ;;  %v5875_v25 = vld [vmem:[%s6316_s9 + $0xa80] ss:$16 sps:$4 sm:$0xff]  }
 0x155   : > { %v5886_v33 = vld [vmem:[%s6316_s9 + $0xaac] ss:$16 sps:$4 sm:$0xff]   ;;  %v5881_v34 = vld [vmem:[%s6316_s9 + $0xaa0] ss:$16 sps:$4 sm:$0xff]  }
 0x156   : > { %v5892_v37 = vld [vmem:[%s6316_s9 + $0xacc] ss:$16 sps:$4 sm:$0xff]   ;;  %v5887_v38 = vld [vmem:[%s6316_s9 + $0xac0] ss:$16 sps:$4 sm:$0xff]  }
 0x157   : > { %3759 = vmatpush1.bf16.msra.mxu0 %v5801_v31  ;;  %4167 = vmatpush1.bf16.msra.mxu1 %v5804_v32  ;;  %v5878_v31 = vld [vmem:[%s6316_s9 + $0xa88] ss:$16 sps:$4 sm:$0xff]   ;;  %v5883_v32 = vld [vmem:[%s6316_s9 + $0xaa4] ss:$16 sps:$4 sm:$0xff]  }
 0x158   : > { %3760 = vmatprep.subr.bf16.mxu0 %v5809_v35  ;;  %4168 = vmatprep.subr.bf16.mxu1 %v5812_v36  ;;  %v5884_v35 = vld [vmem:[%s6316_s9 + $0xaa8] ss:$16 sps:$4 sm:$0xff]   ;;  %v5889_v36 = vld [vmem:[%s6316_s9 + $0xac4] ss:$16 sps:$4 sm:$0xff]  }
 0x15b   : > { %3761 = vmatpush1.bf16.msra.mxu0 %v5807_v39  ;;  %4169 = vmatpush1.bf16.msra.mxu1 %v5810_v40  ;;  %v5890_v39 = vld [vmem:[%s6316_s9 + $0xac8] ss:$16 sps:$4 sm:$0xff]   ;;  %v5895_v40 = vld [vmem:[%s6316_s9 + $0xae4] ss:$16 sps:$4 sm:$0xff]  }
 0x15c   : > { %3762 = vmatprep.subr.bf16.mxu0 %v5815_v41  ;;  %4170 = vmatprep.subr.bf16.mxu1 %v5818_v44  ;;  %v5898_v41 = vld [vmem:[%s6316_s9 + $0xaec] ss:$16 sps:$4 sm:$0xff]   ;;  %v5893_v44 = vld [vmem:[%s6316_s9 + $0xae0] ss:$16 sps:$4 sm:$0xff]  }
 0x15f   : > { %3763 = vmatpush1.bf16.msra.mxu0 %v5813_v27  ;;  %4171 = vmatpush1.bf16.msra.mxu1 %v5816_v45  ;;  %v5896_v27 = vld [vmem:[%s6316_s9 + $0xae8] ss:$16 sps:$4 sm:$0xff]   ;;  %v5901_v45 = vld [vmem:[%s6316_s9 + $0xb04] ss:$16 sps:$4 sm:$0xff]  }
 0x160   : > { %3764 = vmatprep.subr.bf16.mxu0 %v5821_v42  ;;  %4172 = vmatprep.subr.bf16.mxu1 %v5824_v43  ;;  %v5904_v42 = vld [vmem:[%s6316_s9 + $0xb0c] ss:$16 sps:$4 sm:$0xff]  }
 0x163   : > { %3765 = vmatpush1.bf16.msra.mxu0 %v5819_v46  ;;  %4173 = vmatpush1.bf16.msra.mxu1 %v5822_v47 }
 0x164   : > { %3766 = vmatprep.subr.bf16.mxu0 %v5827_v48  ;;  %4174 = vmatprep.subr.bf16.mxu1 %v5830_v49 }
 0x167   : > { %3767 = vmatpush1.bf16.msra.mxu0 %v5825_v50  ;;  %4175 = vmatpush1.bf16.msra.mxu1 %v5828_v53 }
 0x168   : > { %3768 = vmatprep.subr.bf16.mxu0 %v5833_v51  ;;  %4176 = vmatprep.subr.bf16.mxu1 %v5836_v52  ;;  %v5899_v52 = vld [vmem:[%s6316_s9 + $0xb00] ss:$16 sps:$4 sm:$0xff]  }
 0x16b   : > { %3769 = vmatpush1.bf16.msra.mxu0 %v5831_v54  ;;  %4177 = vmatpush1.bf16.msra.mxu1 %v5834_v55  ;;  %v5902_v54 = vld [vmem:[%s6316_s9 + $0xb08] ss:$16 sps:$4 sm:$0xff]  }
 0x16c   : > { %3770 = vmatprep.subr.bf16.mxu0 %v5839_v56  ;;  %4178 = vmatprep.subr.bf16.mxu1 %v5842_v59 }
 0x16f   : > { %3771 = vmatpush1.bf16.msra.mxu0 %v5837_v60  ;;  %4179 = vmatpush1.bf16.msra.mxu1 %v5840_v57  ;;  %v5908_v60 = vld [vmem:[%s6316_s9 + $0xb28] ss:$16 sps:$4 sm:$0xff]   ;;  %v5913_v57 = vld [vmem:[%s6316_s9 + $0xb44] ss:$16 sps:$4 sm:$0xff]  }
 0x170   : > { %3772 = vmatprep.subr.bf16.mxu0 %v5845_v58  ;;  %4180 = vmatprep.subr.bf16.mxu1 %v5848_v61  ;;  %v5916_v58 = vld [vmem:[%s6316_s9 + $0xb4c] ss:$16 sps:$4 sm:$0xff]   ;;  %v5911_v61 = vld [vmem:[%s6316_s9 + $0xb40] ss:$16 sps:$4 sm:$0xff]  }
 0x173   : > { %3773 = vmatpush1.bf16.msra.mxu0 %v5843_v62  ;;  %4181 = vmatpush1.bf16.msra.mxu1 %v5846_v63  ;;  %v5914_v62 = vld [vmem:[%s6316_s9 + $0xb48] ss:$16 sps:$4 sm:$0xff]   ;;  %v5919_v63 = vld [vmem:[%s6316_s9 + $0xb64] ss:$16 sps:$4 sm:$0xff]  }
 0x174   : > { %3793 = vmatprep.subr.bf16.mxu0 %v5851_v2  ;;  %4201 = vmatprep.subr.bf16.mxu1 %v5854_v3  ;;  %v5922_v2 = vld [vmem:[%s6316_s9 + $0xb6c] ss:$16 sps:$4 sm:$0xff]   ;;  %v5917_v3 = vld [vmem:[%s6316_s9 + $0xb60] ss:$16 sps:$4 sm:$0xff]  }
 0x176   : > { %3775 = vmatmul.mubr.bf16.vlgmr.msra.gmra.mrb[0].mxu0 %v4704_v5  ;;  %4183 = vmatmul.mubr.bf16.vlgmr.msra.gmra.mrb[0].mxu1 %v4704_v5  ;;  %v5925_v5 = vld [vmem:[%s6316_s9 + $0xb84] ss:$16 sps:$4 sm:$0xff]  }
 0x177   : > { %3794 = vmatpush1.bf16.msra.mxu0 %v5849_v4  ;;  %4202 = vmatpush1.bf16.msra.mxu1 %v5852_v6  ;;  %v5920_v4 = vld [vmem:[%s6316_s9 + $0xb68] ss:$16 sps:$4 sm:$0xff]   ;;  %v5928_v6 = vld [vmem:[%s6316_s9 + $0xb8c] ss:$16 sps:$4 sm:$0xff]  }
 0x178   : > { %3795 = vmatprep.subr.bf16.mxu0 %v5857_v8  ;;  %4203 = vmatprep.subr.bf16.mxu1 %v5860_v9  ;;  %v5926_v8 = vld [vmem:[%s6316_s9 + $0xb88] ss:$16 sps:$4 sm:$0xff]   ;;  %v5931_v9 = vld [vmem:[%s6316_s9 + $0xba4] ss:$16 sps:$4 sm:$0xff]  }
 0x179   : > { %3784 = vmatprep.mubr.bf16.mxu0 %v4721_v11  ;;  %4192 = vmatprep.mubr.bf16.mxu1 %v4721_v11  ;;  %v5929_v11 = vld [vmem:[%s6316_s9 + $0xba0] ss:$16 sps:$4 sm:$0xff]  }
 0x17b   : > { %3796 = vmatpush1.bf16.msra.mxu0 %v5855_v10  ;;  %4204 = vmatpush1.bf16.msra.mxu1 %v5858_v0  ;;  %v5934_v10 = vld [vmem:[%s6316_s9 + $0xbac] ss:$16 sps:$4 sm:$0xff]   ;;  %v5932_v0 = vld [vmem:[%s6316_s9 + $0xba8] ss:$16 sps:$4 sm:$0xff]  }
 0x17c   : > { %3797 = vmatprep.subr.bf16.mxu0 %v5865_v1  ;;  %4205 = vmatprep.subr.bf16.mxu1 %v5868_v12  ;;  %v5937_v1 = vld [vmem:[%s6316_s9 + $0xbc4] ss:$16 sps:$4 sm:$0xff]   ;;  %v5940_v12 = vld [vmem:[%s6316_s9 + $0xbcc] ss:$16 sps:$4 sm:$0xff]  }
 0x17e   : > { %3785 = vmatmul.mubr.bf16.gmra.mrb[20].mxu0 %v4720_v16  ;;  %4193 = vmatmul.mubr.bf16.gmra.mrb[20].mxu1 %v4720_v16  ;;  %v5943_v16 = vld [vmem:[%s6316_s9 + $0xbe4] ss:$16 sps:$4 sm:$0xff]  }
 0x17f   : > { %3798 = vmatpush1.bf16.msra.mxu0 %v5863_v14  ;;  %4206 = vmatpush1.bf16.msra.mxu1 %v5866_v15  ;;  %v5935_v14 = vld [vmem:[%s6316_s9 + $0xbc0] ss:$16 sps:$4 sm:$0xff]   ;;  %v5938_v15 = vld [vmem:[%s6316_s9 + $0xbc8] ss:$16 sps:$4 sm:$0xff]  }
 0x180   : > { %3799 = vmatprep.subr.bf16.mxu0 %v5871_v18  ;;  %4207 = vmatprep.subr.bf16.mxu1 %v5874_v19  ;;  %v5946_v18 = vld [vmem:[%s6316_s9 + $0xbec] ss:$16 sps:$4 sm:$0xff]   ;;  %v5941_v19 = vld [vmem:[%s6316_s9 + $0xbe0] ss:$16 sps:$4 sm:$0xff]  }
 0x181   : > { %3825 = vmatprep.mubr.bf16.mxu0 %v4707_v20  ;;  %4233 = vmatprep.mubr.bf16.mxu1 %v4707_v20  ;;  %v5944_v20 = vld [vmem:[%s6316_s9 + $0xbe8] ss:$16 sps:$4 sm:$0xff]  }
 0x183   : > { %3800 = vmatpush1.bf16.msra.mxu0 %v5869_v21  ;;  %4208 = vmatpush1.bf16.msra.mxu1 %v5872_v22  ;;  %v5949_v21 = vld [vmem:[%s6316_s9 + $0xc04] ss:$16 sps:$4 sm:$0xff]   ;;  %v5952_v22 = vld [vmem:[%s6316_s9 + $0xc0c] ss:$16 sps:$4 sm:$0xff]  }
 0x184   : > { %3801 = vmatprep.subr.bf16.mxu0 %v5877_v23  ;;  %4209 = vmatprep.subr.bf16.mxu1 %v5880_v24  ;;  %v4706_v23 = vcombine.low %v6704_v13, %v6709_v17  ;;  %v839_v24 = vld [vmem:[%s6305_s30 + $0xa8] sm:$0xff]  ;;  %v5953_v13 = vld [vmem:[%s6316_s9 + $0xc20] ss:$16 sps:$4 sm:$0xff]  }
 0x185   : > { %v5956_v17 = vld [vmem:[%s6316_s9 + $0xc28] ss:$16 sps:$4 sm:$0xff]  }
 0x187   : > { %3802 = vmatpush1.bf16.msra.mxu0 %v5875_v25  ;;  %4210 = vmatpush1.bf16.msra.mxu1 %v5878_v31  ;;  %v5947_v25 = vld [vmem:[%s6316_s9 + $0xc00] ss:$16 sps:$4 sm:$0xff]   ;;  %v5950_v31 = vld [vmem:[%s6316_s9 + $0xc08] ss:$16 sps:$4 sm:$0xff]  }
 0x188   : > { %3803 = vmatprep.subr.bf16.mxu0 %v5883_v32  ;;  %4211 = vmatprep.subr.bf16.mxu1 %v5886_v33  ;;  %v5955_v32 = vld [vmem:[%s6316_s9 + $0xc24] ss:$16 sps:$4 sm:$0xff]   ;;  %v5958_v33 = vld [vmem:[%s6316_s9 + $0xc2c] ss:$16 sps:$4 sm:$0xff]  }
 0x18b   : > { %3804 = vmatpush1.bf16.msra.mxu0 %v5881_v34  ;;  %4212 = vmatpush1.bf16.msra.mxu1 %v5884_v35  ;;  %v4723_v34 = vcombine.high %v839_v24, %v839_v24  ;;  %v5963_v35 = vld [vmem:[%s6316_s9 + $0xc44] ss:$16 sps:$4 sm:$0xff]  }
 0x18c   : > { %3805 = vmatprep.subr.bf16.mxu0 %v5889_v36  ;;  %4213 = vmatprep.subr.bf16.mxu1 %v5892_v37  ;;  %v5966_v36 = vld [vmem:[%s6316_s9 + $0xc4c] ss:$16 sps:$4 sm:$0xff]   ;;  %v4722_v37 = vcombine.low %v839_v24, %v839_v24  ;;  %v6023_v24 = vld [vmem:[%s6316_s9 + $0xd84] ss:$16 sps:$4 sm:$0xff]  }
 0x18f   : > { %3806 = vmatpush1.bf16.msra.mxu0 %v5887_v38  ;;  %4214 = vmatpush1.bf16.msra.mxu1 %v5890_v39  ;;  %v6791_v38 = vld [vmem:[%s6305_s30 + $0x30] sm:$0xff] }
 0x190   : > { %3807 = vmatprep.subr.bf16.mxu0 %v5895_v40  ;;  %4215 = vmatprep.subr.bf16.mxu1 %v5898_v41  ;;  %v6794_v39 = vld [vmem:[%s6305_s30 + $0x70] sm:$0xff]  ;;  %v5964_v41 = vld [vmem:[%s6316_s9 + $0xc48] ss:$16 sps:$4 sm:$0xff]  }
 0x191   : > { %v3633_v43 = vpop.f32.mrb[8].mxu0  ;;  %v4041_v46 = vpop.f32.mrb[8].mxu1  ;;  %v5961_v40 = vld [vmem:[%s6316_s9 + $0xc40] ss:$16 sps:$4 sm:$0xff]  }
 0x192   : > { %v6736_v47 = vadd.f32 %v3633_v43, %v6652_v26  ;;  %v6739_v48 = vadd.f32 %v4041_v46, %v6654_v28  ;;  %v3635_v49 = vpop.f32.mrb[9].mxu0  ;;  %v4043_v50 = vpop.f32.mrb[9].mxu1  ;;  %v5907_v28 = vld [vmem:[%s6316_s9 + $0xb24] ss:$16 sps:$4 sm:$0xff]   ;;  %v5970_v43 = vld [vmem:[%s6316_s9 + $0xc68] ss:$16 sps:$4 sm:$0xff]  }
 0x193   : > { %v6742_v53 = vadd.f32 %v3635_v49, %v6656_v29  ;;  %v6745_v51 = vadd.f32 %v4043_v50, %v6658_v30  ;;  %3808 = vmatpush1.bf16.msra.mxu0 %v5893_v44  ;;  %4216 = vmatpush1.bf16.msra.mxu1 %v5896_v27  ;;  %v3637_v26 = vpop.f32.mrb[10].mxu0  ;;  %v4045_v55 = vpop.f32.mrb[10].mxu1  ;;  %v5910_v29 = vld [vmem:[%s6316_s9 + $0xb2c] ss:$16 sps:$4 sm:$0xff]   ;;  %v5905_v30 = vld [vmem:[%s6316_s9 + $0xb20] ss:$16 sps:$4 sm:$0xff]  }
 0x194   : > { %3809 = vmatprep.subr.bf16.mxu0 %v5901_v45  ;;  %4217 = vmatprep.subr.bf16.mxu1 %v5904_v42  ;;  %v3638_v56 = vpop.f32.mrb[11].mxu0  ;;  %v4046_v59 = vpop.f32.mrb[11].mxu1  ;;  %v5969_v44 = vld [vmem:[%s6316_s9 + $0xc64] ss:$16 sps:$4 sm:$0xff]   ;;  %v5972_v27 = vld [vmem:[%s6316_s9 + $0xc6c] ss:$16 sps:$4 sm:$0xff]   ;;  %v4709_v45 = vcombine.high %v6791_v38, %v6794_v39 }
 0x195   : > { %v5967_v42 = vld [vmem:[%s6316_s9 + $0xc60] ss:$16 sps:$4 sm:$0xff]   ;;  %v5975_v46 = vld [vmem:[%s6316_s9 + $0xc84] ss:$16 sps:$4 sm:$0xff]   ;;  %v5978_v49 = vld [vmem:[%s6316_s9 + $0xc8c] ss:$16 sps:$4 sm:$0xff]  }
 0x196   : > { %v5973_v50 = vld [vmem:[%s6316_s9 + $0xc80] ss:$16 sps:$4 sm:$0xff]   ;;  %v5984_v26 = vld [vmem:[%s6316_s9 + $0xcac] ss:$16 sps:$4 sm:$0xff]  }
 0x197   : > { %3810 = vmatpush1.bf16.msra.mxu0 %v5899_v52  ;;  %4218 = vmatpush1.bf16.msra.mxu1 %v5902_v54  ;;  %v5976_v52 = vld [vmem:[%s6316_s9 + $0xc88] ss:$16 sps:$4 sm:$0xff]   ;;  %v5981_v54 = vld [vmem:[%s6316_s9 + $0xca4] ss:$16 sps:$4 sm:$0xff]   ;;  %v5979_v55 = vld [vmem:[%s6316_s9 + $0xca0] ss:$16 sps:$4 sm:$0xff]  }
 0x198   : > { %3811 = vmatprep.subr.bf16.mxu0 %v5907_v28  ;;  %4219 = vmatprep.subr.bf16.mxu1 %v5910_v29  ;;  %v5982_v28 = vld [vmem:[%s6316_s9 + $0xca8] ss:$16 sps:$4 sm:$0xff]   ;;  %v5987_v29 = vld [vmem:[%s6316_s9 + $0xcc4] ss:$16 sps:$4 sm:$0xff]   ;;  %v5990_v56 = vld [vmem:[%s6316_s9 + $0xccc] ss:$16 sps:$4 sm:$0xff]  }
 0x199   : > { %v5985_v59 = vld [vmem:[%s6316_s9 + $0xcc0] ss:$16 sps:$4 sm:$0xff]  }
 0x19b   : > { %3812 = vmatpush1.bf16.msra.mxu0 %v5905_v30  ;;  %4220 = vmatpush1.bf16.msra.mxu1 %v5908_v60  ;;  %v5988_v30 = vld [vmem:[%s6316_s9 + $0xcc8] ss:$16 sps:$4 sm:$0xff]   ;;  %v5993_v60 = vld [vmem:[%s6316_s9 + $0xce4] ss:$16 sps:$4 sm:$0xff]  }
 0x19c   : > { %3813 = vmatprep.subr.bf16.mxu0 %v5913_v57  ;;  %4221 = vmatprep.subr.bf16.mxu1 %v5916_v58  ;;  %v5996_v57 = vld [vmem:[%s6316_s9 + $0xcec] ss:$16 sps:$4 sm:$0xff]   ;;  %v5991_v58 = vld [vmem:[%s6316_s9 + $0xce0] ss:$16 sps:$4 sm:$0xff]  }
 0x19f   : > { %3814 = vmatpush1.bf16.msra.mxu0 %v5911_v61  ;;  %4222 = vmatpush1.bf16.msra.mxu1 %v5914_v62  ;;  %v5994_v61 = vld [vmem:[%s6316_s9 + $0xce8] ss:$16 sps:$4 sm:$0xff]   ;;  %v5999_v62 = vld [vmem:[%s6316_s9 + $0xd04] ss:$16 sps:$4 sm:$0xff]  }
 0x1a0   : > { %3815 = vmatprep.subr.bf16.mxu0 %v5919_v63  ;;  %4223 = vmatprep.subr.bf16.mxu1 %v5922_v2  ;;  %v6002_v63 = vld [vmem:[%s6316_s9 + $0xd0c] ss:$16 sps:$4 sm:$0xff]  }
 0x1a3   : > { %3816 = vmatpush1.bf16.msra.mxu0 %v5917_v3  ;;  %4224 = vmatpush1.bf16.msra.mxu1 %v5920_v4 }
 0x1a4   : > { %3817 = vmatprep.subr.bf16.mxu0 %v5925_v5  ;;  %4225 = vmatprep.subr.bf16.mxu1 %v5928_v6 }
 0x1a7   : > { %3818 = vmatpush1.bf16.msra.mxu0 %v5923_v7  ;;  %4226 = vmatpush1.bf16.msra.mxu1 %v5926_v8 }
 0x1a8   : > { %3819 = vmatprep.subr.bf16.mxu0 %v5931_v9  ;;  %4227 = vmatprep.subr.bf16.mxu1 %v5934_v10  ;;  %v5997_v10 = vld [vmem:[%s6316_s9 + $0xd00] ss:$16 sps:$4 sm:$0xff]  }
 0x1ab   : > { %3820 = vmatpush1.bf16.msra.mxu0 %v5929_v11  ;;  %4228 = vmatpush1.bf16.msra.mxu1 %v5932_v0  ;;  %v6000_v11 = vld [vmem:[%s6316_s9 + $0xd08] ss:$16 sps:$4 sm:$0xff]  }
 0x1ac   : > { %3821 = vmatprep.subr.bf16.mxu0 %v5937_v1  ;;  %4229 = vmatprep.subr.bf16.mxu1 %v5940_v12 }
 0x1af   : > { %3822 = vmatpush1.bf16.msra.mxu0 %v5935_v14  ;;  %4230 = vmatpush1.bf16.msra.mxu1 %v5938_v15  ;;  %v6006_v14 = vld [vmem:[%s6316_s9 + $0xd28] ss:$16 sps:$4 sm:$0xff]   ;;  %v6011_v15 = vld [vmem:[%s6316_s9 + $0xd44] ss:$16 sps:$4 sm:$0xff]  }
 0x1b0   : > { %3823 = vmatprep.subr.bf16.mxu0 %v5943_v16  ;;  %4231 = vmatprep.subr.bf16.mxu1 %v5946_v18  ;;  %v6014_v16 = vld [vmem:[%s6316_s9 + $0xd4c] ss:$16 sps:$4 sm:$0xff]   ;;  %v6009_v18 = vld [vmem:[%s6316_s9 + $0xd40] ss:$16 sps:$4 sm:$0xff]  }
 0x1b3   : > { %3824 = vmatpush1.bf16.msra.mxu0 %v5941_v19  ;;  %4232 = vmatpush1.bf16.msra.mxu1 %v5944_v20  ;;  %v6012_v19 = vld [vmem:[%s6316_s9 + $0xd48] ss:$16 sps:$4 sm:$0xff]   ;;  %v6017_v20 = vld [vmem:[%s6316_s9 + $0xd64] ss:$16 sps:$4 sm:$0xff]  }
 0x1b4   : > { %3844 = vmatprep.subr.bf16.mxu0 %v5949_v21  ;;  %4252 = vmatprep.subr.bf16.mxu1 %v5952_v22  ;;  %v6020_v21 = vld [vmem:[%s6316_s9 + $0xd6c] ss:$16 sps:$4 sm:$0xff]   ;;  %v6015_v22 = vld [vmem:[%s6316_s9 + $0xd60] ss:$16 sps:$4 sm:$0xff]  }
 0x1b6   : > { %3826 = vmatmul.mubr.bf16.vlgmr.msra.gmra.mrb[0].mxu0 %v4706_v23  ;;  %4234 = vmatmul.mubr.bf16.vlgmr.msra.gmra.mrb[0].mxu1 %v4706_v23  ;;  %v6018_v23 = vld [vmem:[%s6316_s9 + $0xd68] ss:$16 sps:$4 sm:$0xff]  }
 0x1b7   : > { %3845 = vmatpush1.bf16.msra.mxu0 %v5947_v25  ;;  %4253 = vmatpush1.bf16.msra.mxu1 %v5950_v31  ;;  %v6026_v25 = vld [vmem:[%s6316_s9 + $0xd8c] ss:$16 sps:$4 sm:$0xff]   ;;  %v6021_v31 = vld [vmem:[%s6316_s9 + $0xd80] ss:$16 sps:$4 sm:$0xff]  }
 0x1b8   : > { %3846 = vmatprep.subr.bf16.mxu0 %v5955_v32  ;;  %4254 = vmatprep.subr.bf16.mxu1 %v5958_v33  ;;  %v6024_v32 = vld [vmem:[%s6316_s9 + $0xd88] ss:$16 sps:$4 sm:$0xff]   ;;  %v6029_v33 = vld [vmem:[%s6316_s9 + $0xda4] ss:$16 sps:$4 sm:$0xff]  }
 0x1b9   : > { %3835 = vmatprep.mubr.bf16.mxu0 %v4723_v34  ;;  %4243 = vmatprep.mubr.bf16.mxu1 %v4723_v34  ;;  %v6032_v34 = vld [vmem:[%s6316_s9 + $0xdac] ss:$16 sps:$4 sm:$0xff]  }
 0x1bb   : > { %3847 = vmatpush1.bf16.msra.mxu0 %v5953_v13  ;;  %4255 = vmatpush1.bf16.msra.mxu1 %v5956_v17  ;;  %v6027_v13 = vld [vmem:[%s6316_s9 + $0xda0] ss:$16 sps:$4 sm:$0xff]   ;;  %v6030_v17 = vld [vmem:[%s6316_s9 + $0xda8] ss:$16 sps:$4 sm:$0xff]  }
 0x1bc   : > { %3848 = vmatprep.subr.bf16.mxu0 %v5963_v35  ;;  %4256 = vmatprep.subr.bf16.mxu1 %v5966_v36  ;;  %v6035_v35 = vld [vmem:[%s6316_s9 + $0xdc4] ss:$16 sps:$4 sm:$0xff]   ;;  %v6038_v36 = vld [vmem:[%s6316_s9 + $0xdcc] ss:$16 sps:$4 sm:$0xff]  }
 0x1be   : > { %3836 = vmatmul.mubr.bf16.gmra.mrb[24].mxu0 %v4722_v37  ;;  %4244 = vmatmul.mubr.bf16.gmra.mrb[24].mxu1 %v4722_v37  ;;  %v6033_v37 = vld [vmem:[%s6316_s9 + $0xdc0] ss:$16 sps:$4 sm:$0xff]  }
 0x1bf   : > { %3849 = vmatpush1.bf16.msra.mxu0 %v5961_v40  ;;  %4257 = vmatpush1.bf16.msra.mxu1 %v5964_v41  ;;  %v6036_v40 = vld [vmem:[%s6316_s9 + $0xdc8] ss:$16 sps:$4 sm:$0xff]   ;;  %v6041_v41 = vld [vmem:[%s6316_s9 + $0xde4] ss:$16 sps:$4 sm:$0xff]  }
 0x1c0   : > { %3850 = vmatprep.subr.bf16.mxu0 %v5969_v44  ;;  %4258 = vmatprep.subr.bf16.mxu1 %v5972_v27  ;;  %v6044_v44 = vld [vmem:[%s6316_s9 + $0xdec] ss:$16 sps:$4 sm:$0xff]   ;;  %v6039_v27 = vld [vmem:[%s6316_s9 + $0xde0] ss:$16 sps:$4 sm:$0xff]  }
 0x1c1   : > { %3876 = vmatprep.mubr.bf16.mxu0 %v4709_v45  ;;  %4284 = vmatprep.mubr.bf16.mxu1 %v4709_v45  ;;  %v6042_v45 = vld [vmem:[%s6316_s9 + $0xde8] ss:$16 sps:$4 sm:$0xff]  }
 0x1c3   : > { %3851 = vmatpush1.bf16.msra.mxu0 %v5967_v42  ;;  %4259 = vmatpush1.bf16.msra.mxu1 %v5970_v43  ;;  %v6047_v42 = vld [vmem:[%s6316_s9 + $0xe04] ss:$16 sps:$4 sm:$0xff]   ;;  %v6050_v43 = vld [vmem:[%s6316_s9 + $0xe0c] ss:$16 sps:$4 sm:$0xff]  }
 0x1c4   : > { %3852 = vmatprep.subr.bf16.mxu0 %v5975_v46  ;;  %4260 = vmatprep.subr.bf16.mxu1 %v5978_v49  ;;  %v4708_v46 = vcombine.low %v6791_v38, %v6794_v39  ;;  %v840_v49 = vld [vmem:[%s6305_s30 + $0xb0] sm:$0xff]  ;;  %v6054_v39 = vld [vmem:[%s6316_s9 + $0xe28] ss:$16 sps:$4 sm:$0xff]  }
 0x1c5   : > { %v6051_v38 = vld [vmem:[%s6316_s9 + $0xe20] ss:$16 sps:$4 sm:$0xff]  }
 0x1c7   : > { %3853 = vmatpush1.bf16.msra.mxu0 %v5973_v50  ;;  %4261 = vmatpush1.bf16.msra.mxu1 %v5976_v52  ;;  %v6045_v50 = vld [vmem:[%s6316_s9 + $0xe00] ss:$16 sps:$4 sm:$0xff]   ;;  %v6048_v52 = vld [vmem:[%s6316_s9 + $0xe08] ss:$16 sps:$4 sm:$0xff]  }
 0x1c8   : > { %3854 = vmatprep.subr.bf16.mxu0 %v5981_v54  ;;  %4262 = vmatprep.subr.bf16.mxu1 %v5984_v26  ;;  %v6053_v54 = vld [vmem:[%s6316_s9 + $0xe24] ss:$16 sps:$4 sm:$0xff]   ;;  %v6056_v26 = vld [vmem:[%s6316_s9 + $0xe2c] ss:$16 sps:$4 sm:$0xff]  }
 0x1cb   : > { %3855 = vmatpush1.bf16.msra.mxu0 %v5979_v55  ;;  %4263 = vmatpush1.bf16.msra.mxu1 %v5982_v28  ;;  %v4725_v55 = vcombine.high %v840_v49, %v840_v49  ;;  %v6061_v28 = vld [vmem:[%s6316_s9 + $0xe44] ss:$16 sps:$4 sm:$0xff]  }
 0x1cc   : > { %3856 = vmatprep.subr.bf16.mxu0 %v5987_v29  ;;  %4264 = vmatprep.subr.bf16.mxu1 %v5990_v56  ;;  %v6064_v29 = vld [vmem:[%s6316_s9 + $0xe4c] ss:$16 sps:$4 sm:$0xff]   ;;  %v4724_v56 = vcombine.low %v840_v49, %v840_v49  ;;  %v6121_v49 = vld [vmem:[%s6316_s9 + $0xf84] ss:$16 sps:$4 sm:$0xff]  }
 0x1cf   : > { %3857 = vmatpush1.bf16.msra.mxu0 %v5985_v59  ;;  %4265 = vmatpush1.bf16.msra.mxu1 %v5988_v30  ;;  %v6878_v59 = vld [vmem:[%s6305_s30 + $0x38] sm:$0xff] }
 0x1d0   : > { %3858 = vmatprep.subr.bf16.mxu0 %v5993_v60  ;;  %4266 = vmatprep.subr.bf16.mxu1 %v5996_v57  ;;  %v6881_v30 = vld [vmem:[%s6305_s30 + $0x78] sm:$0xff]  ;;  %v6059_v60 = vld [vmem:[%s6316_s9 + $0xe40] ss:$16 sps:$4 sm:$0xff]  }
 0x1d1   : > { %v3684_v2 = vpop.f32.mrb[12].mxu0  ;;  %v4092_v3 = vpop.f32.mrb[12].mxu1  ;;  %v6062_v57 = vld [vmem:[%s6316_s9 + $0xe48] ss:$16 sps:$4 sm:$0xff]  }
 0x1d2   : > { %v6823_v4 = vadd.f32 %v3684_v2, %v6736_v47  ;;  %v6826_v5 = vadd.f32 %v4092_v3, %v6739_v48  ;;  %v3686_v6 = vpop.f32.mrb[13].mxu0  ;;  %v4094_v7 = vpop.f32.mrb[13].mxu1  ;;  %v6005_v48 = vld [vmem:[%s6316_s9 + $0xd24] ss:$16 sps:$4 sm:$0xff]   ;;  %v6068_v2 = vld [vmem:[%s6316_s9 + $0xe68] ss:$16 sps:$4 sm:$0xff]  }
 0x1d3   : > { %v6829_v8 = vadd.f32 %v3686_v6, %v6742_v53  ;;  %v6832_v9 = vadd.f32 %v4094_v7, %v6745_v51  ;;  %3859 = vmatpush1.bf16.msra.mxu0 %v5991_v58  ;;  %4267 = vmatpush1.bf16.msra.mxu1 %v5994_v61  ;;  %v3688_v47 = vpop.f32.mrb[14].mxu0  ;;  %v4096_v0 = vpop.f32.mrb[14].mxu1  ;;  %v6008_v53 = vld [vmem:[%s6316_s9 + $0xd2c] ss:$16 sps:$4 sm:$0xff]   ;;  %v6003_v51 = vld [vmem:[%s6316_s9 + $0xd20] ss:$16 sps:$4 sm:$0xff]  }
 0x1d4   : > { %3860 = vmatprep.subr.bf16.mxu0 %v5999_v62  ;;  %4268 = vmatprep.subr.bf16.mxu1 %v6002_v63  ;;  %v3689_v1 = vpop.f32.mrb[15].mxu0  ;;  %v4097_v12 = vpop.f32.mrb[15].mxu1  ;;  %v6067_v58 = vld [vmem:[%s6316_s9 + $0xe64] ss:$16 sps:$4 sm:$0xff]   ;;  %v6070_v61 = vld [vmem:[%s6316_s9 + $0xe6c] ss:$16 sps:$4 sm:$0xff]   ;;  %v4711_v62 = vcombine.high %v6878_v59, %v6881_v30 }
 0x1d5   : > { %v6065_v63 = vld [vmem:[%s6316_s9 + $0xe60] ss:$16 sps:$4 sm:$0xff]   ;;  %v6073_v3 = vld [vmem:[%s6316_s9 + $0xe84] ss:$16 sps:$4 sm:$0xff]   ;;  %v6076_v6 = vld [vmem:[%s6316_s9 + $0xe8c] ss:$16 sps:$4 sm:$0xff]  }
 0x1d6   : > { %v6071_v7 = vld [vmem:[%s6316_s9 + $0xe80] ss:$16 sps:$4 sm:$0xff]   ;;  %v6082_v47 = vld [vmem:[%s6316_s9 + $0xeac] ss:$16 sps:$4 sm:$0xff]  }
 0x1d7   : > { %3861 = vmatpush1.bf16.msra.mxu0 %v5997_v10  ;;  %4269 = vmatpush1.bf16.msra.mxu1 %v6000_v11  ;;  %v6074_v10 = vld [vmem:[%s6316_s9 + $0xe88] ss:$16 sps:$4 sm:$0xff]   ;;  %v6079_v11 = vld [vmem:[%s6316_s9 + $0xea4] ss:$16 sps:$4 sm:$0xff]   ;;  %v6077_v0 = vld [vmem:[%s6316_s9 + $0xea0] ss:$16 sps:$4 sm:$0xff]  }
 0x1d8   : > { %3862 = vmatprep.subr.bf16.mxu0 %v6005_v48  ;;  %4270 = vmatprep.subr.bf16.mxu1 %v6008_v53  ;;  %v6080_v48 = vld [vmem:[%s6316_s9 + $0xea8] ss:$16 sps:$4 sm:$0xff]   ;;  %v6085_v53 = vld [vmem:[%s6316_s9 + $0xec4] ss:$16 sps:$4 sm:$0xff]   ;;  %v6088_v1 = vld [vmem:[%s6316_s9 + $0xecc] ss:$16 sps:$4 sm:$0xff]  }
 0x1d9   : > { %v6083_v12 = vld [vmem:[%s6316_s9 + $0xec0] ss:$16 sps:$4 sm:$0xff]  }
 0x1db   : > { %3863 = vmatpush1.bf16.msra.mxu0 %v6003_v51  ;;  %4271 = vmatpush1.bf16.msra.mxu1 %v6006_v14  ;;  %v6086_v51 = vld [vmem:[%s6316_s9 + $0xec8] ss:$16 sps:$4 sm:$0xff]   ;;  %v6091_v14 = vld [vmem:[%s6316_s9 + $0xee4] ss:$16 sps:$4 sm:$0xff]  }
 0x1dc   : > { %3864 = vmatprep.subr.bf16.mxu0 %v6011_v15  ;;  %4272 = vmatprep.subr.bf16.mxu1 %v6014_v16  ;;  %v6094_v15 = vld [vmem:[%s6316_s9 + $0xeec] ss:$16 sps:$4 sm:$0xff]   ;;  %v6089_v16 = vld [vmem:[%s6316_s9 + $0xee0] ss:$16 sps:$4 sm:$0xff]  }
 0x1df   : > { %3865 = vmatpush1.bf16.msra.mxu0 %v6009_v18  ;;  %4273 = vmatpush1.bf16.msra.mxu1 %v6012_v19  ;;  %v6092_v18 = vld [vmem:[%s6316_s9 + $0xee8] ss:$16 sps:$4 sm:$0xff]   ;;  %v6097_v19 = vld [vmem:[%s6316_s9 + $0xf04] ss:$16 sps:$4 sm:$0xff]  }
 0x1e0   : > { %3866 = vmatprep.subr.bf16.mxu0 %v6017_v20  ;;  %4274 = vmatprep.subr.bf16.mxu1 %v6020_v21  ;;  %v6100_v20 = vld [vmem:[%s6316_s9 + $0xf0c] ss:$16 sps:$4 sm:$0xff]  }
 0x1e3   : > { %3867 = vmatpush1.bf16.msra.mxu0 %v6015_v22  ;;  %4275 = vmatpush1.bf16.msra.mxu1 %v6018_v23 }
 0x1e4   : > { %3868 = vmatprep.subr.bf16.mxu0 %v6023_v24  ;;  %4276 = vmatprep.subr.bf16.mxu1 %v6026_v25 }
 0x1e7   : > { %3869 = vmatpush1.bf16.msra.mxu0 %v6021_v31  ;;  %4277 = vmatpush1.bf16.msra.mxu1 %v6024_v32 }
 0x1e8   : > { %3870 = vmatprep.subr.bf16.mxu0 %v6029_v33  ;;  %4278 = vmatprep.subr.bf16.mxu1 %v6032_v34  ;;  %v6095_v34 = vld [vmem:[%s6316_s9 + $0xf00] ss:$16 sps:$4 sm:$0xff]  }
 0x1eb   : > { %3871 = vmatpush1.bf16.msra.mxu0 %v6027_v13  ;;  %4279 = vmatpush1.bf16.msra.mxu1 %v6030_v17  ;;  %v6098_v13 = vld [vmem:[%s6316_s9 + $0xf08] ss:$16 sps:$4 sm:$0xff]  }
 0x1ec   : > { %3872 = vmatprep.subr.bf16.mxu0 %v6035_v35  ;;  %4280 = vmatprep.subr.bf16.mxu1 %v6038_v36 }
 0x1ef   : > { %3873 = vmatpush1.bf16.msra.mxu0 %v6033_v37  ;;  %4281 = vmatpush1.bf16.msra.mxu1 %v6036_v40  ;;  %v6104_v37 = vld [vmem:[%s6316_s9 + $0xf28] ss:$16 sps:$4 sm:$0xff]   ;;  %v6109_v40 = vld [vmem:[%s6316_s9 + $0xf44] ss:$16 sps:$4 sm:$0xff]  }
 0x1f0   : > { %3874 = vmatprep.subr.bf16.mxu0 %v6041_v41  ;;  %4282 = vmatprep.subr.bf16.mxu1 %v6044_v44  ;;  %v6112_v41 = vld [vmem:[%s6316_s9 + $0xf4c] ss:$16 sps:$4 sm:$0xff]   ;;  %v6107_v44 = vld [vmem:[%s6316_s9 + $0xf40] ss:$16 sps:$4 sm:$0xff]  }
 0x1f3   : > { %3875 = vmatpush1.bf16.msra.mxu0 %v6039_v27  ;;  %4283 = vmatpush1.bf16.msra.mxu1 %v6042_v45  ;;  %v6110_v27 = vld [vmem:[%s6316_s9 + $0xf48] ss:$16 sps:$4 sm:$0xff]   ;;  %v6115_v45 = vld [vmem:[%s6316_s9 + $0xf64] ss:$16 sps:$4 sm:$0xff]  }
 0x1f4   : > { %3895 = vmatprep.subr.bf16.mxu0 %v6047_v42  ;;  %4303 = vmatprep.subr.bf16.mxu1 %v6050_v43  ;;  %v6118_v42 = vld [vmem:[%s6316_s9 + $0xf6c] ss:$16 sps:$4 sm:$0xff]   ;;  %v6113_v43 = vld [vmem:[%s6316_s9 + $0xf60] ss:$16 sps:$4 sm:$0xff]  }
 0x1f6   : > { %3877 = vmatmul.mubr.bf16.vlgmr.msra.gmra.mrb[0].mxu0 %v4708_v46  ;;  %4285 = vmatmul.mubr.bf16.vlgmr.msra.gmra.mrb[0].mxu1 %v4708_v46  ;;  %v6116_v46 = vld [vmem:[%s6316_s9 + $0xf68] ss:$16 sps:$4 sm:$0xff]  }
 0x1f7   : > { %3896 = vmatpush1.bf16.msra.mxu0 %v6045_v50  ;;  %4304 = vmatpush1.bf16.msra.mxu1 %v6048_v52  ;;  %v6124_v50 = vld [vmem:[%s6316_s9 + $0xf8c] ss:$16 sps:$4 sm:$0xff]   ;;  %v6119_v52 = vld [vmem:[%s6316_s9 + $0xf80] ss:$16 sps:$4 sm:$0xff]  }
 0x1f8   : > { %3897 = vmatprep.subr.bf16.mxu0 %v6053_v54  ;;  %4305 = vmatprep.subr.bf16.mxu1 %v6056_v26  ;;  %v6122_v54 = vld [vmem:[%s6316_s9 + $0xf88] ss:$16 sps:$4 sm:$0xff]   ;;  %v6127_v26 = vld [vmem:[%s6316_s9 + $0xfa4] ss:$16 sps:$4 sm:$0xff]  }
 0x1f9   : > { %3886 = vmatprep.mubr.bf16.mxu0 %v4725_v55  ;;  %4294 = vmatprep.mubr.bf16.mxu1 %v4725_v55  ;;  %v6130_v55 = vld [vmem:[%s6316_s9 + $0xfac] ss:$16 sps:$4 sm:$0xff]  }
 0x1fb   : > { %3898 = vmatpush1.bf16.msra.mxu0 %v6051_v38  ;;  %4306 = vmatpush1.bf16.msra.mxu1 %v6054_v39  ;;  %v6125_v38 = vld [vmem:[%s6316_s9 + $0xfa0] ss:$16 sps:$4 sm:$0xff]   ;;  %v6128_v39 = vld [vmem:[%s6316_s9 + $0xfa8] ss:$16 sps:$4 sm:$0xff]  }
 0x1fc   : > { %3899 = vmatprep.subr.bf16.mxu0 %v6061_v28  ;;  %4307 = vmatprep.subr.bf16.mxu1 %v6064_v29  ;;  %v6133_v28 = vld [vmem:[%s6316_s9 + $0xfc4] ss:$16 sps:$4 sm:$0xff]   ;;  %v6136_v29 = vld [vmem:[%s6316_s9 + $0xfcc] ss:$16 sps:$4 sm:$0xff]  }
 0x1fe   : > { %3887 = vmatmul.mubr.bf16.gmra.mrb[28].mxu0 %v4724_v56  ;;  %4295 = vmatmul.mubr.bf16.gmra.mrb[28].mxu1 %v4724_v56  ;;  %v6131_v56 = vld [vmem:[%s6316_s9 + $0xfc0] ss:$16 sps:$4 sm:$0xff]  }
 0x1ff   : > { %3900 = vmatpush1.bf16.msra.mxu0 %v6059_v60  ;;  %4308 = vmatpush1.bf16.msra.mxu1 %v6062_v57  ;;  %v6134_v60 = vld [vmem:[%s6316_s9 + $0xfc8] ss:$16 sps:$4 sm:$0xff]   ;;  %v6139_v57 = vld [vmem:[%s6316_s9 + $0xfe4] ss:$16 sps:$4 sm:$0xff]  }
 0x200   : > { %3901 = vmatprep.subr.bf16.mxu0 %v6067_v58  ;;  %4309 = vmatprep.subr.bf16.mxu1 %v6070_v61  ;;  %v6142_v58 = vld [vmem:[%s6316_s9 + $0xfec] ss:$16 sps:$4 sm:$0xff]   ;;  %v6137_v61 = vld [vmem:[%s6316_s9 + $0xfe0] ss:$16 sps:$4 sm:$0xff]  }
 0x201   : > { %3927 = vmatprep.mubr.bf16.mxu0 %v4711_v62  ;;  %4335 = vmatprep.mubr.bf16.mxu1 %v4711_v62  ;;  %v6140_v62 = vld [vmem:[%s6316_s9 + $0xfe8] ss:$16 sps:$4 sm:$0xff]  }
 0x203   : > { %3902 = vmatpush1.bf16.msra.mxu0 %v6065_v63  ;;  %4310 = vmatpush1.bf16.msra.mxu1 %v6068_v2  ;;  %v841_v63 = vld [vmem:[%s6305_s30 + $0xb8] sm:$0xff]  ;;  %v4710_v2 = vcombine.low %v6878_v59, %v6881_v30 }
 0x204   : > { %3903 = vmatprep.subr.bf16.mxu0 %v6073_v3  ;;  %4311 = vmatprep.subr.bf16.mxu1 %v6076_v6  ;;  %v4727_v3 = vcombine.high %v841_v63, %v841_v63  ;;  %v4726_v6 = vcombine.low %v841_v63, %v841_v63  ;;  %v814_v63 = vld [vmem:[#allocation2 + $0x40] sm:$0xff] }
 0x207   : > { %3904 = vmatpush1.bf16.msra.mxu0 %v6071_v7  ;;  %4312 = vmatpush1.bf16.msra.mxu1 %v6074_v10 }
 0x208   : > { %3905 = vmatprep.subr.bf16.mxu0 %v6079_v11  ;;  %4313 = vmatprep.subr.bf16.mxu1 %v6082_v47 }
 0x20b   : > { %3906 = vmatpush1.bf16.msra.mxu0 %v6077_v0  ;;  %4314 = vmatpush1.bf16.msra.mxu1 %v6080_v48 }
 0x20c   : > { %3907 = vmatprep.subr.bf16.mxu0 %v6085_v53  ;;  %4315 = vmatprep.subr.bf16.mxu1 %v6088_v1 }
 0x20f   : > { %3908 = vmatpush1.bf16.msra.mxu0 %v6083_v12  ;;  %4316 = vmatpush1.bf16.msra.mxu1 %v6086_v51 }
 0x210   : > { %3909 = vmatprep.subr.bf16.mxu0 %v6091_v14  ;;  %4317 = vmatprep.subr.bf16.mxu1 %v6094_v15 }
 0x211   : > { %v3735_v21 = vpop.f32.mrb[16].mxu0  ;;  %v4143_v22 = vpop.f32.mrb[16].mxu1 }
 0x212   : > { %v6910_v23 = vadd.f32 %v3735_v21, %v6823_v4  ;;  %v6913_v24 = vadd.f32 %v4143_v22, %v6826_v5  ;;  %v3737_v25 = vpop.f32.mrb[17].mxu0  ;;  %v4145_v31 = vpop.f32.mrb[17].mxu1  ;;  %v6103_v5 = vld [vmem:[%s6316_s9 + $0xf24] ss:$16 sps:$4 sm:$0xff]  }
 0x213   : > { %v6916_v32 = vadd.f32 %v3737_v25, %v6829_v8  ;;  %v6919_v33 = vadd.f32 %v4145_v31, %v6832_v9  ;;  %3910 = vmatpush1.bf16.msra.mxu0 %v6089_v16  ;;  %4318 = vmatpush1.bf16.msra.mxu1 %v6092_v18  ;;  %v3739_v4 = vpop.f32.mrb[18].mxu0  ;;  %v4147_v17 = vpop.f32.mrb[18].mxu1  ;;  %v6106_v8 = vld [vmem:[%s6316_s9 + $0xf2c] ss:$16 sps:$4 sm:$0xff]   ;;  %v6101_v9 = vld [vmem:[%s6316_s9 + $0xf20] ss:$16 sps:$4 sm:$0xff]  }
 0x214   : > { %3911 = vmatprep.subr.bf16.mxu0 %v6097_v19  ;;  %4319 = vmatprep.subr.bf16.mxu1 %v6100_v20  ;;  %v3740_v35 = vpop.f32.mrb[19].mxu0  ;;  %v4148_v36 = vpop.f32.mrb[19].mxu1 }
 0x217   : > { %3912 = vmatpush1.bf16.msra.mxu0 %v6095_v34  ;;  %4320 = vmatpush1.bf16.msra.mxu1 %v6098_v13 }
 0x218   : > { %3913 = vmatprep.subr.bf16.mxu0 %v6103_v5  ;;  %4321 = vmatprep.subr.bf16.mxu1 %v6106_v8 }
 0x21b   : > { %3914 = vmatpush1.bf16.msra.mxu0 %v6101_v9  ;;  %4322 = vmatpush1.bf16.msra.mxu1 %v6104_v37 }
 0x21c   : > { %3915 = vmatprep.subr.bf16.mxu0 %v6109_v40  ;;  %4323 = vmatprep.subr.bf16.mxu1 %v6112_v41  ;;  %v806_v40 = vld [vmem:[#allocation2] sm:$0xff]  ;;  %v808_v41 = vld [vmem:[#allocation2 + $0x10] sm:$0xff] }
 0x21f   : > { %3916 = vmatpush1.bf16.msra.mxu0 %v6107_v44  ;;  %4324 = vmatpush1.bf16.msra.mxu1 %v6110_v27  ;;  %v807_v44 = vld [vmem:[#allocation2 + $0x8] sm:$0xff]  ;;  %v809_v27 = vld [vmem:[#allocation2 + $0x18] sm:$0xff] }
 0x220   : > { %3917 = vmatprep.subr.bf16.mxu0 %v6115_v45  ;;  %4325 = vmatprep.subr.bf16.mxu1 %v6118_v42 }
 0x223   : > { %3918 = vmatpush1.bf16.msra.mxu0 %v6113_v43  ;;  %4326 = vmatpush1.bf16.msra.mxu1 %v6116_v46  ;;  %v810_v43 = vld [vmem:[#allocation2 + $0x20] sm:$0xff]  ;;  %v812_v46 = vld [vmem:[#allocation2 + $0x30] sm:$0xff] }
 0x224   : > { %3919 = vmatprep.subr.bf16.mxu0 %v6121_v49  ;;  %4327 = vmatprep.subr.bf16.mxu1 %v6124_v50 }
 0x227   : > { %3920 = vmatpush1.bf16.msra.mxu0 %v6119_v52  ;;  %4328 = vmatpush1.bf16.msra.mxu1 %v6122_v54 }
 0x228   : > { %3921 = vmatprep.subr.bf16.mxu0 %v6127_v26  ;;  %4329 = vmatprep.subr.bf16.mxu1 %v6130_v55  ;;  %v811_v26 = vld [vmem:[#allocation2 + $0x28] sm:$0xff]  ;;  %v813_v55 = vld [vmem:[#allocation2 + $0x38] sm:$0xff] }
 0x22b   : > { %3922 = vmatpush1.bf16.msra.mxu0 %v6125_v38  ;;  %4330 = vmatpush1.bf16.msra.mxu1 %v6128_v39 }
 0x22c   : > { %3923 = vmatprep.subr.bf16.mxu0 %v6133_v28  ;;  %4331 = vmatprep.subr.bf16.mxu1 %v6136_v29 }
 0x22f   : > { %3924 = vmatpush1.bf16.msra.mxu0 %v6131_v56  ;;  %4332 = vmatpush1.bf16.msra.mxu1 %v6134_v60 }
 0x230   : > { %3925 = vmatprep.subr.bf16.mxu0 %v6139_v57  ;;  %4333 = vmatprep.subr.bf16.mxu1 %v6142_v58 }
 0x233   : > { %3926 = vmatpush1.bf16.msra.mxu0 %v6137_v61  ;;  %4334 = vmatpush1.bf16.msra.mxu1 %v6140_v62 }
 0x236   : > { %3928 = vmatmul.mubr.bf16.vlgmr.msra.gmra.mrb[0].mxu0 %v4710_v2  ;;  %4336 = vmatmul.mubr.bf16.vlgmr.msra.gmra.mrb[0].mxu1 %v4710_v2 }
 0x237   : > { %3937 = vmatprep.mubr.bf16.mxu0 %v4727_v3  ;;  %4345 = vmatprep.mubr.bf16.mxu1 %v4727_v3  ;;  %v816_v3 = vld [vmem:[#allocation2 + $0x50] sm:$0xff] }
 0x23e   : > { %3938 = vmatmul.mubr.bf16.gmra.mrb[32].mxu0 %v4726_v6  ;;  %4346 = vmatmul.mubr.bf16.gmra.mrb[32].mxu1 %v4726_v6 }
 0x251   : > { %v3786_v7 = vpop.f32.mrb[20].mxu0  ;;  %v4194_v10 = vpop.f32.mrb[20].mxu1 }
 0x252   : > { %v3787_v11 = vadd.f32 %v3786_v7, %v6910_v23  ;;  %v4195_v47 = vadd.f32 %v4194_v10, %v6913_v24  ;;  %v3788_v0 = vpop.f32.mrb[21].mxu0  ;;  %v4196_v48 = vpop.f32.mrb[21].mxu1 }
 0x253   : > { %v3789_v59 = vadd.f32 %v3788_v0, %v6916_v32  ;;  %v4197_v30 = vadd.f32 %v4196_v48, %v6919_v33  ;;  %v3790_v53 = vpop.f32.mrb[22].mxu0  ;;  %v4198_v1 = vpop.f32.mrb[22].mxu1  ;;  %v817_v0 = vld [vmem:[#allocation2 + $0x58] sm:$0xff] }
 0x254   : > { %v3791_v12 = vpop.f32.mrb[23].mxu0  ;;  %v4199_v51 = vpop.f32.mrb[23].mxu1 }
 0x291   : > { %v3837_v14 = vpop.f32.mrb[24].mxu0  ;;  %v4245_v15 = vpop.f32.mrb[24].mxu1 }
 0x292   : > { %v3838_v16 = vadd.f32 %v3837_v14, %v3787_v11  ;;  %v4246_v18 = vadd.f32 %v4245_v15, %v4195_v47  ;;  %v3839_v19 = vpop.f32.mrb[25].mxu0  ;;  %v4247_v20 = vpop.f32.mrb[25].mxu1  ;;  %v815_v11 = vld [vmem:[#allocation2 + $0x48] sm:$0xff] }
 0x293   : > { %v3840_v21 = vadd.f32 %v3839_v19, %v3789_v59  ;;  %v4248_v22 = vadd.f32 %v4247_v20, %v4197_v30  ;;  %v3841_v23 = vpop.f32.mrb[26].mxu0  ;;  %v4249_v24 = vpop.f32.mrb[26].mxu1 }
 0x294   : > { %v3842_v25 = vpop.f32.mrb[27].mxu0  ;;  %v4250_v31 = vpop.f32.mrb[27].mxu1 }
 0x295   : > { %v6186_v31 = vmov (!%p5240_p10), 1966171168  }
 0x2d1   : > { %v3888_v34 = vpop.f32.mrb[28].mxu0  ;;  %v4296_v32 = vpop.f32.mrb[28].mxu1 }
 0x2d2   : > { %v3889_v13 = vadd.f32 %v3888_v34, %v3838_v16  ;;  %v4297_v33 = vadd.f32 %v4296_v32, %v4246_v18  ;;  %v3890_v4 = vpop.f32.mrb[29].mxu0  ;;  %v4298_v17 = vpop.f32.mrb[29].mxu1  ;;  %v4433_v34 = vunpack.c.l.s4 (!%p5240_p10), %v6186_v31 }
 0x2d3   : > { %v3891_v5 = vadd.f32 %v3890_v4, %v3840_v21  ;;  %v4299_v8 = vadd.f32 %v4298_v17, %v4248_v22  ;;  %v3892_v35 = vpop.f32.mrb[30].mxu0  ;;  %v4300_v36 = vpop.f32.mrb[30].mxu1  ;;  %v4435_v22 = vlaneseq (!%p5240_p10) }
 0x2d4   : > { %v3893_v9 = vpop.f32.mrb[31].mxu0  ;;  %v4301_v37 = vpop.f32.mrb[31].mxu1 }
 0x2d5   : > { %vm4457_vm0 = vcmp.lt.s32.totalorder (!%p5240_p10), %v4435_v22, 512 }
 0x309   : > { %v3929_v45 = vpop.f32.mrb[0].mxu0  ;;  %v4337_v42 = vpop.f32.mrb[0].mxu1 }
 0x30a   : > { %v4354_v49 = vadd.f32 %v3929_v45, %v806_v40  ;;  %v4356_v50 = vadd.f32 %v4337_v42, %v808_v41  ;;  %v3931_v52 = vpop.f32.mrb[1].mxu0  ;;  %v4339_v54 = vpop.f32.mrb[1].mxu1  ;;  %v4434_v41 = vunpack.c.0.s8 (!%p5240_p10), %v4433_v34 }
 0x30b   : > { %v4355_v38 = vadd.f32 %v3931_v52, %v807_v44  ;;  %v4357_v39 = vadd.f32 %v4339_v54, %v809_v27  ;;  %v3933_v28 = vpop.f32.mrb[2].mxu0  ;;  %v4341_v29 = vpop.f32.mrb[2].mxu1 }
 0x30c   : > { %4366 = vst [vmem:[#allocation2] sm:$0xff] %v4354_v49  ;;  %4368 = vst [vmem:[#allocation2 + $0x10] sm:$0xff] %v4356_v50  ;;  %v4358_v56 = vadd.f32 %v3933_v28, %v810_v43  ;;  %v4360_v60 = vadd.f32 %v4341_v29, %v812_v46  ;;  %v3935_v57 = vpop.f32.mrb[3].mxu0  ;;  %v4343_v58 = vpop.f32.mrb[3].mxu1 }
 0x30d   : > { %4367 = vst [vmem:[#allocation2 + $0x8] sm:$0xff] %v4355_v38  ;;  %4369 = vst [vmem:[#allocation2 + $0x18] sm:$0xff] %v4357_v39  ;;  %v4359_v61 = vadd.f32 %v3935_v57, %v811_v26  ;;  %v4361_v62 = vadd.f32 %v4343_v58, %v813_v55 }
 0x30e   : > { %4370 = vst [vmem:[#allocation2 + $0x20] sm:$0xff] %v4358_v56  ;;  %4372 = vst [vmem:[#allocation2 + $0x30] sm:$0xff] %v4360_v60 }
 0x30f   : > { %4371 = vst [vmem:[#allocation2 + $0x28] sm:$0xff] %v4359_v61  ;;  %4373 = vst [vmem:[#allocation2 + $0x38] sm:$0xff] %v4361_v62 }
 0x311   : > { %v3939_v2 = vpop.f32.mrb[32].mxu0  ;;  %v4347_v6 = vpop.f32.mrb[32].mxu1  ;;  %4381 = sbr.rel (%p5240_p10) target bundleno = 826 (0x33a), region = 59 }
 0x312   : > { %v3940_v7 = vadd.f32 %v3939_v2, %v3889_v13  ;;  %v4348_v10 = vadd.f32 %v4347_v6, %v4297_v33  ;;  %v3941_v47 = vpop.f32.mrb[33].mxu0  ;;  %v4349_v48 = vpop.f32.mrb[33].mxu1 }
 0x313   : > { %v3942_v59 = vadd.f32 %v3941_v47, %v3891_v5  ;;  %v4350_v30 = vadd.f32 %v4349_v48, %v4299_v8  ;;  %v3943_v53 = vpop.f32.mrb[34].mxu0  ;;  %v4351_v1 = vpop.f32.mrb[34].mxu1  ;;  %v6959_v19 = vld [vmem:[#allocation2] sm:$0xff] (!%p5240_p10)  ;;  %v6963_v21 = vld [vmem:[#allocation2 + $0x10] sm:$0xff] (!%p5240_p10)  ;;  %v4436_v8 = vshrl.u32 (!%p5240_p10), %v4435_v22, 7 }
 0x314   : > { %v4362_v12 = vadd.f32 %v3940_v7, %v814_v63  ;;  %v4364_v51 = vadd.f32 %v4348_v10, %v816_v3  ;;  %v3944_v14 = vpop.f32.mrb[35].mxu0  ;;  %v4352_v15 = vpop.f32.mrb[35].mxu1  ;;  %v6961_v20 = vld [vmem:[#allocation2 + $0x8] sm:$0xff] (!%p5240_p10)  ;;  %v6965_v23 = vld [vmem:[#allocation2 + $0x18] sm:$0xff] (!%p5240_p10)  ;;  %v4460_v32 = vmul.f32 (!%p5240_p10), %v6959_v19, %v6959_v19  ;;  %v4462_v35 = vmul.f32 (!%p5240_p10), %v6963_v21, %v6963_v21 }
 0x315   : > { %v4363_v16 = vadd.f32 %v3942_v59, %v815_v11  ;;  %v4365_v18 = vadd.f32 %v4350_v30, %v817_v0  ;;  %v6967_v24 = vld [vmem:[#allocation2 + $0x20] sm:$0xff] (!%p5240_p10)  ;;  %v4461_v13 = vmul.f32 (!%p5240_p10), %v6961_v20, %v6961_v20  ;;  %v6975_v33 = vld [vmem:[#allocation2 + $0x30] sm:$0xff] (!%p5240_p10)  ;;  %v4463_v44 = vmul.f32 (!%p5240_p10), %v6965_v23, %v6965_v23 }
 0x316   : > { %4374 = vst [vmem:[#allocation2 + $0x40] sm:$0xff] %v4362_v12  ;;  %4376 = vst [vmem:[#allocation2 + $0x50] sm:$0xff] %v4364_v51  ;;  %v6969_v25 = vld [vmem:[#allocation2 + $0x28] sm:$0xff] (!%p5240_p10)  ;;  %v6977_v4 = vld [vmem:[#allocation2 + $0x38] sm:$0xff] (!%p5240_p10)  ;;  %v4394_v17 = vadd.f32 (!%p5240_p10), %v6967_v24, %v6959_v19  ;;  %v4410_v37 = vadd.f32 (!%p5240_p10), %v6975_v33, %v6963_v21  ;;  %v4464_v46 = vmul.f32 (!%p5240_p10), %v6967_v24, %v6967_v24 }
 0x317   : > { %4375 = vst [vmem:[#allocation2 + $0x48] sm:$0xff] %v4363_v16  ;;  %4377 = vst [vmem:[#allocation2 + $0x58] sm:$0xff] %v4365_v18  ;;  %v4402_v5 = vadd.f32 (!%p5240_p10), %v6969_v25, %v6961_v20  ;;  %v4418_v40 = vadd.f32 (!%p5240_p10), %v6977_v4, %v6965_v23  ;;  %v4465_v49 = vmul.f32 (!%p5240_p10), %v6969_v25, %v6969_v25 }
 0x318   : > { %v7008_v54 = vsub.s32 %v4434_v41, %v4436_v8  ;;  %v4466_v26 = vmul.f32 %v6975_v33, %v6975_v33  ;;  %v4467_v39 = vmul.f32 %v6977_v4, %v6977_v4  ;;  %v4472_v63 = vadd.f32 %v4464_v46, %v4460_v32 }
 0x319   : > { %v4480_v6 = vadd.f32 %v4465_v49, %v4461_v13 }
 0x31a   : > { %v4488_v7 = vadd.f32 %v4466_v26, %v4462_v35  ;;  %v4496_v0 = vadd.f32 %v4467_v39, %v4463_v44 }
 0x31d   : > { %v6986_v36 = vld [vmem:[#allocation2 + $0x40] sm:$0xff]  ;;  %v6996_v27 = vld [vmem:[#allocation2 + $0x50] sm:$0xff] }
 0x31e   : > { %v6988_v9 = vld [vmem:[#allocation2 + $0x48] sm:$0xff]  ;;  %v6998_v45 = vld [vmem:[#allocation2 + $0x58] sm:$0xff]  ;;  %v4395_v42 = vadd.f32 %v4394_v17, %v6986_v36  ;;  %v4411_v50 = vadd.f32 %v4410_v37, %v6996_v27  ;;  %v4468_v28 = vmul.f32 %v6986_v36, %v6986_v36  ;;  %v4470_v57 = vmul.f32 %v6996_v27, %v6996_v27 }
 0x31f   : > { %v4403_v43 = vadd.f32 %v4402_v5, %v6988_v9  ;;  %v4419_v52 = vadd.f32 %v4418_v40, %v6998_v45  ;;  %v4469_v60 = vmul.f32 %v6988_v9, %v6988_v9  ;;  %v4471_v62 = vmul.f32 %v6998_v45, %v6998_v45 }
 0x320   : > { %v4396_v55 = vrot.slane %v4395_v42, 4  ;;  %v4412_v29 = vrot.slane %v4411_v50, 4  ;;  %v4473_v47 = vadd.f32 %v4472_v63, %v4468_v28  ;;  %v4489_v53 = vadd.f32 %v4488_v7, %v4470_v57 }
 0x321   : > { %v4404_v38 = vrot.slane %v4403_v43, 4  ;;  %v4420_v56 = vrot.slane %v4419_v52, 4  ;;  %v4481_v30 = vadd.f32 %v4480_v6, %v4469_v60  ;;  %v4497_v14 = vadd.f32 %v4496_v0, %v4471_v62 }
 0x322   : > { %v4397_v58 = vadd.f32 %v4396_v55, %v4395_v42  ;;  %v4413_v2 = vadd.f32 %v4412_v29, %v4411_v50  ;;  %v4474_v51 = vrot.slane %v4473_v47, 4  ;;  %v4490_v31 = vrot.slane %v4489_v53, 4 }
 0x323   : > { %v4405_v61 = vadd.f32 %v4404_v38, %v4403_v43  ;;  %v4421_v3 = vadd.f32 %v4420_v56, %v4419_v52  ;;  %v4482_v18 = vrot.slane %v4481_v30, 4  ;;  %v4498_v17 = vrot.slane %v4497_v14, 4 }
 0x324   : > { %v4398_v10 = vrot.slane %v4397_v58, 2  ;;  %v4414_v48 = vrot.slane %v4413_v2, 2  ;;  %v4475_v13 = vadd.f32 %v4474_v51, %v4473_v47  ;;  %v4491_v37 = vadd.f32 %v4490_v31, %v4489_v53 }
 0x325   : > { %v4406_v11 = vrot.slane %v4405_v61, 2  ;;  %v4422_v59 = vrot.slane %v4421_v3, 2  ;;  %v4483_v35 = vadd.f32 %v4482_v18, %v4481_v30  ;;  %v4499_v42 = vadd.f32 %v4498_v17, %v4497_v14 }
 0x326   : > { %v4399_v1 = vadd.f32 %v4398_v10, %v4397_v58  ;;  %v4415_v15 = vadd.f32 %v4414_v48, %v4413_v2  ;;  %v4476_v44 = vrot.slane %v4475_v13, 2  ;;  %v4492_v50 = vrot.slane %v4491_v37, 2 }
 0x327   : > { %v4407_v12 = vadd.f32 %v4406_v11, %v4405_v61  ;;  %v4423_v16 = vadd.f32 %v4422_v59, %v4421_v3  ;;  %v4484_v49 = vrot.slane %v4483_v35, 2  ;;  %v4500_v55 = vrot.slane %v4499_v42, 2 }
 0x328   : > { %v4400_v34 = vrot.slane %v4399_v1, 1  ;;  %v4416_v5 = vrot.slane %v4415_v15, 1  ;;  %v4477_v26 = vadd.f32 %v4476_v44, %v4475_v13  ;;  %v5255_v38 = vpack.c.bf16 %v6961_v20, %v6959_v19 }
 0x329   : > { %v4408_v32 = vrot.slane %v4407_v12, 1  ;;  %v4424_v8 = vrot.slane %v4423_v16, 1  ;;  %v4485_v28 = vadd.f32 %v4484_v49, %v4483_v35  ;;  %v4493_v29 = vadd.f32 %v4492_v50, %v4491_v37 }
 0x32a   : > { %v4401_v40 = vadd.f32 %v4400_v34, %v4399_v1  ;;  %v4417_v43 = vadd.f32 %v4416_v5, %v4415_v15  ;;  %v5256_v56 = vpack.c.bf16 %v6965_v23, %v6963_v21  ;;  %v4478_v57 = vrot.slane %v4477_v26, 1  ;;  %4575 = vst [vmem:[%s7082_s2] sm:$0xff] %v5255_v38 }
 0x32b   : > { %v4409_v41 = vadd.f32 %v4408_v32, %v4407_v12  ;;  %v4425_v46 = vadd.f32 %v4424_v8, %v4423_v16  ;;  %v4501_v58 = vadd.f32 %v4500_v55, %v4499_v42  ;;  %v5257_v61 = vpack.c.bf16 %v6969_v25, %v6967_v24 }
 0x32c   : > { %v4486_v19 = vrot.slane %v4485_v28, 1  ;;  %v4494_v20 = vrot.slane %v4493_v29, 1  ;;  %4576 = vst [vmem:[%s7082_s2 + $0x8] sm:$0xff] %v5256_v56  ;;  %v5258_v21 = vpack.c.bf16 %v6977_v4, %v6975_v33  ;;  %v4479_v23 = vadd.f32 %v4478_v57, %v4477_v26 }
 0x32d   : > { %v4430_v52 = vcombine.low %v4401_v40, %v4409_v41  ;;  %v4431_v39 = vcombine.low %v4417_v43, %v4425_v46  ;;  %v4502_v63 = vrot.slane %v4501_v58, 1  ;;  %4577 = vst [vmem:[%s7082_s2 + $0x10] sm:$0xff] %v5257_v61  ;;  %v5259_v24 = vpack.c.bf16 %v6988_v9, %v6986_v36 }
 0x32e   : > { %v5260_v25 = vpack.c.bf16 %v6998_v45, %v6996_v27  ;;  %v4487_v3 = vadd.f32 %v4486_v19, %v4485_v28  ;;  %v4495_v6 = vadd.f32 %v4494_v20, %v4493_v29  ;;  %4578 = vst [vmem:[%s7082_s2 + $0x18] sm:$0xff] %v5258_v21 }
 0x32f   : > { %v4438_v60 = vrot.slane %v4430_v52, %v7008_v54  ;;  %v4445_v62 = vrot.slane %v4431_v39, %v7008_v54  ;;  %v4503_v33 = vadd.f32 %v4502_v63, %v4501_v58  ;;  %4579 = vst [vmem:[%s7082_s2 + $0x20] sm:$0xff] %v5259_v24 }
 0x330   : > { %4580 = vst [vmem:[%s7082_s2 + $0x28] sm:$0xff] %v5260_v25  ;;  %v4508_v36 = vcombine.low %v4479_v23, %v4487_v3 }
 0x331   : > { %v4446_v2 = vcombine.low %v4438_v60, %v4445_v62  ;;  %v4509_v9 = vcombine.low %v4495_v6, %v4503_v33 }
 0x332   : > { %v4516_v27 = vrot.slane %v4508_v36, %v7008_v54 }
 0x333   : > { %v4453_v4 = vrot.slane %v4446_v2, %v7008_v54  ;;  %v4523_v22 = vrot.slane %v4509_v9, %v7008_v54 }
 0x335   : > { %4459 = vst.msk [vmem:[%s7083_s3] ss:$2 sm:$0xf] %vm4457_vm0, %v4453_v4  ;;  %v4524_v45 = vcombine.low %v4516_v27, %v4523_v22 }
 0x337   : > { %v4531_v7 = vrot.slane %v4524_v45, %v7008_v54 }
 0x339   : > { %5241 = vst.msk [vmem:[%s7083_s3 + $0x1] ss:$2 sm:$0xf] %vm4457_vm0, %v4531_v7 }
 0x33a PF: > { %s14_s16 = sadd.s32 1, %s6183_s16   ;;  %s7084_s12 = smov %s6171_s13 }
 0x33b   : > { %p11_p11 = scmp.ge.s32.totalorder %s14_s16, 4   ;;  %s7085_s13 = smov %s6242_s20 }
 0x33c   : > { %s7086_s14 = smov %s6179_s15  ;;  %s7087_s15 = smov %s7089_s17 }
 0x33d   :  { %13 = sbr.rel (!%p11_p11) target bundleno = 3 (0x3), region = 108 }

</bundles_post_ra>
